<compile_context>
chip_gen: v7x
topology: tpu7x:2x2x1
jax: 0.10.0
libtpu: 0.0.40
codegen_flags: <defaults>
</compile_context>

<pallas_src>
import functools

import jax
import jax.numpy as jnp
import numpy as np
from jax.experimental import pallas as pl
from jax.experimental.pallas import tpu as pltpu

LEAKY_SLOPE = 0.2
BN_EPS = 1e-5
LANE_TILE = 512          # N tile width (lane-dense stores, >=2 blocks for v7x)
NUM_CLASSES = 1502
IN_FEATURES = 2048
HIDDEN = 1000


def _round_up(x, m):
    return ((x + m - 1) // m) * m


# ----------------------------------------------------------------------------
# Fused matmul kernel: out = leaky_relu((x @ w) * scale + shift, alpha)
#   bf16 operands, f32 VMEM accumulator, f32 epilogue.
# ----------------------------------------------------------------------------
def _fused_matmul_kernel(x_ref, w_ref, scale_ref, shift_ref, o_ref, acc_ref, *, alpha):
    k = pl.program_id(2)

    @pl.when(k == 0)
    def _():
        acc_ref[...] = jnp.zeros_like(acc_ref)

    acc_ref[...] += jnp.dot(x_ref[...], w_ref[...],
                            preferred_element_type=jnp.float32)

    @pl.when(k == pl.num_programs(2) - 1)
    def _():
        y = acc_ref[...] * scale_ref[...] + shift_ref[...]
        o_ref[...] = jnp.where(y >= 0.0, y, alpha * y).astype(o_ref.dtype)


def fused_matmul(x, w, scale, shift, *, alpha, out_dtype, tn=LANE_TILE, tk=2048):
    """leaky_relu((x @ w) * scale + shift).  All operands pre-padded/aligned:

      x:     (Mp, Kp)   Mp % 8 == 0, Kp % 128 == 0
      w:     (Kp, Np)   Np % tn == 0   (pre-transposed / padded / cast)
      scale: (1, Np) f32
      shift: (1, Np) f32
    """
    Mp, Kp = x.shape
    Kp2, Np = w.shape
    assert Kp == Kp2 and Mp % 8 == 0 and Np % tn == 0 and Kp % 128 == 0

    tm = Mp                      # tiny batch: single M block
    tk = min(tk, Kp)
    assert Kp % tk == 0

    return pl.pallas_call(
        functools.partial(_fused_matmul_kernel, alpha=alpha),
        out_shape=jax.ShapeDtypeStruct((Mp, Np), out_dtype),
        grid_spec=pltpu.PrefetchScalarGridSpec(
            num_scalar_prefetch=0,
            grid=(Mp // tm, Np // tn, Kp // tk),
            in_specs=[
                pl.BlockSpec((tm, tk), lambda i, j, k: (i, k)),
                pl.BlockSpec((tk, tn), lambda i, j, k: (k, j)),
                pl.BlockSpec((1, tn), lambda i, j, k: (0, j)),
                pl.BlockSpec((1, tn), lambda i, j, k: (0, j)),
            ],
            out_specs=pl.BlockSpec((tm, tn), lambda i, j, k: (i, j)),
            scratch_shapes=[pltpu.VMEM((tm, tn), jnp.float32)],
        ),
        compiler_params=pltpu.CompilerParams(
            dimension_semantics=("parallel", "parallel", "arbitrary")),
    )(x, w, scale, shift)


# ----------------------------------------------------------------------------
# Parameters: init matching the PyTorch module, then one-time layout prep.
# ----------------------------------------------------------------------------
def init_params(key, in_nc=IN_FEATURES, hidden=HIDDEN, num_classes=NUM_CLASSES):
    # weights_init_classifier: Linear weight ~ N(0, 0.001^2), no bias (bias=False).
    # BatchNorm1d defaults: gamma=1, beta=0, running_mean=0, running_var=1.
    dims = [(in_nc, hidden), (hidden, hidden), (hidden, hidden), (hidden, num_classes)]
    keys = jax.random.split(key, len(dims))
    layers = []
    for k, (din, dout) in zip(keys, dims):
        w = 0.001 * jax.random.normal(k, (dout, din), jnp.float32)   # PyTorch (out, in)
        layers.append(dict(
            w=w,
            gamma=jnp.ones((dout,), jnp.float32),
            beta=jnp.zeros((dout,), jnp.float32),
            mean=jnp.zeros((dout,), jnp.float32),    # BN running stats (eval mode)
            var=jnp.ones((dout,), jnp.float32)))
    return dict(layers=layers)


def prepare_params(params, *, compute_dtype=jnp.bfloat16, tn=LANE_TILE):
    """One-time weight layout: transpose to (K, N), zero-pad to aligned tiles,
    cast to bf16, and fold eval-mode BN into f32 per-column scale/shift."""
    prepped = []
    kp = _round_up(params["layers"][0]["w"].shape[1], 128)
    for p in params["layers"]:
        dout, din = p["w"].shape
        assert din <= kp
        np_ = _round_up(dout, tn)
        w_mat = jnp.zeros((kp, np_), compute_dtype).at[:din, :dout].set(
            p["w"].T.astype(compute_dtype))
        inv_std = 1.0 / jnp.sqrt(p["var"] + BN_EPS)
        scale = p["gamma"] * inv_std
        shift = p["beta"] - p["mean"] * scale
        scale_p = jnp.zeros((1, np_), jnp.float32).at[0, :dout].set(scale)
        shift_p = jnp.zeros((1, np_), jnp.float32).at[0, :dout].set(shift)
        prepped.append(dict(w=w_mat, scale=scale_p, shift=shift_p))
        kp = np_           # next layer's padded input width = this padded output
    return prepped


# ----------------------------------------------------------------------------
# Forward pass
# ----------------------------------------------------------------------------
@functools.partial(jax.jit, static_argnames=("num_classes", "compute_dtype"))
def id_market_net23_forward(x, prepped, num_classes=NUM_CLASSES,
                            compute_dtype=jnp.bfloat16):
    """x: (B, 2048) -> class scores (B, 1502)."""
    b, din0 = x.shape
    mp = _round_up(b, 8)
    kp0 = prepped[0]["w"].shape[0]
    h = jnp.zeros((mp, kp0), compute_dtype).at[:b, :din0].set(x.astype(compute_dtype))

    n_layers = len(prepped)
    for li, p in enumerate(prepped):
        last = li == n_layers - 1
        h = fused_matmul(h, p["w"], p["scale"], p["shift"],
                         alpha=LEAKY_SLOPE,
                         out_dtype=jnp.float32 if last else compute_dtype)
    return h[:b, :num_classes]


# ----------------------------------------------------------------------------
# Pure-JAX f32 reference (same eval-mode semantics) for a sanity check
# ----------------------------------------------------------------------------
def reference_forward(x, params):
    h = x.astype(jnp.float32)
    for p in params["layers"]:
        y = h @ p["w"].T
        y = (y - p["mean"]) / jnp.sqrt(p["var"] + BN_EPS) * p["gamma"] + p["beta"]
        h = jnp.where(y >= 0.0, y, LEAKY_SLOPE * y)
    return h


if __name__ == "__main__":
    key = jax.random.PRNGKey(0)
    pkey, xkey = jax.random.split(key)
    params = init_params(pkey)
    prepped = prepare_params(params)          # one-time layout, outside the jitted fwd

    # Input like the PyTorch module: feature of shape (B, 2048), small batch.
    x = jax.random.normal(xkey, (4, IN_FEATURES), jnp.float32)

    out = jax.block_until_ready(id_market_net23_forward(x, prepped))
    assert out.shape == (4, NUM_CLASSES), out.shape
    assert bool(jnp.all(jnp.isfinite(out)))

    ref = jax.block_until_ready(jax.jit(reference_forward)(x, params))
    ref_np, out_np = np.asarray(ref), np.asarray(out)
    tol = 0.05 * float(np.max(np.abs(ref_np))) + 1e-8   # bf16 operands vs f32 reference
    np.testing.assert_allclose(out_np, ref_np, rtol=0.05, atol=tol)

    print("KERNEL_OK")
</pallas_src>

<mosaic_0001>
module attributes {stable_mosaic.version = 11 : i64} {
  func.func @_fused_matmul_kernel(%arg0: i32, %arg1: i32, %arg2: i32, %arg3: memref<8x1024xbf16, #tpu.memory_space<vmem>>, %arg4: memref<1024x512xbf16, #tpu.memory_space<vmem>>, %arg5: memref<1x512xf32, #tpu.memory_space<vmem>>, %arg6: memref<1x512xf32, #tpu.memory_space<vmem>>, %arg7: memref<8x512xbf16, #tpu.memory_space<vmem>>, %arg8: memref<8x512xf32, #tpu.memory_space<vmem>>) attributes {dimension_semantics = [#tpu.dimension_semantics<parallel>, #tpu.dimension_semantics<parallel>, #tpu.dimension_semantics<arbitrary>], iteration_bounds = array<i64: 1, 2, 1>, scalar_prefetch = 0 : i64, scratch_operands = 1 : i64, tpu.core_type = #tpu.core_type<tc>, window_params = [{transform_indices = @transform_0, window_bounds = array<i64: 8, 1024>}, {transform_indices = @transform_1, window_bounds = array<i64: 1024, 512>}, {transform_indices = @transform_2, window_bounds = array<i64: 1, 512>}, {transform_indices = @transform_3, window_bounds = array<i64: 1, 512>}, {transform_indices = @transform_4, window_bounds = array<i64: 8, 512>}]} {
    %c0_i32 = arith.constant 0 : i32
    %0 = arith.cmpi eq, %arg2, %c0_i32 : i32
    %1 = arith.extui %0 : i1 to i32
    %c0_i32_0 = arith.constant 0 : i32
    %2 = arith.cmpi ne, %1, %c0_i32_0 : i32
    scf.if %2 {
      %cst_10 = arith.constant 0.000000e+00 : f32
      %12 = vector.broadcast %cst_10 : f32 to vector<8x512xf32>
      %c0_11 = arith.constant 0 : index
      %c0_12 = arith.constant 0 : index
      %13 = vector.load %arg8[%c0_11, %c0_12] : memref<8x512xf32, #tpu.memory_space<vmem>>, vector<8x512xf32>
      tpu.vector_store %arg8[%c0_11, %c0_12], %12 {strides = array<i32>} : memref<8x512xf32, #tpu.memory_space<vmem>>, vector<8x512xf32>,
    } else {
    }
    %c0 = arith.constant 0 : index
    %c0_1 = arith.constant 0 : index
    %3 = vector.load %arg8[%c0, %c0_1] : memref<8x512xf32, #tpu.memory_space<vmem>>, vector<8x512xf32>
    %c0_2 = arith.constant 0 : index
    %c0_3 = arith.constant 0 : index
    %4 = vector.load %arg3[%c0_2, %c0_3] : memref<8x1024xbf16, #tpu.memory_space<vmem>>, vector<8x1024xbf16>
    %c0_4 = arith.constant 0 : index
    %c0_5 = arith.constant 0 : index
    %5 = vector.load %arg4[%c0_4, %c0_5] : memref<1024x512xbf16, #tpu.memory_space<vmem>>, vector<1024x512xbf16>
    %cst = arith.constant dense<0.000000e+00> : vector<8x512xf32>
    %6 = tpu.matmul %4, %5, %cst {dimension_numbers = #tpu.dot_dimension_numbers<[1], [0], [0], [1], [0, 0, 1, 1], [], []>} : vector<8x1024xbf16>, vector<1024x512xbf16>, vector<8x512xf32> -> vector<8x512xf32>
    %7 = arith.addf %3, %6 : vector<8x512xf32>
    %c0_6 = arith.constant 0 : index
    %c0_7 = arith.constant 0 : index
    %8 = vector.load %arg8[%c0_6, %c0_7] : memref<8x512xf32, #tpu.memory_space<vmem>>, vector<8x512xf32>
    tpu.vector_store %arg8[%c0_6, %c0_7], %7 {strides = array<i32>} : memref<8x512xf32, #tpu.memory_space<vmem>>, vector<8x512xf32>,
    %c0_i32_8 = arith.constant 0 : i32
    %9 = arith.cmpi eq, %arg2, %c0_i32_8 : i32
    %10 = arith.extui %9 : i1 to i32
    %c0_i32_9 = arith.constant 0 : i32
    %11 = arith.cmpi ne, %10, %c0_i32_9 : i32
    scf.if %11 {
      %c0_10 = arith.constant 0 : index
      %c0_11 = arith.constant 0 : index
      %12 = vector.load %arg8[%c0_10, %c0_11] : memref<8x512xf32, #tpu.memory_space<vmem>>, vector<8x512xf32>
      %c0_12 = arith.constant 0 : index
      %c0_13 = arith.constant 0 : index
      %13 = vector.load %arg5[%c0_12, %c0_13] : memref<1x512xf32, #tpu.memory_space<vmem>>, vector<1x512xf32>
      %14 = vector.broadcast %13 : vector<1x512xf32> to vector<8x512xf32>
      %15 = arith.mulf %12, %14 : vector<8x512xf32>
      %c0_14 = arith.constant 0 : index
      %c0_15 = arith.constant 0 : index
      %16 = vector.load %arg6[%c0_14, %c0_15] : memref<1x512xf32, #tpu.memory_space<vmem>>, vector<1x512xf32>
      %17 = vector.broadcast %16 : vector<1x512xf32> to vector<8x512xf32>
      %18 = arith.addf %15, %17 : vector<8x512xf32>
      %cst_16 = arith.constant 0.000000e+00 : f32
      %19 = vector.broadcast %cst_16 : f32 to vector<8x512xf32>
      %20 = arith.cmpf oge, %18, %19 : vector<8x512xf32>
      %cst_17 = arith.constant 2.000000e-01 : f32
      %21 = vector.broadcast %cst_17 : f32 to vector<8x512xf32>
      %22 = arith.mulf %21, %18 : vector<8x512xf32>
      %23 = arith.select %20, %18, %22 : vector<8x512xi1>, vector<8x512xf32>
      %24 = arith.truncf %23 : vector<8x512xf32> to vector<8x512xbf16>
      %c0_18 = arith.constant 0 : index
      %c0_19 = arith.constant 0 : index
      %25 = vector.load %arg7[%c0_18, %c0_19] : memref<8x512xbf16, #tpu.memory_space<vmem>>, vector<8x512xbf16>
      tpu.vector_store %arg7[%c0_18, %c0_19], %24 {strides = array<i32>} : memref<8x512xbf16, #tpu.memory_space<vmem>>, vector<8x512xbf16>,
    } else {
    }
    return
  }
  func.func @transform_0(%arg0: i32, %arg1: i32, %arg2: i32) -> (i32, i32) {
    %c0_i32 = arith.constant 0 : i32
    return %arg0, %arg2 : i32, i32
  }
  func.func @transform_1(%arg0: i32, %arg1: i32, %arg2: i32) -> (i32, i32) {
    %c0_i32 = arith.constant 0 : i32
    return %arg2, %arg1 : i32, i32
  }
  func.func @transform_2(%arg0: i32, %arg1: i32, %arg2: i32) -> (i32, i32) {
    %c0_i32 = arith.constant 0 : i32
    %c0_i32_0 = arith.constant 0 : i32
    return %c0_i32, %arg1 : i32, i32
  }
  func.func @transform_3(%arg0: i32, %arg1: i32, %arg2: i32) -> (i32, i32) {
    %c0_i32 = arith.constant 0 : i32
    %c0_i32_0 = arith.constant 0 : i32
    return %c0_i32, %arg1 : i32, i32
  }
  func.func @transform_4(%arg0: i32, %arg1: i32, %arg2: i32) -> (i32, i32) {
    %c0_i32 = arith.constant 0 : i32
    return %arg0, %arg1 : i32, i32
  }
}

module attributes {stable_mosaic.version = 11 : i64} {
  func.func @_fused_matmul_kernel(%arg0: i32, %arg1: i32, %arg2: i32, %arg3: memref<8x2048xbf16, #tpu.memory_space<vmem>>, %arg4: memref<2048x512xbf16, #tpu.memory_space<vmem>>, %arg5: memref<1x512xf32, #tpu.memory_space<vmem>>, %arg6: memref<1x512xf32, #tpu.memory_space<vmem>>, %arg7: memref<8x512xbf16, #tpu.memory_space<vmem>>, %arg8: memref<8x512xf32, #tpu.memory_space<vmem>>) attributes {dimension_semantics = [#tpu.dimension_semantics<parallel>, #tpu.dimension_semantics<parallel>, #tpu.dimension_semantics<arbitrary>], iteration_bounds = array<i64: 1, 2, 1>, scalar_prefetch = 0 : i64, scratch_operands = 1 : i64, tpu.core_type = #tpu.core_type<tc>, window_params = [{transform_indices = @transform_0, window_bounds = array<i64: 8, 2048>}, {transform_indices = @transform_1, window_bounds = array<i64: 2048, 512>}, {transform_indices = @transform_2, window_bounds = array<i64: 1, 512>}, {transform_indices = @transform_3, window_bounds = array<i64: 1, 512>}, {transform_indices = @transform_4, window_bounds = array<i64: 8, 512>}]} {
    %c0_i32 = arith.constant 0 : i32
    %0 = arith.cmpi eq, %arg2, %c0_i32 : i32
    %1 = arith.extui %0 : i1 to i32
    %c0_i32_0 = arith.constant 0 : i32
    %2 = arith.cmpi ne, %1, %c0_i32_0 : i32
    scf.if %2 {
      %cst_10 = arith.constant 0.000000e+00 : f32
      %12 = vector.broadcast %cst_10 : f32 to vector<8x512xf32>
      %c0_11 = arith.constant 0 : index
      %c0_12 = arith.constant 0 : index
      %13 = vector.load %arg8[%c0_11, %c0_12] : memref<8x512xf32, #tpu.memory_space<vmem>>, vector<8x512xf32>
      tpu.vector_store %arg8[%c0_11, %c0_12], %12 {strides = array<i32>} : memref<8x512xf32, #tpu.memory_space<vmem>>, vector<8x512xf32>,
    } else {
    }
    %c0 = arith.constant 0 : index
    %c0_1 = arith.constant 0 : index
    %3 = vector.load %arg8[%c0, %c0_1] : memref<8x512xf32, #tpu.memory_space<vmem>>, vector<8x512xf32>
    %c0_2 = arith.constant 0 : index
    %c0_3 = arith.constant 0 : index
    %4 = vector.load %arg3[%c0_2, %c0_3] : memref<8x2048xbf16, #tpu.memory_space<vmem>>, vector<8x2048xbf16>
    %c0_4 = arith.constant 0 : index
    %c0_5 = arith.constant 0 : index
    %5 = vector.load %arg4[%c0_4, %c0_5] : memref<2048x512xbf16, #tpu.memory_space<vmem>>, vector<2048x512xbf16>
    %cst = arith.constant dense<0.000000e+00> : vector<8x512xf32>
    %6 = tpu.matmul %4, %5, %cst {dimension_numbers = #tpu.dot_dimension_numbers<[1], [0], [0], [1], [0, 0, 1, 1], [], []>} : vector<8x2048xbf16>, vector<2048x512xbf16>, vector<8x512xf32> -> vector<8x512xf32>
    %7 = arith.addf %3, %6 : vector<8x512xf32>
    %c0_6 = arith.constant 0 : index
    %c0_7 = arith.constant 0 : index
    %8 = vector.load %arg8[%c0_6, %c0_7] : memref<8x512xf32, #tpu.memory_space<vmem>>, vector<8x512xf32>
    tpu.vector_store %arg8[%c0_6, %c0_7], %7 {strides = array<i32>} : memref<8x512xf32, #tpu.memory_space<vmem>>, vector<8x512xf32>,
    %c0_i32_8 = arith.constant 0 : i32
    %9 = arith.cmpi eq, %arg2, %c0_i32_8 : i32
    %10 = arith.extui %9 : i1 to i32
    %c0_i32_9 = arith.constant 0 : i32
    %11 = arith.cmpi ne, %10, %c0_i32_9 : i32
    scf.if %11 {
      %c0_10 = arith.constant 0 : index
      %c0_11 = arith.constant 0 : index
      %12 = vector.load %arg8[%c0_10, %c0_11] : memref<8x512xf32, #tpu.memory_space<vmem>>, vector<8x512xf32>
      %c0_12 = arith.constant 0 : index
      %c0_13 = arith.constant 0 : index
      %13 = vector.load %arg5[%c0_12, %c0_13] : memref<1x512xf32, #tpu.memory_space<vmem>>, vector<1x512xf32>
      %14 = vector.broadcast %13 : vector<1x512xf32> to vector<8x512xf32>
      %15 = arith.mulf %12, %14 : vector<8x512xf32>
      %c0_14 = arith.constant 0 : index
      %c0_15 = arith.constant 0 : index
      %16 = vector.load %arg6[%c0_14, %c0_15] : memref<1x512xf32, #tpu.memory_space<vmem>>, vector<1x512xf32>
      %17 = vector.broadcast %16 : vector<1x512xf32> to vector<8x512xf32>
      %18 = arith.addf %15, %17 : vector<8x512xf32>
      %cst_16 = arith.constant 0.000000e+00 : f32
      %19 = vector.broadcast %cst_16 : f32 to vector<8x512xf32>
      %20 = arith.cmpf oge, %18, %19 : vector<8x512xf32>
      %cst_17 = arith.constant 2.000000e-01 : f32
      %21 = vector.broadcast %cst_17 : f32 to vector<8x512xf32>
      %22 = arith.mulf %21, %18 : vector<8x512xf32>
      %23 = arith.select %20, %18, %22 : vector<8x512xi1>, vector<8x512xf32>
      %24 = arith.truncf %23 : vector<8x512xf32> to vector<8x512xbf16>
      %c0_18 = arith.constant 0 : index
      %c0_19 = arith.constant 0 : index
      %25 = vector.load %arg7[%c0_18, %c0_19] : memref<8x512xbf16, #tpu.memory_space<vmem>>, vector<8x512xbf16>
      tpu.vector_store %arg7[%c0_18, %c0_19], %24 {strides = array<i32>} : memref<8x512xbf16, #tpu.memory_space<vmem>>, vector<8x512xbf16>,
    } else {
    }
    return
  }
  func.func @transform_0(%arg0: i32, %arg1: i32, %arg2: i32) -> (i32, i32) {
    %c0_i32 = arith.constant 0 : i32
    return %arg0, %arg2 : i32, i32
  }
  func.func @transform_1(%arg0: i32, %arg1: i32, %arg2: i32) -> (i32, i32) {
    %c0_i32 = arith.constant 0 : i32
    return %arg2, %arg1 : i32, i32
  }
  func.func @transform_2(%arg0: i32, %arg1: i32, %arg2: i32) -> (i32, i32) {
    %c0_i32 = arith.constant 0 : i32
    %c0_i32_0 = arith.constant 0 : i32
    return %c0_i32, %arg1 : i32, i32
  }
  func.func @transform_3(%arg0: i32, %arg1: i32, %arg2: i32) -> (i32, i32) {
    %c0_i32 = arith.constant 0 : i32
    %c0_i32_0 = arith.constant 0 : i32
    return %c0_i32, %arg1 : i32, i32
  }
  func.func @transform_4(%arg0: i32, %arg1: i32, %arg2: i32) -> (i32, i32) {
    %c0_i32 = arith.constant 0 : i32
    return %arg0, %arg1 : i32, i32
  }
}

module attributes {stable_mosaic.version = 11 : i64} {
  func.func @_fused_matmul_kernel(%arg0: i32, %arg1: i32, %arg2: i32, %arg3: memref<8x1024xbf16, #tpu.memory_space<vmem>>, %arg4: memref<1024x512xbf16, #tpu.memory_space<vmem>>, %arg5: memref<1x512xf32, #tpu.memory_space<vmem>>, %arg6: memref<1x512xf32, #tpu.memory_space<vmem>>, %arg7: memref<8x512xf32, #tpu.memory_space<vmem>>, %arg8: memref<8x512xf32, #tpu.memory_space<vmem>>) attributes {dimension_semantics = [#tpu.dimension_semantics<parallel>, #tpu.dimension_semantics<parallel>, #tpu.dimension_semantics<arbitrary>], iteration_bounds = array<i64: 1, 3, 1>, scalar_prefetch = 0 : i64, scratch_operands = 1 : i64, tpu.core_type = #tpu.core_type<tc>, window_params = [{transform_indices = @transform_0, window_bounds = array<i64: 8, 1024>}, {transform_indices = @transform_1, window_bounds = array<i64: 1024, 512>}, {transform_indices = @transform_2, window_bounds = array<i64: 1, 512>}, {transform_indices = @transform_3, window_bounds = array<i64: 1, 512>}, {transform_indices = @transform_4, window_bounds = array<i64: 8, 512>}]} {
    %c0_i32 = arith.constant 0 : i32
    %0 = arith.cmpi eq, %arg2, %c0_i32 : i32
    %1 = arith.extui %0 : i1 to i32
    %c0_i32_0 = arith.constant 0 : i32
    %2 = arith.cmpi ne, %1, %c0_i32_0 : i32
    scf.if %2 {
      %cst_10 = arith.constant 0.000000e+00 : f32
      %12 = vector.broadcast %cst_10 : f32 to vector<8x512xf32>
      %c0_11 = arith.constant 0 : index
      %c0_12 = arith.constant 0 : index
      %13 = vector.load %arg8[%c0_11, %c0_12] : memref<8x512xf32, #tpu.memory_space<vmem>>, vector<8x512xf32>
      tpu.vector_store %arg8[%c0_11, %c0_12], %12 {strides = array<i32>} : memref<8x512xf32, #tpu.memory_space<vmem>>, vector<8x512xf32>,
    } else {
    }
    %c0 = arith.constant 0 : index
    %c0_1 = arith.constant 0 : index
    %3 = vector.load %arg8[%c0, %c0_1] : memref<8x512xf32, #tpu.memory_space<vmem>>, vector<8x512xf32>
    %c0_2 = arith.constant 0 : index
    %c0_3 = arith.constant 0 : index
    %4 = vector.load %arg3[%c0_2, %c0_3] : memref<8x1024xbf16, #tpu.memory_space<vmem>>, vector<8x1024xbf16>
    %c0_4 = arith.constant 0 : index
    %c0_5 = arith.constant 0 : index
    %5 = vector.load %arg4[%c0_4, %c0_5] : memref<1024x512xbf16, #tpu.memory_space<vmem>>, vector<1024x512xbf16>
    %cst = arith.constant dense<0.000000e+00> : vector<8x512xf32>
    %6 = tpu.matmul %4, %5, %cst {dimension_numbers = #tpu.dot_dimension_numbers<[1], [0], [0], [1], [0, 0, 1, 1], [], []>} : vector<8x1024xbf16>, vector<1024x512xbf16>, vector<8x512xf32> -> vector<8x512xf32>
    %7 = arith.addf %3, %6 : vector<8x512xf32>
    %c0_6 = arith.constant 0 : index
    %c0_7 = arith.constant 0 : index
    %8 = vector.load %arg8[%c0_6, %c0_7] : memref<8x512xf32, #tpu.memory_space<vmem>>, vector<8x512xf32>
    tpu.vector_store %arg8[%c0_6, %c0_7], %7 {strides = array<i32>} : memref<8x512xf32, #tpu.memory_space<vmem>>, vector<8x512xf32>,
    %c0_i32_8 = arith.constant 0 : i32
    %9 = arith.cmpi eq, %arg2, %c0_i32_8 : i32
    %10 = arith.extui %9 : i1 to i32
    %c0_i32_9 = arith.constant 0 : i32
    %11 = arith.cmpi ne, %10, %c0_i32_9 : i32
    scf.if %11 {
      %c0_10 = arith.constant 0 : index
      %c0_11 = arith.constant 0 : index
      %12 = vector.load %arg8[%c0_10, %c0_11] : memref<8x512xf32, #tpu.memory_space<vmem>>, vector<8x512xf32>
      %c0_12 = arith.constant 0 : index
      %c0_13 = arith.constant 0 : index
      %13 = vector.load %arg5[%c0_12, %c0_13] : memref<1x512xf32, #tpu.memory_space<vmem>>, vector<1x512xf32>
      %14 = vector.broadcast %13 : vector<1x512xf32> to vector<8x512xf32>
      %15 = arith.mulf %12, %14 : vector<8x512xf32>
      %c0_14 = arith.constant 0 : index
      %c0_15 = arith.constant 0 : index
      %16 = vector.load %arg6[%c0_14, %c0_15] : memref<1x512xf32, #tpu.memory_space<vmem>>, vector<1x512xf32>
      %17 = vector.broadcast %16 : vector<1x512xf32> to vector<8x512xf32>
      %18 = arith.addf %15, %17 : vector<8x512xf32>
      %cst_16 = arith.constant 0.000000e+00 : f32
      %19 = vector.broadcast %cst_16 : f32 to vector<8x512xf32>
      %20 = arith.cmpf oge, %18, %19 : vector<8x512xf32>
      %cst_17 = arith.constant 2.000000e-01 : f32
      %21 = vector.broadcast %cst_17 : f32 to vector<8x512xf32>
      %22 = arith.mulf %21, %18 : vector<8x512xf32>
      %23 = arith.select %20, %18, %22 : vector<8x512xi1>, vector<8x512xf32>
      %c0_18 = arith.constant 0 : index
      %c0_19 = arith.constant 0 : index
      %24 = vector.load %arg7[%c0_18, %c0_19] : memref<8x512xf32, #tpu.memory_space<vmem>>, vector<8x512xf32>
      tpu.vector_store %arg7[%c0_18, %c0_19], %23 {strides = array<i32>} : memref<8x512xf32, #tpu.memory_space<vmem>>, vector<8x512xf32>,
    } else {
    }
    return
  }
  func.func @transform_0(%arg0: i32, %arg1: i32, %arg2: i32) -> (i32, i32) {
    %c0_i32 = arith.constant 0 : i32
    return %arg0, %arg2 : i32, i32
  }
  func.func @transform_1(%arg0: i32, %arg1: i32, %arg2: i32) -> (i32, i32) {
    %c0_i32 = arith.constant 0 : i32
    return %arg2, %arg1 : i32, i32
  }
  func.func @transform_2(%arg0: i32, %arg1: i32, %arg2: i32) -> (i32, i32) {
    %c0_i32 = arith.constant 0 : i32
    %c0_i32_0 = arith.constant 0 : i32
    return %c0_i32, %arg1 : i32, i32
  }
  func.func @transform_3(%arg0: i32, %arg1: i32, %arg2: i32) -> (i32, i32) {
    %c0_i32 = arith.constant 0 : i32
    %c0_i32_0 = arith.constant 0 : i32
    return %c0_i32, %arg1 : i32, i32
  }
  func.func @transform_4(%arg0: i32, %arg1: i32, %arg2: i32) -> (i32, i32) {
    %c0_i32 = arith.constant 0 : i32
    return %arg0, %arg1 : i32, i32
  }
}

</mosaic_0001>

<bundles_post_ra>
// kernel: id_market_net23_forward.5
= control target key start
LH: loop header
LB: loop body
LE: loop exit
PB: predicated region body
PF: predicated region fallthrough
CT: control target
= control target key end

     0   :  { %s3782_s15 = smov 0   ;;  %s3784_s16 = smov 0   ;;  %s4668_s0 = inlined_call_operand.vmem [shape: bf16[8,1024], index: 0, kind: input, shape index: {}]   ;;  %s4669_s1 = inlined_call_operand.vmem [shape: bf16[1024,1024], index: 1, kind: input, shape index: {}]   ;;  %s4670_s2 = inlined_call_operand.vmem [shape: f32[1,1024], index: 2, kind: input, shape index: {}]   ;;  %s4671_s3 = inlined_call_operand.vmem [shape: f32[1,1024], index: 3, kind: input, shape index: {}]   ;;  %s4672_s4 = inlined_call_operand.vmem [shape: bf16[8,1024], index: 4, kind: output, shape index: {}]  }
   0x1   :  { %s3786_s17 = smov 0   ;;  %s3788_s18 = smov 0  }
   0x2   :  { %s3790_s19 = smov 0  }
   0x3 LB: > { %s29_s20 = sadd.s32 1, %s3751_s18  ;;  %p77_p1 = scmp.ne.s32.totalorder %s3743_s16, %s3739_s15  ;;  %s3755_s19 = sphi %s3790_s19, %s14_s19   ;;  %s3751_s18 = sphi %s3788_s18, %s4676_s18   ;;  %s3747_s17 = sphi %s3786_s17, %s4675_s17   ;;  %s3743_s16 = sphi %s3784_s16, %s4674_s16   ;;  %s3739_s15 = sphi %s3782_s15, %s4673_s15  }
   0x4   : > { %p31_p0 = scmp.ge.s32.totalorder %s29_s20, 2  ;;  %p78_p2 = scmp.eq.s32.totalorder %s3755_s19, 0 }
   0x5   : > { %s70_s22 = sadd.s32 1, %s3743_s16  ;;  %p2980_p5 = scmp.ge.s32.totalorder %s3755_s19, 2 }
   0x6   : > { %s4678_s20 = smov (%p31_p0, %s29_s20), 0  ;;  %p79_p3 = por %p78_p2, %p77_p1 }
   0x7   : > { %s66_s21 = ssub.s32 %s3751_s18, %s4678_s20  ;;  %196 = sbr.rel (%p2980_p5) target bundleno = 146 (0x92), region = 20 }
   0x8   : > { %p68_p4 = scmp.eq.s32.totalorder %s66_s21, 0 }
   0xa   : > { %s3817_s23 = scalar_select %p68_p4, %s3743_s16, %s70_s22  }
   0xe   : > { %199 = sbr.rel (!%p79_p3) target bundleno = 146 (0x92), region = 24  ;;  %s201_s24 = sand.u32 (%p79_p3), 1, %s3743_s16  }
   0xf   : > { %s3258_s25 = sshll.u32 (%p79_p3), %s3751_s18, 4  ;;  %s2981_s26 = sshll.u32 (%p79_p3), %s201_s24, 11 }
  0x10   : > { %s3825_s29 = scalar_lea.vmem (%p79_p3), %s4669_s1, %s3258_s25  ;;  %s3830_s30 = scalar_lea.vmem (%p79_p3), [#allocation3], %s2981_s26 }
  0x11   : > { %v222_v0 = vld [vmem:[%s3825_s29] sm:$0xff] (%p79_p3)  ;;  %v224_v1 = vld [vmem:[%s3825_s29 + $0x8] sm:$0xff] (%p79_p3) }
  0x12   : > { %v226_v2 = vld [vmem:[%s3825_s29 + $0x20] sm:$0xff] (%p79_p3)  ;;  %223 = vst [vmem:[%s3830_s30] sm:$0xff] (%p79_p3), %v222_v0  ;;  %225 = vst [vmem:[%s3830_s30 + $0x8] sm:$0xff] (%p79_p3), %v224_v1  ;;  %v228_v3 = vld [vmem:[%s3825_s29 + $0x28] sm:$0xff] (%p79_p3) }
  0x13   : > { %227 = vst [vmem:[%s3830_s30 + $0x10] sm:$0xff] (%p79_p3), %v226_v2  ;;  %v230_v4 = vld [vmem:[%s3825_s29 + $0x40] sm:$0xff] (%p79_p3)  ;;  %v232_v5 = vld [vmem:[%s3825_s29 + $0x48] sm:$0xff] (%p79_p3)  ;;  %229 = vst [vmem:[%s3830_s30 + $0x18] sm:$0xff] (%p79_p3), %v228_v3 }
  0x14   : > { %231 = vst [vmem:[%s3830_s30 + $0x20] sm:$0xff] (%p79_p3), %v230_v4  ;;  %233 = vst [vmem:[%s3830_s30 + $0x28] sm:$0xff] (%p79_p3), %v232_v5  ;;  %v234_v6 = vld [vmem:[%s3825_s29 + $0x60] sm:$0xff] (%p79_p3)  ;;  %v236_v7 = vld [vmem:[%s3825_s29 + $0x68] sm:$0xff] (%p79_p3) }
  0x15   : > { %v238_v8 = vld [vmem:[%s3825_s29 + $0x80] sm:$0xff]  ;;  %235 = vst [vmem:[%s3830_s30 + $0x30] sm:$0xff] %v234_v6  ;;  %237 = vst [vmem:[%s3830_s30 + $0x38] sm:$0xff] %v236_v7  ;;  %v240_v9 = vld [vmem:[%s3825_s29 + $0x88] sm:$0xff] }
  0x16   : > { %239 = vst [vmem:[%s3830_s30 + $0x40] sm:$0xff] %v238_v8  ;;  %v242_v10 = vld [vmem:[%s3825_s29 + $0xa0] sm:$0xff]  ;;  %v244_v11 = vld [vmem:[%s3825_s29 + $0xa8] sm:$0xff]  ;;  %241 = vst [vmem:[%s3830_s30 + $0x48] sm:$0xff] %v240_v9 }
  0x17   : > { %243 = vst [vmem:[%s3830_s30 + $0x50] sm:$0xff] %v242_v10  ;;  %245 = vst [vmem:[%s3830_s30 + $0x58] sm:$0xff] %v244_v11  ;;  %v246_v12 = vld [vmem:[%s3825_s29 + $0xc0] sm:$0xff]  ;;  %v248_v13 = vld [vmem:[%s3825_s29 + $0xc8] sm:$0xff] }
  0x18   : > { %v250_v14 = vld [vmem:[%s3825_s29 + $0xe0] sm:$0xff]  ;;  %247 = vst [vmem:[%s3830_s30 + $0x60] sm:$0xff] %v246_v12  ;;  %249 = vst [vmem:[%s3830_s30 + $0x68] sm:$0xff] %v248_v13  ;;  %v252_v15 = vld [vmem:[%s3825_s29 + $0xe8] sm:$0xff] }
  0x19   : > { %251 = vst [vmem:[%s3830_s30 + $0x70] sm:$0xff] %v250_v14  ;;  %v254_v16 = vld [vmem:[%s3825_s29 + $0x100] sm:$0xff]  ;;  %v256_v17 = vld [vmem:[%s3825_s29 + $0x108] sm:$0xff]  ;;  %253 = vst [vmem:[%s3830_s30 + $0x78] sm:$0xff] %v252_v15 }
  0x1a   : > { %255 = vst [vmem:[%s3830_s30 + $0x80] sm:$0xff] %v254_v16  ;;  %257 = vst [vmem:[%s3830_s30 + $0x88] sm:$0xff] %v256_v17  ;;  %v258_v18 = vld [vmem:[%s3825_s29 + $0x120] sm:$0xff]  ;;  %v260_v19 = vld [vmem:[%s3825_s29 + $0x128] sm:$0xff] }
  0x1b   : > { %v262_v20 = vld [vmem:[%s3825_s29 + $0x140] sm:$0xff]  ;;  %259 = vst [vmem:[%s3830_s30 + $0x90] sm:$0xff] %v258_v18  ;;  %261 = vst [vmem:[%s3830_s30 + $0x98] sm:$0xff] %v260_v19  ;;  %v264_v21 = vld [vmem:[%s3825_s29 + $0x148] sm:$0xff] }
  0x1c   : > { %263 = vst [vmem:[%s3830_s30 + $0xa0] sm:$0xff] %v262_v20  ;;  %v266_v22 = vld [vmem:[%s3825_s29 + $0x160] sm:$0xff]  ;;  %v268_v23 = vld [vmem:[%s3825_s29 + $0x168] sm:$0xff]  ;;  %265 = vst [vmem:[%s3830_s30 + $0xa8] sm:$0xff] %v264_v21 }
  0x1d   : > { %267 = vst [vmem:[%s3830_s30 + $0xb0] sm:$0xff] %v266_v22  ;;  %269 = vst [vmem:[%s3830_s30 + $0xb8] sm:$0xff] %v268_v23  ;;  %v270_v24 = vld [vmem:[%s3825_s29 + $0x180] sm:$0xff]  ;;  %v272_v25 = vld [vmem:[%s3825_s29 + $0x188] sm:$0xff] }
  0x1e   : > { %v274_v26 = vld [vmem:[%s3825_s29 + $0x1a0] sm:$0xff]  ;;  %271 = vst [vmem:[%s3830_s30 + $0xc0] sm:$0xff] %v270_v24  ;;  %273 = vst [vmem:[%s3830_s30 + $0xc8] sm:$0xff] %v272_v25  ;;  %v276_v27 = vld [vmem:[%s3825_s29 + $0x1a8] sm:$0xff] }
  0x1f   : > { %275 = vst [vmem:[%s3830_s30 + $0xd0] sm:$0xff] %v274_v26  ;;  %v278_v28 = vld [vmem:[%s3825_s29 + $0x1c0] sm:$0xff]  ;;  %v280_v29 = vld [vmem:[%s3825_s29 + $0x1c8] sm:$0xff]  ;;  %277 = vst [vmem:[%s3830_s30 + $0xd8] sm:$0xff] %v276_v27 }
  0x20   : > { %279 = vst [vmem:[%s3830_s30 + $0xe0] sm:$0xff] %v278_v28  ;;  %281 = vst [vmem:[%s3830_s30 + $0xe8] sm:$0xff] %v280_v29  ;;  %v282_v30 = vld [vmem:[%s3825_s29 + $0x1e0] sm:$0xff]  ;;  %v284_v31 = vld [vmem:[%s3825_s29 + $0x1e8] sm:$0xff] }
  0x21   : > { %v286_v32 = vld [vmem:[%s3825_s29 + $0x200] sm:$0xff]  ;;  %283 = vst [vmem:[%s3830_s30 + $0xf0] sm:$0xff] %v282_v30  ;;  %285 = vst [vmem:[%s3830_s30 + $0xf8] sm:$0xff] %v284_v31  ;;  %v288_v33 = vld [vmem:[%s3825_s29 + $0x208] sm:$0xff] }
  0x22   : > { %287 = vst [vmem:[%s3830_s30 + $0x100] sm:$0xff] %v286_v32  ;;  %v290_v34 = vld [vmem:[%s3825_s29 + $0x220] sm:$0xff]  ;;  %v292_v35 = vld [vmem:[%s3825_s29 + $0x228] sm:$0xff]  ;;  %289 = vst [vmem:[%s3830_s30 + $0x108] sm:$0xff] %v288_v33 }
  0x23   : > { %291 = vst [vmem:[%s3830_s30 + $0x110] sm:$0xff] %v290_v34  ;;  %293 = vst [vmem:[%s3830_s30 + $0x118] sm:$0xff] %v292_v35  ;;  %v294_v36 = vld [vmem:[%s3825_s29 + $0x240] sm:$0xff]  ;;  %v296_v37 = vld [vmem:[%s3825_s29 + $0x248] sm:$0xff] }
  0x24   : > { %v298_v38 = vld [vmem:[%s3825_s29 + $0x260] sm:$0xff]  ;;  %295 = vst [vmem:[%s3830_s30 + $0x120] sm:$0xff] %v294_v36  ;;  %297 = vst [vmem:[%s3830_s30 + $0x128] sm:$0xff] %v296_v37  ;;  %v300_v39 = vld [vmem:[%s3825_s29 + $0x268] sm:$0xff] }
  0x25   : > { %299 = vst [vmem:[%s3830_s30 + $0x130] sm:$0xff] %v298_v38  ;;  %v302_v40 = vld [vmem:[%s3825_s29 + $0x280] sm:$0xff]  ;;  %v304_v41 = vld [vmem:[%s3825_s29 + $0x288] sm:$0xff]  ;;  %301 = vst [vmem:[%s3830_s30 + $0x138] sm:$0xff] %v300_v39 }
  0x26   : > { %303 = vst [vmem:[%s3830_s30 + $0x140] sm:$0xff] %v302_v40  ;;  %305 = vst [vmem:[%s3830_s30 + $0x148] sm:$0xff] %v304_v41  ;;  %v306_v42 = vld [vmem:[%s3825_s29 + $0x2a0] sm:$0xff]  ;;  %v308_v43 = vld [vmem:[%s3825_s29 + $0x2a8] sm:$0xff] }
  0x27   : > { %v310_v44 = vld [vmem:[%s3825_s29 + $0x2c0] sm:$0xff]  ;;  %307 = vst [vmem:[%s3830_s30 + $0x150] sm:$0xff] %v306_v42  ;;  %309 = vst [vmem:[%s3830_s30 + $0x158] sm:$0xff] %v308_v43  ;;  %v312_v45 = vld [vmem:[%s3825_s29 + $0x2c8] sm:$0xff] }
  0x28   : > { %311 = vst [vmem:[%s3830_s30 + $0x160] sm:$0xff] %v310_v44  ;;  %v314_v46 = vld [vmem:[%s3825_s29 + $0x2e0] sm:$0xff]  ;;  %v316_v47 = vld [vmem:[%s3825_s29 + $0x2e8] sm:$0xff]  ;;  %313 = vst [vmem:[%s3830_s30 + $0x168] sm:$0xff] %v312_v45 }
  0x29   : > { %315 = vst [vmem:[%s3830_s30 + $0x170] sm:$0xff] %v314_v46  ;;  %317 = vst [vmem:[%s3830_s30 + $0x178] sm:$0xff] %v316_v47  ;;  %v318_v48 = vld [vmem:[%s3825_s29 + $0x300] sm:$0xff]  ;;  %v320_v49 = vld [vmem:[%s3825_s29 + $0x308] sm:$0xff] }
  0x2a   : > { %v322_v50 = vld [vmem:[%s3825_s29 + $0x320] sm:$0xff]  ;;  %319 = vst [vmem:[%s3830_s30 + $0x180] sm:$0xff] %v318_v48  ;;  %321 = vst [vmem:[%s3830_s30 + $0x188] sm:$0xff] %v320_v49  ;;  %v324_v51 = vld [vmem:[%s3825_s29 + $0x328] sm:$0xff] }
  0x2b   : > { %323 = vst [vmem:[%s3830_s30 + $0x190] sm:$0xff] %v322_v50  ;;  %v326_v52 = vld [vmem:[%s3825_s29 + $0x340] sm:$0xff]  ;;  %v328_v53 = vld [vmem:[%s3825_s29 + $0x348] sm:$0xff]  ;;  %325 = vst [vmem:[%s3830_s30 + $0x198] sm:$0xff] %v324_v51 }
  0x2c   : > { %327 = vst [vmem:[%s3830_s30 + $0x1a0] sm:$0xff] %v326_v52  ;;  %329 = vst [vmem:[%s3830_s30 + $0x1a8] sm:$0xff] %v328_v53  ;;  %v330_v54 = vld [vmem:[%s3825_s29 + $0x360] sm:$0xff]  ;;  %v332_v55 = vld [vmem:[%s3825_s29 + $0x368] sm:$0xff] }
  0x2d   : > { %v334_v56 = vld [vmem:[%s3825_s29 + $0x380] sm:$0xff]  ;;  %331 = vst [vmem:[%s3830_s30 + $0x1b0] sm:$0xff] %v330_v54  ;;  %333 = vst [vmem:[%s3830_s30 + $0x1b8] sm:$0xff] %v332_v55  ;;  %v336_v57 = vld [vmem:[%s3825_s29 + $0x388] sm:$0xff] }
  0x2e   : > { %335 = vst [vmem:[%s3830_s30 + $0x1c0] sm:$0xff] %v334_v56  ;;  %v338_v58 = vld [vmem:[%s3825_s29 + $0x3a0] sm:$0xff]  ;;  %v340_v59 = vld [vmem:[%s3825_s29 + $0x3a8] sm:$0xff]  ;;  %337 = vst [vmem:[%s3830_s30 + $0x1c8] sm:$0xff] %v336_v57 }
  0x2f   : > { %339 = vst [vmem:[%s3830_s30 + $0x1d0] sm:$0xff] %v338_v58  ;;  %341 = vst [vmem:[%s3830_s30 + $0x1d8] sm:$0xff] %v340_v59  ;;  %v342_v60 = vld [vmem:[%s3825_s29 + $0x3c0] sm:$0xff]  ;;  %v344_v61 = vld [vmem:[%s3825_s29 + $0x3c8] sm:$0xff] }
  0x30   : > { %v346_v62 = vld [vmem:[%s3825_s29 + $0x3e0] sm:$0xff]  ;;  %343 = vst [vmem:[%s3830_s30 + $0x1e0] sm:$0xff] %v342_v60  ;;  %345 = vst [vmem:[%s3830_s30 + $0x1e8] sm:$0xff] %v344_v61  ;;  %v348_v63 = vld [vmem:[%s3825_s29 + $0x3e8] sm:$0xff] }
  0x31   : > { %347 = vst [vmem:[%s3830_s30 + $0x1f0] sm:$0xff] %v346_v62  ;;  %v350_v0 = vld [vmem:[%s3825_s29 + $0x400] sm:$0xff]  ;;  %v352_v1 = vld [vmem:[%s3825_s29 + $0x408] sm:$0xff]  ;;  %349 = vst [vmem:[%s3830_s30 + $0x1f8] sm:$0xff] %v348_v63 }
  0x32   : > { %351 = vst [vmem:[%s3830_s30 + $0x200] sm:$0xff] %v350_v0  ;;  %353 = vst [vmem:[%s3830_s30 + $0x208] sm:$0xff] %v352_v1  ;;  %v354_v2 = vld [vmem:[%s3825_s29 + $0x420] sm:$0xff]  ;;  %v356_v3 = vld [vmem:[%s3825_s29 + $0x428] sm:$0xff] }
  0x33   : > { %v358_v4 = vld [vmem:[%s3825_s29 + $0x440] sm:$0xff]  ;;  %355 = vst [vmem:[%s3830_s30 + $0x210] sm:$0xff] %v354_v2  ;;  %357 = vst [vmem:[%s3830_s30 + $0x218] sm:$0xff] %v356_v3  ;;  %v360_v5 = vld [vmem:[%s3825_s29 + $0x448] sm:$0xff] }
  0x34   : > { %359 = vst [vmem:[%s3830_s30 + $0x220] sm:$0xff] %v358_v4  ;;  %v362_v6 = vld [vmem:[%s3825_s29 + $0x460] sm:$0xff]  ;;  %v364_v7 = vld [vmem:[%s3825_s29 + $0x468] sm:$0xff]  ;;  %361 = vst [vmem:[%s3830_s30 + $0x228] sm:$0xff] %v360_v5 }
  0x35   : > { %363 = vst [vmem:[%s3830_s30 + $0x230] sm:$0xff] %v362_v6  ;;  %365 = vst [vmem:[%s3830_s30 + $0x238] sm:$0xff] %v364_v7  ;;  %v366_v8 = vld [vmem:[%s3825_s29 + $0x480] sm:$0xff]  ;;  %v368_v9 = vld [vmem:[%s3825_s29 + $0x488] sm:$0xff] }
  0x36   : > { %v370_v10 = vld [vmem:[%s3825_s29 + $0x4a0] sm:$0xff]  ;;  %367 = vst [vmem:[%s3830_s30 + $0x240] sm:$0xff] %v366_v8  ;;  %369 = vst [vmem:[%s3830_s30 + $0x248] sm:$0xff] %v368_v9  ;;  %v372_v11 = vld [vmem:[%s3825_s29 + $0x4a8] sm:$0xff] }
  0x37   : > { %371 = vst [vmem:[%s3830_s30 + $0x250] sm:$0xff] %v370_v10  ;;  %v374_v12 = vld [vmem:[%s3825_s29 + $0x4c0] sm:$0xff]  ;;  %v376_v13 = vld [vmem:[%s3825_s29 + $0x4c8] sm:$0xff]  ;;  %373 = vst [vmem:[%s3830_s30 + $0x258] sm:$0xff] %v372_v11 }
  0x38   : > { %375 = vst [vmem:[%s3830_s30 + $0x260] sm:$0xff] %v374_v12  ;;  %377 = vst [vmem:[%s3830_s30 + $0x268] sm:$0xff] %v376_v13  ;;  %v378_v14 = vld [vmem:[%s3825_s29 + $0x4e0] sm:$0xff]  ;;  %v380_v15 = vld [vmem:[%s3825_s29 + $0x4e8] sm:$0xff] }
  0x39   : > { %v382_v16 = vld [vmem:[%s3825_s29 + $0x500] sm:$0xff]  ;;  %379 = vst [vmem:[%s3830_s30 + $0x270] sm:$0xff] %v378_v14  ;;  %381 = vst [vmem:[%s3830_s30 + $0x278] sm:$0xff] %v380_v15  ;;  %v384_v17 = vld [vmem:[%s3825_s29 + $0x508] sm:$0xff] }
  0x3a   : > { %383 = vst [vmem:[%s3830_s30 + $0x280] sm:$0xff] %v382_v16  ;;  %v386_v18 = vld [vmem:[%s3825_s29 + $0x520] sm:$0xff]  ;;  %v388_v19 = vld [vmem:[%s3825_s29 + $0x528] sm:$0xff]  ;;  %385 = vst [vmem:[%s3830_s30 + $0x288] sm:$0xff] %v384_v17 }
  0x3b   : > { %387 = vst [vmem:[%s3830_s30 + $0x290] sm:$0xff] %v386_v18  ;;  %389 = vst [vmem:[%s3830_s30 + $0x298] sm:$0xff] %v388_v19  ;;  %v390_v20 = vld [vmem:[%s3825_s29 + $0x540] sm:$0xff]  ;;  %v392_v21 = vld [vmem:[%s3825_s29 + $0x548] sm:$0xff] }
  0x3c   : > { %v394_v22 = vld [vmem:[%s3825_s29 + $0x560] sm:$0xff]  ;;  %391 = vst [vmem:[%s3830_s30 + $0x2a0] sm:$0xff] %v390_v20  ;;  %393 = vst [vmem:[%s3830_s30 + $0x2a8] sm:$0xff] %v392_v21  ;;  %v396_v23 = vld [vmem:[%s3825_s29 + $0x568] sm:$0xff] }
  0x3d   : > { %395 = vst [vmem:[%s3830_s30 + $0x2b0] sm:$0xff] %v394_v22  ;;  %v398_v24 = vld [vmem:[%s3825_s29 + $0x580] sm:$0xff]  ;;  %v400_v25 = vld [vmem:[%s3825_s29 + $0x588] sm:$0xff]  ;;  %397 = vst [vmem:[%s3830_s30 + $0x2b8] sm:$0xff] %v396_v23 }
  0x3e   : > { %399 = vst [vmem:[%s3830_s30 + $0x2c0] sm:$0xff] %v398_v24  ;;  %401 = vst [vmem:[%s3830_s30 + $0x2c8] sm:$0xff] %v400_v25  ;;  %v402_v26 = vld [vmem:[%s3825_s29 + $0x5a0] sm:$0xff]  ;;  %v404_v27 = vld [vmem:[%s3825_s29 + $0x5a8] sm:$0xff] }
  0x3f   : > { %v406_v28 = vld [vmem:[%s3825_s29 + $0x5c0] sm:$0xff]  ;;  %403 = vst [vmem:[%s3830_s30 + $0x2d0] sm:$0xff] %v402_v26  ;;  %405 = vst [vmem:[%s3830_s30 + $0x2d8] sm:$0xff] %v404_v27  ;;  %v408_v29 = vld [vmem:[%s3825_s29 + $0x5c8] sm:$0xff] }
  0x40   : > { %407 = vst [vmem:[%s3830_s30 + $0x2e0] sm:$0xff] %v406_v28  ;;  %v410_v30 = vld [vmem:[%s3825_s29 + $0x5e0] sm:$0xff]  ;;  %v412_v31 = vld [vmem:[%s3825_s29 + $0x5e8] sm:$0xff]  ;;  %409 = vst [vmem:[%s3830_s30 + $0x2e8] sm:$0xff] %v408_v29 }
  0x41   : > { %411 = vst [vmem:[%s3830_s30 + $0x2f0] sm:$0xff] %v410_v30  ;;  %413 = vst [vmem:[%s3830_s30 + $0x2f8] sm:$0xff] %v412_v31  ;;  %v414_v32 = vld [vmem:[%s3825_s29 + $0x600] sm:$0xff]  ;;  %v416_v33 = vld [vmem:[%s3825_s29 + $0x608] sm:$0xff] }
  0x42   : > { %v418_v34 = vld [vmem:[%s3825_s29 + $0x620] sm:$0xff]  ;;  %415 = vst [vmem:[%s3830_s30 + $0x300] sm:$0xff] %v414_v32  ;;  %417 = vst [vmem:[%s3830_s30 + $0x308] sm:$0xff] %v416_v33  ;;  %v420_v35 = vld [vmem:[%s3825_s29 + $0x628] sm:$0xff] }
  0x43   : > { %419 = vst [vmem:[%s3830_s30 + $0x310] sm:$0xff] %v418_v34  ;;  %v422_v36 = vld [vmem:[%s3825_s29 + $0x640] sm:$0xff]  ;;  %v424_v37 = vld [vmem:[%s3825_s29 + $0x648] sm:$0xff]  ;;  %421 = vst [vmem:[%s3830_s30 + $0x318] sm:$0xff] %v420_v35 }
  0x44   : > { %423 = vst [vmem:[%s3830_s30 + $0x320] sm:$0xff] %v422_v36  ;;  %425 = vst [vmem:[%s3830_s30 + $0x328] sm:$0xff] %v424_v37  ;;  %v426_v38 = vld [vmem:[%s3825_s29 + $0x660] sm:$0xff]  ;;  %v428_v39 = vld [vmem:[%s3825_s29 + $0x668] sm:$0xff] }
  0x45   : > { %v430_v40 = vld [vmem:[%s3825_s29 + $0x680] sm:$0xff]  ;;  %427 = vst [vmem:[%s3830_s30 + $0x330] sm:$0xff] %v426_v38  ;;  %429 = vst [vmem:[%s3830_s30 + $0x338] sm:$0xff] %v428_v39  ;;  %v432_v41 = vld [vmem:[%s3825_s29 + $0x688] sm:$0xff] }
  0x46   : > { %431 = vst [vmem:[%s3830_s30 + $0x340] sm:$0xff] %v430_v40  ;;  %v434_v42 = vld [vmem:[%s3825_s29 + $0x6a0] sm:$0xff]  ;;  %v436_v43 = vld [vmem:[%s3825_s29 + $0x6a8] sm:$0xff]  ;;  %433 = vst [vmem:[%s3830_s30 + $0x348] sm:$0xff] %v432_v41 }
  0x47   : > { %435 = vst [vmem:[%s3830_s30 + $0x350] sm:$0xff] %v434_v42  ;;  %437 = vst [vmem:[%s3830_s30 + $0x358] sm:$0xff] %v436_v43  ;;  %v438_v44 = vld [vmem:[%s3825_s29 + $0x6c0] sm:$0xff]  ;;  %v440_v45 = vld [vmem:[%s3825_s29 + $0x6c8] sm:$0xff] }
  0x48   : > { %v442_v46 = vld [vmem:[%s3825_s29 + $0x6e0] sm:$0xff]  ;;  %439 = vst [vmem:[%s3830_s30 + $0x360] sm:$0xff] %v438_v44  ;;  %441 = vst [vmem:[%s3830_s30 + $0x368] sm:$0xff] %v440_v45  ;;  %v444_v47 = vld [vmem:[%s3825_s29 + $0x6e8] sm:$0xff] }
  0x49   : > { %443 = vst [vmem:[%s3830_s30 + $0x370] sm:$0xff] %v442_v46  ;;  %v446_v48 = vld [vmem:[%s3825_s29 + $0x700] sm:$0xff]  ;;  %v448_v49 = vld [vmem:[%s3825_s29 + $0x708] sm:$0xff]  ;;  %445 = vst [vmem:[%s3830_s30 + $0x378] sm:$0xff] %v444_v47 }
  0x4a   : > { %447 = vst [vmem:[%s3830_s30 + $0x380] sm:$0xff] %v446_v48  ;;  %449 = vst [vmem:[%s3830_s30 + $0x388] sm:$0xff] %v448_v49  ;;  %v450_v50 = vld [vmem:[%s3825_s29 + $0x720] sm:$0xff]  ;;  %v452_v51 = vld [vmem:[%s3825_s29 + $0x728] sm:$0xff] }
  0x4b   : > { %v454_v52 = vld [vmem:[%s3825_s29 + $0x740] sm:$0xff]  ;;  %451 = vst [vmem:[%s3830_s30 + $0x390] sm:$0xff] %v450_v50  ;;  %453 = vst [vmem:[%s3830_s30 + $0x398] sm:$0xff] %v452_v51  ;;  %v456_v53 = vld [vmem:[%s3825_s29 + $0x748] sm:$0xff] }
  0x4c   : > { %455 = vst [vmem:[%s3830_s30 + $0x3a0] sm:$0xff] %v454_v52  ;;  %v458_v54 = vld [vmem:[%s3825_s29 + $0x760] sm:$0xff]  ;;  %v460_v55 = vld [vmem:[%s3825_s29 + $0x768] sm:$0xff]  ;;  %457 = vst [vmem:[%s3830_s30 + $0x3a8] sm:$0xff] %v456_v53 }
  0x4d   : > { %459 = vst [vmem:[%s3830_s30 + $0x3b0] sm:$0xff] %v458_v54  ;;  %461 = vst [vmem:[%s3830_s30 + $0x3b8] sm:$0xff] %v460_v55  ;;  %v462_v56 = vld [vmem:[%s3825_s29 + $0x780] sm:$0xff]  ;;  %v464_v57 = vld [vmem:[%s3825_s29 + $0x788] sm:$0xff] }
  0x4e   : > { %v466_v58 = vld [vmem:[%s3825_s29 + $0x7a0] sm:$0xff]  ;;  %463 = vst [vmem:[%s3830_s30 + $0x3c0] sm:$0xff] %v462_v56  ;;  %465 = vst [vmem:[%s3830_s30 + $0x3c8] sm:$0xff] %v464_v57  ;;  %v468_v59 = vld [vmem:[%s3825_s29 + $0x7a8] sm:$0xff] }
  0x4f   : > { %467 = vst [vmem:[%s3830_s30 + $0x3d0] sm:$0xff] %v466_v58  ;;  %v470_v60 = vld [vmem:[%s3825_s29 + $0x7c0] sm:$0xff]  ;;  %v472_v61 = vld [vmem:[%s3825_s29 + $0x7c8] sm:$0xff]  ;;  %469 = vst [vmem:[%s3830_s30 + $0x3d8] sm:$0xff] %v468_v59 }
  0x50   : > { %471 = vst [vmem:[%s3830_s30 + $0x3e0] sm:$0xff] %v470_v60  ;;  %473 = vst [vmem:[%s3830_s30 + $0x3e8] sm:$0xff] %v472_v61  ;;  %v474_v62 = vld [vmem:[%s3825_s29 + $0x7e0] sm:$0xff]  ;;  %v476_v63 = vld [vmem:[%s3825_s29 + $0x7e8] sm:$0xff] }
  0x51   : > { %v478_v0 = vld [vmem:[%s3825_s29 + $0x800] sm:$0xff]  ;;  %475 = vst [vmem:[%s3830_s30 + $0x3f0] sm:$0xff] %v474_v62  ;;  %477 = vst [vmem:[%s3830_s30 + $0x3f8] sm:$0xff] %v476_v63  ;;  %v480_v1 = vld [vmem:[%s3825_s29 + $0x808] sm:$0xff] }
  0x52   : > { %479 = vst [vmem:[%s3830_s30 + $0x400] sm:$0xff] %v478_v0  ;;  %v482_v2 = vld [vmem:[%s3825_s29 + $0x820] sm:$0xff]  ;;  %v484_v3 = vld [vmem:[%s3825_s29 + $0x828] sm:$0xff]  ;;  %481 = vst [vmem:[%s3830_s30 + $0x408] sm:$0xff] %v480_v1 }
  0x53   : > { %483 = vst [vmem:[%s3830_s30 + $0x410] sm:$0xff] %v482_v2  ;;  %485 = vst [vmem:[%s3830_s30 + $0x418] sm:$0xff] %v484_v3  ;;  %v486_v4 = vld [vmem:[%s3825_s29 + $0x840] sm:$0xff]  ;;  %v488_v5 = vld [vmem:[%s3825_s29 + $0x848] sm:$0xff] }
  0x54   : > { %v490_v6 = vld [vmem:[%s3825_s29 + $0x860] sm:$0xff]  ;;  %487 = vst [vmem:[%s3830_s30 + $0x420] sm:$0xff] %v486_v4  ;;  %489 = vst [vmem:[%s3830_s30 + $0x428] sm:$0xff] %v488_v5  ;;  %v492_v7 = vld [vmem:[%s3825_s29 + $0x868] sm:$0xff] }
  0x55   : > { %491 = vst [vmem:[%s3830_s30 + $0x430] sm:$0xff] %v490_v6  ;;  %v494_v8 = vld [vmem:[%s3825_s29 + $0x880] sm:$0xff]  ;;  %v496_v9 = vld [vmem:[%s3825_s29 + $0x888] sm:$0xff]  ;;  %493 = vst [vmem:[%s3830_s30 + $0x438] sm:$0xff] %v492_v7 }
  0x56   : > { %495 = vst [vmem:[%s3830_s30 + $0x440] sm:$0xff] %v494_v8  ;;  %497 = vst [vmem:[%s3830_s30 + $0x448] sm:$0xff] %v496_v9  ;;  %v498_v10 = vld [vmem:[%s3825_s29 + $0x8a0] sm:$0xff]  ;;  %v500_v11 = vld [vmem:[%s3825_s29 + $0x8a8] sm:$0xff] }
  0x57   : > { %v502_v12 = vld [vmem:[%s3825_s29 + $0x8c0] sm:$0xff]  ;;  %499 = vst [vmem:[%s3830_s30 + $0x450] sm:$0xff] %v498_v10  ;;  %501 = vst [vmem:[%s3830_s30 + $0x458] sm:$0xff] %v500_v11  ;;  %v504_v13 = vld [vmem:[%s3825_s29 + $0x8c8] sm:$0xff] }
  0x58   : > { %503 = vst [vmem:[%s3830_s30 + $0x460] sm:$0xff] %v502_v12  ;;  %v506_v14 = vld [vmem:[%s3825_s29 + $0x8e0] sm:$0xff]  ;;  %v508_v15 = vld [vmem:[%s3825_s29 + $0x8e8] sm:$0xff]  ;;  %505 = vst [vmem:[%s3830_s30 + $0x468] sm:$0xff] %v504_v13 }
  0x59   : > { %507 = vst [vmem:[%s3830_s30 + $0x470] sm:$0xff] %v506_v14  ;;  %509 = vst [vmem:[%s3830_s30 + $0x478] sm:$0xff] %v508_v15  ;;  %v510_v16 = vld [vmem:[%s3825_s29 + $0x900] sm:$0xff]  ;;  %v512_v17 = vld [vmem:[%s3825_s29 + $0x908] sm:$0xff] }
  0x5a   : > { %v514_v18 = vld [vmem:[%s3825_s29 + $0x920] sm:$0xff]  ;;  %511 = vst [vmem:[%s3830_s30 + $0x480] sm:$0xff] %v510_v16  ;;  %513 = vst [vmem:[%s3830_s30 + $0x488] sm:$0xff] %v512_v17  ;;  %v516_v19 = vld [vmem:[%s3825_s29 + $0x928] sm:$0xff] }
  0x5b   : > { %515 = vst [vmem:[%s3830_s30 + $0x490] sm:$0xff] %v514_v18  ;;  %v518_v20 = vld [vmem:[%s3825_s29 + $0x940] sm:$0xff]  ;;  %v520_v21 = vld [vmem:[%s3825_s29 + $0x948] sm:$0xff]  ;;  %517 = vst [vmem:[%s3830_s30 + $0x498] sm:$0xff] %v516_v19 }
  0x5c   : > { %519 = vst [vmem:[%s3830_s30 + $0x4a0] sm:$0xff] %v518_v20  ;;  %521 = vst [vmem:[%s3830_s30 + $0x4a8] sm:$0xff] %v520_v21  ;;  %v522_v22 = vld [vmem:[%s3825_s29 + $0x960] sm:$0xff]  ;;  %v524_v23 = vld [vmem:[%s3825_s29 + $0x968] sm:$0xff] }
  0x5d   : > { %v526_v24 = vld [vmem:[%s3825_s29 + $0x980] sm:$0xff]  ;;  %523 = vst [vmem:[%s3830_s30 + $0x4b0] sm:$0xff] %v522_v22  ;;  %525 = vst [vmem:[%s3830_s30 + $0x4b8] sm:$0xff] %v524_v23  ;;  %v528_v25 = vld [vmem:[%s3825_s29 + $0x988] sm:$0xff] }
  0x5e   : > { %527 = vst [vmem:[%s3830_s30 + $0x4c0] sm:$0xff] %v526_v24  ;;  %v530_v26 = vld [vmem:[%s3825_s29 + $0x9a0] sm:$0xff]  ;;  %v532_v27 = vld [vmem:[%s3825_s29 + $0x9a8] sm:$0xff]  ;;  %529 = vst [vmem:[%s3830_s30 + $0x4c8] sm:$0xff] %v528_v25 }
  0x5f   : > { %531 = vst [vmem:[%s3830_s30 + $0x4d0] sm:$0xff] %v530_v26  ;;  %533 = vst [vmem:[%s3830_s30 + $0x4d8] sm:$0xff] %v532_v27  ;;  %v534_v28 = vld [vmem:[%s3825_s29 + $0x9c0] sm:$0xff]  ;;  %v536_v29 = vld [vmem:[%s3825_s29 + $0x9c8] sm:$0xff] }
  0x60   : > { %v538_v30 = vld [vmem:[%s3825_s29 + $0x9e0] sm:$0xff]  ;;  %535 = vst [vmem:[%s3830_s30 + $0x4e0] sm:$0xff] %v534_v28  ;;  %537 = vst [vmem:[%s3830_s30 + $0x4e8] sm:$0xff] %v536_v29  ;;  %v540_v31 = vld [vmem:[%s3825_s29 + $0x9e8] sm:$0xff] }
  0x61   : > { %539 = vst [vmem:[%s3830_s30 + $0x4f0] sm:$0xff] %v538_v30  ;;  %v542_v32 = vld [vmem:[%s3825_s29 + $0xa00] sm:$0xff]  ;;  %v544_v33 = vld [vmem:[%s3825_s29 + $0xa08] sm:$0xff]  ;;  %541 = vst [vmem:[%s3830_s30 + $0x4f8] sm:$0xff] %v540_v31 }
  0x62   : > { %543 = vst [vmem:[%s3830_s30 + $0x500] sm:$0xff] %v542_v32  ;;  %545 = vst [vmem:[%s3830_s30 + $0x508] sm:$0xff] %v544_v33  ;;  %v546_v34 = vld [vmem:[%s3825_s29 + $0xa20] sm:$0xff]  ;;  %v548_v35 = vld [vmem:[%s3825_s29 + $0xa28] sm:$0xff] }
  0x63   : > { %v550_v36 = vld [vmem:[%s3825_s29 + $0xa40] sm:$0xff]  ;;  %547 = vst [vmem:[%s3830_s30 + $0x510] sm:$0xff] %v546_v34  ;;  %549 = vst [vmem:[%s3830_s30 + $0x518] sm:$0xff] %v548_v35  ;;  %v552_v37 = vld [vmem:[%s3825_s29 + $0xa48] sm:$0xff] }
  0x64   : > { %551 = vst [vmem:[%s3830_s30 + $0x520] sm:$0xff] %v550_v36  ;;  %v554_v38 = vld [vmem:[%s3825_s29 + $0xa60] sm:$0xff]  ;;  %v556_v39 = vld [vmem:[%s3825_s29 + $0xa68] sm:$0xff]  ;;  %553 = vst [vmem:[%s3830_s30 + $0x528] sm:$0xff] %v552_v37 }
  0x65   : > { %555 = vst [vmem:[%s3830_s30 + $0x530] sm:$0xff] %v554_v38  ;;  %557 = vst [vmem:[%s3830_s30 + $0x538] sm:$0xff] %v556_v39  ;;  %v558_v40 = vld [vmem:[%s3825_s29 + $0xa80] sm:$0xff]  ;;  %v560_v41 = vld [vmem:[%s3825_s29 + $0xa88] sm:$0xff] }
  0x66   : > { %v562_v42 = vld [vmem:[%s3825_s29 + $0xaa0] sm:$0xff]  ;;  %559 = vst [vmem:[%s3830_s30 + $0x540] sm:$0xff] %v558_v40  ;;  %561 = vst [vmem:[%s3830_s30 + $0x548] sm:$0xff] %v560_v41  ;;  %v564_v43 = vld [vmem:[%s3825_s29 + $0xaa8] sm:$0xff] }
  0x67   : > { %563 = vst [vmem:[%s3830_s30 + $0x550] sm:$0xff] %v562_v42  ;;  %v566_v44 = vld [vmem:[%s3825_s29 + $0xac0] sm:$0xff]  ;;  %v568_v45 = vld [vmem:[%s3825_s29 + $0xac8] sm:$0xff]  ;;  %565 = vst [vmem:[%s3830_s30 + $0x558] sm:$0xff] %v564_v43 }
  0x68   : > { %567 = vst [vmem:[%s3830_s30 + $0x560] sm:$0xff] %v566_v44  ;;  %569 = vst [vmem:[%s3830_s30 + $0x568] sm:$0xff] %v568_v45  ;;  %v570_v46 = vld [vmem:[%s3825_s29 + $0xae0] sm:$0xff]  ;;  %v572_v47 = vld [vmem:[%s3825_s29 + $0xae8] sm:$0xff] }
  0x69   : > { %v574_v48 = vld [vmem:[%s3825_s29 + $0xb00] sm:$0xff]  ;;  %571 = vst [vmem:[%s3830_s30 + $0x570] sm:$0xff] %v570_v46  ;;  %573 = vst [vmem:[%s3830_s30 + $0x578] sm:$0xff] %v572_v47  ;;  %v576_v49 = vld [vmem:[%s3825_s29 + $0xb08] sm:$0xff] }
  0x6a   : > { %575 = vst [vmem:[%s3830_s30 + $0x580] sm:$0xff] %v574_v48  ;;  %v578_v50 = vld [vmem:[%s3825_s29 + $0xb20] sm:$0xff]  ;;  %v580_v51 = vld [vmem:[%s3825_s29 + $0xb28] sm:$0xff]  ;;  %577 = vst [vmem:[%s3830_s30 + $0x588] sm:$0xff] %v576_v49 }
  0x6b   : > { %579 = vst [vmem:[%s3830_s30 + $0x590] sm:$0xff] %v578_v50  ;;  %581 = vst [vmem:[%s3830_s30 + $0x598] sm:$0xff] %v580_v51  ;;  %v582_v52 = vld [vmem:[%s3825_s29 + $0xb40] sm:$0xff]  ;;  %v584_v53 = vld [vmem:[%s3825_s29 + $0xb48] sm:$0xff] }
  0x6c   : > { %v586_v54 = vld [vmem:[%s3825_s29 + $0xb60] sm:$0xff]  ;;  %583 = vst [vmem:[%s3830_s30 + $0x5a0] sm:$0xff] %v582_v52  ;;  %585 = vst [vmem:[%s3830_s30 + $0x5a8] sm:$0xff] %v584_v53  ;;  %v588_v55 = vld [vmem:[%s3825_s29 + $0xb68] sm:$0xff] }
  0x6d   : > { %587 = vst [vmem:[%s3830_s30 + $0x5b0] sm:$0xff] %v586_v54  ;;  %v590_v56 = vld [vmem:[%s3825_s29 + $0xb80] sm:$0xff]  ;;  %v592_v57 = vld [vmem:[%s3825_s29 + $0xb88] sm:$0xff]  ;;  %589 = vst [vmem:[%s3830_s30 + $0x5b8] sm:$0xff] %v588_v55 }
  0x6e   : > { %591 = vst [vmem:[%s3830_s30 + $0x5c0] sm:$0xff] %v590_v56  ;;  %593 = vst [vmem:[%s3830_s30 + $0x5c8] sm:$0xff] %v592_v57  ;;  %v594_v58 = vld [vmem:[%s3825_s29 + $0xba0] sm:$0xff]  ;;  %v596_v59 = vld [vmem:[%s3825_s29 + $0xba8] sm:$0xff] }
  0x6f   : > { %v598_v60 = vld [vmem:[%s3825_s29 + $0xbc0] sm:$0xff]  ;;  %595 = vst [vmem:[%s3830_s30 + $0x5d0] sm:$0xff] %v594_v58  ;;  %597 = vst [vmem:[%s3830_s30 + $0x5d8] sm:$0xff] %v596_v59  ;;  %v600_v61 = vld [vmem:[%s3825_s29 + $0xbc8] sm:$0xff] }
  0x70   : > { %599 = vst [vmem:[%s3830_s30 + $0x5e0] sm:$0xff] %v598_v60  ;;  %v602_v62 = vld [vmem:[%s3825_s29 + $0xbe0] sm:$0xff]  ;;  %v604_v63 = vld [vmem:[%s3825_s29 + $0xbe8] sm:$0xff]  ;;  %601 = vst [vmem:[%s3830_s30 + $0x5e8] sm:$0xff] %v600_v61 }
  0x71   : > { %603 = vst [vmem:[%s3830_s30 + $0x5f0] sm:$0xff] %v602_v62  ;;  %605 = vst [vmem:[%s3830_s30 + $0x5f8] sm:$0xff] %v604_v63  ;;  %v606_v0 = vld [vmem:[%s3825_s29 + $0xc00] sm:$0xff]  ;;  %v608_v1 = vld [vmem:[%s3825_s29 + $0xc08] sm:$0xff] }
  0x72   : > { %v610_v2 = vld [vmem:[%s3825_s29 + $0xc20] sm:$0xff]  ;;  %607 = vst [vmem:[%s3830_s30 + $0x600] sm:$0xff] %v606_v0  ;;  %609 = vst [vmem:[%s3830_s30 + $0x608] sm:$0xff] %v608_v1  ;;  %v612_v3 = vld [vmem:[%s3825_s29 + $0xc28] sm:$0xff] }
  0x73   : > { %611 = vst [vmem:[%s3830_s30 + $0x610] sm:$0xff] %v610_v2  ;;  %v614_v4 = vld [vmem:[%s3825_s29 + $0xc40] sm:$0xff]  ;;  %v616_v5 = vld [vmem:[%s3825_s29 + $0xc48] sm:$0xff]  ;;  %613 = vst [vmem:[%s3830_s30 + $0x618] sm:$0xff] %v612_v3 }
  0x74   : > { %615 = vst [vmem:[%s3830_s30 + $0x620] sm:$0xff] %v614_v4  ;;  %617 = vst [vmem:[%s3830_s30 + $0x628] sm:$0xff] %v616_v5  ;;  %v618_v6 = vld [vmem:[%s3825_s29 + $0xc60] sm:$0xff]  ;;  %v620_v7 = vld [vmem:[%s3825_s29 + $0xc68] sm:$0xff] }
  0x75   : > { %v622_v8 = vld [vmem:[%s3825_s29 + $0xc80] sm:$0xff]  ;;  %619 = vst [vmem:[%s3830_s30 + $0x630] sm:$0xff] %v618_v6  ;;  %621 = vst [vmem:[%s3830_s30 + $0x638] sm:$0xff] %v620_v7  ;;  %v624_v9 = vld [vmem:[%s3825_s29 + $0xc88] sm:$0xff] }
  0x76   : > { %623 = vst [vmem:[%s3830_s30 + $0x640] sm:$0xff] %v622_v8  ;;  %v626_v10 = vld [vmem:[%s3825_s29 + $0xca0] sm:$0xff]  ;;  %v628_v11 = vld [vmem:[%s3825_s29 + $0xca8] sm:$0xff]  ;;  %625 = vst [vmem:[%s3830_s30 + $0x648] sm:$0xff] %v624_v9 }
  0x77   : > { %627 = vst [vmem:[%s3830_s30 + $0x650] sm:$0xff] %v626_v10  ;;  %629 = vst [vmem:[%s3830_s30 + $0x658] sm:$0xff] %v628_v11  ;;  %v630_v12 = vld [vmem:[%s3825_s29 + $0xcc0] sm:$0xff]  ;;  %v632_v13 = vld [vmem:[%s3825_s29 + $0xcc8] sm:$0xff] }
  0x78   : > { %v634_v14 = vld [vmem:[%s3825_s29 + $0xce0] sm:$0xff]  ;;  %631 = vst [vmem:[%s3830_s30 + $0x660] sm:$0xff] %v630_v12  ;;  %633 = vst [vmem:[%s3830_s30 + $0x668] sm:$0xff] %v632_v13  ;;  %v636_v15 = vld [vmem:[%s3825_s29 + $0xce8] sm:$0xff] }
  0x79   : > { %635 = vst [vmem:[%s3830_s30 + $0x670] sm:$0xff] %v634_v14  ;;  %v638_v16 = vld [vmem:[%s3825_s29 + $0xd00] sm:$0xff]  ;;  %v640_v17 = vld [vmem:[%s3825_s29 + $0xd08] sm:$0xff]  ;;  %637 = vst [vmem:[%s3830_s30 + $0x678] sm:$0xff] %v636_v15 }
  0x7a   : > { %639 = vst [vmem:[%s3830_s30 + $0x680] sm:$0xff] %v638_v16  ;;  %641 = vst [vmem:[%s3830_s30 + $0x688] sm:$0xff] %v640_v17  ;;  %v642_v18 = vld [vmem:[%s3825_s29 + $0xd20] sm:$0xff]  ;;  %v644_v19 = vld [vmem:[%s3825_s29 + $0xd28] sm:$0xff] }
  0x7b   : > { %v646_v20 = vld [vmem:[%s3825_s29 + $0xd40] sm:$0xff]  ;;  %643 = vst [vmem:[%s3830_s30 + $0x690] sm:$0xff] %v642_v18  ;;  %645 = vst [vmem:[%s3830_s30 + $0x698] sm:$0xff] %v644_v19  ;;  %v648_v21 = vld [vmem:[%s3825_s29 + $0xd48] sm:$0xff] }
  0x7c   : > { %647 = vst [vmem:[%s3830_s30 + $0x6a0] sm:$0xff] %v646_v20  ;;  %v650_v22 = vld [vmem:[%s3825_s29 + $0xd60] sm:$0xff]  ;;  %v652_v23 = vld [vmem:[%s3825_s29 + $0xd68] sm:$0xff]  ;;  %649 = vst [vmem:[%s3830_s30 + $0x6a8] sm:$0xff] %v648_v21 }
  0x7d   : > { %651 = vst [vmem:[%s3830_s30 + $0x6b0] sm:$0xff] %v650_v22  ;;  %653 = vst [vmem:[%s3830_s30 + $0x6b8] sm:$0xff] %v652_v23  ;;  %v654_v24 = vld [vmem:[%s3825_s29 + $0xd80] sm:$0xff]  ;;  %v656_v25 = vld [vmem:[%s3825_s29 + $0xd88] sm:$0xff] }
  0x7e   : > { %v658_v26 = vld [vmem:[%s3825_s29 + $0xda0] sm:$0xff]  ;;  %655 = vst [vmem:[%s3830_s30 + $0x6c0] sm:$0xff] %v654_v24  ;;  %657 = vst [vmem:[%s3830_s30 + $0x6c8] sm:$0xff] %v656_v25  ;;  %v660_v27 = vld [vmem:[%s3825_s29 + $0xda8] sm:$0xff] }
  0x7f   : > { %659 = vst [vmem:[%s3830_s30 + $0x6d0] sm:$0xff] %v658_v26  ;;  %v662_v28 = vld [vmem:[%s3825_s29 + $0xdc0] sm:$0xff]  ;;  %v664_v29 = vld [vmem:[%s3825_s29 + $0xdc8] sm:$0xff]  ;;  %661 = vst [vmem:[%s3830_s30 + $0x6d8] sm:$0xff] %v660_v27 }
  0x80   : > { %663 = vst [vmem:[%s3830_s30 + $0x6e0] sm:$0xff] %v662_v28  ;;  %665 = vst [vmem:[%s3830_s30 + $0x6e8] sm:$0xff] %v664_v29  ;;  %v666_v30 = vld [vmem:[%s3825_s29 + $0xde0] sm:$0xff]  ;;  %v668_v31 = vld [vmem:[%s3825_s29 + $0xde8] sm:$0xff] }
  0x81   : > { %v670_v32 = vld [vmem:[%s3825_s29 + $0xe00] sm:$0xff]  ;;  %667 = vst [vmem:[%s3830_s30 + $0x6f0] sm:$0xff] %v666_v30  ;;  %669 = vst [vmem:[%s3830_s30 + $0x6f8] sm:$0xff] %v668_v31  ;;  %v672_v33 = vld [vmem:[%s3825_s29 + $0xe08] sm:$0xff] }
  0x82   : > { %671 = vst [vmem:[%s3830_s30 + $0x700] sm:$0xff] %v670_v32  ;;  %v674_v34 = vld [vmem:[%s3825_s29 + $0xe20] sm:$0xff]  ;;  %v676_v35 = vld [vmem:[%s3825_s29 + $0xe28] sm:$0xff]  ;;  %673 = vst [vmem:[%s3830_s30 + $0x708] sm:$0xff] %v672_v33 }
  0x83   : > { %675 = vst [vmem:[%s3830_s30 + $0x710] sm:$0xff] %v674_v34  ;;  %677 = vst [vmem:[%s3830_s30 + $0x718] sm:$0xff] %v676_v35  ;;  %v678_v36 = vld [vmem:[%s3825_s29 + $0xe40] sm:$0xff]  ;;  %v680_v37 = vld [vmem:[%s3825_s29 + $0xe48] sm:$0xff] }
  0x84   : > { %v682_v38 = vld [vmem:[%s3825_s29 + $0xe60] sm:$0xff]  ;;  %679 = vst [vmem:[%s3830_s30 + $0x720] sm:$0xff] %v678_v36  ;;  %681 = vst [vmem:[%s3830_s30 + $0x728] sm:$0xff] %v680_v37  ;;  %v684_v39 = vld [vmem:[%s3825_s29 + $0xe68] sm:$0xff] }
  0x85   : > { %683 = vst [vmem:[%s3830_s30 + $0x730] sm:$0xff] %v682_v38  ;;  %v686_v40 = vld [vmem:[%s3825_s29 + $0xe80] sm:$0xff]  ;;  %v688_v41 = vld [vmem:[%s3825_s29 + $0xe88] sm:$0xff]  ;;  %685 = vst [vmem:[%s3830_s30 + $0x738] sm:$0xff] %v684_v39 }
  0x86   : > { %687 = vst [vmem:[%s3830_s30 + $0x740] sm:$0xff] %v686_v40  ;;  %689 = vst [vmem:[%s3830_s30 + $0x748] sm:$0xff] %v688_v41  ;;  %v690_v42 = vld [vmem:[%s3825_s29 + $0xea0] sm:$0xff]  ;;  %v692_v43 = vld [vmem:[%s3825_s29 + $0xea8] sm:$0xff] }
  0x87   : > { %v694_v44 = vld [vmem:[%s3825_s29 + $0xec0] sm:$0xff]  ;;  %691 = vst [vmem:[%s3830_s30 + $0x750] sm:$0xff] %v690_v42  ;;  %693 = vst [vmem:[%s3830_s30 + $0x758] sm:$0xff] %v692_v43  ;;  %v696_v45 = vld [vmem:[%s3825_s29 + $0xec8] sm:$0xff] }
  0x88   : > { %695 = vst [vmem:[%s3830_s30 + $0x760] sm:$0xff] %v694_v44  ;;  %v698_v46 = vld [vmem:[%s3825_s29 + $0xee0] sm:$0xff]  ;;  %v700_v47 = vld [vmem:[%s3825_s29 + $0xee8] sm:$0xff]  ;;  %697 = vst [vmem:[%s3830_s30 + $0x768] sm:$0xff] %v696_v45 }
  0x89   : > { %699 = vst [vmem:[%s3830_s30 + $0x770] sm:$0xff] %v698_v46  ;;  %701 = vst [vmem:[%s3830_s30 + $0x778] sm:$0xff] %v700_v47  ;;  %v702_v48 = vld [vmem:[%s3825_s29 + $0xf00] sm:$0xff]  ;;  %v704_v49 = vld [vmem:[%s3825_s29 + $0xf08] sm:$0xff] }
  0x8a   : > { %v706_v50 = vld [vmem:[%s3825_s29 + $0xf20] sm:$0xff]  ;;  %703 = vst [vmem:[%s3830_s30 + $0x780] sm:$0xff] %v702_v48  ;;  %705 = vst [vmem:[%s3830_s30 + $0x788] sm:$0xff] %v704_v49  ;;  %v708_v51 = vld [vmem:[%s3825_s29 + $0xf28] sm:$0xff] }
  0x8b   : > { %707 = vst [vmem:[%s3830_s30 + $0x790] sm:$0xff] %v706_v50  ;;  %v710_v52 = vld [vmem:[%s3825_s29 + $0xf40] sm:$0xff]  ;;  %v712_v53 = vld [vmem:[%s3825_s29 + $0xf48] sm:$0xff]  ;;  %709 = vst [vmem:[%s3830_s30 + $0x798] sm:$0xff] %v708_v51 }
  0x8c   : > { %711 = vst [vmem:[%s3830_s30 + $0x7a0] sm:$0xff] %v710_v52  ;;  %713 = vst [vmem:[%s3830_s30 + $0x7a8] sm:$0xff] %v712_v53  ;;  %v714_v54 = vld [vmem:[%s3825_s29 + $0xf60] sm:$0xff]  ;;  %v716_v55 = vld [vmem:[%s3825_s29 + $0xf68] sm:$0xff] }
  0x8d   : > { %v718_v56 = vld [vmem:[%s3825_s29 + $0xf80] sm:$0xff]  ;;  %715 = vst [vmem:[%s3830_s30 + $0x7b0] sm:$0xff] %v714_v54  ;;  %717 = vst [vmem:[%s3830_s30 + $0x7b8] sm:$0xff] %v716_v55  ;;  %v720_v57 = vld [vmem:[%s3825_s29 + $0xf88] sm:$0xff] }
  0x8e   : > { %719 = vst [vmem:[%s3830_s30 + $0x7c0] sm:$0xff] %v718_v56  ;;  %v722_v58 = vld [vmem:[%s3825_s29 + $0xfa0] sm:$0xff]  ;;  %v724_v59 = vld [vmem:[%s3825_s29 + $0xfa8] sm:$0xff]  ;;  %721 = vst [vmem:[%s3830_s30 + $0x7c8] sm:$0xff] %v720_v57 }
  0x8f   : > { %723 = vst [vmem:[%s3830_s30 + $0x7d0] sm:$0xff] %v722_v58  ;;  %725 = vst [vmem:[%s3830_s30 + $0x7d8] sm:$0xff] %v724_v59  ;;  %v726_v60 = vld [vmem:[%s3825_s29 + $0xfc0] sm:$0xff]  ;;  %v728_v61 = vld [vmem:[%s3825_s29 + $0xfc8] sm:$0xff] }
  0x90   : > { %v730_v62 = vld [vmem:[%s3825_s29 + $0xfe0] sm:$0xff]  ;;  %727 = vst [vmem:[%s3830_s30 + $0x7e0] sm:$0xff] %v726_v60  ;;  %729 = vst [vmem:[%s3830_s30 + $0x7e8] sm:$0xff] %v728_v61  ;;  %v732_v63 = vld [vmem:[%s3825_s29 + $0xfe8] sm:$0xff] }
  0x91   : > { %731 = vst [vmem:[%s3830_s30 + $0x7f0] sm:$0xff] %v730_v62  ;;  %733 = vst [vmem:[%s3830_s30 + $0x7f8] sm:$0xff] %v732_v63 }
  0x92 PF: > { %p2984_p6 = scmp.ge.s32.totalorder %s3755_s19, 1  ;;  %p754_p7 = scmp.lt.s32.totalorder %s3755_s19, 3 }
  0x94   : > { %p755_p8 = pnand %p2984_p6, %p754_p7 }
  0x95   : > { %s761_s5 = sand.u32 (!%p755_p8), 1, %s3739_s15   ;;  %v4347_v0 = vld [vmem:[%s4668_s0] sm:$0xff] (!%p755_p8)  ;;  %s2986_s21 = sshll.u32 (!%p755_p8), %s3747_s17, 2 }
  0x96   : > { %758 = sbr.rel (%p755_p8) target bundleno = 632 (0x278), region = 55  ;;  %s2985_s8 = sshll.u32 (!%p755_p8), %s761_s5, 11  ;;  %v2991_v1 = vcombine.high (!%p755_p8), %v4347_v0, %v4347_v0 }
  0x97   : > { %s4351_s9 = scalar_lea.vmem (!%p755_p8), [#allocation3], %s2985_s8  ;;  %p820_p9 = scmp.lt.s32.totalorder (!%p755_p8), %s2986_s21, 7 }
  0x98   : > { %v3325_v2 = vld [vmem:[%s4351_s9 + $0x4] ss:$16 sps:$4 sm:$0xff] (!%p755_p8)   ;;  %2451 = vmatprep.mubr.bf16.mxu0 (!%p755_p8), %v2991_v1  ;;  %2615 = vmatprep.mubr.bf16.mxu1 (!%p755_p8), %v2991_v1  ;;  %v3327_v3 = vld [vmem:[%s4351_s9 + $0xc] ss:$16 sps:$4 sm:$0xff] (!%p755_p8)   ;;  %v3329_v4 = vld [vmem:[%s4351_s9] ss:$16 sps:$4 sm:$0xff] (!%p755_p8)  }
  0x99   : > { %2419 = vmatprep.subr.bf16.mxu0 (!%p755_p8), %v3325_v2  ;;  %v3330_v5 = vld [vmem:[%s4351_s9 + $0x8] ss:$16 sps:$4 sm:$0xff] (!%p755_p8)   ;;  %2583 = vmatprep.subr.bf16.mxu1 (!%p755_p8), %v3327_v3  ;;  %v3331_v6 = vld [vmem:[%s4351_s9 + $0x24] ss:$16 sps:$4 sm:$0xff] (!%p755_p8)   ;;  %v3333_v7 = vld [vmem:[%s4351_s9 + $0x2c] ss:$16 sps:$4 sm:$0xff] (!%p755_p8)  }
  0x9a   : > { %2420 = vmatpush1.bf16.msra.mxu0 (!%p755_p8), %v3329_v4  ;;  %2584 = vmatpush1.bf16.msra.mxu1 (!%p755_p8), %v3330_v5  ;;  %v3335_v8 = vld [vmem:[%s4351_s9 + $0x20] ss:$16 sps:$4 sm:$0xff] (!%p755_p8)   ;;  %v3336_v9 = vld [vmem:[%s4351_s9 + $0x28] ss:$16 sps:$4 sm:$0xff] (!%p755_p8)   ;;  %v3337_v10 = vld [vmem:[%s4351_s9 + $0x44] ss:$16 sps:$4 sm:$0xff] (!%p755_p8)   ;;  %v2990_v5 = vcombine.low (!%p755_p8), %v4347_v0, %v4347_v0 }
  0x9b   : > { %2421 = vmatprep.subr.bf16.mxu0 (!%p755_p8), %v3331_v6  ;;  %2585 = vmatprep.subr.bf16.mxu1 (!%p755_p8), %v3333_v7  ;;  %v3339_v11 = vld [vmem:[%s4351_s9 + $0x4c] ss:$16 sps:$4 sm:$0xff] (!%p755_p8)   ;;  %v3341_v12 = vld [vmem:[%s4351_s9 + $0x40] ss:$16 sps:$4 sm:$0xff] (!%p755_p8)   ;;  %v3342_v13 = vld [vmem:[%s4351_s9 + $0x48] ss:$16 sps:$4 sm:$0xff] (!%p755_p8)  }
  0x9c   : > { %v3343_v14 = vld [vmem:[%s4351_s9 + $0x64] ss:$16 sps:$4 sm:$0xff] (!%p755_p8)   ;;  %v3345_v15 = vld [vmem:[%s4351_s9 + $0x6c] ss:$16 sps:$4 sm:$0xff] (!%p755_p8)   ;;  %v3347_v16 = vld [vmem:[%s4351_s9 + $0x60] ss:$16 sps:$4 sm:$0xff] (!%p755_p8)  }
  0x9d   : > { %v3348_v17 = vld [vmem:[%s4351_s9 + $0x68] ss:$16 sps:$4 sm:$0xff]   ;;  %v3349_v18 = vld [vmem:[%s4351_s9 + $0x84] ss:$16 sps:$4 sm:$0xff]   ;;  %v3351_v19 = vld [vmem:[%s4351_s9 + $0x8c] ss:$16 sps:$4 sm:$0xff]  }
  0x9e   : > { %2422 = vmatpush1.bf16.msra.mxu0 %v3335_v8  ;;  %2586 = vmatpush1.bf16.msra.mxu1 %v3336_v9  ;;  %v3353_v20 = vld [vmem:[%s4351_s9 + $0x80] ss:$16 sps:$4 sm:$0xff]   ;;  %v3354_v21 = vld [vmem:[%s4351_s9 + $0x88] ss:$16 sps:$4 sm:$0xff]   ;;  %v3355_v22 = vld [vmem:[%s4351_s9 + $0xa4] ss:$16 sps:$4 sm:$0xff]  }
  0x9f   : > { %2423 = vmatprep.subr.bf16.mxu0 %v3337_v10  ;;  %2587 = vmatprep.subr.bf16.mxu1 %v3339_v11  ;;  %v3357_v23 = vld [vmem:[%s4351_s9 + $0xac] ss:$16 sps:$4 sm:$0xff]   ;;  %v3359_v24 = vld [vmem:[%s4351_s9 + $0xa0] ss:$16 sps:$4 sm:$0xff]   ;;  %v3360_v25 = vld [vmem:[%s4351_s9 + $0xa8] ss:$16 sps:$4 sm:$0xff]  }
  0xa0   : > { %v3361_v26 = vld [vmem:[%s4351_s9 + $0xc4] ss:$16 sps:$4 sm:$0xff]   ;;  %v3363_v27 = vld [vmem:[%s4351_s9 + $0xcc] ss:$16 sps:$4 sm:$0xff]   ;;  %v3365_v28 = vld [vmem:[%s4351_s9 + $0xc0] ss:$16 sps:$4 sm:$0xff]  }
  0xa1   : > { %v3366_v29 = vld [vmem:[%s4351_s9 + $0xc8] ss:$16 sps:$4 sm:$0xff]   ;;  %v3367_v30 = vld [vmem:[%s4351_s9 + $0xe4] ss:$16 sps:$4 sm:$0xff]   ;;  %v3369_v31 = vld [vmem:[%s4351_s9 + $0xec] ss:$16 sps:$4 sm:$0xff]  }
  0xa2   : > { %2424 = vmatpush1.bf16.msra.mxu0 %v3341_v12  ;;  %2588 = vmatpush1.bf16.msra.mxu1 %v3342_v13  ;;  %v3371_v32 = vld [vmem:[%s4351_s9 + $0xe0] ss:$16 sps:$4 sm:$0xff]   ;;  %v3372_v33 = vld [vmem:[%s4351_s9 + $0xe8] ss:$16 sps:$4 sm:$0xff]   ;;  %v3373_v34 = vld [vmem:[%s4351_s9 + $0x104] ss:$16 sps:$4 sm:$0xff]  }
  0xa3   : > { %2425 = vmatprep.subr.bf16.mxu0 %v3343_v14  ;;  %2589 = vmatprep.subr.bf16.mxu1 %v3345_v15  ;;  %v3375_v35 = vld [vmem:[%s4351_s9 + $0x10c] ss:$16 sps:$4 sm:$0xff]   ;;  %v3377_v36 = vld [vmem:[%s4351_s9 + $0x100] ss:$16 sps:$4 sm:$0xff]   ;;  %v3378_v37 = vld [vmem:[%s4351_s9 + $0x108] ss:$16 sps:$4 sm:$0xff]  }
  0xa4   : > { %v3379_v38 = vld [vmem:[%s4351_s9 + $0x124] ss:$16 sps:$4 sm:$0xff]   ;;  %v3381_v39 = vld [vmem:[%s4351_s9 + $0x12c] ss:$16 sps:$4 sm:$0xff]   ;;  %v3383_v40 = vld [vmem:[%s4351_s9 + $0x120] ss:$16 sps:$4 sm:$0xff]  }
  0xa5   : > { %v3384_v41 = vld [vmem:[%s4351_s9 + $0x128] ss:$16 sps:$4 sm:$0xff]   ;;  %v3385_v42 = vld [vmem:[%s4351_s9 + $0x144] ss:$16 sps:$4 sm:$0xff]   ;;  %v3387_v43 = vld [vmem:[%s4351_s9 + $0x14c] ss:$16 sps:$4 sm:$0xff]  }
  0xa6   : > { %2426 = vmatpush1.bf16.msra.mxu0 %v3347_v16  ;;  %2590 = vmatpush1.bf16.msra.mxu1 %v3348_v17  ;;  %v3389_v44 = vld [vmem:[%s4351_s9 + $0x140] ss:$16 sps:$4 sm:$0xff]   ;;  %v3390_v45 = vld [vmem:[%s4351_s9 + $0x148] ss:$16 sps:$4 sm:$0xff]   ;;  %v3391_v46 = vld [vmem:[%s4351_s9 + $0x164] ss:$16 sps:$4 sm:$0xff]  }
  0xa7   : > { %2427 = vmatprep.subr.bf16.mxu0 %v3349_v18  ;;  %2591 = vmatprep.subr.bf16.mxu1 %v3351_v19  ;;  %v3393_v47 = vld [vmem:[%s4351_s9 + $0x16c] ss:$16 sps:$4 sm:$0xff]   ;;  %v3395_v48 = vld [vmem:[%s4351_s9 + $0x160] ss:$16 sps:$4 sm:$0xff]   ;;  %v3396_v49 = vld [vmem:[%s4351_s9 + $0x168] ss:$16 sps:$4 sm:$0xff]  }
  0xa8   : > { %v3397_v50 = vld [vmem:[%s4351_s9 + $0x184] ss:$16 sps:$4 sm:$0xff]   ;;  %v3399_v51 = vld [vmem:[%s4351_s9 + $0x18c] ss:$16 sps:$4 sm:$0xff]   ;;  %v3401_v52 = vld [vmem:[%s4351_s9 + $0x180] ss:$16 sps:$4 sm:$0xff]  }
  0xa9   : > { %v3402_v53 = vld [vmem:[%s4351_s9 + $0x188] ss:$16 sps:$4 sm:$0xff]   ;;  %v3403_v54 = vld [vmem:[%s4351_s9 + $0x1a4] ss:$16 sps:$4 sm:$0xff]   ;;  %v3405_v55 = vld [vmem:[%s4351_s9 + $0x1ac] ss:$16 sps:$4 sm:$0xff]  }
  0xaa   : > { %2428 = vmatpush1.bf16.msra.mxu0 %v3353_v20  ;;  %2592 = vmatpush1.bf16.msra.mxu1 %v3354_v21  ;;  %v3407_v56 = vld [vmem:[%s4351_s9 + $0x1a0] ss:$16 sps:$4 sm:$0xff]   ;;  %v3408_v57 = vld [vmem:[%s4351_s9 + $0x1a8] ss:$16 sps:$4 sm:$0xff]   ;;  %v3409_v58 = vld [vmem:[%s4351_s9 + $0x1c4] ss:$16 sps:$4 sm:$0xff]  }
  0xab   : > { %2429 = vmatprep.subr.bf16.mxu0 %v3355_v22  ;;  %2593 = vmatprep.subr.bf16.mxu1 %v3357_v23  ;;  %v3411_v59 = vld [vmem:[%s4351_s9 + $0x1cc] ss:$16 sps:$4 sm:$0xff]   ;;  %v3413_v60 = vld [vmem:[%s4351_s9 + $0x1c0] ss:$16 sps:$4 sm:$0xff]   ;;  %v3414_v61 = vld [vmem:[%s4351_s9 + $0x1c8] ss:$16 sps:$4 sm:$0xff]  }
  0xac   : > { %v3415_v62 = vld [vmem:[%s4351_s9 + $0x1e4] ss:$16 sps:$4 sm:$0xff]   ;;  %v3417_v63 = vld [vmem:[%s4351_s9 + $0x1ec] ss:$16 sps:$4 sm:$0xff]   ;;  %v3419_v1 = vld [vmem:[%s4351_s9 + $0x1e0] ss:$16 sps:$4 sm:$0xff]  }
  0xad   : > { %v3420_v2 = vld [vmem:[%s4351_s9 + $0x1e8] ss:$16 sps:$4 sm:$0xff]   ;;  %v3425_v3 = vld [vmem:[%s4351_s9 + $0x204] ss:$16 sps:$4 sm:$0xff]   ;;  %v3428_v4 = vld [vmem:[%s4351_s9 + $0x20c] ss:$16 sps:$4 sm:$0xff]  }
  0xae   : > { %2430 = vmatpush1.bf16.msra.mxu0 %v3359_v24  ;;  %2594 = vmatpush1.bf16.msra.mxu1 %v3360_v25  ;;  %v3423_v6 = vld [vmem:[%s4351_s9 + $0x200] ss:$16 sps:$4 sm:$0xff]   ;;  %v3426_v7 = vld [vmem:[%s4351_s9 + $0x208] ss:$16 sps:$4 sm:$0xff]   ;;  %v3431_v8 = vld [vmem:[%s4351_s9 + $0x224] ss:$16 sps:$4 sm:$0xff]  }
  0xaf   : > { %2431 = vmatprep.subr.bf16.mxu0 %v3361_v26  ;;  %2595 = vmatprep.subr.bf16.mxu1 %v3363_v27  ;;  %v3434_v9 = vld [vmem:[%s4351_s9 + $0x22c] ss:$16 sps:$4 sm:$0xff]   ;;  %v3429_v10 = vld [vmem:[%s4351_s9 + $0x220] ss:$16 sps:$4 sm:$0xff]   ;;  %v3432_v11 = vld [vmem:[%s4351_s9 + $0x228] ss:$16 sps:$4 sm:$0xff]  }
  0xb0   : > { %v3437_v0 = vld [vmem:[%s4351_s9 + $0x244] ss:$16 sps:$4 sm:$0xff]   ;;  %v3440_v12 = vld [vmem:[%s4351_s9 + $0x24c] ss:$16 sps:$4 sm:$0xff]   ;;  %v3435_v13 = vld [vmem:[%s4351_s9 + $0x240] ss:$16 sps:$4 sm:$0xff]  }
  0xb1   : > { %v3438_v14 = vld [vmem:[%s4351_s9 + $0x248] ss:$16 sps:$4 sm:$0xff]   ;;  %v3443_v15 = vld [vmem:[%s4351_s9 + $0x264] ss:$16 sps:$4 sm:$0xff]   ;;  %v3446_v16 = vld [vmem:[%s4351_s9 + $0x26c] ss:$16 sps:$4 sm:$0xff]  }
  0xb2   : > { %2432 = vmatpush1.bf16.msra.mxu0 %v3365_v28  ;;  %2596 = vmatpush1.bf16.msra.mxu1 %v3366_v29  ;;  %v3441_v17 = vld [vmem:[%s4351_s9 + $0x260] ss:$16 sps:$4 sm:$0xff]   ;;  %v3444_v18 = vld [vmem:[%s4351_s9 + $0x268] ss:$16 sps:$4 sm:$0xff]   ;;  %v3449_v19 = vld [vmem:[%s4351_s9 + $0x284] ss:$16 sps:$4 sm:$0xff]  }
  0xb3   : > { %2433 = vmatprep.subr.bf16.mxu0 %v3367_v30  ;;  %2597 = vmatprep.subr.bf16.mxu1 %v3369_v31  ;;  %v3452_v20 = vld [vmem:[%s4351_s9 + $0x28c] ss:$16 sps:$4 sm:$0xff]   ;;  %v3447_v21 = vld [vmem:[%s4351_s9 + $0x280] ss:$16 sps:$4 sm:$0xff]   ;;  %v3450_v22 = vld [vmem:[%s4351_s9 + $0x288] ss:$16 sps:$4 sm:$0xff]  }
  0xb4   : > { %v3455_v23 = vld [vmem:[%s4351_s9 + $0x2a4] ss:$16 sps:$4 sm:$0xff]   ;;  %v3458_v24 = vld [vmem:[%s4351_s9 + $0x2ac] ss:$16 sps:$4 sm:$0xff]   ;;  %v3453_v25 = vld [vmem:[%s4351_s9 + $0x2a0] ss:$16 sps:$4 sm:$0xff]  }
  0xb5   : > { %v3456_v26 = vld [vmem:[%s4351_s9 + $0x2a8] ss:$16 sps:$4 sm:$0xff]   ;;  %v3461_v27 = vld [vmem:[%s4351_s9 + $0x2c4] ss:$16 sps:$4 sm:$0xff]   ;;  %v3464_v28 = vld [vmem:[%s4351_s9 + $0x2cc] ss:$16 sps:$4 sm:$0xff]  }
  0xb6   : > { %2434 = vmatpush1.bf16.msra.mxu0 %v3371_v32  ;;  %2598 = vmatpush1.bf16.msra.mxu1 %v3372_v33  ;;  %v4448_v29 = vld [vmem:[%s4668_s0 + $0x8] sm:$0xff]  ;;  %v3459_v31 = vld [vmem:[%s4351_s9 + $0x2c0] ss:$16 sps:$4 sm:$0xff]   ;;  %v3467_v33 = vld [vmem:[%s4351_s9 + $0x2e4] ss:$16 sps:$4 sm:$0xff]   ;;  %s4680_s21 = smov (!%p820_p9, %s2986_s21), 7 }
  0xb7   : > { %2435 = vmatprep.subr.bf16.mxu0 %v3373_v34  ;;  %2599 = vmatprep.subr.bf16.mxu1 %v3375_v35  ;;  %v2993_v30 = vcombine.high %v4448_v29, %v4448_v29  ;;  %v3462_v32 = vld [vmem:[%s4351_s9 + $0x2c8] ss:$16 sps:$4 sm:$0xff]   ;;  %v3470_v34 = vld [vmem:[%s4351_s9 + $0x2ec] ss:$16 sps:$4 sm:$0xff]   ;;  %v3465_v35 = vld [vmem:[%s4351_s9 + $0x2e0] ss:$16 sps:$4 sm:$0xff]   ;;  %s822_s25 = scalar_lea.vmem %s4670_s2, %s4680_s21  ;;  %s827_s28 = scalar_lea.vmem %s4671_s3, %s4680_s21 }
  0xb8   : > { %s2989_s17 = sshll.u32 %s4680_s21, 2 }
  0xb9   : > { %s837_s5 = scalar_lea.vmem %s4672_s4, %s2989_s17 }
  0xba   : > { %2436 = vmatpush1.bf16.msra.mxu0 %v3377_v36  ;;  %2600 = vmatpush1.bf16.msra.mxu1 %v3378_v37  ;;  %v3468_v36 = vld [vmem:[%s4351_s9 + $0x2e8] ss:$16 sps:$4 sm:$0xff]   ;;  %v3473_v37 = vld [vmem:[%s4351_s9 + $0x304] ss:$16 sps:$4 sm:$0xff]  }
  0xbb   : > { %2437 = vmatprep.subr.bf16.mxu0 %v3379_v38  ;;  %2601 = vmatprep.subr.bf16.mxu1 %v3381_v39  ;;  %v3476_v38 = vld [vmem:[%s4351_s9 + $0x30c] ss:$16 sps:$4 sm:$0xff]   ;;  %v3471_v39 = vld [vmem:[%s4351_s9 + $0x300] ss:$16 sps:$4 sm:$0xff]  }
  0xbe   : > { %2438 = vmatpush1.bf16.msra.mxu0 %v3383_v40  ;;  %2602 = vmatpush1.bf16.msra.mxu1 %v3384_v41  ;;  %v3474_v40 = vld [vmem:[%s4351_s9 + $0x308] ss:$16 sps:$4 sm:$0xff]   ;;  %v3479_v41 = vld [vmem:[%s4351_s9 + $0x324] ss:$16 sps:$4 sm:$0xff]  }
  0xbf   : > { %2439 = vmatprep.subr.bf16.mxu0 %v3385_v42  ;;  %2603 = vmatprep.subr.bf16.mxu1 %v3387_v43  ;;  %v3482_v42 = vld [vmem:[%s4351_s9 + $0x32c] ss:$16 sps:$4 sm:$0xff]   ;;  %v3477_v43 = vld [vmem:[%s4351_s9 + $0x320] ss:$16 sps:$4 sm:$0xff]  }
  0xc2   : > { %2440 = vmatpush1.bf16.msra.mxu0 %v3389_v44  ;;  %2604 = vmatpush1.bf16.msra.mxu1 %v3390_v45  ;;  %v3480_v44 = vld [vmem:[%s4351_s9 + $0x328] ss:$16 sps:$4 sm:$0xff]   ;;  %v3485_v45 = vld [vmem:[%s4351_s9 + $0x344] ss:$16 sps:$4 sm:$0xff]  }
  0xc3   : > { %2441 = vmatprep.subr.bf16.mxu0 %v3391_v46  ;;  %2605 = vmatprep.subr.bf16.mxu1 %v3393_v47  ;;  %v3488_v46 = vld [vmem:[%s4351_s9 + $0x34c] ss:$16 sps:$4 sm:$0xff]   ;;  %v3483_v47 = vld [vmem:[%s4351_s9 + $0x340] ss:$16 sps:$4 sm:$0xff]  }
  0xc6   : > { %2442 = vmatpush1.bf16.msra.mxu0 %v3395_v48  ;;  %2606 = vmatpush1.bf16.msra.mxu1 %v3396_v49  ;;  %v3486_v48 = vld [vmem:[%s4351_s9 + $0x348] ss:$16 sps:$4 sm:$0xff]   ;;  %v3491_v49 = vld [vmem:[%s4351_s9 + $0x364] ss:$16 sps:$4 sm:$0xff]  }
  0xc7   : > { %2443 = vmatprep.subr.bf16.mxu0 %v3397_v50  ;;  %2607 = vmatprep.subr.bf16.mxu1 %v3399_v51  ;;  %v3494_v50 = vld [vmem:[%s4351_s9 + $0x36c] ss:$16 sps:$4 sm:$0xff]   ;;  %v3489_v51 = vld [vmem:[%s4351_s9 + $0x360] ss:$16 sps:$4 sm:$0xff]  }
  0xca   : > { %2444 = vmatpush1.bf16.msra.mxu0 %v3401_v52  ;;  %2608 = vmatpush1.bf16.msra.mxu1 %v3402_v53  ;;  %v3492_v52 = vld [vmem:[%s4351_s9 + $0x368] ss:$16 sps:$4 sm:$0xff]   ;;  %v3497_v53 = vld [vmem:[%s4351_s9 + $0x384] ss:$16 sps:$4 sm:$0xff]  }
  0xcb   : > { %2445 = vmatprep.subr.bf16.mxu0 %v3403_v54  ;;  %2609 = vmatprep.subr.bf16.mxu1 %v3405_v55  ;;  %v3500_v54 = vld [vmem:[%s4351_s9 + $0x38c] ss:$16 sps:$4 sm:$0xff]   ;;  %v3495_v55 = vld [vmem:[%s4351_s9 + $0x380] ss:$16 sps:$4 sm:$0xff]  }
  0xce   : > { %2446 = vmatpush1.bf16.msra.mxu0 %v3407_v56  ;;  %2610 = vmatpush1.bf16.msra.mxu1 %v3408_v57  ;;  %v3498_v56 = vld [vmem:[%s4351_s9 + $0x388] ss:$16 sps:$4 sm:$0xff]   ;;  %v3503_v57 = vld [vmem:[%s4351_s9 + $0x3a4] ss:$16 sps:$4 sm:$0xff]  }
  0xcf   : > { %2447 = vmatprep.subr.bf16.mxu0 %v3409_v58  ;;  %2611 = vmatprep.subr.bf16.mxu1 %v3411_v59  ;;  %v3506_v58 = vld [vmem:[%s4351_s9 + $0x3ac] ss:$16 sps:$4 sm:$0xff]   ;;  %v3501_v59 = vld [vmem:[%s4351_s9 + $0x3a0] ss:$16 sps:$4 sm:$0xff]  }
  0xd2   : > { %2448 = vmatpush1.bf16.msra.mxu0 %v3413_v60  ;;  %2612 = vmatpush1.bf16.msra.mxu1 %v3414_v61  ;;  %v3504_v60 = vld [vmem:[%s4351_s9 + $0x3a8] ss:$16 sps:$4 sm:$0xff]   ;;  %v3509_v61 = vld [vmem:[%s4351_s9 + $0x3c4] ss:$16 sps:$4 sm:$0xff]  }
  0xd3   : > { %2449 = vmatprep.subr.bf16.mxu0 %v3415_v62  ;;  %2613 = vmatprep.subr.bf16.mxu1 %v3417_v63  ;;  %v3512_v62 = vld [vmem:[%s4351_s9 + $0x3cc] ss:$16 sps:$4 sm:$0xff]   ;;  %v3507_v63 = vld [vmem:[%s4351_s9 + $0x3c0] ss:$16 sps:$4 sm:$0xff]  }
  0xd6   : > { %2450 = vmatpush1.bf16.msra.mxu0 %v3419_v1  ;;  %2614 = vmatpush1.bf16.msra.mxu1 %v3420_v2  ;;  %v3510_v1 = vld [vmem:[%s4351_s9 + $0x3c8] ss:$16 sps:$4 sm:$0xff]   ;;  %v3515_v2 = vld [vmem:[%s4351_s9 + $0x3e4] ss:$16 sps:$4 sm:$0xff]  }
  0xd7   : > { %2460 = vmatprep.subr.bf16.mxu0 %v3425_v3  ;;  %2624 = vmatprep.subr.bf16.mxu1 %v3428_v4  ;;  %v3518_v3 = vld [vmem:[%s4351_s9 + $0x3ec] ss:$16 sps:$4 sm:$0xff]   ;;  %v3513_v4 = vld [vmem:[%s4351_s9 + $0x3e0] ss:$16 sps:$4 sm:$0xff]  }
  0xd9   : > { %2452 = vmatmul.mubr.bf16.vlgmr.msra.gmra.mrb[0].mxu0 %v2990_v5  ;;  %2616 = vmatmul.mubr.bf16.vlgmr.msra.gmra.mrb[0].mxu1 %v2990_v5  ;;  %v3516_v5 = vld [vmem:[%s4351_s9 + $0x3e8] ss:$16 sps:$4 sm:$0xff]  }
  0xda   : > { %2461 = vmatpush1.bf16.msra.mxu0 %v3423_v6  ;;  %2625 = vmatpush1.bf16.msra.mxu1 %v3426_v7  ;;  %v3523_v6 = vld [vmem:[%s4351_s9 + $0x404] ss:$16 sps:$4 sm:$0xff]   ;;  %v3526_v7 = vld [vmem:[%s4351_s9 + $0x40c] ss:$16 sps:$4 sm:$0xff]  }
  0xdb   : > { %2462 = vmatprep.subr.bf16.mxu0 %v3431_v8  ;;  %2626 = vmatprep.subr.bf16.mxu1 %v3434_v9  ;;  %v2992_v8 = vcombine.low %v4448_v29, %v4448_v29  ;;  %v3521_v9 = vld [vmem:[%s4351_s9 + $0x400] ss:$16 sps:$4 sm:$0xff]   ;;  %v3556_v29 = vld [vmem:[%s4351_s9 + $0x4ac] ss:$16 sps:$4 sm:$0xff]  }
  0xdc   : > { %2492 = vmatprep.mubr.bf16.mxu0 %v2993_v30  ;;  %2656 = vmatprep.mubr.bf16.mxu1 %v2993_v30  ;;  %v3551_v30 = vld [vmem:[%s4351_s9 + $0x4a0] ss:$16 sps:$4 sm:$0xff]  }
  0xde   : > { %2463 = vmatpush1.bf16.msra.mxu0 %v3429_v10  ;;  %2627 = vmatpush1.bf16.msra.mxu1 %v3432_v11  ;;  %v3524_v10 = vld [vmem:[%s4351_s9 + $0x408] ss:$16 sps:$4 sm:$0xff]   ;;  %v4499_v11 = vld [vmem:[%s4668_s0 + $0x10] sm:$0xff] }
  0xdf   : > { %2464 = vmatprep.subr.bf16.mxu0 %v3437_v0  ;;  %2628 = vmatprep.subr.bf16.mxu1 %v3440_v12  ;;  %v3529_v0 = vld [vmem:[%s4351_s9 + $0x424] ss:$16 sps:$4 sm:$0xff]   ;;  %v3532_v12 = vld [vmem:[%s4351_s9 + $0x42c] ss:$16 sps:$4 sm:$0xff]  }
  0xe2   : > { %2465 = vmatpush1.bf16.msra.mxu0 %v3435_v13  ;;  %2629 = vmatpush1.bf16.msra.mxu1 %v3438_v14  ;;  %v2995_v13 = vcombine.high %v4499_v11, %v4499_v11  ;;  %v3527_v14 = vld [vmem:[%s4351_s9 + $0x420] ss:$16 sps:$4 sm:$0xff]  }
  0xe3   : > { %2466 = vmatprep.subr.bf16.mxu0 %v3443_v15  ;;  %2630 = vmatprep.subr.bf16.mxu1 %v3446_v16  ;;  %v3530_v15 = vld [vmem:[%s4351_s9 + $0x428] ss:$16 sps:$4 sm:$0xff]   ;;  %v3535_v16 = vld [vmem:[%s4351_s9 + $0x444] ss:$16 sps:$4 sm:$0xff]  }
  0xe6   : > { %2467 = vmatpush1.bf16.msra.mxu0 %v3441_v17  ;;  %2631 = vmatpush1.bf16.msra.mxu1 %v3444_v18  ;;  %v3538_v17 = vld [vmem:[%s4351_s9 + $0x44c] ss:$16 sps:$4 sm:$0xff]   ;;  %v3533_v18 = vld [vmem:[%s4351_s9 + $0x440] ss:$16 sps:$4 sm:$0xff]  }
  0xe7   : > { %2468 = vmatprep.subr.bf16.mxu0 %v3449_v19  ;;  %2632 = vmatprep.subr.bf16.mxu1 %v3452_v20  ;;  %v3536_v19 = vld [vmem:[%s4351_s9 + $0x448] ss:$16 sps:$4 sm:$0xff]   ;;  %v3541_v20 = vld [vmem:[%s4351_s9 + $0x464] ss:$16 sps:$4 sm:$0xff]  }
  0xea   : > { %2469 = vmatpush1.bf16.msra.mxu0 %v3447_v21  ;;  %2633 = vmatpush1.bf16.msra.mxu1 %v3450_v22  ;;  %v3544_v21 = vld [vmem:[%s4351_s9 + $0x46c] ss:$16 sps:$4 sm:$0xff]   ;;  %v3539_v22 = vld [vmem:[%s4351_s9 + $0x460] ss:$16 sps:$4 sm:$0xff]  }
  0xeb   : > { %2470 = vmatprep.subr.bf16.mxu0 %v3455_v23  ;;  %2634 = vmatprep.subr.bf16.mxu1 %v3458_v24  ;;  %v3542_v23 = vld [vmem:[%s4351_s9 + $0x468] ss:$16 sps:$4 sm:$0xff]   ;;  %v3547_v24 = vld [vmem:[%s4351_s9 + $0x484] ss:$16 sps:$4 sm:$0xff]  }
  0xee   : > { %2471 = vmatpush1.bf16.msra.mxu0 %v3453_v25  ;;  %2635 = vmatpush1.bf16.msra.mxu1 %v3456_v26  ;;  %v3550_v25 = vld [vmem:[%s4351_s9 + $0x48c] ss:$16 sps:$4 sm:$0xff]   ;;  %v3545_v26 = vld [vmem:[%s4351_s9 + $0x480] ss:$16 sps:$4 sm:$0xff]  }
  0xef   : > { %2472 = vmatprep.subr.bf16.mxu0 %v3461_v27  ;;  %2636 = vmatprep.subr.bf16.mxu1 %v3464_v28  ;;  %v3548_v27 = vld [vmem:[%s4351_s9 + $0x488] ss:$16 sps:$4 sm:$0xff]   ;;  %v3553_v28 = vld [vmem:[%s4351_s9 + $0x4a4] ss:$16 sps:$4 sm:$0xff]  }
  0xf2   : > { %2473 = vmatpush1.bf16.msra.mxu0 %v3459_v31  ;;  %2637 = vmatpush1.bf16.msra.mxu1 %v3462_v32  ;;  %v3554_v31 = vld [vmem:[%s4351_s9 + $0x4a8] ss:$16 sps:$4 sm:$0xff]   ;;  %v3559_v32 = vld [vmem:[%s4351_s9 + $0x4c4] ss:$16 sps:$4 sm:$0xff]  }
  0xf3   : > { %2474 = vmatprep.subr.bf16.mxu0 %v3467_v33  ;;  %2638 = vmatprep.subr.bf16.mxu1 %v3470_v34  ;;  %v3562_v33 = vld [vmem:[%s4351_s9 + $0x4cc] ss:$16 sps:$4 sm:$0xff]   ;;  %v3557_v34 = vld [vmem:[%s4351_s9 + $0x4c0] ss:$16 sps:$4 sm:$0xff]  }
  0xf6   : > { %2475 = vmatpush1.bf16.msra.mxu0 %v3465_v35  ;;  %2639 = vmatpush1.bf16.msra.mxu1 %v3468_v36  ;;  %v3560_v35 = vld [vmem:[%s4351_s9 + $0x4c8] ss:$16 sps:$4 sm:$0xff]   ;;  %v3565_v36 = vld [vmem:[%s4351_s9 + $0x4e4] ss:$16 sps:$4 sm:$0xff]  }
  0xf7   : > { %2476 = vmatprep.subr.bf16.mxu0 %v3473_v37  ;;  %2640 = vmatprep.subr.bf16.mxu1 %v3476_v38  ;;  %v3568_v37 = vld [vmem:[%s4351_s9 + $0x4ec] ss:$16 sps:$4 sm:$0xff]   ;;  %v3563_v38 = vld [vmem:[%s4351_s9 + $0x4e0] ss:$16 sps:$4 sm:$0xff]  }
  0xfa   : > { %2477 = vmatpush1.bf16.msra.mxu0 %v3471_v39  ;;  %2641 = vmatpush1.bf16.msra.mxu1 %v3474_v40  ;;  %v3566_v39 = vld [vmem:[%s4351_s9 + $0x4e8] ss:$16 sps:$4 sm:$0xff]   ;;  %v3571_v40 = vld [vmem:[%s4351_s9 + $0x504] ss:$16 sps:$4 sm:$0xff]  }
  0xfb   : > { %2478 = vmatprep.subr.bf16.mxu0 %v3479_v41  ;;  %2642 = vmatprep.subr.bf16.mxu1 %v3482_v42  ;;  %v3574_v41 = vld [vmem:[%s4351_s9 + $0x50c] ss:$16 sps:$4 sm:$0xff]   ;;  %v3569_v42 = vld [vmem:[%s4351_s9 + $0x500] ss:$16 sps:$4 sm:$0xff]  }
  0xfe   : > { %2479 = vmatpush1.bf16.msra.mxu0 %v3477_v43  ;;  %2643 = vmatpush1.bf16.msra.mxu1 %v3480_v44  ;;  %v3572_v43 = vld [vmem:[%s4351_s9 + $0x508] ss:$16 sps:$4 sm:$0xff]   ;;  %v3577_v44 = vld [vmem:[%s4351_s9 + $0x524] ss:$16 sps:$4 sm:$0xff]  }
  0xff   : > { %2480 = vmatprep.subr.bf16.mxu0 %v3485_v45  ;;  %2644 = vmatprep.subr.bf16.mxu1 %v3488_v46  ;;  %v3580_v45 = vld [vmem:[%s4351_s9 + $0x52c] ss:$16 sps:$4 sm:$0xff]   ;;  %v3575_v46 = vld [vmem:[%s4351_s9 + $0x520] ss:$16 sps:$4 sm:$0xff]  }
 0x102   : > { %2481 = vmatpush1.bf16.msra.mxu0 %v3483_v47  ;;  %2645 = vmatpush1.bf16.msra.mxu1 %v3486_v48  ;;  %v3578_v47 = vld [vmem:[%s4351_s9 + $0x528] ss:$16 sps:$4 sm:$0xff]   ;;  %v3583_v48 = vld [vmem:[%s4351_s9 + $0x544] ss:$16 sps:$4 sm:$0xff]  }
 0x103   : > { %2482 = vmatprep.subr.bf16.mxu0 %v3491_v49  ;;  %2646 = vmatprep.subr.bf16.mxu1 %v3494_v50  ;;  %v3586_v49 = vld [vmem:[%s4351_s9 + $0x54c] ss:$16 sps:$4 sm:$0xff]   ;;  %v3581_v50 = vld [vmem:[%s4351_s9 + $0x540] ss:$16 sps:$4 sm:$0xff]  }
 0x106   : > { %2483 = vmatpush1.bf16.msra.mxu0 %v3489_v51  ;;  %2647 = vmatpush1.bf16.msra.mxu1 %v3492_v52  ;;  %v3584_v51 = vld [vmem:[%s4351_s9 + $0x548] ss:$16 sps:$4 sm:$0xff]   ;;  %v3589_v52 = vld [vmem:[%s4351_s9 + $0x564] ss:$16 sps:$4 sm:$0xff]  }
 0x107   : > { %2484 = vmatprep.subr.bf16.mxu0 %v3497_v53  ;;  %2648 = vmatprep.subr.bf16.mxu1 %v3500_v54  ;;  %v3592_v53 = vld [vmem:[%s4351_s9 + $0x56c] ss:$16 sps:$4 sm:$0xff]   ;;  %v3587_v54 = vld [vmem:[%s4351_s9 + $0x560] ss:$16 sps:$4 sm:$0xff]  }
 0x10a   : > { %2485 = vmatpush1.bf16.msra.mxu0 %v3495_v55  ;;  %2649 = vmatpush1.bf16.msra.mxu1 %v3498_v56  ;;  %v3590_v55 = vld [vmem:[%s4351_s9 + $0x568] ss:$16 sps:$4 sm:$0xff]   ;;  %v3595_v56 = vld [vmem:[%s4351_s9 + $0x584] ss:$16 sps:$4 sm:$0xff]  }
 0x10b   : > { %2486 = vmatprep.subr.bf16.mxu0 %v3503_v57  ;;  %2650 = vmatprep.subr.bf16.mxu1 %v3506_v58  ;;  %v3598_v57 = vld [vmem:[%s4351_s9 + $0x58c] ss:$16 sps:$4 sm:$0xff]   ;;  %v3593_v58 = vld [vmem:[%s4351_s9 + $0x580] ss:$16 sps:$4 sm:$0xff]  }
 0x10e   : > { %2487 = vmatpush1.bf16.msra.mxu0 %v3501_v59  ;;  %2651 = vmatpush1.bf16.msra.mxu1 %v3504_v60  ;;  %v3596_v59 = vld [vmem:[%s4351_s9 + $0x588] ss:$16 sps:$4 sm:$0xff]   ;;  %v3601_v60 = vld [vmem:[%s4351_s9 + $0x5a4] ss:$16 sps:$4 sm:$0xff]  }
 0x10f   : > { %2488 = vmatprep.subr.bf16.mxu0 %v3509_v61  ;;  %2652 = vmatprep.subr.bf16.mxu1 %v3512_v62  ;;  %v3604_v61 = vld [vmem:[%s4351_s9 + $0x5ac] ss:$16 sps:$4 sm:$0xff]   ;;  %v3599_v62 = vld [vmem:[%s4351_s9 + $0x5a0] ss:$16 sps:$4 sm:$0xff]  }
 0x112   : > { %2489 = vmatpush1.bf16.msra.mxu0 %v3507_v63  ;;  %2653 = vmatpush1.bf16.msra.mxu1 %v3510_v1  ;;  %v3602_v63 = vld [vmem:[%s4351_s9 + $0x5a8] ss:$16 sps:$4 sm:$0xff]   ;;  %v3607_v1 = vld [vmem:[%s4351_s9 + $0x5c4] ss:$16 sps:$4 sm:$0xff]  }
 0x113   : > { %2490 = vmatprep.subr.bf16.mxu0 %v3515_v2  ;;  %2654 = vmatprep.subr.bf16.mxu1 %v3518_v3  ;;  %v3610_v2 = vld [vmem:[%s4351_s9 + $0x5cc] ss:$16 sps:$4 sm:$0xff]   ;;  %v3605_v3 = vld [vmem:[%s4351_s9 + $0x5c0] ss:$16 sps:$4 sm:$0xff]  }
 0x116   : > { %2491 = vmatpush1.bf16.msra.mxu0 %v3513_v4  ;;  %2655 = vmatpush1.bf16.msra.mxu1 %v3516_v5  ;;  %v3608_v4 = vld [vmem:[%s4351_s9 + $0x5c8] ss:$16 sps:$4 sm:$0xff]   ;;  %v3613_v5 = vld [vmem:[%s4351_s9 + $0x5e4] ss:$16 sps:$4 sm:$0xff]  }
 0x117   : > { %2501 = vmatprep.subr.bf16.mxu0 %v3523_v6  ;;  %2665 = vmatprep.subr.bf16.mxu1 %v3526_v7  ;;  %v3616_v6 = vld [vmem:[%s4351_s9 + $0x5ec] ss:$16 sps:$4 sm:$0xff]   ;;  %v3611_v7 = vld [vmem:[%s4351_s9 + $0x5e0] ss:$16 sps:$4 sm:$0xff]  }
 0x119   : > { %2493 = vmatmul.mubr.bf16.vlgmr.msra.gmra.mrb[0].mxu0 %v2992_v8  ;;  %2657 = vmatmul.mubr.bf16.vlgmr.msra.gmra.mrb[0].mxu1 %v2992_v8  ;;  %v3614_v8 = vld [vmem:[%s4351_s9 + $0x5e8] ss:$16 sps:$4 sm:$0xff]  }
 0x11a   : > { %2502 = vmatpush1.bf16.msra.mxu0 %v3521_v9  ;;  %2666 = vmatpush1.bf16.msra.mxu1 %v3524_v10  ;;  %v3621_v9 = vld [vmem:[%s4351_s9 + $0x604] ss:$16 sps:$4 sm:$0xff]   ;;  %v3624_v10 = vld [vmem:[%s4351_s9 + $0x60c] ss:$16 sps:$4 sm:$0xff]  }
 0x11b   : > { %2503 = vmatprep.subr.bf16.mxu0 %v3529_v0  ;;  %2667 = vmatprep.subr.bf16.mxu1 %v3532_v12  ;;  %v2994_v0 = vcombine.low %v4499_v11, %v4499_v11  ;;  %v4570_v12 = vld [vmem:[%s4668_s0 + $0x18] sm:$0xff] }
 0x11c   : > { %2533 = vmatprep.mubr.bf16.mxu0 %v2995_v13  ;;  %2697 = vmatprep.mubr.bf16.mxu1 %v2995_v13  ;;  %v3619_v13 = vld [vmem:[%s4351_s9 + $0x600] ss:$16 sps:$4 sm:$0xff]   ;;  %v2997_v11 = vcombine.high %v4570_v12, %v4570_v12 }
 0x11e   : > { %2504 = vmatpush1.bf16.msra.mxu0 %v3527_v14  ;;  %2668 = vmatpush1.bf16.msra.mxu1 %v3530_v15  ;;  %v3622_v14 = vld [vmem:[%s4351_s9 + $0x608] ss:$16 sps:$4 sm:$0xff]   ;;  %v3627_v15 = vld [vmem:[%s4351_s9 + $0x624] ss:$16 sps:$4 sm:$0xff]  }
 0x11f   : > { %2505 = vmatprep.subr.bf16.mxu0 %v3535_v16  ;;  %2669 = vmatprep.subr.bf16.mxu1 %v3538_v17  ;;  %v3630_v16 = vld [vmem:[%s4351_s9 + $0x62c] ss:$16 sps:$4 sm:$0xff]   ;;  %v3625_v17 = vld [vmem:[%s4351_s9 + $0x620] ss:$16 sps:$4 sm:$0xff]  }
 0x122   : > { %2506 = vmatpush1.bf16.msra.mxu0 %v3533_v18  ;;  %2670 = vmatpush1.bf16.msra.mxu1 %v3536_v19  ;;  %v3628_v18 = vld [vmem:[%s4351_s9 + $0x628] ss:$16 sps:$4 sm:$0xff]   ;;  %v3633_v19 = vld [vmem:[%s4351_s9 + $0x644] ss:$16 sps:$4 sm:$0xff]  }
 0x123   : > { %2507 = vmatprep.subr.bf16.mxu0 %v3541_v20  ;;  %2671 = vmatprep.subr.bf16.mxu1 %v3544_v21  ;;  %v3636_v20 = vld [vmem:[%s4351_s9 + $0x64c] ss:$16 sps:$4 sm:$0xff]   ;;  %v3631_v21 = vld [vmem:[%s4351_s9 + $0x640] ss:$16 sps:$4 sm:$0xff]  }
 0x126   : > { %2508 = vmatpush1.bf16.msra.mxu0 %v3539_v22  ;;  %2672 = vmatpush1.bf16.msra.mxu1 %v3542_v23  ;;  %v3634_v22 = vld [vmem:[%s4351_s9 + $0x648] ss:$16 sps:$4 sm:$0xff]   ;;  %v3639_v23 = vld [vmem:[%s4351_s9 + $0x664] ss:$16 sps:$4 sm:$0xff]  }
 0x127   : > { %2509 = vmatprep.subr.bf16.mxu0 %v3547_v24  ;;  %2673 = vmatprep.subr.bf16.mxu1 %v3550_v25  ;;  %v3642_v24 = vld [vmem:[%s4351_s9 + $0x66c] ss:$16 sps:$4 sm:$0xff]   ;;  %v3637_v25 = vld [vmem:[%s4351_s9 + $0x660] ss:$16 sps:$4 sm:$0xff]  }
 0x12a   : > { %2510 = vmatpush1.bf16.msra.mxu0 %v3545_v26  ;;  %2674 = vmatpush1.bf16.msra.mxu1 %v3548_v27  ;;  %v3640_v26 = vld [vmem:[%s4351_s9 + $0x668] ss:$16 sps:$4 sm:$0xff]   ;;  %v3645_v27 = vld [vmem:[%s4351_s9 + $0x684] ss:$16 sps:$4 sm:$0xff]  }
 0x12b   : > { %2511 = vmatprep.subr.bf16.mxu0 %v3553_v28  ;;  %2675 = vmatprep.subr.bf16.mxu1 %v3556_v29  ;;  %v3648_v28 = vld [vmem:[%s4351_s9 + $0x68c] ss:$16 sps:$4 sm:$0xff]   ;;  %v3643_v29 = vld [vmem:[%s4351_s9 + $0x680] ss:$16 sps:$4 sm:$0xff]  }
 0x12e   : > { %2512 = vmatpush1.bf16.msra.mxu0 %v3551_v30  ;;  %2676 = vmatpush1.bf16.msra.mxu1 %v3554_v31  ;;  %v3646_v30 = vld [vmem:[%s4351_s9 + $0x688] ss:$16 sps:$4 sm:$0xff]   ;;  %v3651_v31 = vld [vmem:[%s4351_s9 + $0x6a4] ss:$16 sps:$4 sm:$0xff]  }
 0x12f   : > { %2513 = vmatprep.subr.bf16.mxu0 %v3559_v32  ;;  %2677 = vmatprep.subr.bf16.mxu1 %v3562_v33  ;;  %v3654_v32 = vld [vmem:[%s4351_s9 + $0x6ac] ss:$16 sps:$4 sm:$0xff]   ;;  %v3649_v33 = vld [vmem:[%s4351_s9 + $0x6a0] ss:$16 sps:$4 sm:$0xff]  }
 0x132   : > { %2514 = vmatpush1.bf16.msra.mxu0 %v3557_v34  ;;  %2678 = vmatpush1.bf16.msra.mxu1 %v3560_v35  ;;  %v3652_v34 = vld [vmem:[%s4351_s9 + $0x6a8] ss:$16 sps:$4 sm:$0xff]   ;;  %v3657_v35 = vld [vmem:[%s4351_s9 + $0x6c4] ss:$16 sps:$4 sm:$0xff]  }
 0x133   : > { %2515 = vmatprep.subr.bf16.mxu0 %v3565_v36  ;;  %2679 = vmatprep.subr.bf16.mxu1 %v3568_v37  ;;  %v3660_v36 = vld [vmem:[%s4351_s9 + $0x6cc] ss:$16 sps:$4 sm:$0xff]   ;;  %v3655_v37 = vld [vmem:[%s4351_s9 + $0x6c0] ss:$16 sps:$4 sm:$0xff]  }
 0x136   : > { %2516 = vmatpush1.bf16.msra.mxu0 %v3563_v38  ;;  %2680 = vmatpush1.bf16.msra.mxu1 %v3566_v39  ;;  %v3658_v38 = vld [vmem:[%s4351_s9 + $0x6c8] ss:$16 sps:$4 sm:$0xff]   ;;  %v3663_v39 = vld [vmem:[%s4351_s9 + $0x6e4] ss:$16 sps:$4 sm:$0xff]  }
 0x137   : > { %2517 = vmatprep.subr.bf16.mxu0 %v3571_v40  ;;  %2681 = vmatprep.subr.bf16.mxu1 %v3574_v41  ;;  %v3666_v40 = vld [vmem:[%s4351_s9 + $0x6ec] ss:$16 sps:$4 sm:$0xff]   ;;  %v3661_v41 = vld [vmem:[%s4351_s9 + $0x6e0] ss:$16 sps:$4 sm:$0xff]  }
 0x13a   : > { %2518 = vmatpush1.bf16.msra.mxu0 %v3569_v42  ;;  %2682 = vmatpush1.bf16.msra.mxu1 %v3572_v43  ;;  %v3664_v42 = vld [vmem:[%s4351_s9 + $0x6e8] ss:$16 sps:$4 sm:$0xff]   ;;  %v3669_v43 = vld [vmem:[%s4351_s9 + $0x704] ss:$16 sps:$4 sm:$0xff]  }
 0x13b   : > { %2519 = vmatprep.subr.bf16.mxu0 %v3577_v44  ;;  %2683 = vmatprep.subr.bf16.mxu1 %v3580_v45  ;;  %v3672_v44 = vld [vmem:[%s4351_s9 + $0x70c] ss:$16 sps:$4 sm:$0xff]   ;;  %v3667_v45 = vld [vmem:[%s4351_s9 + $0x700] ss:$16 sps:$4 sm:$0xff]  }
 0x13e   : > { %2520 = vmatpush1.bf16.msra.mxu0 %v3575_v46  ;;  %2684 = vmatpush1.bf16.msra.mxu1 %v3578_v47  ;;  %v3670_v46 = vld [vmem:[%s4351_s9 + $0x708] ss:$16 sps:$4 sm:$0xff]   ;;  %v3675_v47 = vld [vmem:[%s4351_s9 + $0x724] ss:$16 sps:$4 sm:$0xff]  }
 0x13f   : > { %2521 = vmatprep.subr.bf16.mxu0 %v3583_v48  ;;  %2685 = vmatprep.subr.bf16.mxu1 %v3586_v49  ;;  %v3678_v48 = vld [vmem:[%s4351_s9 + $0x72c] ss:$16 sps:$4 sm:$0xff]   ;;  %v3673_v49 = vld [vmem:[%s4351_s9 + $0x720] ss:$16 sps:$4 sm:$0xff]  }
 0x142   : > { %2522 = vmatpush1.bf16.msra.mxu0 %v3581_v50  ;;  %2686 = vmatpush1.bf16.msra.mxu1 %v3584_v51  ;;  %v3676_v50 = vld [vmem:[%s4351_s9 + $0x728] ss:$16 sps:$4 sm:$0xff]   ;;  %v3681_v51 = vld [vmem:[%s4351_s9 + $0x744] ss:$16 sps:$4 sm:$0xff]  }
 0x143   : > { %2523 = vmatprep.subr.bf16.mxu0 %v3589_v52  ;;  %2687 = vmatprep.subr.bf16.mxu1 %v3592_v53  ;;  %v3684_v52 = vld [vmem:[%s4351_s9 + $0x74c] ss:$16 sps:$4 sm:$0xff]   ;;  %v3679_v53 = vld [vmem:[%s4351_s9 + $0x740] ss:$16 sps:$4 sm:$0xff]  }
 0x146   : > { %2524 = vmatpush1.bf16.msra.mxu0 %v3587_v54  ;;  %2688 = vmatpush1.bf16.msra.mxu1 %v3590_v55  ;;  %v3682_v54 = vld [vmem:[%s4351_s9 + $0x748] ss:$16 sps:$4 sm:$0xff]   ;;  %v3687_v55 = vld [vmem:[%s4351_s9 + $0x764] ss:$16 sps:$4 sm:$0xff]  }
 0x147   : > { %2525 = vmatprep.subr.bf16.mxu0 %v3595_v56  ;;  %2689 = vmatprep.subr.bf16.mxu1 %v3598_v57  ;;  %v3690_v56 = vld [vmem:[%s4351_s9 + $0x76c] ss:$16 sps:$4 sm:$0xff]   ;;  %v3685_v57 = vld [vmem:[%s4351_s9 + $0x760] ss:$16 sps:$4 sm:$0xff]  }
 0x14a   : > { %2526 = vmatpush1.bf16.msra.mxu0 %v3593_v58  ;;  %2690 = vmatpush1.bf16.msra.mxu1 %v3596_v59  ;;  %v3688_v58 = vld [vmem:[%s4351_s9 + $0x768] ss:$16 sps:$4 sm:$0xff]   ;;  %v3693_v59 = vld [vmem:[%s4351_s9 + $0x784] ss:$16 sps:$4 sm:$0xff]  }
 0x14b   : > { %2527 = vmatprep.subr.bf16.mxu0 %v3601_v60  ;;  %2691 = vmatprep.subr.bf16.mxu1 %v3604_v61  ;;  %v3696_v60 = vld [vmem:[%s4351_s9 + $0x78c] ss:$16 sps:$4 sm:$0xff]   ;;  %v3691_v61 = vld [vmem:[%s4351_s9 + $0x780] ss:$16 sps:$4 sm:$0xff]  }
 0x14e   : > { %2528 = vmatpush1.bf16.msra.mxu0 %v3599_v62  ;;  %2692 = vmatpush1.bf16.msra.mxu1 %v3602_v63  ;;  %v3694_v62 = vld [vmem:[%s4351_s9 + $0x788] ss:$16 sps:$4 sm:$0xff]   ;;  %v3699_v63 = vld [vmem:[%s4351_s9 + $0x7a4] ss:$16 sps:$4 sm:$0xff]  }
 0x14f   : > { %2529 = vmatprep.subr.bf16.mxu0 %v3607_v1  ;;  %2693 = vmatprep.subr.bf16.mxu1 %v3610_v2  ;;  %v3702_v1 = vld [vmem:[%s4351_s9 + $0x7ac] ss:$16 sps:$4 sm:$0xff]   ;;  %v3697_v2 = vld [vmem:[%s4351_s9 + $0x7a0] ss:$16 sps:$4 sm:$0xff]  }
 0x152   : > { %2530 = vmatpush1.bf16.msra.mxu0 %v3605_v3  ;;  %2694 = vmatpush1.bf16.msra.mxu1 %v3608_v4  ;;  %v3700_v3 = vld [vmem:[%s4351_s9 + $0x7a8] ss:$16 sps:$4 sm:$0xff]   ;;  %v3705_v4 = vld [vmem:[%s4351_s9 + $0x7c4] ss:$16 sps:$4 sm:$0xff]  }
 0x153   : > { %2531 = vmatprep.subr.bf16.mxu0 %v3613_v5  ;;  %2695 = vmatprep.subr.bf16.mxu1 %v3616_v6  ;;  %v3708_v5 = vld [vmem:[%s4351_s9 + $0x7cc] ss:$16 sps:$4 sm:$0xff]   ;;  %v3703_v6 = vld [vmem:[%s4351_s9 + $0x7c0] ss:$16 sps:$4 sm:$0xff]  }
 0x156   : > { %2532 = vmatpush1.bf16.msra.mxu0 %v3611_v7  ;;  %2696 = vmatpush1.bf16.msra.mxu1 %v3614_v8  ;;  %v3706_v7 = vld [vmem:[%s4351_s9 + $0x7c8] ss:$16 sps:$4 sm:$0xff]   ;;  %v3711_v8 = vld [vmem:[%s4351_s9 + $0x7e4] ss:$16 sps:$4 sm:$0xff]  }
 0x157   : > { %2542 = vmatprep.subr.bf16.mxu0 %v3621_v9  ;;  %2706 = vmatprep.subr.bf16.mxu1 %v3624_v10  ;;  %v3714_v9 = vld [vmem:[%s4351_s9 + $0x7ec] ss:$16 sps:$4 sm:$0xff]   ;;  %v3709_v10 = vld [vmem:[%s4351_s9 + $0x7e0] ss:$16 sps:$4 sm:$0xff]  }
 0x159   : > { %2534 = vmatmul.mubr.bf16.vlgmr.msra.gmra.mrb[0].mxu0 %v2994_v0  ;;  %2698 = vmatmul.mubr.bf16.vlgmr.msra.gmra.mrb[0].mxu1 %v2994_v0  ;;  %v3712_v0 = vld [vmem:[%s4351_s9 + $0x7e8] ss:$16 sps:$4 sm:$0xff]  }
 0x15a   : > { %2543 = vmatpush1.bf16.msra.mxu0 %v3619_v13  ;;  %2707 = vmatpush1.bf16.msra.mxu1 %v3622_v14  ;;  %v2996_v13 = vcombine.low %v4570_v12, %v4570_v12  ;;  %v2764_v14 = vlaneseq }
 0x15b   : > { %2544 = vmatprep.subr.bf16.mxu0 %v3627_v15  ;;  %2708 = vmatprep.subr.bf16.mxu1 %v3630_v16 }
 0x15c   : > { %2574 = vmatprep.mubr.bf16.mxu0 %v2997_v11  ;;  %2738 = vmatprep.mubr.bf16.mxu1 %v2997_v11  ;;  %v2765_v15 = vshrl.u32 %v2764_v14, 7  ;;  %v2762_v11 = vld [vmem:[%s822_s25] sm:$0xf] }
 0x15e   : > { %2545 = vmatpush1.bf16.msra.mxu0 %v3625_v17  ;;  %2709 = vmatpush1.bf16.msra.mxu1 %v3628_v18  ;;  %v2766_v12 = vsub.s32 0, %v2765_v15  ;;  %v2774_v16 = vsub.s32 2, %v2765_v15  ;;  %v2770_v17 = vsub.s32 1, %v2765_v15  ;;  %v2778_v18 = vsub.s32 3, %v2765_v15 }
 0x15f   : > { %2546 = vmatprep.subr.bf16.mxu0 %v3633_v19  ;;  %2710 = vmatprep.subr.bf16.mxu1 %v3636_v20  ;;  %v2788_v19 = vld [vmem:[%s827_s28] sm:$0xf] }
 0x160   : > { %v2767_v20 = vrot.slane %v2762_v11, %v2766_v12 }
 0x162   : > { %2547 = vmatpush1.bf16.msra.mxu0 %v3631_v21  ;;  %2711 = vmatpush1.bf16.msra.mxu1 %v3634_v22  ;;  %v2775_v21 = vrot.slane %v2762_v11, %v2774_v16  ;;  %v2771_v22 = vrot.slane %v2762_v11, %v2770_v17 }
 0x163   : > { %2548 = vmatprep.subr.bf16.mxu0 %v3639_v23  ;;  %2712 = vmatprep.subr.bf16.mxu1 %v3642_v24  ;;  %v2779_v23 = vrot.slane %v2762_v11, %v2778_v18  ;;  %v2793_v24 = vrot.slane %v2788_v19, %v2766_v12 }
 0x166   : > { %2549 = vmatpush1.bf16.msra.mxu0 %v3637_v25  ;;  %2713 = vmatpush1.bf16.msra.mxu1 %v3640_v26  ;;  %v2801_v25 = vrot.slane %v2788_v19, %v2774_v16 }
 0x167   : > { %2550 = vmatprep.subr.bf16.mxu0 %v3645_v27  ;;  %2714 = vmatprep.subr.bf16.mxu1 %v3648_v28  ;;  %v2797_v28 = vrot.slane %v2788_v19, %v2770_v17 }
 0x16a   : > { %2551 = vmatpush1.bf16.msra.mxu0 %v3643_v29  ;;  %2715 = vmatpush1.bf16.msra.mxu1 %v3646_v30  ;;  %v2805_v29 = vrot.slane %v2788_v19, %v2778_v18 }
 0x16b   : > { %2552 = vmatprep.subr.bf16.mxu0 %v3651_v31  ;;  %2716 = vmatprep.subr.bf16.mxu1 %v3654_v32 }
 0x16e   : > { %2553 = vmatpush1.bf16.msra.mxu0 %v3649_v33  ;;  %2717 = vmatpush1.bf16.msra.mxu1 %v3652_v34 }
 0x16f   : > { %2554 = vmatprep.subr.bf16.mxu0 %v3657_v35  ;;  %2718 = vmatprep.subr.bf16.mxu1 %v3660_v36 }
 0x172   : > { %2555 = vmatpush1.bf16.msra.mxu0 %v3655_v37  ;;  %2719 = vmatpush1.bf16.msra.mxu1 %v3658_v38 }
 0x173   : > { %2556 = vmatprep.subr.bf16.mxu0 %v3663_v39  ;;  %2720 = vmatprep.subr.bf16.mxu1 %v3666_v40 }
 0x176   : > { %2557 = vmatpush1.bf16.msra.mxu0 %v3661_v41  ;;  %2721 = vmatpush1.bf16.msra.mxu1 %v3664_v42 }
 0x177   : > { %2558 = vmatprep.subr.bf16.mxu0 %v3669_v43  ;;  %2722 = vmatprep.subr.bf16.mxu1 %v3672_v44 }
 0x17a   : > { %2559 = vmatpush1.bf16.msra.mxu0 %v3667_v45  ;;  %2723 = vmatpush1.bf16.msra.mxu1 %v3670_v46 }
 0x17b   : > { %2560 = vmatprep.subr.bf16.mxu0 %v3675_v47  ;;  %2724 = vmatprep.subr.bf16.mxu1 %v3678_v48 }
 0x17e   : > { %2561 = vmatpush1.bf16.msra.mxu0 %v3673_v49  ;;  %2725 = vmatpush1.bf16.msra.mxu1 %v3676_v50 }
 0x17f   : > { %2562 = vmatprep.subr.bf16.mxu0 %v3681_v51  ;;  %2726 = vmatprep.subr.bf16.mxu1 %v3684_v52 }
 0x182   : > { %2563 = vmatpush1.bf16.msra.mxu0 %v3679_v53  ;;  %2727 = vmatpush1.bf16.msra.mxu1 %v3682_v54 }
 0x183   : > { %2564 = vmatprep.subr.bf16.mxu0 %v3687_v55  ;;  %2728 = vmatprep.subr.bf16.mxu1 %v3690_v56 }
 0x186   : > { %2565 = vmatpush1.bf16.msra.mxu0 %v3685_v57  ;;  %2729 = vmatpush1.bf16.msra.mxu1 %v3688_v58 }
 0x187   : > { %2566 = vmatprep.subr.bf16.mxu0 %v3693_v59  ;;  %2730 = vmatprep.subr.bf16.mxu1 %v3696_v60 }
 0x18a   : > { %2567 = vmatpush1.bf16.msra.mxu0 %v3691_v61  ;;  %2731 = vmatpush1.bf16.msra.mxu1 %v3694_v62 }
 0x18b   : > { %2568 = vmatprep.subr.bf16.mxu0 %v3699_v63  ;;  %2732 = vmatprep.subr.bf16.mxu1 %v3702_v1 }
 0x18e   : > { %2569 = vmatpush1.bf16.msra.mxu0 %v3697_v2  ;;  %2733 = vmatpush1.bf16.msra.mxu1 %v3700_v3 }
 0x18f   : > { %2570 = vmatprep.subr.bf16.mxu0 %v3705_v4  ;;  %2734 = vmatprep.subr.bf16.mxu1 %v3708_v5 }
 0x192   : > { %2571 = vmatpush1.bf16.msra.mxu0 %v3703_v6  ;;  %2735 = vmatpush1.bf16.msra.mxu1 %v3706_v7 }
 0x193   : > { %2572 = vmatprep.subr.bf16.mxu0 %v3711_v8  ;;  %2736 = vmatprep.subr.bf16.mxu1 %v3714_v9 }
 0x196   : > { %2573 = vmatpush1.bf16.msra.mxu0 %v3709_v10  ;;  %2737 = vmatpush1.bf16.msra.mxu1 %v3712_v0 }
 0x199   : > { %2575 = vmatmul.mubr.bf16.vlgmr.msra.gmra.mrb[0].mxu0 %v2996_v13  ;;  %2739 = vmatmul.mubr.bf16.vlgmr.msra.gmra.mrb[0].mxu1 %v2996_v13 }
 0x26c   : > { %v2576_v26 = vpop.f32.mrb[0].mxu0  ;;  %v2740_v27 = vpop.f32.mrb[0].mxu1 }
 0x26d   : > { %v2784_v30 = vmul.f32 %v2767_v20, %v2576_v26  ;;  %v2786_v31 = vmul.f32 %v2775_v21, %v2740_v27  ;;  %v2578_v32 = vpop.f32.mrb[1].mxu0  ;;  %v2742_v33 = vpop.f32.mrb[1].mxu1 }
 0x26e   : > { %v2785_v34 = vmul.f32 %v2771_v22, %v2578_v32  ;;  %v2787_v35 = vmul.f32 %v2779_v23, %v2742_v33  ;;  %v2580_v36 = vpop.f32.mrb[2].mxu0  ;;  %v2744_v37 = vpop.f32.mrb[2].mxu1 }
 0x26f   : > { %v2810_v38 = vadd.f32 %v2793_v24, %v2784_v30  ;;  %v2812_v39 = vadd.f32 %v2801_v25, %v2786_v31  ;;  %v2581_v40 = vpop.f32.mrb[3].mxu0  ;;  %v2745_v41 = vpop.f32.mrb[3].mxu1 }
 0x270   : > { %v2811_v42 = vadd.f32 %v2797_v28, %v2785_v34  ;;  %v2813_v43 = vadd.f32 %v2805_v29, %v2787_v35 }
 0x271   : > { %vm2814_vm0 = vcmp.ge.f32.partialorder %v2810_v38, 0.0  ;;  %v2818_v44 = vmul.f32 0.2, %v2810_v38  ;;  %vm2816_vm1 = vcmp.ge.f32.partialorder %v2812_v39, 0.0  ;;  %v2820_v45 = vmul.f32 0.2, %v2812_v39 }
 0x272   : > { %vm2815_vm2 = vcmp.ge.f32.partialorder %v2811_v42, 0.0  ;;  %v2819_v46 = vmul.f32 0.2, %v2811_v42  ;;  %vm2817_vm3 = vcmp.ge.f32.partialorder %v2813_v43, 0.0  ;;  %v2821_v47 = vmul.f32 0.2, %v2813_v43 }
 0x273   : > { %v2822_v48 = vsel %vm2814_vm0, %v2810_v38, %v2818_v44  ;;  %v2824_v49 = vsel %vm2816_vm1, %v2812_v39, %v2820_v45 }
 0x274   : > { %v2823_v50 = vsel %vm2815_vm2, %v2811_v42, %v2819_v46  ;;  %v2825_v51 = vsel %vm2817_vm3, %v2813_v43, %v2821_v47 }
 0x275   : > { %v3259_v52 = vpack.c.bf16 %v2823_v50, %v2822_v48  ;;  %v3260_v53 = vpack.c.bf16 %v2825_v51, %v2824_v49 }
 0x277   : > { %2842 = vst [vmem:[%s837_s5] sm:$0xff] %v3259_v52  ;;  %2843 = vst [vmem:[%s837_s5 + $0x8] sm:$0xff] %v3260_v53 }
 0x278 PF: > { %s14_s19 = sadd.s32 1, %s3755_s19   ;;  %s4673_s15 = smov %s3743_s16 }
 0x279   : > { %p11_p10 = scmp.ge.s32.totalorder %s14_s19, 4   ;;  %s4674_s16 = smov %s3817_s23 }
 0x27a   : > { %s4675_s17 = smov %s3751_s18  ;;  %s4676_s18 = smov %s4678_s20 }
 0x27b   :  { %13 = sbr.rel (!%p11_p10) target bundleno = 3 (0x3), region = 111 }

// kernel: id_market_net23_forward.7
= control target key start
LH: loop header
LB: loop body
LE: loop exit
PB: predicated region body
PF: predicated region fallthrough
CT: control target
= control target key end

     0   :  { %s3764_s15 = smov 0   ;;  %s3766_s16 = smov 0   ;;  %s4650_s0 = inlined_call_operand.vmem [shape: bf16[8,1024], index: 0, kind: input, shape index: {}]   ;;  %s4651_s1 = inlined_call_operand.vmem [shape: bf16[1024,1536], index: 1, kind: input, shape index: {}]   ;;  %s4652_s2 = inlined_call_operand.vmem [shape: f32[1,1536], index: 2, kind: input, shape index: {}]   ;;  %s4653_s3 = inlined_call_operand.vmem [shape: f32[1,1536], index: 3, kind: input, shape index: {}]   ;;  %s4654_s4 = inlined_call_operand.vmem [shape: f32[8,1536], index: 4, kind: output, shape index: {}]  }
   0x1   :  { %s3768_s17 = smov 0   ;;  %s3770_s18 = smov 0  }
   0x2   :  { %s3772_s19 = smov 0  }
   0x3 LB: > { %s29_s20 = sadd.s32 1, %s3733_s18  ;;  %p77_p1 = scmp.ne.s32.totalorder %s3725_s16, %s3721_s15  ;;  %s3737_s19 = sphi %s3772_s19, %s14_s19   ;;  %s3733_s18 = sphi %s3770_s18, %s4658_s18   ;;  %s3729_s17 = sphi %s3768_s17, %s4657_s17   ;;  %s3725_s16 = sphi %s3766_s16, %s4656_s16   ;;  %s3721_s15 = sphi %s3764_s15, %s4655_s15  }
   0x4   : > { %p31_p0 = scmp.ge.s32.totalorder %s29_s20, 3  ;;  %p78_p2 = scmp.eq.s32.totalorder %s3737_s19, 0 }
   0x5   : > { %s70_s22 = sadd.s32 1, %s3725_s16  ;;  %p2966_p5 = scmp.ge.s32.totalorder %s3737_s19, 3 }
   0x6   : > { %s4660_s20 = smov (%p31_p0, %s29_s20), 0  ;;  %p79_p3 = por %p78_p2, %p77_p1 }
   0x7   : > { %s66_s21 = ssub.s32 %s3733_s18, %s4660_s20  ;;  %196 = sbr.rel (%p2966_p5) target bundleno = 146 (0x92), region = 20 }
   0x8   : > { %p68_p4 = scmp.eq.s32.totalorder %s66_s21, 0 }
   0xa   : > { %s3799_s23 = scalar_select %p68_p4, %s3725_s16, %s70_s22  }
   0xe   : > { %199 = sbr.rel (!%p79_p3) target bundleno = 146 (0x92), region = 24  ;;  %s201_s24 = sand.u32 (%p79_p3), 1, %s3725_s16  }
   0xf   : > { %s3242_s25 = sshll.u32 (%p79_p3), %s3733_s18, 4  ;;  %s2967_s26 = sshll.u32 (%p79_p3), %s201_s24, 11 }
  0x10   : > { %s3807_s29 = scalar_lea.vmem (%p79_p3), %s4651_s1, %s3242_s25  ;;  %s3812_s30 = scalar_lea.vmem (%p79_p3), [#allocation3], %s2967_s26 }
  0x11   : > { %v222_v0 = vld [vmem:[%s3807_s29] sm:$0xff] (%p79_p3)  ;;  %v224_v1 = vld [vmem:[%s3807_s29 + $0x8] sm:$0xff] (%p79_p3)  ;;  %v226_v2 = vld [vmem:[%s3807_s29 + $0x30] sm:$0xff] (%p79_p3) }
  0x12   : > { %223 = vst [vmem:[%s3812_s30] sm:$0xff] (%p79_p3), %v222_v0  ;;  %225 = vst [vmem:[%s3812_s30 + $0x8] sm:$0xff] (%p79_p3), %v224_v1  ;;  %v228_v3 = vld [vmem:[%s3807_s29 + $0x38] sm:$0xff] (%p79_p3)  ;;  %v230_v4 = vld [vmem:[%s3807_s29 + $0x60] sm:$0xff] (%p79_p3) }
  0x13   : > { %227 = vst [vmem:[%s3812_s30 + $0x10] sm:$0xff] (%p79_p3), %v226_v2  ;;  %v232_v5 = vld [vmem:[%s3807_s29 + $0x68] sm:$0xff] (%p79_p3)  ;;  %229 = vst [vmem:[%s3812_s30 + $0x18] sm:$0xff] (%p79_p3), %v228_v3  ;;  %v234_v6 = vld [vmem:[%s3807_s29 + $0x90] sm:$0xff] (%p79_p3) }
  0x14   : > { %231 = vst [vmem:[%s3812_s30 + $0x20] sm:$0xff] (%p79_p3), %v230_v4  ;;  %233 = vst [vmem:[%s3812_s30 + $0x28] sm:$0xff] (%p79_p3), %v232_v5  ;;  %v236_v7 = vld [vmem:[%s3807_s29 + $0x98] sm:$0xff] (%p79_p3)  ;;  %v238_v8 = vld [vmem:[%s3807_s29 + $0xc0] sm:$0xff] (%p79_p3) }
  0x15   : > { %235 = vst [vmem:[%s3812_s30 + $0x30] sm:$0xff] %v234_v6  ;;  %237 = vst [vmem:[%s3812_s30 + $0x38] sm:$0xff] %v236_v7  ;;  %v240_v9 = vld [vmem:[%s3807_s29 + $0xc8] sm:$0xff]  ;;  %v242_v10 = vld [vmem:[%s3807_s29 + $0xf0] sm:$0xff] }
  0x16   : > { %239 = vst [vmem:[%s3812_s30 + $0x40] sm:$0xff] %v238_v8  ;;  %v244_v11 = vld [vmem:[%s3807_s29 + $0xf8] sm:$0xff]  ;;  %241 = vst [vmem:[%s3812_s30 + $0x48] sm:$0xff] %v240_v9  ;;  %v246_v12 = vld [vmem:[%s3807_s29 + $0x120] sm:$0xff] }
  0x17   : > { %243 = vst [vmem:[%s3812_s30 + $0x50] sm:$0xff] %v242_v10  ;;  %245 = vst [vmem:[%s3812_s30 + $0x58] sm:$0xff] %v244_v11  ;;  %v248_v13 = vld [vmem:[%s3807_s29 + $0x128] sm:$0xff]  ;;  %v250_v14 = vld [vmem:[%s3807_s29 + $0x150] sm:$0xff] }
  0x18   : > { %247 = vst [vmem:[%s3812_s30 + $0x60] sm:$0xff] %v246_v12  ;;  %249 = vst [vmem:[%s3812_s30 + $0x68] sm:$0xff] %v248_v13  ;;  %v252_v15 = vld [vmem:[%s3807_s29 + $0x158] sm:$0xff]  ;;  %v254_v16 = vld [vmem:[%s3807_s29 + $0x180] sm:$0xff] }
  0x19   : > { %251 = vst [vmem:[%s3812_s30 + $0x70] sm:$0xff] %v250_v14  ;;  %v256_v17 = vld [vmem:[%s3807_s29 + $0x188] sm:$0xff]  ;;  %253 = vst [vmem:[%s3812_s30 + $0x78] sm:$0xff] %v252_v15  ;;  %v258_v18 = vld [vmem:[%s3807_s29 + $0x1b0] sm:$0xff] }
  0x1a   : > { %255 = vst [vmem:[%s3812_s30 + $0x80] sm:$0xff] %v254_v16  ;;  %257 = vst [vmem:[%s3812_s30 + $0x88] sm:$0xff] %v256_v17  ;;  %v260_v19 = vld [vmem:[%s3807_s29 + $0x1b8] sm:$0xff]  ;;  %v262_v20 = vld [vmem:[%s3807_s29 + $0x1e0] sm:$0xff] }
  0x1b   : > { %259 = vst [vmem:[%s3812_s30 + $0x90] sm:$0xff] %v258_v18  ;;  %261 = vst [vmem:[%s3812_s30 + $0x98] sm:$0xff] %v260_v19  ;;  %v264_v21 = vld [vmem:[%s3807_s29 + $0x1e8] sm:$0xff]  ;;  %v266_v22 = vld [vmem:[%s3807_s29 + $0x210] sm:$0xff] }
  0x1c   : > { %263 = vst [vmem:[%s3812_s30 + $0xa0] sm:$0xff] %v262_v20  ;;  %v268_v23 = vld [vmem:[%s3807_s29 + $0x218] sm:$0xff]  ;;  %265 = vst [vmem:[%s3812_s30 + $0xa8] sm:$0xff] %v264_v21  ;;  %v270_v24 = vld [vmem:[%s3807_s29 + $0x240] sm:$0xff] }
  0x1d   : > { %267 = vst [vmem:[%s3812_s30 + $0xb0] sm:$0xff] %v266_v22  ;;  %269 = vst [vmem:[%s3812_s30 + $0xb8] sm:$0xff] %v268_v23  ;;  %v272_v25 = vld [vmem:[%s3807_s29 + $0x248] sm:$0xff]  ;;  %v274_v26 = vld [vmem:[%s3807_s29 + $0x270] sm:$0xff] }
  0x1e   : > { %271 = vst [vmem:[%s3812_s30 + $0xc0] sm:$0xff] %v270_v24  ;;  %273 = vst [vmem:[%s3812_s30 + $0xc8] sm:$0xff] %v272_v25  ;;  %v276_v27 = vld [vmem:[%s3807_s29 + $0x278] sm:$0xff]  ;;  %v278_v28 = vld [vmem:[%s3807_s29 + $0x2a0] sm:$0xff] }
  0x1f   : > { %275 = vst [vmem:[%s3812_s30 + $0xd0] sm:$0xff] %v274_v26  ;;  %v280_v29 = vld [vmem:[%s3807_s29 + $0x2a8] sm:$0xff]  ;;  %277 = vst [vmem:[%s3812_s30 + $0xd8] sm:$0xff] %v276_v27  ;;  %v282_v30 = vld [vmem:[%s3807_s29 + $0x2d0] sm:$0xff] }
  0x20   : > { %279 = vst [vmem:[%s3812_s30 + $0xe0] sm:$0xff] %v278_v28  ;;  %281 = vst [vmem:[%s3812_s30 + $0xe8] sm:$0xff] %v280_v29  ;;  %v284_v31 = vld [vmem:[%s3807_s29 + $0x2d8] sm:$0xff]  ;;  %v286_v32 = vld [vmem:[%s3807_s29 + $0x300] sm:$0xff] }
  0x21   : > { %283 = vst [vmem:[%s3812_s30 + $0xf0] sm:$0xff] %v282_v30  ;;  %285 = vst [vmem:[%s3812_s30 + $0xf8] sm:$0xff] %v284_v31  ;;  %v288_v33 = vld [vmem:[%s3807_s29 + $0x308] sm:$0xff]  ;;  %v290_v34 = vld [vmem:[%s3807_s29 + $0x330] sm:$0xff] }
  0x22   : > { %287 = vst [vmem:[%s3812_s30 + $0x100] sm:$0xff] %v286_v32  ;;  %v292_v35 = vld [vmem:[%s3807_s29 + $0x338] sm:$0xff]  ;;  %289 = vst [vmem:[%s3812_s30 + $0x108] sm:$0xff] %v288_v33  ;;  %v294_v36 = vld [vmem:[%s3807_s29 + $0x360] sm:$0xff] }
  0x23   : > { %291 = vst [vmem:[%s3812_s30 + $0x110] sm:$0xff] %v290_v34  ;;  %293 = vst [vmem:[%s3812_s30 + $0x118] sm:$0xff] %v292_v35  ;;  %v296_v37 = vld [vmem:[%s3807_s29 + $0x368] sm:$0xff]  ;;  %v298_v38 = vld [vmem:[%s3807_s29 + $0x390] sm:$0xff] }
  0x24   : > { %295 = vst [vmem:[%s3812_s30 + $0x120] sm:$0xff] %v294_v36  ;;  %297 = vst [vmem:[%s3812_s30 + $0x128] sm:$0xff] %v296_v37  ;;  %v300_v39 = vld [vmem:[%s3807_s29 + $0x398] sm:$0xff]  ;;  %v302_v40 = vld [vmem:[%s3807_s29 + $0x3c0] sm:$0xff] }
  0x25   : > { %299 = vst [vmem:[%s3812_s30 + $0x130] sm:$0xff] %v298_v38  ;;  %v304_v41 = vld [vmem:[%s3807_s29 + $0x3c8] sm:$0xff]  ;;  %301 = vst [vmem:[%s3812_s30 + $0x138] sm:$0xff] %v300_v39  ;;  %v306_v42 = vld [vmem:[%s3807_s29 + $0x3f0] sm:$0xff] }
  0x26   : > { %303 = vst [vmem:[%s3812_s30 + $0x140] sm:$0xff] %v302_v40  ;;  %305 = vst [vmem:[%s3812_s30 + $0x148] sm:$0xff] %v304_v41  ;;  %v308_v43 = vld [vmem:[%s3807_s29 + $0x3f8] sm:$0xff]  ;;  %v310_v44 = vld [vmem:[%s3807_s29 + $0x420] sm:$0xff] }
  0x27   : > { %307 = vst [vmem:[%s3812_s30 + $0x150] sm:$0xff] %v306_v42  ;;  %309 = vst [vmem:[%s3812_s30 + $0x158] sm:$0xff] %v308_v43  ;;  %v312_v45 = vld [vmem:[%s3807_s29 + $0x428] sm:$0xff]  ;;  %v314_v46 = vld [vmem:[%s3807_s29 + $0x450] sm:$0xff] }
  0x28   : > { %311 = vst [vmem:[%s3812_s30 + $0x160] sm:$0xff] %v310_v44  ;;  %v316_v47 = vld [vmem:[%s3807_s29 + $0x458] sm:$0xff]  ;;  %313 = vst [vmem:[%s3812_s30 + $0x168] sm:$0xff] %v312_v45  ;;  %v318_v48 = vld [vmem:[%s3807_s29 + $0x480] sm:$0xff] }
  0x29   : > { %315 = vst [vmem:[%s3812_s30 + $0x170] sm:$0xff] %v314_v46  ;;  %317 = vst [vmem:[%s3812_s30 + $0x178] sm:$0xff] %v316_v47  ;;  %v320_v49 = vld [vmem:[%s3807_s29 + $0x488] sm:$0xff]  ;;  %v322_v50 = vld [vmem:[%s3807_s29 + $0x4b0] sm:$0xff] }
  0x2a   : > { %319 = vst [vmem:[%s3812_s30 + $0x180] sm:$0xff] %v318_v48  ;;  %321 = vst [vmem:[%s3812_s30 + $0x188] sm:$0xff] %v320_v49  ;;  %v324_v51 = vld [vmem:[%s3807_s29 + $0x4b8] sm:$0xff]  ;;  %v326_v52 = vld [vmem:[%s3807_s29 + $0x4e0] sm:$0xff] }
  0x2b   : > { %323 = vst [vmem:[%s3812_s30 + $0x190] sm:$0xff] %v322_v50  ;;  %v328_v53 = vld [vmem:[%s3807_s29 + $0x4e8] sm:$0xff]  ;;  %325 = vst [vmem:[%s3812_s30 + $0x198] sm:$0xff] %v324_v51  ;;  %v330_v54 = vld [vmem:[%s3807_s29 + $0x510] sm:$0xff] }
  0x2c   : > { %327 = vst [vmem:[%s3812_s30 + $0x1a0] sm:$0xff] %v326_v52  ;;  %329 = vst [vmem:[%s3812_s30 + $0x1a8] sm:$0xff] %v328_v53  ;;  %v332_v55 = vld [vmem:[%s3807_s29 + $0x518] sm:$0xff]  ;;  %v334_v56 = vld [vmem:[%s3807_s29 + $0x540] sm:$0xff] }
  0x2d   : > { %331 = vst [vmem:[%s3812_s30 + $0x1b0] sm:$0xff] %v330_v54  ;;  %333 = vst [vmem:[%s3812_s30 + $0x1b8] sm:$0xff] %v332_v55  ;;  %v336_v57 = vld [vmem:[%s3807_s29 + $0x548] sm:$0xff]  ;;  %v338_v58 = vld [vmem:[%s3807_s29 + $0x570] sm:$0xff] }
  0x2e   : > { %335 = vst [vmem:[%s3812_s30 + $0x1c0] sm:$0xff] %v334_v56  ;;  %v340_v59 = vld [vmem:[%s3807_s29 + $0x578] sm:$0xff]  ;;  %337 = vst [vmem:[%s3812_s30 + $0x1c8] sm:$0xff] %v336_v57  ;;  %v342_v60 = vld [vmem:[%s3807_s29 + $0x5a0] sm:$0xff] }
  0x2f   : > { %339 = vst [vmem:[%s3812_s30 + $0x1d0] sm:$0xff] %v338_v58  ;;  %341 = vst [vmem:[%s3812_s30 + $0x1d8] sm:$0xff] %v340_v59  ;;  %v344_v61 = vld [vmem:[%s3807_s29 + $0x5a8] sm:$0xff]  ;;  %v346_v62 = vld [vmem:[%s3807_s29 + $0x5d0] sm:$0xff] }
  0x30   : > { %343 = vst [vmem:[%s3812_s30 + $0x1e0] sm:$0xff] %v342_v60  ;;  %345 = vst [vmem:[%s3812_s30 + $0x1e8] sm:$0xff] %v344_v61  ;;  %v348_v63 = vld [vmem:[%s3807_s29 + $0x5d8] sm:$0xff]  ;;  %v350_v0 = vld [vmem:[%s3807_s29 + $0x600] sm:$0xff] }
  0x31   : > { %347 = vst [vmem:[%s3812_s30 + $0x1f0] sm:$0xff] %v346_v62  ;;  %v352_v1 = vld [vmem:[%s3807_s29 + $0x608] sm:$0xff]  ;;  %349 = vst [vmem:[%s3812_s30 + $0x1f8] sm:$0xff] %v348_v63  ;;  %v354_v2 = vld [vmem:[%s3807_s29 + $0x630] sm:$0xff] }
  0x32   : > { %351 = vst [vmem:[%s3812_s30 + $0x200] sm:$0xff] %v350_v0  ;;  %353 = vst [vmem:[%s3812_s30 + $0x208] sm:$0xff] %v352_v1  ;;  %v356_v3 = vld [vmem:[%s3807_s29 + $0x638] sm:$0xff]  ;;  %v358_v4 = vld [vmem:[%s3807_s29 + $0x660] sm:$0xff] }
  0x33   : > { %355 = vst [vmem:[%s3812_s30 + $0x210] sm:$0xff] %v354_v2  ;;  %357 = vst [vmem:[%s3812_s30 + $0x218] sm:$0xff] %v356_v3  ;;  %v360_v5 = vld [vmem:[%s3807_s29 + $0x668] sm:$0xff]  ;;  %v362_v6 = vld [vmem:[%s3807_s29 + $0x690] sm:$0xff] }
  0x34   : > { %359 = vst [vmem:[%s3812_s30 + $0x220] sm:$0xff] %v358_v4  ;;  %v364_v7 = vld [vmem:[%s3807_s29 + $0x698] sm:$0xff]  ;;  %361 = vst [vmem:[%s3812_s30 + $0x228] sm:$0xff] %v360_v5  ;;  %v366_v8 = vld [vmem:[%s3807_s29 + $0x6c0] sm:$0xff] }
  0x35   : > { %363 = vst [vmem:[%s3812_s30 + $0x230] sm:$0xff] %v362_v6  ;;  %365 = vst [vmem:[%s3812_s30 + $0x238] sm:$0xff] %v364_v7  ;;  %v368_v9 = vld [vmem:[%s3807_s29 + $0x6c8] sm:$0xff]  ;;  %v370_v10 = vld [vmem:[%s3807_s29 + $0x6f0] sm:$0xff] }
  0x36   : > { %367 = vst [vmem:[%s3812_s30 + $0x240] sm:$0xff] %v366_v8  ;;  %369 = vst [vmem:[%s3812_s30 + $0x248] sm:$0xff] %v368_v9  ;;  %v372_v11 = vld [vmem:[%s3807_s29 + $0x6f8] sm:$0xff]  ;;  %v374_v12 = vld [vmem:[%s3807_s29 + $0x720] sm:$0xff] }
  0x37   : > { %371 = vst [vmem:[%s3812_s30 + $0x250] sm:$0xff] %v370_v10  ;;  %v376_v13 = vld [vmem:[%s3807_s29 + $0x728] sm:$0xff]  ;;  %373 = vst [vmem:[%s3812_s30 + $0x258] sm:$0xff] %v372_v11  ;;  %v378_v14 = vld [vmem:[%s3807_s29 + $0x750] sm:$0xff] }
  0x38   : > { %375 = vst [vmem:[%s3812_s30 + $0x260] sm:$0xff] %v374_v12  ;;  %377 = vst [vmem:[%s3812_s30 + $0x268] sm:$0xff] %v376_v13  ;;  %v380_v15 = vld [vmem:[%s3807_s29 + $0x758] sm:$0xff]  ;;  %v382_v16 = vld [vmem:[%s3807_s29 + $0x780] sm:$0xff] }
  0x39   : > { %379 = vst [vmem:[%s3812_s30 + $0x270] sm:$0xff] %v378_v14  ;;  %381 = vst [vmem:[%s3812_s30 + $0x278] sm:$0xff] %v380_v15  ;;  %v384_v17 = vld [vmem:[%s3807_s29 + $0x788] sm:$0xff]  ;;  %v386_v18 = vld [vmem:[%s3807_s29 + $0x7b0] sm:$0xff] }
  0x3a   : > { %383 = vst [vmem:[%s3812_s30 + $0x280] sm:$0xff] %v382_v16  ;;  %v388_v19 = vld [vmem:[%s3807_s29 + $0x7b8] sm:$0xff]  ;;  %385 = vst [vmem:[%s3812_s30 + $0x288] sm:$0xff] %v384_v17  ;;  %v390_v20 = vld [vmem:[%s3807_s29 + $0x7e0] sm:$0xff] }
  0x3b   : > { %387 = vst [vmem:[%s3812_s30 + $0x290] sm:$0xff] %v386_v18  ;;  %389 = vst [vmem:[%s3812_s30 + $0x298] sm:$0xff] %v388_v19  ;;  %v392_v21 = vld [vmem:[%s3807_s29 + $0x7e8] sm:$0xff]  ;;  %v394_v22 = vld [vmem:[%s3807_s29 + $0x810] sm:$0xff] }
  0x3c   : > { %391 = vst [vmem:[%s3812_s30 + $0x2a0] sm:$0xff] %v390_v20  ;;  %393 = vst [vmem:[%s3812_s30 + $0x2a8] sm:$0xff] %v392_v21  ;;  %v396_v23 = vld [vmem:[%s3807_s29 + $0x818] sm:$0xff]  ;;  %v398_v24 = vld [vmem:[%s3807_s29 + $0x840] sm:$0xff] }
  0x3d   : > { %395 = vst [vmem:[%s3812_s30 + $0x2b0] sm:$0xff] %v394_v22  ;;  %v400_v25 = vld [vmem:[%s3807_s29 + $0x848] sm:$0xff]  ;;  %397 = vst [vmem:[%s3812_s30 + $0x2b8] sm:$0xff] %v396_v23  ;;  %v402_v26 = vld [vmem:[%s3807_s29 + $0x870] sm:$0xff] }
  0x3e   : > { %399 = vst [vmem:[%s3812_s30 + $0x2c0] sm:$0xff] %v398_v24  ;;  %401 = vst [vmem:[%s3812_s30 + $0x2c8] sm:$0xff] %v400_v25  ;;  %v404_v27 = vld [vmem:[%s3807_s29 + $0x878] sm:$0xff]  ;;  %v406_v28 = vld [vmem:[%s3807_s29 + $0x8a0] sm:$0xff] }
  0x3f   : > { %403 = vst [vmem:[%s3812_s30 + $0x2d0] sm:$0xff] %v402_v26  ;;  %405 = vst [vmem:[%s3812_s30 + $0x2d8] sm:$0xff] %v404_v27  ;;  %v408_v29 = vld [vmem:[%s3807_s29 + $0x8a8] sm:$0xff]  ;;  %v410_v30 = vld [vmem:[%s3807_s29 + $0x8d0] sm:$0xff] }
  0x40   : > { %407 = vst [vmem:[%s3812_s30 + $0x2e0] sm:$0xff] %v406_v28  ;;  %v412_v31 = vld [vmem:[%s3807_s29 + $0x8d8] sm:$0xff]  ;;  %409 = vst [vmem:[%s3812_s30 + $0x2e8] sm:$0xff] %v408_v29  ;;  %v414_v32 = vld [vmem:[%s3807_s29 + $0x900] sm:$0xff] }
  0x41   : > { %411 = vst [vmem:[%s3812_s30 + $0x2f0] sm:$0xff] %v410_v30  ;;  %413 = vst [vmem:[%s3812_s30 + $0x2f8] sm:$0xff] %v412_v31  ;;  %v416_v33 = vld [vmem:[%s3807_s29 + $0x908] sm:$0xff]  ;;  %v418_v34 = vld [vmem:[%s3807_s29 + $0x930] sm:$0xff] }
  0x42   : > { %415 = vst [vmem:[%s3812_s30 + $0x300] sm:$0xff] %v414_v32  ;;  %417 = vst [vmem:[%s3812_s30 + $0x308] sm:$0xff] %v416_v33  ;;  %v420_v35 = vld [vmem:[%s3807_s29 + $0x938] sm:$0xff]  ;;  %v422_v36 = vld [vmem:[%s3807_s29 + $0x960] sm:$0xff] }
  0x43   : > { %419 = vst [vmem:[%s3812_s30 + $0x310] sm:$0xff] %v418_v34  ;;  %v424_v37 = vld [vmem:[%s3807_s29 + $0x968] sm:$0xff]  ;;  %421 = vst [vmem:[%s3812_s30 + $0x318] sm:$0xff] %v420_v35  ;;  %v426_v38 = vld [vmem:[%s3807_s29 + $0x990] sm:$0xff] }
  0x44   : > { %423 = vst [vmem:[%s3812_s30 + $0x320] sm:$0xff] %v422_v36  ;;  %425 = vst [vmem:[%s3812_s30 + $0x328] sm:$0xff] %v424_v37  ;;  %v428_v39 = vld [vmem:[%s3807_s29 + $0x998] sm:$0xff]  ;;  %v430_v40 = vld [vmem:[%s3807_s29 + $0x9c0] sm:$0xff] }
  0x45   : > { %427 = vst [vmem:[%s3812_s30 + $0x330] sm:$0xff] %v426_v38  ;;  %429 = vst [vmem:[%s3812_s30 + $0x338] sm:$0xff] %v428_v39  ;;  %v432_v41 = vld [vmem:[%s3807_s29 + $0x9c8] sm:$0xff]  ;;  %v434_v42 = vld [vmem:[%s3807_s29 + $0x9f0] sm:$0xff] }
  0x46   : > { %431 = vst [vmem:[%s3812_s30 + $0x340] sm:$0xff] %v430_v40  ;;  %v436_v43 = vld [vmem:[%s3807_s29 + $0x9f8] sm:$0xff]  ;;  %433 = vst [vmem:[%s3812_s30 + $0x348] sm:$0xff] %v432_v41  ;;  %v438_v44 = vld [vmem:[%s3807_s29 + $0xa20] sm:$0xff] }
  0x47   : > { %435 = vst [vmem:[%s3812_s30 + $0x350] sm:$0xff] %v434_v42  ;;  %437 = vst [vmem:[%s3812_s30 + $0x358] sm:$0xff] %v436_v43  ;;  %v440_v45 = vld [vmem:[%s3807_s29 + $0xa28] sm:$0xff]  ;;  %v442_v46 = vld [vmem:[%s3807_s29 + $0xa50] sm:$0xff] }
  0x48   : > { %439 = vst [vmem:[%s3812_s30 + $0x360] sm:$0xff] %v438_v44  ;;  %441 = vst [vmem:[%s3812_s30 + $0x368] sm:$0xff] %v440_v45  ;;  %v444_v47 = vld [vmem:[%s3807_s29 + $0xa58] sm:$0xff]  ;;  %v446_v48 = vld [vmem:[%s3807_s29 + $0xa80] sm:$0xff] }
  0x49   : > { %443 = vst [vmem:[%s3812_s30 + $0x370] sm:$0xff] %v442_v46  ;;  %v448_v49 = vld [vmem:[%s3807_s29 + $0xa88] sm:$0xff]  ;;  %445 = vst [vmem:[%s3812_s30 + $0x378] sm:$0xff] %v444_v47  ;;  %v450_v50 = vld [vmem:[%s3807_s29 + $0xab0] sm:$0xff] }
  0x4a   : > { %447 = vst [vmem:[%s3812_s30 + $0x380] sm:$0xff] %v446_v48  ;;  %449 = vst [vmem:[%s3812_s30 + $0x388] sm:$0xff] %v448_v49  ;;  %v452_v51 = vld [vmem:[%s3807_s29 + $0xab8] sm:$0xff]  ;;  %v454_v52 = vld [vmem:[%s3807_s29 + $0xae0] sm:$0xff] }
  0x4b   : > { %451 = vst [vmem:[%s3812_s30 + $0x390] sm:$0xff] %v450_v50  ;;  %453 = vst [vmem:[%s3812_s30 + $0x398] sm:$0xff] %v452_v51  ;;  %v456_v53 = vld [vmem:[%s3807_s29 + $0xae8] sm:$0xff]  ;;  %v458_v54 = vld [vmem:[%s3807_s29 + $0xb10] sm:$0xff] }
  0x4c   : > { %455 = vst [vmem:[%s3812_s30 + $0x3a0] sm:$0xff] %v454_v52  ;;  %v460_v55 = vld [vmem:[%s3807_s29 + $0xb18] sm:$0xff]  ;;  %457 = vst [vmem:[%s3812_s30 + $0x3a8] sm:$0xff] %v456_v53  ;;  %v462_v56 = vld [vmem:[%s3807_s29 + $0xb40] sm:$0xff] }
  0x4d   : > { %459 = vst [vmem:[%s3812_s30 + $0x3b0] sm:$0xff] %v458_v54  ;;  %461 = vst [vmem:[%s3812_s30 + $0x3b8] sm:$0xff] %v460_v55  ;;  %v464_v57 = vld [vmem:[%s3807_s29 + $0xb48] sm:$0xff]  ;;  %v466_v58 = vld [vmem:[%s3807_s29 + $0xb70] sm:$0xff] }
  0x4e   : > { %463 = vst [vmem:[%s3812_s30 + $0x3c0] sm:$0xff] %v462_v56  ;;  %465 = vst [vmem:[%s3812_s30 + $0x3c8] sm:$0xff] %v464_v57  ;;  %v468_v59 = vld [vmem:[%s3807_s29 + $0xb78] sm:$0xff]  ;;  %v470_v60 = vld [vmem:[%s3807_s29 + $0xba0] sm:$0xff] }
  0x4f   : > { %467 = vst [vmem:[%s3812_s30 + $0x3d0] sm:$0xff] %v466_v58  ;;  %v472_v61 = vld [vmem:[%s3807_s29 + $0xba8] sm:$0xff]  ;;  %469 = vst [vmem:[%s3812_s30 + $0x3d8] sm:$0xff] %v468_v59  ;;  %v474_v62 = vld [vmem:[%s3807_s29 + $0xbd0] sm:$0xff] }
  0x50   : > { %471 = vst [vmem:[%s3812_s30 + $0x3e0] sm:$0xff] %v470_v60  ;;  %473 = vst [vmem:[%s3812_s30 + $0x3e8] sm:$0xff] %v472_v61  ;;  %v476_v63 = vld [vmem:[%s3807_s29 + $0xbd8] sm:$0xff]  ;;  %v478_v0 = vld [vmem:[%s3807_s29 + $0xc00] sm:$0xff] }
  0x51   : > { %475 = vst [vmem:[%s3812_s30 + $0x3f0] sm:$0xff] %v474_v62  ;;  %477 = vst [vmem:[%s3812_s30 + $0x3f8] sm:$0xff] %v476_v63  ;;  %v480_v1 = vld [vmem:[%s3807_s29 + $0xc08] sm:$0xff]  ;;  %v482_v2 = vld [vmem:[%s3807_s29 + $0xc30] sm:$0xff] }
  0x52   : > { %479 = vst [vmem:[%s3812_s30 + $0x400] sm:$0xff] %v478_v0  ;;  %v484_v3 = vld [vmem:[%s3807_s29 + $0xc38] sm:$0xff]  ;;  %481 = vst [vmem:[%s3812_s30 + $0x408] sm:$0xff] %v480_v1  ;;  %v486_v4 = vld [vmem:[%s3807_s29 + $0xc60] sm:$0xff] }
  0x53   : > { %483 = vst [vmem:[%s3812_s30 + $0x410] sm:$0xff] %v482_v2  ;;  %485 = vst [vmem:[%s3812_s30 + $0x418] sm:$0xff] %v484_v3  ;;  %v488_v5 = vld [vmem:[%s3807_s29 + $0xc68] sm:$0xff]  ;;  %v490_v6 = vld [vmem:[%s3807_s29 + $0xc90] sm:$0xff] }
  0x54   : > { %487 = vst [vmem:[%s3812_s30 + $0x420] sm:$0xff] %v486_v4  ;;  %489 = vst [vmem:[%s3812_s30 + $0x428] sm:$0xff] %v488_v5  ;;  %v492_v7 = vld [vmem:[%s3807_s29 + $0xc98] sm:$0xff]  ;;  %v494_v8 = vld [vmem:[%s3807_s29 + $0xcc0] sm:$0xff] }
  0x55   : > { %491 = vst [vmem:[%s3812_s30 + $0x430] sm:$0xff] %v490_v6  ;;  %v496_v9 = vld [vmem:[%s3807_s29 + $0xcc8] sm:$0xff]  ;;  %493 = vst [vmem:[%s3812_s30 + $0x438] sm:$0xff] %v492_v7  ;;  %v498_v10 = vld [vmem:[%s3807_s29 + $0xcf0] sm:$0xff] }
  0x56   : > { %495 = vst [vmem:[%s3812_s30 + $0x440] sm:$0xff] %v494_v8  ;;  %497 = vst [vmem:[%s3812_s30 + $0x448] sm:$0xff] %v496_v9  ;;  %v500_v11 = vld [vmem:[%s3807_s29 + $0xcf8] sm:$0xff]  ;;  %v502_v12 = vld [vmem:[%s3807_s29 + $0xd20] sm:$0xff] }
  0x57   : > { %499 = vst [vmem:[%s3812_s30 + $0x450] sm:$0xff] %v498_v10  ;;  %501 = vst [vmem:[%s3812_s30 + $0x458] sm:$0xff] %v500_v11  ;;  %v504_v13 = vld [vmem:[%s3807_s29 + $0xd28] sm:$0xff]  ;;  %v506_v14 = vld [vmem:[%s3807_s29 + $0xd50] sm:$0xff] }
  0x58   : > { %503 = vst [vmem:[%s3812_s30 + $0x460] sm:$0xff] %v502_v12  ;;  %v508_v15 = vld [vmem:[%s3807_s29 + $0xd58] sm:$0xff]  ;;  %505 = vst [vmem:[%s3812_s30 + $0x468] sm:$0xff] %v504_v13  ;;  %v510_v16 = vld [vmem:[%s3807_s29 + $0xd80] sm:$0xff] }
  0x59   : > { %507 = vst [vmem:[%s3812_s30 + $0x470] sm:$0xff] %v506_v14  ;;  %509 = vst [vmem:[%s3812_s30 + $0x478] sm:$0xff] %v508_v15  ;;  %v512_v17 = vld [vmem:[%s3807_s29 + $0xd88] sm:$0xff]  ;;  %v514_v18 = vld [vmem:[%s3807_s29 + $0xdb0] sm:$0xff] }
  0x5a   : > { %511 = vst [vmem:[%s3812_s30 + $0x480] sm:$0xff] %v510_v16  ;;  %513 = vst [vmem:[%s3812_s30 + $0x488] sm:$0xff] %v512_v17  ;;  %v516_v19 = vld [vmem:[%s3807_s29 + $0xdb8] sm:$0xff]  ;;  %v518_v20 = vld [vmem:[%s3807_s29 + $0xde0] sm:$0xff] }
  0x5b   : > { %515 = vst [vmem:[%s3812_s30 + $0x490] sm:$0xff] %v514_v18  ;;  %v520_v21 = vld [vmem:[%s3807_s29 + $0xde8] sm:$0xff]  ;;  %517 = vst [vmem:[%s3812_s30 + $0x498] sm:$0xff] %v516_v19  ;;  %v522_v22 = vld [vmem:[%s3807_s29 + $0xe10] sm:$0xff] }
  0x5c   : > { %519 = vst [vmem:[%s3812_s30 + $0x4a0] sm:$0xff] %v518_v20  ;;  %521 = vst [vmem:[%s3812_s30 + $0x4a8] sm:$0xff] %v520_v21  ;;  %v524_v23 = vld [vmem:[%s3807_s29 + $0xe18] sm:$0xff]  ;;  %v526_v24 = vld [vmem:[%s3807_s29 + $0xe40] sm:$0xff] }
  0x5d   : > { %523 = vst [vmem:[%s3812_s30 + $0x4b0] sm:$0xff] %v522_v22  ;;  %525 = vst [vmem:[%s3812_s30 + $0x4b8] sm:$0xff] %v524_v23  ;;  %v528_v25 = vld [vmem:[%s3807_s29 + $0xe48] sm:$0xff]  ;;  %v530_v26 = vld [vmem:[%s3807_s29 + $0xe70] sm:$0xff] }
  0x5e   : > { %527 = vst [vmem:[%s3812_s30 + $0x4c0] sm:$0xff] %v526_v24  ;;  %v532_v27 = vld [vmem:[%s3807_s29 + $0xe78] sm:$0xff]  ;;  %529 = vst [vmem:[%s3812_s30 + $0x4c8] sm:$0xff] %v528_v25  ;;  %v534_v28 = vld [vmem:[%s3807_s29 + $0xea0] sm:$0xff] }
  0x5f   : > { %531 = vst [vmem:[%s3812_s30 + $0x4d0] sm:$0xff] %v530_v26  ;;  %533 = vst [vmem:[%s3812_s30 + $0x4d8] sm:$0xff] %v532_v27  ;;  %v536_v29 = vld [vmem:[%s3807_s29 + $0xea8] sm:$0xff]  ;;  %v538_v30 = vld [vmem:[%s3807_s29 + $0xed0] sm:$0xff] }
  0x60   : > { %535 = vst [vmem:[%s3812_s30 + $0x4e0] sm:$0xff] %v534_v28  ;;  %537 = vst [vmem:[%s3812_s30 + $0x4e8] sm:$0xff] %v536_v29  ;;  %v540_v31 = vld [vmem:[%s3807_s29 + $0xed8] sm:$0xff]  ;;  %v542_v32 = vld [vmem:[%s3807_s29 + $0xf00] sm:$0xff] }
  0x61   : > { %539 = vst [vmem:[%s3812_s30 + $0x4f0] sm:$0xff] %v538_v30  ;;  %v544_v33 = vld [vmem:[%s3807_s29 + $0xf08] sm:$0xff]  ;;  %541 = vst [vmem:[%s3812_s30 + $0x4f8] sm:$0xff] %v540_v31  ;;  %v546_v34 = vld [vmem:[%s3807_s29 + $0xf30] sm:$0xff] }
  0x62   : > { %543 = vst [vmem:[%s3812_s30 + $0x500] sm:$0xff] %v542_v32  ;;  %545 = vst [vmem:[%s3812_s30 + $0x508] sm:$0xff] %v544_v33  ;;  %v548_v35 = vld [vmem:[%s3807_s29 + $0xf38] sm:$0xff]  ;;  %v550_v36 = vld [vmem:[%s3807_s29 + $0xf60] sm:$0xff] }
  0x63   : > { %547 = vst [vmem:[%s3812_s30 + $0x510] sm:$0xff] %v546_v34  ;;  %549 = vst [vmem:[%s3812_s30 + $0x518] sm:$0xff] %v548_v35  ;;  %v552_v37 = vld [vmem:[%s3807_s29 + $0xf68] sm:$0xff]  ;;  %v554_v38 = vld [vmem:[%s3807_s29 + $0xf90] sm:$0xff] }
  0x64   : > { %551 = vst [vmem:[%s3812_s30 + $0x520] sm:$0xff] %v550_v36  ;;  %v556_v39 = vld [vmem:[%s3807_s29 + $0xf98] sm:$0xff]  ;;  %553 = vst [vmem:[%s3812_s30 + $0x528] sm:$0xff] %v552_v37  ;;  %v558_v40 = vld [vmem:[%s3807_s29 + $0xfc0] sm:$0xff] }
  0x65   : > { %555 = vst [vmem:[%s3812_s30 + $0x530] sm:$0xff] %v554_v38  ;;  %557 = vst [vmem:[%s3812_s30 + $0x538] sm:$0xff] %v556_v39  ;;  %v560_v41 = vld [vmem:[%s3807_s29 + $0xfc8] sm:$0xff]  ;;  %v562_v42 = vld [vmem:[%s3807_s29 + $0xff0] sm:$0xff] }
  0x66   : > { %559 = vst [vmem:[%s3812_s30 + $0x540] sm:$0xff] %v558_v40  ;;  %561 = vst [vmem:[%s3812_s30 + $0x548] sm:$0xff] %v560_v41  ;;  %v564_v43 = vld [vmem:[%s3807_s29 + $0xff8] sm:$0xff]  ;;  %v566_v44 = vld [vmem:[%s3807_s29 + $0x1020] sm:$0xff] }
  0x67   : > { %563 = vst [vmem:[%s3812_s30 + $0x550] sm:$0xff] %v562_v42  ;;  %v568_v45 = vld [vmem:[%s3807_s29 + $0x1028] sm:$0xff]  ;;  %565 = vst [vmem:[%s3812_s30 + $0x558] sm:$0xff] %v564_v43  ;;  %v570_v46 = vld [vmem:[%s3807_s29 + $0x1050] sm:$0xff] }
  0x68   : > { %567 = vst [vmem:[%s3812_s30 + $0x560] sm:$0xff] %v566_v44  ;;  %569 = vst [vmem:[%s3812_s30 + $0x568] sm:$0xff] %v568_v45  ;;  %v572_v47 = vld [vmem:[%s3807_s29 + $0x1058] sm:$0xff]  ;;  %v574_v48 = vld [vmem:[%s3807_s29 + $0x1080] sm:$0xff] }
  0x69   : > { %571 = vst [vmem:[%s3812_s30 + $0x570] sm:$0xff] %v570_v46  ;;  %573 = vst [vmem:[%s3812_s30 + $0x578] sm:$0xff] %v572_v47  ;;  %v576_v49 = vld [vmem:[%s3807_s29 + $0x1088] sm:$0xff]  ;;  %v578_v50 = vld [vmem:[%s3807_s29 + $0x10b0] sm:$0xff] }
  0x6a   : > { %575 = vst [vmem:[%s3812_s30 + $0x580] sm:$0xff] %v574_v48  ;;  %v580_v51 = vld [vmem:[%s3807_s29 + $0x10b8] sm:$0xff]  ;;  %577 = vst [vmem:[%s3812_s30 + $0x588] sm:$0xff] %v576_v49  ;;  %v582_v52 = vld [vmem:[%s3807_s29 + $0x10e0] sm:$0xff] }
  0x6b   : > { %579 = vst [vmem:[%s3812_s30 + $0x590] sm:$0xff] %v578_v50  ;;  %581 = vst [vmem:[%s3812_s30 + $0x598] sm:$0xff] %v580_v51  ;;  %v584_v53 = vld [vmem:[%s3807_s29 + $0x10e8] sm:$0xff]  ;;  %v586_v54 = vld [vmem:[%s3807_s29 + $0x1110] sm:$0xff] }
  0x6c   : > { %583 = vst [vmem:[%s3812_s30 + $0x5a0] sm:$0xff] %v582_v52  ;;  %585 = vst [vmem:[%s3812_s30 + $0x5a8] sm:$0xff] %v584_v53  ;;  %v588_v55 = vld [vmem:[%s3807_s29 + $0x1118] sm:$0xff]  ;;  %v590_v56 = vld [vmem:[%s3807_s29 + $0x1140] sm:$0xff] }
  0x6d   : > { %587 = vst [vmem:[%s3812_s30 + $0x5b0] sm:$0xff] %v586_v54  ;;  %v592_v57 = vld [vmem:[%s3807_s29 + $0x1148] sm:$0xff]  ;;  %589 = vst [vmem:[%s3812_s30 + $0x5b8] sm:$0xff] %v588_v55  ;;  %v594_v58 = vld [vmem:[%s3807_s29 + $0x1170] sm:$0xff] }
  0x6e   : > { %591 = vst [vmem:[%s3812_s30 + $0x5c0] sm:$0xff] %v590_v56  ;;  %593 = vst [vmem:[%s3812_s30 + $0x5c8] sm:$0xff] %v592_v57  ;;  %v596_v59 = vld [vmem:[%s3807_s29 + $0x1178] sm:$0xff]  ;;  %v598_v60 = vld [vmem:[%s3807_s29 + $0x11a0] sm:$0xff] }
  0x6f   : > { %595 = vst [vmem:[%s3812_s30 + $0x5d0] sm:$0xff] %v594_v58  ;;  %597 = vst [vmem:[%s3812_s30 + $0x5d8] sm:$0xff] %v596_v59  ;;  %v600_v61 = vld [vmem:[%s3807_s29 + $0x11a8] sm:$0xff]  ;;  %v602_v62 = vld [vmem:[%s3807_s29 + $0x11d0] sm:$0xff] }
  0x70   : > { %599 = vst [vmem:[%s3812_s30 + $0x5e0] sm:$0xff] %v598_v60  ;;  %v604_v63 = vld [vmem:[%s3807_s29 + $0x11d8] sm:$0xff]  ;;  %601 = vst [vmem:[%s3812_s30 + $0x5e8] sm:$0xff] %v600_v61  ;;  %v606_v0 = vld [vmem:[%s3807_s29 + $0x1200] sm:$0xff] }
  0x71   : > { %603 = vst [vmem:[%s3812_s30 + $0x5f0] sm:$0xff] %v602_v62  ;;  %605 = vst [vmem:[%s3812_s30 + $0x5f8] sm:$0xff] %v604_v63  ;;  %v608_v1 = vld [vmem:[%s3807_s29 + $0x1208] sm:$0xff]  ;;  %v610_v2 = vld [vmem:[%s3807_s29 + $0x1230] sm:$0xff] }
  0x72   : > { %607 = vst [vmem:[%s3812_s30 + $0x600] sm:$0xff] %v606_v0  ;;  %609 = vst [vmem:[%s3812_s30 + $0x608] sm:$0xff] %v608_v1  ;;  %v612_v3 = vld [vmem:[%s3807_s29 + $0x1238] sm:$0xff]  ;;  %v614_v4 = vld [vmem:[%s3807_s29 + $0x1260] sm:$0xff] }
  0x73   : > { %611 = vst [vmem:[%s3812_s30 + $0x610] sm:$0xff] %v610_v2  ;;  %v616_v5 = vld [vmem:[%s3807_s29 + $0x1268] sm:$0xff]  ;;  %613 = vst [vmem:[%s3812_s30 + $0x618] sm:$0xff] %v612_v3  ;;  %v618_v6 = vld [vmem:[%s3807_s29 + $0x1290] sm:$0xff] }
  0x74   : > { %615 = vst [vmem:[%s3812_s30 + $0x620] sm:$0xff] %v614_v4  ;;  %617 = vst [vmem:[%s3812_s30 + $0x628] sm:$0xff] %v616_v5  ;;  %v620_v7 = vld [vmem:[%s3807_s29 + $0x1298] sm:$0xff]  ;;  %v622_v8 = vld [vmem:[%s3807_s29 + $0x12c0] sm:$0xff] }
  0x75   : > { %619 = vst [vmem:[%s3812_s30 + $0x630] sm:$0xff] %v618_v6  ;;  %621 = vst [vmem:[%s3812_s30 + $0x638] sm:$0xff] %v620_v7  ;;  %v624_v9 = vld [vmem:[%s3807_s29 + $0x12c8] sm:$0xff]  ;;  %v626_v10 = vld [vmem:[%s3807_s29 + $0x12f0] sm:$0xff] }
  0x76   : > { %623 = vst [vmem:[%s3812_s30 + $0x640] sm:$0xff] %v622_v8  ;;  %v628_v11 = vld [vmem:[%s3807_s29 + $0x12f8] sm:$0xff]  ;;  %625 = vst [vmem:[%s3812_s30 + $0x648] sm:$0xff] %v624_v9  ;;  %v630_v12 = vld [vmem:[%s3807_s29 + $0x1320] sm:$0xff] }
  0x77   : > { %627 = vst [vmem:[%s3812_s30 + $0x650] sm:$0xff] %v626_v10  ;;  %629 = vst [vmem:[%s3812_s30 + $0x658] sm:$0xff] %v628_v11  ;;  %v632_v13 = vld [vmem:[%s3807_s29 + $0x1328] sm:$0xff]  ;;  %v634_v14 = vld [vmem:[%s3807_s29 + $0x1350] sm:$0xff] }
  0x78   : > { %631 = vst [vmem:[%s3812_s30 + $0x660] sm:$0xff] %v630_v12  ;;  %633 = vst [vmem:[%s3812_s30 + $0x668] sm:$0xff] %v632_v13  ;;  %v636_v15 = vld [vmem:[%s3807_s29 + $0x1358] sm:$0xff]  ;;  %v638_v16 = vld [vmem:[%s3807_s29 + $0x1380] sm:$0xff] }
  0x79   : > { %635 = vst [vmem:[%s3812_s30 + $0x670] sm:$0xff] %v634_v14  ;;  %v640_v17 = vld [vmem:[%s3807_s29 + $0x1388] sm:$0xff]  ;;  %637 = vst [vmem:[%s3812_s30 + $0x678] sm:$0xff] %v636_v15  ;;  %v642_v18 = vld [vmem:[%s3807_s29 + $0x13b0] sm:$0xff] }
  0x7a   : > { %639 = vst [vmem:[%s3812_s30 + $0x680] sm:$0xff] %v638_v16  ;;  %641 = vst [vmem:[%s3812_s30 + $0x688] sm:$0xff] %v640_v17  ;;  %v644_v19 = vld [vmem:[%s3807_s29 + $0x13b8] sm:$0xff]  ;;  %v646_v20 = vld [vmem:[%s3807_s29 + $0x13e0] sm:$0xff] }
  0x7b   : > { %643 = vst [vmem:[%s3812_s30 + $0x690] sm:$0xff] %v642_v18  ;;  %645 = vst [vmem:[%s3812_s30 + $0x698] sm:$0xff] %v644_v19  ;;  %v648_v21 = vld [vmem:[%s3807_s29 + $0x13e8] sm:$0xff]  ;;  %v650_v22 = vld [vmem:[%s3807_s29 + $0x1410] sm:$0xff] }
  0x7c   : > { %647 = vst [vmem:[%s3812_s30 + $0x6a0] sm:$0xff] %v646_v20  ;;  %v652_v23 = vld [vmem:[%s3807_s29 + $0x1418] sm:$0xff]  ;;  %649 = vst [vmem:[%s3812_s30 + $0x6a8] sm:$0xff] %v648_v21  ;;  %v654_v24 = vld [vmem:[%s3807_s29 + $0x1440] sm:$0xff] }
  0x7d   : > { %651 = vst [vmem:[%s3812_s30 + $0x6b0] sm:$0xff] %v650_v22  ;;  %653 = vst [vmem:[%s3812_s30 + $0x6b8] sm:$0xff] %v652_v23  ;;  %v656_v25 = vld [vmem:[%s3807_s29 + $0x1448] sm:$0xff]  ;;  %v658_v26 = vld [vmem:[%s3807_s29 + $0x1470] sm:$0xff] }
  0x7e   : > { %655 = vst [vmem:[%s3812_s30 + $0x6c0] sm:$0xff] %v654_v24  ;;  %657 = vst [vmem:[%s3812_s30 + $0x6c8] sm:$0xff] %v656_v25  ;;  %v660_v27 = vld [vmem:[%s3807_s29 + $0x1478] sm:$0xff]  ;;  %v662_v28 = vld [vmem:[%s3807_s29 + $0x14a0] sm:$0xff] }
  0x7f   : > { %659 = vst [vmem:[%s3812_s30 + $0x6d0] sm:$0xff] %v658_v26  ;;  %v664_v29 = vld [vmem:[%s3807_s29 + $0x14a8] sm:$0xff]  ;;  %661 = vst [vmem:[%s3812_s30 + $0x6d8] sm:$0xff] %v660_v27  ;;  %v666_v30 = vld [vmem:[%s3807_s29 + $0x14d0] sm:$0xff] }
  0x80   : > { %663 = vst [vmem:[%s3812_s30 + $0x6e0] sm:$0xff] %v662_v28  ;;  %665 = vst [vmem:[%s3812_s30 + $0x6e8] sm:$0xff] %v664_v29  ;;  %v668_v31 = vld [vmem:[%s3807_s29 + $0x14d8] sm:$0xff]  ;;  %v670_v32 = vld [vmem:[%s3807_s29 + $0x1500] sm:$0xff] }
  0x81   : > { %667 = vst [vmem:[%s3812_s30 + $0x6f0] sm:$0xff] %v666_v30  ;;  %669 = vst [vmem:[%s3812_s30 + $0x6f8] sm:$0xff] %v668_v31  ;;  %v672_v33 = vld [vmem:[%s3807_s29 + $0x1508] sm:$0xff]  ;;  %v674_v34 = vld [vmem:[%s3807_s29 + $0x1530] sm:$0xff] }
  0x82   : > { %671 = vst [vmem:[%s3812_s30 + $0x700] sm:$0xff] %v670_v32  ;;  %v676_v35 = vld [vmem:[%s3807_s29 + $0x1538] sm:$0xff]  ;;  %673 = vst [vmem:[%s3812_s30 + $0x708] sm:$0xff] %v672_v33  ;;  %v678_v36 = vld [vmem:[%s3807_s29 + $0x1560] sm:$0xff] }
  0x83   : > { %675 = vst [vmem:[%s3812_s30 + $0x710] sm:$0xff] %v674_v34  ;;  %677 = vst [vmem:[%s3812_s30 + $0x718] sm:$0xff] %v676_v35  ;;  %v680_v37 = vld [vmem:[%s3807_s29 + $0x1568] sm:$0xff]  ;;  %v682_v38 = vld [vmem:[%s3807_s29 + $0x1590] sm:$0xff] }
  0x84   : > { %679 = vst [vmem:[%s3812_s30 + $0x720] sm:$0xff] %v678_v36  ;;  %681 = vst [vmem:[%s3812_s30 + $0x728] sm:$0xff] %v680_v37  ;;  %v684_v39 = vld [vmem:[%s3807_s29 + $0x1598] sm:$0xff]  ;;  %v686_v40 = vld [vmem:[%s3807_s29 + $0x15c0] sm:$0xff] }
  0x85   : > { %683 = vst [vmem:[%s3812_s30 + $0x730] sm:$0xff] %v682_v38  ;;  %v688_v41 = vld [vmem:[%s3807_s29 + $0x15c8] sm:$0xff]  ;;  %685 = vst [vmem:[%s3812_s30 + $0x738] sm:$0xff] %v684_v39  ;;  %v690_v42 = vld [vmem:[%s3807_s29 + $0x15f0] sm:$0xff] }
  0x86   : > { %687 = vst [vmem:[%s3812_s30 + $0x740] sm:$0xff] %v686_v40  ;;  %689 = vst [vmem:[%s3812_s30 + $0x748] sm:$0xff] %v688_v41  ;;  %v692_v43 = vld [vmem:[%s3807_s29 + $0x15f8] sm:$0xff]  ;;  %v694_v44 = vld [vmem:[%s3807_s29 + $0x1620] sm:$0xff] }
  0x87   : > { %691 = vst [vmem:[%s3812_s30 + $0x750] sm:$0xff] %v690_v42  ;;  %693 = vst [vmem:[%s3812_s30 + $0x758] sm:$0xff] %v692_v43  ;;  %v696_v45 = vld [vmem:[%s3807_s29 + $0x1628] sm:$0xff]  ;;  %v698_v46 = vld [vmem:[%s3807_s29 + $0x1650] sm:$0xff] }
  0x88   : > { %695 = vst [vmem:[%s3812_s30 + $0x760] sm:$0xff] %v694_v44  ;;  %v700_v47 = vld [vmem:[%s3807_s29 + $0x1658] sm:$0xff]  ;;  %697 = vst [vmem:[%s3812_s30 + $0x768] sm:$0xff] %v696_v45  ;;  %v702_v48 = vld [vmem:[%s3807_s29 + $0x1680] sm:$0xff] }
  0x89   : > { %699 = vst [vmem:[%s3812_s30 + $0x770] sm:$0xff] %v698_v46  ;;  %701 = vst [vmem:[%s3812_s30 + $0x778] sm:$0xff] %v700_v47  ;;  %v704_v49 = vld [vmem:[%s3807_s29 + $0x1688] sm:$0xff]  ;;  %v706_v50 = vld [vmem:[%s3807_s29 + $0x16b0] sm:$0xff] }
  0x8a   : > { %703 = vst [vmem:[%s3812_s30 + $0x780] sm:$0xff] %v702_v48  ;;  %705 = vst [vmem:[%s3812_s30 + $0x788] sm:$0xff] %v704_v49  ;;  %v708_v51 = vld [vmem:[%s3807_s29 + $0x16b8] sm:$0xff]  ;;  %v710_v52 = vld [vmem:[%s3807_s29 + $0x16e0] sm:$0xff] }
  0x8b   : > { %707 = vst [vmem:[%s3812_s30 + $0x790] sm:$0xff] %v706_v50  ;;  %v712_v53 = vld [vmem:[%s3807_s29 + $0x16e8] sm:$0xff]  ;;  %709 = vst [vmem:[%s3812_s30 + $0x798] sm:$0xff] %v708_v51  ;;  %v714_v54 = vld [vmem:[%s3807_s29 + $0x1710] sm:$0xff] }
  0x8c   : > { %711 = vst [vmem:[%s3812_s30 + $0x7a0] sm:$0xff] %v710_v52  ;;  %713 = vst [vmem:[%s3812_s30 + $0x7a8] sm:$0xff] %v712_v53  ;;  %v716_v55 = vld [vmem:[%s3807_s29 + $0x1718] sm:$0xff]  ;;  %v718_v56 = vld [vmem:[%s3807_s29 + $0x1740] sm:$0xff] }
  0x8d   : > { %715 = vst [vmem:[%s3812_s30 + $0x7b0] sm:$0xff] %v714_v54  ;;  %717 = vst [vmem:[%s3812_s30 + $0x7b8] sm:$0xff] %v716_v55  ;;  %v720_v57 = vld [vmem:[%s3807_s29 + $0x1748] sm:$0xff]  ;;  %v722_v58 = vld [vmem:[%s3807_s29 + $0x1770] sm:$0xff] }
  0x8e   : > { %719 = vst [vmem:[%s3812_s30 + $0x7c0] sm:$0xff] %v718_v56  ;;  %v724_v59 = vld [vmem:[%s3807_s29 + $0x1778] sm:$0xff]  ;;  %721 = vst [vmem:[%s3812_s30 + $0x7c8] sm:$0xff] %v720_v57  ;;  %v726_v60 = vld [vmem:[%s3807_s29 + $0x17a0] sm:$0xff] }
  0x8f   : > { %723 = vst [vmem:[%s3812_s30 + $0x7d0] sm:$0xff] %v722_v58  ;;  %725 = vst [vmem:[%s3812_s30 + $0x7d8] sm:$0xff] %v724_v59  ;;  %v728_v61 = vld [vmem:[%s3807_s29 + $0x17a8] sm:$0xff]  ;;  %v730_v62 = vld [vmem:[%s3807_s29 + $0x17d0] sm:$0xff] }
  0x90   : > { %727 = vst [vmem:[%s3812_s30 + $0x7e0] sm:$0xff] %v726_v60  ;;  %729 = vst [vmem:[%s3812_s30 + $0x7e8] sm:$0xff] %v728_v61  ;;  %v732_v63 = vld [vmem:[%s3807_s29 + $0x17d8] sm:$0xff] }
  0x91   : > { %731 = vst [vmem:[%s3812_s30 + $0x7f0] sm:$0xff] %v730_v62  ;;  %733 = vst [vmem:[%s3812_s30 + $0x7f8] sm:$0xff] %v732_v63 }
  0x92 PF: > { %p2970_p6 = scmp.ge.s32.totalorder %s3737_s19, 1  ;;  %p754_p7 = scmp.lt.s32.totalorder %s3737_s19, 4 }
  0x94   : > { %p755_p8 = pnand %p2970_p6, %p754_p7 }
  0x95   : > { %s761_s5 = sand.u32 (!%p755_p8), 1, %s3721_s15   ;;  %v4329_v0 = vld [vmem:[%s4650_s0] sm:$0xff] (!%p755_p8)  ;;  %s2972_s21 = sshll.u32 (!%p755_p8), %s3729_s17, 2 }
  0x96   : > { %758 = sbr.rel (%p755_p8) target bundleno = 630 (0x276), region = 55  ;;  %s2971_s8 = sshll.u32 (!%p755_p8), %s761_s5, 11  ;;  %v2977_v1 = vcombine.high (!%p755_p8), %v4329_v0, %v4329_v0 }
  0x97   : > { %s4333_s9 = scalar_lea.vmem (!%p755_p8), [#allocation3], %s2971_s8  ;;  %p820_p9 = scmp.lt.s32.totalorder (!%p755_p8), %s2972_s21, 11 }
  0x98   : > { %v3307_v2 = vld [vmem:[%s4333_s9 + $0x4] ss:$16 sps:$4 sm:$0xff] (!%p755_p8)   ;;  %2451 = vmatprep.mubr.bf16.mxu0 (!%p755_p8), %v2977_v1  ;;  %2615 = vmatprep.mubr.bf16.mxu1 (!%p755_p8), %v2977_v1  ;;  %v3309_v3 = vld [vmem:[%s4333_s9 + $0xc] ss:$16 sps:$4 sm:$0xff] (!%p755_p8)   ;;  %v3311_v4 = vld [vmem:[%s4333_s9] ss:$16 sps:$4 sm:$0xff] (!%p755_p8)  }
  0x99   : > { %2419 = vmatprep.subr.bf16.mxu0 (!%p755_p8), %v3307_v2  ;;  %v3312_v5 = vld [vmem:[%s4333_s9 + $0x8] ss:$16 sps:$4 sm:$0xff] (!%p755_p8)   ;;  %2583 = vmatprep.subr.bf16.mxu1 (!%p755_p8), %v3309_v3  ;;  %v3313_v6 = vld [vmem:[%s4333_s9 + $0x24] ss:$16 sps:$4 sm:$0xff] (!%p755_p8)   ;;  %v3315_v7 = vld [vmem:[%s4333_s9 + $0x2c] ss:$16 sps:$4 sm:$0xff] (!%p755_p8)  }
  0x9a   : > { %2420 = vmatpush1.bf16.msra.mxu0 (!%p755_p8), %v3311_v4  ;;  %2584 = vmatpush1.bf16.msra.mxu1 (!%p755_p8), %v3312_v5  ;;  %v3317_v8 = vld [vmem:[%s4333_s9 + $0x20] ss:$16 sps:$4 sm:$0xff] (!%p755_p8)   ;;  %v3318_v9 = vld [vmem:[%s4333_s9 + $0x28] ss:$16 sps:$4 sm:$0xff] (!%p755_p8)   ;;  %v3319_v10 = vld [vmem:[%s4333_s9 + $0x44] ss:$16 sps:$4 sm:$0xff] (!%p755_p8)   ;;  %v2976_v5 = vcombine.low (!%p755_p8), %v4329_v0, %v4329_v0 }
  0x9b   : > { %2421 = vmatprep.subr.bf16.mxu0 (!%p755_p8), %v3313_v6  ;;  %2585 = vmatprep.subr.bf16.mxu1 (!%p755_p8), %v3315_v7  ;;  %v3321_v11 = vld [vmem:[%s4333_s9 + $0x4c] ss:$16 sps:$4 sm:$0xff] (!%p755_p8)   ;;  %v3323_v12 = vld [vmem:[%s4333_s9 + $0x40] ss:$16 sps:$4 sm:$0xff] (!%p755_p8)   ;;  %v3324_v13 = vld [vmem:[%s4333_s9 + $0x48] ss:$16 sps:$4 sm:$0xff] (!%p755_p8)  }
  0x9c   : > { %v3325_v14 = vld [vmem:[%s4333_s9 + $0x64] ss:$16 sps:$4 sm:$0xff] (!%p755_p8)   ;;  %v3327_v15 = vld [vmem:[%s4333_s9 + $0x6c] ss:$16 sps:$4 sm:$0xff] (!%p755_p8)   ;;  %v3329_v16 = vld [vmem:[%s4333_s9 + $0x60] ss:$16 sps:$4 sm:$0xff] (!%p755_p8)  }
  0x9d   : > { %v3330_v17 = vld [vmem:[%s4333_s9 + $0x68] ss:$16 sps:$4 sm:$0xff]   ;;  %v3331_v18 = vld [vmem:[%s4333_s9 + $0x84] ss:$16 sps:$4 sm:$0xff]   ;;  %v3333_v19 = vld [vmem:[%s4333_s9 + $0x8c] ss:$16 sps:$4 sm:$0xff]  }
  0x9e   : > { %2422 = vmatpush1.bf16.msra.mxu0 %v3317_v8  ;;  %2586 = vmatpush1.bf16.msra.mxu1 %v3318_v9  ;;  %v3335_v20 = vld [vmem:[%s4333_s9 + $0x80] ss:$16 sps:$4 sm:$0xff]   ;;  %v3336_v21 = vld [vmem:[%s4333_s9 + $0x88] ss:$16 sps:$4 sm:$0xff]   ;;  %v3337_v22 = vld [vmem:[%s4333_s9 + $0xa4] ss:$16 sps:$4 sm:$0xff]  }
  0x9f   : > { %2423 = vmatprep.subr.bf16.mxu0 %v3319_v10  ;;  %2587 = vmatprep.subr.bf16.mxu1 %v3321_v11  ;;  %v3339_v23 = vld [vmem:[%s4333_s9 + $0xac] ss:$16 sps:$4 sm:$0xff]   ;;  %v3341_v24 = vld [vmem:[%s4333_s9 + $0xa0] ss:$16 sps:$4 sm:$0xff]   ;;  %v3342_v25 = vld [vmem:[%s4333_s9 + $0xa8] ss:$16 sps:$4 sm:$0xff]  }
  0xa0   : > { %v3343_v26 = vld [vmem:[%s4333_s9 + $0xc4] ss:$16 sps:$4 sm:$0xff]   ;;  %v3345_v27 = vld [vmem:[%s4333_s9 + $0xcc] ss:$16 sps:$4 sm:$0xff]   ;;  %v3347_v28 = vld [vmem:[%s4333_s9 + $0xc0] ss:$16 sps:$4 sm:$0xff]  }
  0xa1   : > { %v3348_v29 = vld [vmem:[%s4333_s9 + $0xc8] ss:$16 sps:$4 sm:$0xff]   ;;  %v3349_v30 = vld [vmem:[%s4333_s9 + $0xe4] ss:$16 sps:$4 sm:$0xff]   ;;  %v3351_v31 = vld [vmem:[%s4333_s9 + $0xec] ss:$16 sps:$4 sm:$0xff]  }
  0xa2   : > { %2424 = vmatpush1.bf16.msra.mxu0 %v3323_v12  ;;  %2588 = vmatpush1.bf16.msra.mxu1 %v3324_v13  ;;  %v3353_v32 = vld [vmem:[%s4333_s9 + $0xe0] ss:$16 sps:$4 sm:$0xff]   ;;  %v3354_v33 = vld [vmem:[%s4333_s9 + $0xe8] ss:$16 sps:$4 sm:$0xff]   ;;  %v3355_v34 = vld [vmem:[%s4333_s9 + $0x104] ss:$16 sps:$4 sm:$0xff]  }
  0xa3   : > { %2425 = vmatprep.subr.bf16.mxu0 %v3325_v14  ;;  %2589 = vmatprep.subr.bf16.mxu1 %v3327_v15  ;;  %v3357_v35 = vld [vmem:[%s4333_s9 + $0x10c] ss:$16 sps:$4 sm:$0xff]   ;;  %v3359_v36 = vld [vmem:[%s4333_s9 + $0x100] ss:$16 sps:$4 sm:$0xff]   ;;  %v3360_v37 = vld [vmem:[%s4333_s9 + $0x108] ss:$16 sps:$4 sm:$0xff]  }
  0xa4   : > { %v3361_v38 = vld [vmem:[%s4333_s9 + $0x124] ss:$16 sps:$4 sm:$0xff]   ;;  %v3363_v39 = vld [vmem:[%s4333_s9 + $0x12c] ss:$16 sps:$4 sm:$0xff]   ;;  %v3365_v40 = vld [vmem:[%s4333_s9 + $0x120] ss:$16 sps:$4 sm:$0xff]  }
  0xa5   : > { %v3366_v41 = vld [vmem:[%s4333_s9 + $0x128] ss:$16 sps:$4 sm:$0xff]   ;;  %v3367_v42 = vld [vmem:[%s4333_s9 + $0x144] ss:$16 sps:$4 sm:$0xff]   ;;  %v3369_v43 = vld [vmem:[%s4333_s9 + $0x14c] ss:$16 sps:$4 sm:$0xff]  }
  0xa6   : > { %2426 = vmatpush1.bf16.msra.mxu0 %v3329_v16  ;;  %2590 = vmatpush1.bf16.msra.mxu1 %v3330_v17  ;;  %v3371_v44 = vld [vmem:[%s4333_s9 + $0x140] ss:$16 sps:$4 sm:$0xff]   ;;  %v3372_v45 = vld [vmem:[%s4333_s9 + $0x148] ss:$16 sps:$4 sm:$0xff]   ;;  %v3373_v46 = vld [vmem:[%s4333_s9 + $0x164] ss:$16 sps:$4 sm:$0xff]  }
  0xa7   : > { %2427 = vmatprep.subr.bf16.mxu0 %v3331_v18  ;;  %2591 = vmatprep.subr.bf16.mxu1 %v3333_v19  ;;  %v3375_v47 = vld [vmem:[%s4333_s9 + $0x16c] ss:$16 sps:$4 sm:$0xff]   ;;  %v3377_v48 = vld [vmem:[%s4333_s9 + $0x160] ss:$16 sps:$4 sm:$0xff]   ;;  %v3378_v49 = vld [vmem:[%s4333_s9 + $0x168] ss:$16 sps:$4 sm:$0xff]  }
  0xa8   : > { %v3379_v50 = vld [vmem:[%s4333_s9 + $0x184] ss:$16 sps:$4 sm:$0xff]   ;;  %v3381_v51 = vld [vmem:[%s4333_s9 + $0x18c] ss:$16 sps:$4 sm:$0xff]   ;;  %v3383_v52 = vld [vmem:[%s4333_s9 + $0x180] ss:$16 sps:$4 sm:$0xff]  }
  0xa9   : > { %v3384_v53 = vld [vmem:[%s4333_s9 + $0x188] ss:$16 sps:$4 sm:$0xff]   ;;  %v3385_v54 = vld [vmem:[%s4333_s9 + $0x1a4] ss:$16 sps:$4 sm:$0xff]   ;;  %v3387_v55 = vld [vmem:[%s4333_s9 + $0x1ac] ss:$16 sps:$4 sm:$0xff]  }
  0xaa   : > { %2428 = vmatpush1.bf16.msra.mxu0 %v3335_v20  ;;  %2592 = vmatpush1.bf16.msra.mxu1 %v3336_v21  ;;  %v3389_v56 = vld [vmem:[%s4333_s9 + $0x1a0] ss:$16 sps:$4 sm:$0xff]   ;;  %v3390_v57 = vld [vmem:[%s4333_s9 + $0x1a8] ss:$16 sps:$4 sm:$0xff]   ;;  %v3391_v58 = vld [vmem:[%s4333_s9 + $0x1c4] ss:$16 sps:$4 sm:$0xff]  }
  0xab   : > { %2429 = vmatprep.subr.bf16.mxu0 %v3337_v22  ;;  %2593 = vmatprep.subr.bf16.mxu1 %v3339_v23  ;;  %v3393_v59 = vld [vmem:[%s4333_s9 + $0x1cc] ss:$16 sps:$4 sm:$0xff]   ;;  %v3395_v60 = vld [vmem:[%s4333_s9 + $0x1c0] ss:$16 sps:$4 sm:$0xff]   ;;  %v3396_v61 = vld [vmem:[%s4333_s9 + $0x1c8] ss:$16 sps:$4 sm:$0xff]  }
  0xac   : > { %v3397_v62 = vld [vmem:[%s4333_s9 + $0x1e4] ss:$16 sps:$4 sm:$0xff]   ;;  %v3399_v63 = vld [vmem:[%s4333_s9 + $0x1ec] ss:$16 sps:$4 sm:$0xff]   ;;  %v3401_v1 = vld [vmem:[%s4333_s9 + $0x1e0] ss:$16 sps:$4 sm:$0xff]  }
  0xad   : > { %v3402_v2 = vld [vmem:[%s4333_s9 + $0x1e8] ss:$16 sps:$4 sm:$0xff]   ;;  %v3407_v3 = vld [vmem:[%s4333_s9 + $0x204] ss:$16 sps:$4 sm:$0xff]   ;;  %v3410_v4 = vld [vmem:[%s4333_s9 + $0x20c] ss:$16 sps:$4 sm:$0xff]  }
  0xae   : > { %2430 = vmatpush1.bf16.msra.mxu0 %v3341_v24  ;;  %2594 = vmatpush1.bf16.msra.mxu1 %v3342_v25  ;;  %v3405_v6 = vld [vmem:[%s4333_s9 + $0x200] ss:$16 sps:$4 sm:$0xff]   ;;  %v3408_v7 = vld [vmem:[%s4333_s9 + $0x208] ss:$16 sps:$4 sm:$0xff]   ;;  %v3413_v8 = vld [vmem:[%s4333_s9 + $0x224] ss:$16 sps:$4 sm:$0xff]  }
  0xaf   : > { %2431 = vmatprep.subr.bf16.mxu0 %v3343_v26  ;;  %2595 = vmatprep.subr.bf16.mxu1 %v3345_v27  ;;  %v3416_v9 = vld [vmem:[%s4333_s9 + $0x22c] ss:$16 sps:$4 sm:$0xff]   ;;  %v3411_v10 = vld [vmem:[%s4333_s9 + $0x220] ss:$16 sps:$4 sm:$0xff]   ;;  %v3414_v11 = vld [vmem:[%s4333_s9 + $0x228] ss:$16 sps:$4 sm:$0xff]  }
  0xb0   : > { %v3419_v0 = vld [vmem:[%s4333_s9 + $0x244] ss:$16 sps:$4 sm:$0xff]   ;;  %v3422_v12 = vld [vmem:[%s4333_s9 + $0x24c] ss:$16 sps:$4 sm:$0xff]   ;;  %v3417_v13 = vld [vmem:[%s4333_s9 + $0x240] ss:$16 sps:$4 sm:$0xff]  }
  0xb1   : > { %v3420_v14 = vld [vmem:[%s4333_s9 + $0x248] ss:$16 sps:$4 sm:$0xff]   ;;  %v3425_v15 = vld [vmem:[%s4333_s9 + $0x264] ss:$16 sps:$4 sm:$0xff]   ;;  %v3428_v16 = vld [vmem:[%s4333_s9 + $0x26c] ss:$16 sps:$4 sm:$0xff]  }
  0xb2   : > { %2432 = vmatpush1.bf16.msra.mxu0 %v3347_v28  ;;  %2596 = vmatpush1.bf16.msra.mxu1 %v3348_v29  ;;  %v3423_v17 = vld [vmem:[%s4333_s9 + $0x260] ss:$16 sps:$4 sm:$0xff]   ;;  %v3426_v18 = vld [vmem:[%s4333_s9 + $0x268] ss:$16 sps:$4 sm:$0xff]   ;;  %v3431_v19 = vld [vmem:[%s4333_s9 + $0x284] ss:$16 sps:$4 sm:$0xff]  }
  0xb3   : > { %2433 = vmatprep.subr.bf16.mxu0 %v3349_v30  ;;  %2597 = vmatprep.subr.bf16.mxu1 %v3351_v31  ;;  %v3434_v20 = vld [vmem:[%s4333_s9 + $0x28c] ss:$16 sps:$4 sm:$0xff]   ;;  %v3429_v21 = vld [vmem:[%s4333_s9 + $0x280] ss:$16 sps:$4 sm:$0xff]   ;;  %v3432_v22 = vld [vmem:[%s4333_s9 + $0x288] ss:$16 sps:$4 sm:$0xff]  }
  0xb4   : > { %v3437_v23 = vld [vmem:[%s4333_s9 + $0x2a4] ss:$16 sps:$4 sm:$0xff]   ;;  %v3440_v24 = vld [vmem:[%s4333_s9 + $0x2ac] ss:$16 sps:$4 sm:$0xff]   ;;  %v3435_v25 = vld [vmem:[%s4333_s9 + $0x2a0] ss:$16 sps:$4 sm:$0xff]  }
  0xb5   : > { %v3438_v26 = vld [vmem:[%s4333_s9 + $0x2a8] ss:$16 sps:$4 sm:$0xff]   ;;  %v3443_v27 = vld [vmem:[%s4333_s9 + $0x2c4] ss:$16 sps:$4 sm:$0xff]   ;;  %v3446_v28 = vld [vmem:[%s4333_s9 + $0x2cc] ss:$16 sps:$4 sm:$0xff]  }
  0xb6   : > { %2434 = vmatpush1.bf16.msra.mxu0 %v3353_v32  ;;  %2598 = vmatpush1.bf16.msra.mxu1 %v3354_v33  ;;  %v4430_v29 = vld [vmem:[%s4650_s0 + $0x8] sm:$0xff]  ;;  %v3441_v31 = vld [vmem:[%s4333_s9 + $0x2c0] ss:$16 sps:$4 sm:$0xff]   ;;  %v3449_v33 = vld [vmem:[%s4333_s9 + $0x2e4] ss:$16 sps:$4 sm:$0xff]   ;;  %s4662_s21 = smov (!%p820_p9, %s2972_s21), 11 }
  0xb7   : > { %2435 = vmatprep.subr.bf16.mxu0 %v3355_v34  ;;  %2599 = vmatprep.subr.bf16.mxu1 %v3357_v35  ;;  %v2979_v30 = vcombine.high %v4430_v29, %v4430_v29  ;;  %v3444_v32 = vld [vmem:[%s4333_s9 + $0x2c8] ss:$16 sps:$4 sm:$0xff]   ;;  %v3452_v34 = vld [vmem:[%s4333_s9 + $0x2ec] ss:$16 sps:$4 sm:$0xff]   ;;  %v3447_v35 = vld [vmem:[%s4333_s9 + $0x2e0] ss:$16 sps:$4 sm:$0xff]   ;;  %s822_s25 = scalar_lea.vmem %s4652_s2, %s4662_s21  ;;  %s827_s28 = scalar_lea.vmem %s4653_s3, %s4662_s21 }
  0xb8   : > { %s2975_s17 = sshll.u32 %s4662_s21, 3 }
  0xb9   : > { %s837_s5 = scalar_lea.vmem %s4654_s4, %s2975_s17 }
  0xba   : > { %2436 = vmatpush1.bf16.msra.mxu0 %v3359_v36  ;;  %2600 = vmatpush1.bf16.msra.mxu1 %v3360_v37  ;;  %v3450_v36 = vld [vmem:[%s4333_s9 + $0x2e8] ss:$16 sps:$4 sm:$0xff]   ;;  %v3455_v37 = vld [vmem:[%s4333_s9 + $0x304] ss:$16 sps:$4 sm:$0xff]  }
  0xbb   : > { %2437 = vmatprep.subr.bf16.mxu0 %v3361_v38  ;;  %2601 = vmatprep.subr.bf16.mxu1 %v3363_v39  ;;  %v3458_v38 = vld [vmem:[%s4333_s9 + $0x30c] ss:$16 sps:$4 sm:$0xff]   ;;  %v3453_v39 = vld [vmem:[%s4333_s9 + $0x300] ss:$16 sps:$4 sm:$0xff]  }
  0xbe   : > { %2438 = vmatpush1.bf16.msra.mxu0 %v3365_v40  ;;  %2602 = vmatpush1.bf16.msra.mxu1 %v3366_v41  ;;  %v3456_v40 = vld [vmem:[%s4333_s9 + $0x308] ss:$16 sps:$4 sm:$0xff]   ;;  %v3461_v41 = vld [vmem:[%s4333_s9 + $0x324] ss:$16 sps:$4 sm:$0xff]  }
  0xbf   : > { %2439 = vmatprep.subr.bf16.mxu0 %v3367_v42  ;;  %2603 = vmatprep.subr.bf16.mxu1 %v3369_v43  ;;  %v3464_v42 = vld [vmem:[%s4333_s9 + $0x32c] ss:$16 sps:$4 sm:$0xff]   ;;  %v3459_v43 = vld [vmem:[%s4333_s9 + $0x320] ss:$16 sps:$4 sm:$0xff]  }
  0xc2   : > { %2440 = vmatpush1.bf16.msra.mxu0 %v3371_v44  ;;  %2604 = vmatpush1.bf16.msra.mxu1 %v3372_v45  ;;  %v3462_v44 = vld [vmem:[%s4333_s9 + $0x328] ss:$16 sps:$4 sm:$0xff]   ;;  %v3467_v45 = vld [vmem:[%s4333_s9 + $0x344] ss:$16 sps:$4 sm:$0xff]  }
  0xc3   : > { %2441 = vmatprep.subr.bf16.mxu0 %v3373_v46  ;;  %2605 = vmatprep.subr.bf16.mxu1 %v3375_v47  ;;  %v3470_v46 = vld [vmem:[%s4333_s9 + $0x34c] ss:$16 sps:$4 sm:$0xff]   ;;  %v3465_v47 = vld [vmem:[%s4333_s9 + $0x340] ss:$16 sps:$4 sm:$0xff]  }
  0xc6   : > { %2442 = vmatpush1.bf16.msra.mxu0 %v3377_v48  ;;  %2606 = vmatpush1.bf16.msra.mxu1 %v3378_v49  ;;  %v3468_v48 = vld [vmem:[%s4333_s9 + $0x348] ss:$16 sps:$4 sm:$0xff]   ;;  %v3473_v49 = vld [vmem:[%s4333_s9 + $0x364] ss:$16 sps:$4 sm:$0xff]  }
  0xc7   : > { %2443 = vmatprep.subr.bf16.mxu0 %v3379_v50  ;;  %2607 = vmatprep.subr.bf16.mxu1 %v3381_v51  ;;  %v3476_v50 = vld [vmem:[%s4333_s9 + $0x36c] ss:$16 sps:$4 sm:$0xff]   ;;  %v3471_v51 = vld [vmem:[%s4333_s9 + $0x360] ss:$16 sps:$4 sm:$0xff]  }
  0xca   : > { %2444 = vmatpush1.bf16.msra.mxu0 %v3383_v52  ;;  %2608 = vmatpush1.bf16.msra.mxu1 %v3384_v53  ;;  %v3474_v52 = vld [vmem:[%s4333_s9 + $0x368] ss:$16 sps:$4 sm:$0xff]   ;;  %v3479_v53 = vld [vmem:[%s4333_s9 + $0x384] ss:$16 sps:$4 sm:$0xff]  }
  0xcb   : > { %2445 = vmatprep.subr.bf16.mxu0 %v3385_v54  ;;  %2609 = vmatprep.subr.bf16.mxu1 %v3387_v55  ;;  %v3482_v54 = vld [vmem:[%s4333_s9 + $0x38c] ss:$16 sps:$4 sm:$0xff]   ;;  %v3477_v55 = vld [vmem:[%s4333_s9 + $0x380] ss:$16 sps:$4 sm:$0xff]  }
  0xce   : > { %2446 = vmatpush1.bf16.msra.mxu0 %v3389_v56  ;;  %2610 = vmatpush1.bf16.msra.mxu1 %v3390_v57  ;;  %v3480_v56 = vld [vmem:[%s4333_s9 + $0x388] ss:$16 sps:$4 sm:$0xff]   ;;  %v3485_v57 = vld [vmem:[%s4333_s9 + $0x3a4] ss:$16 sps:$4 sm:$0xff]  }
  0xcf   : > { %2447 = vmatprep.subr.bf16.mxu0 %v3391_v58  ;;  %2611 = vmatprep.subr.bf16.mxu1 %v3393_v59  ;;  %v3488_v58 = vld [vmem:[%s4333_s9 + $0x3ac] ss:$16 sps:$4 sm:$0xff]   ;;  %v3483_v59 = vld [vmem:[%s4333_s9 + $0x3a0] ss:$16 sps:$4 sm:$0xff]  }
  0xd2   : > { %2448 = vmatpush1.bf16.msra.mxu0 %v3395_v60  ;;  %2612 = vmatpush1.bf16.msra.mxu1 %v3396_v61  ;;  %v3486_v60 = vld [vmem:[%s4333_s9 + $0x3a8] ss:$16 sps:$4 sm:$0xff]   ;;  %v3491_v61 = vld [vmem:[%s4333_s9 + $0x3c4] ss:$16 sps:$4 sm:$0xff]  }
  0xd3   : > { %2449 = vmatprep.subr.bf16.mxu0 %v3397_v62  ;;  %2613 = vmatprep.subr.bf16.mxu1 %v3399_v63  ;;  %v3494_v62 = vld [vmem:[%s4333_s9 + $0x3cc] ss:$16 sps:$4 sm:$0xff]   ;;  %v3489_v63 = vld [vmem:[%s4333_s9 + $0x3c0] ss:$16 sps:$4 sm:$0xff]  }
  0xd6   : > { %2450 = vmatpush1.bf16.msra.mxu0 %v3401_v1  ;;  %2614 = vmatpush1.bf16.msra.mxu1 %v3402_v2  ;;  %v3492_v1 = vld [vmem:[%s4333_s9 + $0x3c8] ss:$16 sps:$4 sm:$0xff]   ;;  %v3497_v2 = vld [vmem:[%s4333_s9 + $0x3e4] ss:$16 sps:$4 sm:$0xff]  }
  0xd7   : > { %2460 = vmatprep.subr.bf16.mxu0 %v3407_v3  ;;  %2624 = vmatprep.subr.bf16.mxu1 %v3410_v4  ;;  %v3500_v3 = vld [vmem:[%s4333_s9 + $0x3ec] ss:$16 sps:$4 sm:$0xff]   ;;  %v3495_v4 = vld [vmem:[%s4333_s9 + $0x3e0] ss:$16 sps:$4 sm:$0xff]  }
  0xd9   : > { %2452 = vmatmul.mubr.bf16.vlgmr.msra.gmra.mrb[0].mxu0 %v2976_v5  ;;  %2616 = vmatmul.mubr.bf16.vlgmr.msra.gmra.mrb[0].mxu1 %v2976_v5  ;;  %v3498_v5 = vld [vmem:[%s4333_s9 + $0x3e8] ss:$16 sps:$4 sm:$0xff]  }
  0xda   : > { %2461 = vmatpush1.bf16.msra.mxu0 %v3405_v6  ;;  %2625 = vmatpush1.bf16.msra.mxu1 %v3408_v7  ;;  %v3505_v6 = vld [vmem:[%s4333_s9 + $0x404] ss:$16 sps:$4 sm:$0xff]   ;;  %v3508_v7 = vld [vmem:[%s4333_s9 + $0x40c] ss:$16 sps:$4 sm:$0xff]  }
  0xdb   : > { %2462 = vmatprep.subr.bf16.mxu0 %v3413_v8  ;;  %2626 = vmatprep.subr.bf16.mxu1 %v3416_v9  ;;  %v2978_v8 = vcombine.low %v4430_v29, %v4430_v29  ;;  %v3503_v9 = vld [vmem:[%s4333_s9 + $0x400] ss:$16 sps:$4 sm:$0xff]   ;;  %v3538_v29 = vld [vmem:[%s4333_s9 + $0x4ac] ss:$16 sps:$4 sm:$0xff]  }
  0xdc   : > { %2492 = vmatprep.mubr.bf16.mxu0 %v2979_v30  ;;  %2656 = vmatprep.mubr.bf16.mxu1 %v2979_v30  ;;  %v3533_v30 = vld [vmem:[%s4333_s9 + $0x4a0] ss:$16 sps:$4 sm:$0xff]  }
  0xde   : > { %2463 = vmatpush1.bf16.msra.mxu0 %v3411_v10  ;;  %2627 = vmatpush1.bf16.msra.mxu1 %v3414_v11  ;;  %v3506_v10 = vld [vmem:[%s4333_s9 + $0x408] ss:$16 sps:$4 sm:$0xff]   ;;  %v4481_v11 = vld [vmem:[%s4650_s0 + $0x10] sm:$0xff] }
  0xdf   : > { %2464 = vmatprep.subr.bf16.mxu0 %v3419_v0  ;;  %2628 = vmatprep.subr.bf16.mxu1 %v3422_v12  ;;  %v3511_v0 = vld [vmem:[%s4333_s9 + $0x424] ss:$16 sps:$4 sm:$0xff]   ;;  %v3514_v12 = vld [vmem:[%s4333_s9 + $0x42c] ss:$16 sps:$4 sm:$0xff]  }
  0xe2   : > { %2465 = vmatpush1.bf16.msra.mxu0 %v3417_v13  ;;  %2629 = vmatpush1.bf16.msra.mxu1 %v3420_v14  ;;  %v2981_v13 = vcombine.high %v4481_v11, %v4481_v11  ;;  %v3509_v14 = vld [vmem:[%s4333_s9 + $0x420] ss:$16 sps:$4 sm:$0xff]  }
  0xe3   : > { %2466 = vmatprep.subr.bf16.mxu0 %v3425_v15  ;;  %2630 = vmatprep.subr.bf16.mxu1 %v3428_v16  ;;  %v3512_v15 = vld [vmem:[%s4333_s9 + $0x428] ss:$16 sps:$4 sm:$0xff]   ;;  %v3517_v16 = vld [vmem:[%s4333_s9 + $0x444] ss:$16 sps:$4 sm:$0xff]  }
  0xe6   : > { %2467 = vmatpush1.bf16.msra.mxu0 %v3423_v17  ;;  %2631 = vmatpush1.bf16.msra.mxu1 %v3426_v18  ;;  %v3520_v17 = vld [vmem:[%s4333_s9 + $0x44c] ss:$16 sps:$4 sm:$0xff]   ;;  %v3515_v18 = vld [vmem:[%s4333_s9 + $0x440] ss:$16 sps:$4 sm:$0xff]  }
  0xe7   : > { %2468 = vmatprep.subr.bf16.mxu0 %v3431_v19  ;;  %2632 = vmatprep.subr.bf16.mxu1 %v3434_v20  ;;  %v3518_v19 = vld [vmem:[%s4333_s9 + $0x448] ss:$16 sps:$4 sm:$0xff]   ;;  %v3523_v20 = vld [vmem:[%s4333_s9 + $0x464] ss:$16 sps:$4 sm:$0xff]  }
  0xea   : > { %2469 = vmatpush1.bf16.msra.mxu0 %v3429_v21  ;;  %2633 = vmatpush1.bf16.msra.mxu1 %v3432_v22  ;;  %v3526_v21 = vld [vmem:[%s4333_s9 + $0x46c] ss:$16 sps:$4 sm:$0xff]   ;;  %v3521_v22 = vld [vmem:[%s4333_s9 + $0x460] ss:$16 sps:$4 sm:$0xff]  }
  0xeb   : > { %2470 = vmatprep.subr.bf16.mxu0 %v3437_v23  ;;  %2634 = vmatprep.subr.bf16.mxu1 %v3440_v24  ;;  %v3524_v23 = vld [vmem:[%s4333_s9 + $0x468] ss:$16 sps:$4 sm:$0xff]   ;;  %v3529_v24 = vld [vmem:[%s4333_s9 + $0x484] ss:$16 sps:$4 sm:$0xff]  }
  0xee   : > { %2471 = vmatpush1.bf16.msra.mxu0 %v3435_v25  ;;  %2635 = vmatpush1.bf16.msra.mxu1 %v3438_v26  ;;  %v3532_v25 = vld [vmem:[%s4333_s9 + $0x48c] ss:$16 sps:$4 sm:$0xff]   ;;  %v3527_v26 = vld [vmem:[%s4333_s9 + $0x480] ss:$16 sps:$4 sm:$0xff]  }
  0xef   : > { %2472 = vmatprep.subr.bf16.mxu0 %v3443_v27  ;;  %2636 = vmatprep.subr.bf16.mxu1 %v3446_v28  ;;  %v3530_v27 = vld [vmem:[%s4333_s9 + $0x488] ss:$16 sps:$4 sm:$0xff]   ;;  %v3535_v28 = vld [vmem:[%s4333_s9 + $0x4a4] ss:$16 sps:$4 sm:$0xff]  }
  0xf2   : > { %2473 = vmatpush1.bf16.msra.mxu0 %v3441_v31  ;;  %2637 = vmatpush1.bf16.msra.mxu1 %v3444_v32  ;;  %v3536_v31 = vld [vmem:[%s4333_s9 + $0x4a8] ss:$16 sps:$4 sm:$0xff]   ;;  %v3541_v32 = vld [vmem:[%s4333_s9 + $0x4c4] ss:$16 sps:$4 sm:$0xff]  }
  0xf3   : > { %2474 = vmatprep.subr.bf16.mxu0 %v3449_v33  ;;  %2638 = vmatprep.subr.bf16.mxu1 %v3452_v34  ;;  %v3544_v33 = vld [vmem:[%s4333_s9 + $0x4cc] ss:$16 sps:$4 sm:$0xff]   ;;  %v3539_v34 = vld [vmem:[%s4333_s9 + $0x4c0] ss:$16 sps:$4 sm:$0xff]  }
  0xf6   : > { %2475 = vmatpush1.bf16.msra.mxu0 %v3447_v35  ;;  %2639 = vmatpush1.bf16.msra.mxu1 %v3450_v36  ;;  %v3542_v35 = vld [vmem:[%s4333_s9 + $0x4c8] ss:$16 sps:$4 sm:$0xff]   ;;  %v3547_v36 = vld [vmem:[%s4333_s9 + $0x4e4] ss:$16 sps:$4 sm:$0xff]  }
  0xf7   : > { %2476 = vmatprep.subr.bf16.mxu0 %v3455_v37  ;;  %2640 = vmatprep.subr.bf16.mxu1 %v3458_v38  ;;  %v3550_v37 = vld [vmem:[%s4333_s9 + $0x4ec] ss:$16 sps:$4 sm:$0xff]   ;;  %v3545_v38 = vld [vmem:[%s4333_s9 + $0x4e0] ss:$16 sps:$4 sm:$0xff]  }
  0xfa   : > { %2477 = vmatpush1.bf16.msra.mxu0 %v3453_v39  ;;  %2641 = vmatpush1.bf16.msra.mxu1 %v3456_v40  ;;  %v3548_v39 = vld [vmem:[%s4333_s9 + $0x4e8] ss:$16 sps:$4 sm:$0xff]   ;;  %v3553_v40 = vld [vmem:[%s4333_s9 + $0x504] ss:$16 sps:$4 sm:$0xff]  }
  0xfb   : > { %2478 = vmatprep.subr.bf16.mxu0 %v3461_v41  ;;  %2642 = vmatprep.subr.bf16.mxu1 %v3464_v42  ;;  %v3556_v41 = vld [vmem:[%s4333_s9 + $0x50c] ss:$16 sps:$4 sm:$0xff]   ;;  %v3551_v42 = vld [vmem:[%s4333_s9 + $0x500] ss:$16 sps:$4 sm:$0xff]  }
  0xfe   : > { %2479 = vmatpush1.bf16.msra.mxu0 %v3459_v43  ;;  %2643 = vmatpush1.bf16.msra.mxu1 %v3462_v44  ;;  %v3554_v43 = vld [vmem:[%s4333_s9 + $0x508] ss:$16 sps:$4 sm:$0xff]   ;;  %v3559_v44 = vld [vmem:[%s4333_s9 + $0x524] ss:$16 sps:$4 sm:$0xff]  }
  0xff   : > { %2480 = vmatprep.subr.bf16.mxu0 %v3467_v45  ;;  %2644 = vmatprep.subr.bf16.mxu1 %v3470_v46  ;;  %v3562_v45 = vld [vmem:[%s4333_s9 + $0x52c] ss:$16 sps:$4 sm:$0xff]   ;;  %v3557_v46 = vld [vmem:[%s4333_s9 + $0x520] ss:$16 sps:$4 sm:$0xff]  }
 0x102   : > { %2481 = vmatpush1.bf16.msra.mxu0 %v3465_v47  ;;  %2645 = vmatpush1.bf16.msra.mxu1 %v3468_v48  ;;  %v3560_v47 = vld [vmem:[%s4333_s9 + $0x528] ss:$16 sps:$4 sm:$0xff]   ;;  %v3565_v48 = vld [vmem:[%s4333_s9 + $0x544] ss:$16 sps:$4 sm:$0xff]  }
 0x103   : > { %2482 = vmatprep.subr.bf16.mxu0 %v3473_v49  ;;  %2646 = vmatprep.subr.bf16.mxu1 %v3476_v50  ;;  %v3568_v49 = vld [vmem:[%s4333_s9 + $0x54c] ss:$16 sps:$4 sm:$0xff]   ;;  %v3563_v50 = vld [vmem:[%s4333_s9 + $0x540] ss:$16 sps:$4 sm:$0xff]  }
 0x106   : > { %2483 = vmatpush1.bf16.msra.mxu0 %v3471_v51  ;;  %2647 = vmatpush1.bf16.msra.mxu1 %v3474_v52  ;;  %v3566_v51 = vld [vmem:[%s4333_s9 + $0x548] ss:$16 sps:$4 sm:$0xff]   ;;  %v3571_v52 = vld [vmem:[%s4333_s9 + $0x564] ss:$16 sps:$4 sm:$0xff]  }
 0x107   : > { %2484 = vmatprep.subr.bf16.mxu0 %v3479_v53  ;;  %2648 = vmatprep.subr.bf16.mxu1 %v3482_v54  ;;  %v3574_v53 = vld [vmem:[%s4333_s9 + $0x56c] ss:$16 sps:$4 sm:$0xff]   ;;  %v3569_v54 = vld [vmem:[%s4333_s9 + $0x560] ss:$16 sps:$4 sm:$0xff]  }
 0x10a   : > { %2485 = vmatpush1.bf16.msra.mxu0 %v3477_v55  ;;  %2649 = vmatpush1.bf16.msra.mxu1 %v3480_v56  ;;  %v3572_v55 = vld [vmem:[%s4333_s9 + $0x568] ss:$16 sps:$4 sm:$0xff]   ;;  %v3577_v56 = vld [vmem:[%s4333_s9 + $0x584] ss:$16 sps:$4 sm:$0xff]  }
 0x10b   : > { %2486 = vmatprep.subr.bf16.mxu0 %v3485_v57  ;;  %2650 = vmatprep.subr.bf16.mxu1 %v3488_v58  ;;  %v3580_v57 = vld [vmem:[%s4333_s9 + $0x58c] ss:$16 sps:$4 sm:$0xff]   ;;  %v3575_v58 = vld [vmem:[%s4333_s9 + $0x580] ss:$16 sps:$4 sm:$0xff]  }
 0x10e   : > { %2487 = vmatpush1.bf16.msra.mxu0 %v3483_v59  ;;  %2651 = vmatpush1.bf16.msra.mxu1 %v3486_v60  ;;  %v3578_v59 = vld [vmem:[%s4333_s9 + $0x588] ss:$16 sps:$4 sm:$0xff]   ;;  %v3583_v60 = vld [vmem:[%s4333_s9 + $0x5a4] ss:$16 sps:$4 sm:$0xff]  }
 0x10f   : > { %2488 = vmatprep.subr.bf16.mxu0 %v3491_v61  ;;  %2652 = vmatprep.subr.bf16.mxu1 %v3494_v62  ;;  %v3586_v61 = vld [vmem:[%s4333_s9 + $0x5ac] ss:$16 sps:$4 sm:$0xff]   ;;  %v3581_v62 = vld [vmem:[%s4333_s9 + $0x5a0] ss:$16 sps:$4 sm:$0xff]  }
 0x112   : > { %2489 = vmatpush1.bf16.msra.mxu0 %v3489_v63  ;;  %2653 = vmatpush1.bf16.msra.mxu1 %v3492_v1  ;;  %v3584_v63 = vld [vmem:[%s4333_s9 + $0x5a8] ss:$16 sps:$4 sm:$0xff]   ;;  %v3589_v1 = vld [vmem:[%s4333_s9 + $0x5c4] ss:$16 sps:$4 sm:$0xff]  }
 0x113   : > { %2490 = vmatprep.subr.bf16.mxu0 %v3497_v2  ;;  %2654 = vmatprep.subr.bf16.mxu1 %v3500_v3  ;;  %v3592_v2 = vld [vmem:[%s4333_s9 + $0x5cc] ss:$16 sps:$4 sm:$0xff]   ;;  %v3587_v3 = vld [vmem:[%s4333_s9 + $0x5c0] ss:$16 sps:$4 sm:$0xff]  }
 0x116   : > { %2491 = vmatpush1.bf16.msra.mxu0 %v3495_v4  ;;  %2655 = vmatpush1.bf16.msra.mxu1 %v3498_v5  ;;  %v3590_v4 = vld [vmem:[%s4333_s9 + $0x5c8] ss:$16 sps:$4 sm:$0xff]   ;;  %v3595_v5 = vld [vmem:[%s4333_s9 + $0x5e4] ss:$16 sps:$4 sm:$0xff]  }
 0x117   : > { %2501 = vmatprep.subr.bf16.mxu0 %v3505_v6  ;;  %2665 = vmatprep.subr.bf16.mxu1 %v3508_v7  ;;  %v3598_v6 = vld [vmem:[%s4333_s9 + $0x5ec] ss:$16 sps:$4 sm:$0xff]   ;;  %v3593_v7 = vld [vmem:[%s4333_s9 + $0x5e0] ss:$16 sps:$4 sm:$0xff]  }
 0x119   : > { %2493 = vmatmul.mubr.bf16.vlgmr.msra.gmra.mrb[0].mxu0 %v2978_v8  ;;  %2657 = vmatmul.mubr.bf16.vlgmr.msra.gmra.mrb[0].mxu1 %v2978_v8  ;;  %v3596_v8 = vld [vmem:[%s4333_s9 + $0x5e8] ss:$16 sps:$4 sm:$0xff]  }
 0x11a   : > { %2502 = vmatpush1.bf16.msra.mxu0 %v3503_v9  ;;  %2666 = vmatpush1.bf16.msra.mxu1 %v3506_v10  ;;  %v3603_v9 = vld [vmem:[%s4333_s9 + $0x604] ss:$16 sps:$4 sm:$0xff]   ;;  %v3606_v10 = vld [vmem:[%s4333_s9 + $0x60c] ss:$16 sps:$4 sm:$0xff]  }
 0x11b   : > { %2503 = vmatprep.subr.bf16.mxu0 %v3511_v0  ;;  %2667 = vmatprep.subr.bf16.mxu1 %v3514_v12  ;;  %v2980_v0 = vcombine.low %v4481_v11, %v4481_v11  ;;  %v4552_v12 = vld [vmem:[%s4650_s0 + $0x18] sm:$0xff] }
 0x11c   : > { %2533 = vmatprep.mubr.bf16.mxu0 %v2981_v13  ;;  %2697 = vmatprep.mubr.bf16.mxu1 %v2981_v13  ;;  %v3601_v13 = vld [vmem:[%s4333_s9 + $0x600] ss:$16 sps:$4 sm:$0xff]   ;;  %v2983_v11 = vcombine.high %v4552_v12, %v4552_v12 }
 0x11e   : > { %2504 = vmatpush1.bf16.msra.mxu0 %v3509_v14  ;;  %2668 = vmatpush1.bf16.msra.mxu1 %v3512_v15  ;;  %v3604_v14 = vld [vmem:[%s4333_s9 + $0x608] ss:$16 sps:$4 sm:$0xff]   ;;  %v3609_v15 = vld [vmem:[%s4333_s9 + $0x624] ss:$16 sps:$4 sm:$0xff]  }
 0x11f   : > { %2505 = vmatprep.subr.bf16.mxu0 %v3517_v16  ;;  %2669 = vmatprep.subr.bf16.mxu1 %v3520_v17  ;;  %v3612_v16 = vld [vmem:[%s4333_s9 + $0x62c] ss:$16 sps:$4 sm:$0xff]   ;;  %v3607_v17 = vld [vmem:[%s4333_s9 + $0x620] ss:$16 sps:$4 sm:$0xff]  }
 0x122   : > { %2506 = vmatpush1.bf16.msra.mxu0 %v3515_v18  ;;  %2670 = vmatpush1.bf16.msra.mxu1 %v3518_v19  ;;  %v3610_v18 = vld [vmem:[%s4333_s9 + $0x628] ss:$16 sps:$4 sm:$0xff]   ;;  %v3615_v19 = vld [vmem:[%s4333_s9 + $0x644] ss:$16 sps:$4 sm:$0xff]  }
 0x123   : > { %2507 = vmatprep.subr.bf16.mxu0 %v3523_v20  ;;  %2671 = vmatprep.subr.bf16.mxu1 %v3526_v21  ;;  %v3618_v20 = vld [vmem:[%s4333_s9 + $0x64c] ss:$16 sps:$4 sm:$0xff]   ;;  %v3613_v21 = vld [vmem:[%s4333_s9 + $0x640] ss:$16 sps:$4 sm:$0xff]  }
 0x126   : > { %2508 = vmatpush1.bf16.msra.mxu0 %v3521_v22  ;;  %2672 = vmatpush1.bf16.msra.mxu1 %v3524_v23  ;;  %v3616_v22 = vld [vmem:[%s4333_s9 + $0x648] ss:$16 sps:$4 sm:$0xff]   ;;  %v3621_v23 = vld [vmem:[%s4333_s9 + $0x664] ss:$16 sps:$4 sm:$0xff]  }
 0x127   : > { %2509 = vmatprep.subr.bf16.mxu0 %v3529_v24  ;;  %2673 = vmatprep.subr.bf16.mxu1 %v3532_v25  ;;  %v3624_v24 = vld [vmem:[%s4333_s9 + $0x66c] ss:$16 sps:$4 sm:$0xff]   ;;  %v3619_v25 = vld [vmem:[%s4333_s9 + $0x660] ss:$16 sps:$4 sm:$0xff]  }
 0x12a   : > { %2510 = vmatpush1.bf16.msra.mxu0 %v3527_v26  ;;  %2674 = vmatpush1.bf16.msra.mxu1 %v3530_v27  ;;  %v3622_v26 = vld [vmem:[%s4333_s9 + $0x668] ss:$16 sps:$4 sm:$0xff]   ;;  %v3627_v27 = vld [vmem:[%s4333_s9 + $0x684] ss:$16 sps:$4 sm:$0xff]  }
 0x12b   : > { %2511 = vmatprep.subr.bf16.mxu0 %v3535_v28  ;;  %2675 = vmatprep.subr.bf16.mxu1 %v3538_v29  ;;  %v3630_v28 = vld [vmem:[%s4333_s9 + $0x68c] ss:$16 sps:$4 sm:$0xff]   ;;  %v3625_v29 = vld [vmem:[%s4333_s9 + $0x680] ss:$16 sps:$4 sm:$0xff]  }
 0x12e   : > { %2512 = vmatpush1.bf16.msra.mxu0 %v3533_v30  ;;  %2676 = vmatpush1.bf16.msra.mxu1 %v3536_v31  ;;  %v3628_v30 = vld [vmem:[%s4333_s9 + $0x688] ss:$16 sps:$4 sm:$0xff]   ;;  %v3633_v31 = vld [vmem:[%s4333_s9 + $0x6a4] ss:$16 sps:$4 sm:$0xff]  }
 0x12f   : > { %2513 = vmatprep.subr.bf16.mxu0 %v3541_v32  ;;  %2677 = vmatprep.subr.bf16.mxu1 %v3544_v33  ;;  %v3636_v32 = vld [vmem:[%s4333_s9 + $0x6ac] ss:$16 sps:$4 sm:$0xff]   ;;  %v3631_v33 = vld [vmem:[%s4333_s9 + $0x6a0] ss:$16 sps:$4 sm:$0xff]  }
 0x132   : > { %2514 = vmatpush1.bf16.msra.mxu0 %v3539_v34  ;;  %2678 = vmatpush1.bf16.msra.mxu1 %v3542_v35  ;;  %v3634_v34 = vld [vmem:[%s4333_s9 + $0x6a8] ss:$16 sps:$4 sm:$0xff]   ;;  %v3639_v35 = vld [vmem:[%s4333_s9 + $0x6c4] ss:$16 sps:$4 sm:$0xff]  }
 0x133   : > { %2515 = vmatprep.subr.bf16.mxu0 %v3547_v36  ;;  %2679 = vmatprep.subr.bf16.mxu1 %v3550_v37  ;;  %v3642_v36 = vld [vmem:[%s4333_s9 + $0x6cc] ss:$16 sps:$4 sm:$0xff]   ;;  %v3637_v37 = vld [vmem:[%s4333_s9 + $0x6c0] ss:$16 sps:$4 sm:$0xff]  }
 0x136   : > { %2516 = vmatpush1.bf16.msra.mxu0 %v3545_v38  ;;  %2680 = vmatpush1.bf16.msra.mxu1 %v3548_v39  ;;  %v3640_v38 = vld [vmem:[%s4333_s9 + $0x6c8] ss:$16 sps:$4 sm:$0xff]   ;;  %v3645_v39 = vld [vmem:[%s4333_s9 + $0x6e4] ss:$16 sps:$4 sm:$0xff]  }
 0x137   : > { %2517 = vmatprep.subr.bf16.mxu0 %v3553_v40  ;;  %2681 = vmatprep.subr.bf16.mxu1 %v3556_v41  ;;  %v3648_v40 = vld [vmem:[%s4333_s9 + $0x6ec] ss:$16 sps:$4 sm:$0xff]   ;;  %v3643_v41 = vld [vmem:[%s4333_s9 + $0x6e0] ss:$16 sps:$4 sm:$0xff]  }
 0x13a   : > { %2518 = vmatpush1.bf16.msra.mxu0 %v3551_v42  ;;  %2682 = vmatpush1.bf16.msra.mxu1 %v3554_v43  ;;  %v3646_v42 = vld [vmem:[%s4333_s9 + $0x6e8] ss:$16 sps:$4 sm:$0xff]   ;;  %v3651_v43 = vld [vmem:[%s4333_s9 + $0x704] ss:$16 sps:$4 sm:$0xff]  }
 0x13b   : > { %2519 = vmatprep.subr.bf16.mxu0 %v3559_v44  ;;  %2683 = vmatprep.subr.bf16.mxu1 %v3562_v45  ;;  %v3654_v44 = vld [vmem:[%s4333_s9 + $0x70c] ss:$16 sps:$4 sm:$0xff]   ;;  %v3649_v45 = vld [vmem:[%s4333_s9 + $0x700] ss:$16 sps:$4 sm:$0xff]  }
 0x13e   : > { %2520 = vmatpush1.bf16.msra.mxu0 %v3557_v46  ;;  %2684 = vmatpush1.bf16.msra.mxu1 %v3560_v47  ;;  %v3652_v46 = vld [vmem:[%s4333_s9 + $0x708] ss:$16 sps:$4 sm:$0xff]   ;;  %v3657_v47 = vld [vmem:[%s4333_s9 + $0x724] ss:$16 sps:$4 sm:$0xff]  }
 0x13f   : > { %2521 = vmatprep.subr.bf16.mxu0 %v3565_v48  ;;  %2685 = vmatprep.subr.bf16.mxu1 %v3568_v49  ;;  %v3660_v48 = vld [vmem:[%s4333_s9 + $0x72c] ss:$16 sps:$4 sm:$0xff]   ;;  %v3655_v49 = vld [vmem:[%s4333_s9 + $0x720] ss:$16 sps:$4 sm:$0xff]  }
 0x142   : > { %2522 = vmatpush1.bf16.msra.mxu0 %v3563_v50  ;;  %2686 = vmatpush1.bf16.msra.mxu1 %v3566_v51  ;;  %v3658_v50 = vld [vmem:[%s4333_s9 + $0x728] ss:$16 sps:$4 sm:$0xff]   ;;  %v3663_v51 = vld [vmem:[%s4333_s9 + $0x744] ss:$16 sps:$4 sm:$0xff]  }
 0x143   : > { %2523 = vmatprep.subr.bf16.mxu0 %v3571_v52  ;;  %2687 = vmatprep.subr.bf16.mxu1 %v3574_v53  ;;  %v3666_v52 = vld [vmem:[%s4333_s9 + $0x74c] ss:$16 sps:$4 sm:$0xff]   ;;  %v3661_v53 = vld [vmem:[%s4333_s9 + $0x740] ss:$16 sps:$4 sm:$0xff]  }
 0x146   : > { %2524 = vmatpush1.bf16.msra.mxu0 %v3569_v54  ;;  %2688 = vmatpush1.bf16.msra.mxu1 %v3572_v55  ;;  %v3664_v54 = vld [vmem:[%s4333_s9 + $0x748] ss:$16 sps:$4 sm:$0xff]   ;;  %v3669_v55 = vld [vmem:[%s4333_s9 + $0x764] ss:$16 sps:$4 sm:$0xff]  }
 0x147   : > { %2525 = vmatprep.subr.bf16.mxu0 %v3577_v56  ;;  %2689 = vmatprep.subr.bf16.mxu1 %v3580_v57  ;;  %v3672_v56 = vld [vmem:[%s4333_s9 + $0x76c] ss:$16 sps:$4 sm:$0xff]   ;;  %v3667_v57 = vld [vmem:[%s4333_s9 + $0x760] ss:$16 sps:$4 sm:$0xff]  }
 0x14a   : > { %2526 = vmatpush1.bf16.msra.mxu0 %v3575_v58  ;;  %2690 = vmatpush1.bf16.msra.mxu1 %v3578_v59  ;;  %v3670_v58 = vld [vmem:[%s4333_s9 + $0x768] ss:$16 sps:$4 sm:$0xff]   ;;  %v3675_v59 = vld [vmem:[%s4333_s9 + $0x784] ss:$16 sps:$4 sm:$0xff]  }
 0x14b   : > { %2527 = vmatprep.subr.bf16.mxu0 %v3583_v60  ;;  %2691 = vmatprep.subr.bf16.mxu1 %v3586_v61  ;;  %v3678_v60 = vld [vmem:[%s4333_s9 + $0x78c] ss:$16 sps:$4 sm:$0xff]   ;;  %v3673_v61 = vld [vmem:[%s4333_s9 + $0x780] ss:$16 sps:$4 sm:$0xff]  }
 0x14e   : > { %2528 = vmatpush1.bf16.msra.mxu0 %v3581_v62  ;;  %2692 = vmatpush1.bf16.msra.mxu1 %v3584_v63  ;;  %v3676_v62 = vld [vmem:[%s4333_s9 + $0x788] ss:$16 sps:$4 sm:$0xff]   ;;  %v3681_v63 = vld [vmem:[%s4333_s9 + $0x7a4] ss:$16 sps:$4 sm:$0xff]  }
 0x14f   : > { %2529 = vmatprep.subr.bf16.mxu0 %v3589_v1  ;;  %2693 = vmatprep.subr.bf16.mxu1 %v3592_v2  ;;  %v3684_v1 = vld [vmem:[%s4333_s9 + $0x7ac] ss:$16 sps:$4 sm:$0xff]   ;;  %v3679_v2 = vld [vmem:[%s4333_s9 + $0x7a0] ss:$16 sps:$4 sm:$0xff]  }
 0x152   : > { %2530 = vmatpush1.bf16.msra.mxu0 %v3587_v3  ;;  %2694 = vmatpush1.bf16.msra.mxu1 %v3590_v4  ;;  %v3682_v3 = vld [vmem:[%s4333_s9 + $0x7a8] ss:$16 sps:$4 sm:$0xff]   ;;  %v3687_v4 = vld [vmem:[%s4333_s9 + $0x7c4] ss:$16 sps:$4 sm:$0xff]  }
 0x153   : > { %2531 = vmatprep.subr.bf16.mxu0 %v3595_v5  ;;  %2695 = vmatprep.subr.bf16.mxu1 %v3598_v6  ;;  %v3690_v5 = vld [vmem:[%s4333_s9 + $0x7cc] ss:$16 sps:$4 sm:$0xff]   ;;  %v3685_v6 = vld [vmem:[%s4333_s9 + $0x7c0] ss:$16 sps:$4 sm:$0xff]  }
 0x156   : > { %2532 = vmatpush1.bf16.msra.mxu0 %v3593_v7  ;;  %2696 = vmatpush1.bf16.msra.mxu1 %v3596_v8  ;;  %v3688_v7 = vld [vmem:[%s4333_s9 + $0x7c8] ss:$16 sps:$4 sm:$0xff]   ;;  %v3693_v8 = vld [vmem:[%s4333_s9 + $0x7e4] ss:$16 sps:$4 sm:$0xff]  }
 0x157   : > { %2542 = vmatprep.subr.bf16.mxu0 %v3603_v9  ;;  %2706 = vmatprep.subr.bf16.mxu1 %v3606_v10  ;;  %v3696_v9 = vld [vmem:[%s4333_s9 + $0x7ec] ss:$16 sps:$4 sm:$0xff]   ;;  %v3691_v10 = vld [vmem:[%s4333_s9 + $0x7e0] ss:$16 sps:$4 sm:$0xff]  }
 0x159   : > { %2534 = vmatmul.mubr.bf16.vlgmr.msra.gmra.mrb[0].mxu0 %v2980_v0  ;;  %2698 = vmatmul.mubr.bf16.vlgmr.msra.gmra.mrb[0].mxu1 %v2980_v0  ;;  %v3694_v0 = vld [vmem:[%s4333_s9 + $0x7e8] ss:$16 sps:$4 sm:$0xff]  }
 0x15a   : > { %2543 = vmatpush1.bf16.msra.mxu0 %v3601_v13  ;;  %2707 = vmatpush1.bf16.msra.mxu1 %v3604_v14  ;;  %v2982_v13 = vcombine.low %v4552_v12, %v4552_v12  ;;  %v2764_v14 = vlaneseq }
 0x15b   : > { %2544 = vmatprep.subr.bf16.mxu0 %v3609_v15  ;;  %2708 = vmatprep.subr.bf16.mxu1 %v3612_v16 }
 0x15c   : > { %2574 = vmatprep.mubr.bf16.mxu0 %v2983_v11  ;;  %2738 = vmatprep.mubr.bf16.mxu1 %v2983_v11  ;;  %v2765_v15 = vshrl.u32 %v2764_v14, 7  ;;  %v2762_v11 = vld [vmem:[%s822_s25] sm:$0xf] }
 0x15e   : > { %2545 = vmatpush1.bf16.msra.mxu0 %v3607_v17  ;;  %2709 = vmatpush1.bf16.msra.mxu1 %v3610_v18  ;;  %v2766_v12 = vsub.s32 0, %v2765_v15  ;;  %v2774_v16 = vsub.s32 2, %v2765_v15  ;;  %v2770_v17 = vsub.s32 1, %v2765_v15  ;;  %v2778_v18 = vsub.s32 3, %v2765_v15 }
 0x15f   : > { %2546 = vmatprep.subr.bf16.mxu0 %v3615_v19  ;;  %2710 = vmatprep.subr.bf16.mxu1 %v3618_v20  ;;  %v2788_v19 = vld [vmem:[%s827_s28] sm:$0xf] }
 0x160   : > { %v2767_v20 = vrot.slane %v2762_v11, %v2766_v12 }
 0x162   : > { %2547 = vmatpush1.bf16.msra.mxu0 %v3613_v21  ;;  %2711 = vmatpush1.bf16.msra.mxu1 %v3616_v22  ;;  %v2775_v21 = vrot.slane %v2762_v11, %v2774_v16  ;;  %v2771_v22 = vrot.slane %v2762_v11, %v2770_v17 }
 0x163   : > { %2548 = vmatprep.subr.bf16.mxu0 %v3621_v23  ;;  %2712 = vmatprep.subr.bf16.mxu1 %v3624_v24  ;;  %v2779_v23 = vrot.slane %v2762_v11, %v2778_v18  ;;  %v2793_v24 = vrot.slane %v2788_v19, %v2766_v12 }
 0x166   : > { %2549 = vmatpush1.bf16.msra.mxu0 %v3619_v25  ;;  %2713 = vmatpush1.bf16.msra.mxu1 %v3622_v26  ;;  %v2801_v25 = vrot.slane %v2788_v19, %v2774_v16 }
 0x167   : > { %2550 = vmatprep.subr.bf16.mxu0 %v3627_v27  ;;  %2714 = vmatprep.subr.bf16.mxu1 %v3630_v28  ;;  %v2797_v28 = vrot.slane %v2788_v19, %v2770_v17 }
 0x16a   : > { %2551 = vmatpush1.bf16.msra.mxu0 %v3625_v29  ;;  %2715 = vmatpush1.bf16.msra.mxu1 %v3628_v30  ;;  %v2805_v29 = vrot.slane %v2788_v19, %v2778_v18 }
 0x16b   : > { %2552 = vmatprep.subr.bf16.mxu0 %v3633_v31  ;;  %2716 = vmatprep.subr.bf16.mxu1 %v3636_v32 }
 0x16e   : > { %2553 = vmatpush1.bf16.msra.mxu0 %v3631_v33  ;;  %2717 = vmatpush1.bf16.msra.mxu1 %v3634_v34 }
 0x16f   : > { %2554 = vmatprep.subr.bf16.mxu0 %v3639_v35  ;;  %2718 = vmatprep.subr.bf16.mxu1 %v3642_v36 }
 0x172   : > { %2555 = vmatpush1.bf16.msra.mxu0 %v3637_v37  ;;  %2719 = vmatpush1.bf16.msra.mxu1 %v3640_v38 }
 0x173   : > { %2556 = vmatprep.subr.bf16.mxu0 %v3645_v39  ;;  %2720 = vmatprep.subr.bf16.mxu1 %v3648_v40 }
 0x176   : > { %2557 = vmatpush1.bf16.msra.mxu0 %v3643_v41  ;;  %2721 = vmatpush1.bf16.msra.mxu1 %v3646_v42 }
 0x177   : > { %2558 = vmatprep.subr.bf16.mxu0 %v3651_v43  ;;  %2722 = vmatprep.subr.bf16.mxu1 %v3654_v44 }
 0x17a   : > { %2559 = vmatpush1.bf16.msra.mxu0 %v3649_v45  ;;  %2723 = vmatpush1.bf16.msra.mxu1 %v3652_v46 }
 0x17b   : > { %2560 = vmatprep.subr.bf16.mxu0 %v3657_v47  ;;  %2724 = vmatprep.subr.bf16.mxu1 %v3660_v48 }
 0x17e   : > { %2561 = vmatpush1.bf16.msra.mxu0 %v3655_v49  ;;  %2725 = vmatpush1.bf16.msra.mxu1 %v3658_v50 }
 0x17f   : > { %2562 = vmatprep.subr.bf16.mxu0 %v3663_v51  ;;  %2726 = vmatprep.subr.bf16.mxu1 %v3666_v52 }
 0x182   : > { %2563 = vmatpush1.bf16.msra.mxu0 %v3661_v53  ;;  %2727 = vmatpush1.bf16.msra.mxu1 %v3664_v54 }
 0x183   : > { %2564 = vmatprep.subr.bf16.mxu0 %v3669_v55  ;;  %2728 = vmatprep.subr.bf16.mxu1 %v3672_v56 }
 0x186   : > { %2565 = vmatpush1.bf16.msra.mxu0 %v3667_v57  ;;  %2729 = vmatpush1.bf16.msra.mxu1 %v3670_v58 }
 0x187   : > { %2566 = vmatprep.subr.bf16.mxu0 %v3675_v59  ;;  %2730 = vmatprep.subr.bf16.mxu1 %v3678_v60 }
 0x18a   : > { %2567 = vmatpush1.bf16.msra.mxu0 %v3673_v61  ;;  %2731 = vmatpush1.bf16.msra.mxu1 %v3676_v62 }
 0x18b   : > { %2568 = vmatprep.subr.bf16.mxu0 %v3681_v63  ;;  %2732 = vmatprep.subr.bf16.mxu1 %v3684_v1 }
 0x18e   : > { %2569 = vmatpush1.bf16.msra.mxu0 %v3679_v2  ;;  %2733 = vmatpush1.bf16.msra.mxu1 %v3682_v3 }
 0x18f   : > { %2570 = vmatprep.subr.bf16.mxu0 %v3687_v4  ;;  %2734 = vmatprep.subr.bf16.mxu1 %v3690_v5 }
 0x192   : > { %2571 = vmatpush1.bf16.msra.mxu0 %v3685_v6  ;;  %2735 = vmatpush1.bf16.msra.mxu1 %v3688_v7 }
 0x193   : > { %2572 = vmatprep.subr.bf16.mxu0 %v3693_v8  ;;  %2736 = vmatprep.subr.bf16.mxu1 %v3696_v9 }
 0x196   : > { %2573 = vmatpush1.bf16.msra.mxu0 %v3691_v10  ;;  %2737 = vmatpush1.bf16.msra.mxu1 %v3694_v0 }
 0x199   : > { %2575 = vmatmul.mubr.bf16.vlgmr.msra.gmra.mrb[0].mxu0 %v2982_v13  ;;  %2739 = vmatmul.mubr.bf16.vlgmr.msra.gmra.mrb[0].mxu1 %v2982_v13 }
 0x26c   : > { %v2576_v26 = vpop.f32.mrb[0].mxu0  ;;  %v2740_v27 = vpop.f32.mrb[0].mxu1 }
 0x26d   : > { %v2784_v30 = vmul.f32 %v2767_v20, %v2576_v26  ;;  %v2786_v31 = vmul.f32 %v2775_v21, %v2740_v27  ;;  %v2578_v32 = vpop.f32.mrb[1].mxu0  ;;  %v2742_v33 = vpop.f32.mrb[1].mxu1 }
 0x26e   : > { %v2785_v34 = vmul.f32 %v2771_v22, %v2578_v32  ;;  %v2787_v35 = vmul.f32 %v2779_v23, %v2742_v33  ;;  %v2580_v36 = vpop.f32.mrb[2].mxu0  ;;  %v2744_v37 = vpop.f32.mrb[2].mxu1 }
 0x26f   : > { %v2810_v38 = vadd.f32 %v2793_v24, %v2784_v30  ;;  %v2812_v39 = vadd.f32 %v2801_v25, %v2786_v31  ;;  %v2581_v40 = vpop.f32.mrb[3].mxu0  ;;  %v2745_v41 = vpop.f32.mrb[3].mxu1 }
 0x270   : > { %v2811_v42 = vadd.f32 %v2797_v28, %v2785_v34  ;;  %v2813_v43 = vadd.f32 %v2805_v29, %v2787_v35 }
 0x271   : > { %vm2814_vm0 = vcmp.ge.f32.partialorder %v2810_v38, 0.0  ;;  %v2818_v44 = vmul.f32 0.2, %v2810_v38  ;;  %vm2816_vm1 = vcmp.ge.f32.partialorder %v2812_v39, 0.0  ;;  %v2820_v45 = vmul.f32 0.2, %v2812_v39 }
 0x272   : > { %vm2815_vm2 = vcmp.ge.f32.partialorder %v2811_v42, 0.0  ;;  %v2819_v46 = vmul.f32 0.2, %v2811_v42  ;;  %vm2817_vm3 = vcmp.ge.f32.partialorder %v2813_v43, 0.0  ;;  %v2821_v47 = vmul.f32 0.2, %v2813_v43 }
 0x273   : > { %v2822_v48 = vsel %vm2814_vm0, %v2810_v38, %v2818_v44  ;;  %v2824_v49 = vsel %vm2816_vm1, %v2812_v39, %v2820_v45 }
 0x274   : > { %2826 = vst [vmem:[%s837_s5] sm:$0xff] %v2822_v48  ;;  %2828 = vst [vmem:[%s837_s5 + $0x10] sm:$0xff] %v2824_v49  ;;  %v2823_v50 = vsel %vm2815_vm2, %v2811_v42, %v2819_v46  ;;  %v2825_v51 = vsel %vm2817_vm3, %v2813_v43, %v2821_v47 }
 0x275   : > { %2827 = vst [vmem:[%s837_s5 + $0x8] sm:$0xff] %v2823_v50  ;;  %2829 = vst [vmem:[%s837_s5 + $0x18] sm:$0xff] %v2825_v51 }
 0x276 PF: > { %s14_s19 = sadd.s32 1, %s3737_s19   ;;  %s4655_s15 = smov %s3725_s16 }
 0x277   : > { %p11_p10 = scmp.ge.s32.totalorder %s14_s19, 5   ;;  %s4656_s16 = smov %s3799_s23 }
 0x278   : > { %s4657_s17 = smov %s3733_s18  ;;  %s4658_s18 = smov %s4660_s20 }
 0x279   :  { %13 = sbr.rel (!%p11_p10) target bundleno = 3 (0x3), region = 111 }

// kernel: id_market_net23_forward.4
= control target key start
LH: loop header
LB: loop body
LE: loop exit
PB: predicated region body
PF: predicated region fallthrough
CT: control target
= control target key end

     0   :  { %s6863_s0 = inlined_call_operand.vmem [shape: bf16[8,2048], index: 0, kind: input, shape index: {}]   ;;  %s6864_s1 = inlined_call_operand.hbm [shape: bf16[2048,1024], index: 1, kind: input, shape index: {}]   ;;  %s6865_s2 = inlined_call_operand.hbm [shape: f32[1,1024], index: 2, kind: input, shape index: {}]   ;;  %s6866_s3 = inlined_call_operand.hbm [shape: f32[1,1024], index: 3, kind: input, shape index: {}]   ;;  %s6867_s4 = inlined_call_operand.vmem [shape: bf16[8,1024], index: 4, kind: output, shape index: {}]  }
   0x1   :  { %6873 = sst [smem:[#allocation11_spill]] %s6864_s1 }
   0x2   :  { %6874 = sst [smem:[#allocation12_spill]] %s6865_s2 }
   0x3   :  { %9 = vsyncpa [#allocation4], 0 }
   0x4   :  { %11 = vsyncpa [#allocation4 + $0x1], 0 }
   0x5   :  { %12 = vsyncpa [#allocation6], 0 }
   0x6   :  { %14 = vsyncpa [#allocation6 + $0x1], 0  ;;  %s6071_s15 = smov 0   ;;  %s6073_s16 = smov 0  }
   0x7   :  { %s6075_s17 = smov 0   ;;  %s6077_s18 = smov 0  }
   0x8   :  { %s6079_s19 = smov 0   ;;  %s6081_s20 = smov 0  }
   0x9 LB: > { %s6869_s21 = sadd.s32 4294967295, %s6038_s20   ;;  %s35_s22 = sadd.s32 1, %s6034_s19  ;;  %s6038_s20 = sphi %s6081_s20, %s20_s20   ;;  %s6034_s19 = sphi %s6079_s19, %s6892_s19   ;;  %s6030_s18 = sphi %s6077_s18, %s6891_s18   ;;  %s6026_s17 = sphi %s6075_s17, %s6890_s17   ;;  %s6022_s16 = sphi %s6073_s16, %s6889_s16   ;;  %s6018_s15 = sphi %s6071_s15, %s6888_s15  }
   0xa   : > { %p37_p0 = scmp.ge.s32.totalorder %s35_s22, 2  ;;  %s76_s23 = sadd.s32 1, %s6026_s17 }
   0xb   : > { %p83_p1 = scmp.ne.s32.totalorder %s6026_s17, %s6022_s16  ;;  %p84_p2 = scmp.eq.s32.totalorder %s6038_s20, 0 }
   0xc   : > { %s6894_s22 = smov (%p37_p0, %s35_s22), 0  ;;  %p89_p4 = scmp.ne.s32.totalorder %s6022_s16, %s6018_s15 }
   0xd   : > { %6875 = sst [smem:[#allocation10_spill]] %s6894_s22  ;;  %p85_p3 = por %p84_p2, %p83_p1 }
   0xe   : > { %s72_s24 = ssub.s32 %s6034_s19, %s6894_s22  ;;  %p90_p5 = scmp.eq.s32.totalorder %s6869_s21, 0 }
   0xf   : > { %p74_p6 = scmp.eq.s32.totalorder %s72_s24, 0  ;;  %p5058_p8 = scmp.lt.s32.totalorder %s6038_s20, 2 }
  0x10   : > { %p6112_p7 = por %p90_p5, %p89_p4  ;;  %s6121_s27 = sand.u32 1, %s6026_s17  }
  0x11   : > { %s6118_s26 = scalar_select %p74_p6, %s6026_s17, %s76_s23  }
  0x12   : > { %s6876_s25 = scalar_select %p6112_p7, 1, 0 }
  0x13   : > { %p6123_p9 = pnand %p5058_p8, %p85_p3  ;;  %s4434_s29 = sshll.u32 %s6121_s27, 12 }
  0x14   : > { %s210_s30 = scalar_lea.vmem [#allocation3], %s4434_s29  ;;  %s230_s6 = sand.u32 1, %s6038_s20  }
  0x15   : > { %s6877_s28 = scalar_select %p6123_p9, 1, 0 }
  0x16   : > { %s220_s5 = sshll.u32 %s210_s30, 4  ;;  %s6870_s7 = sshll.u32 %s6121_s27, 2  ;;  %s6129_s5 = int_to_ptr.vmem [resolvable:$true] %s220_s5 }
  0x17   : > { %s4982_s8 = sshll.u32 %s6034_s19, 6  ;;  %s6878_s2 = sld [smem:[#allocation12_spill]] }
  0x18   : > { %s234_s12 = scalar_lea.vmem [#allocation5], %s6870_s7  ;;  %s6145_s23 = scalar_lea.hbm %s6866_s3, %s4982_s8 }
  0x19   : > { %s242_s13 = sshll.u32 %s234_s12, 4  ;;  %s6147_s24 = scalar_lea.sflag [#allocation6], %s230_s6  ;;  %s6140_s13 = int_to_ptr.vmem [resolvable:$true] %s242_s13 }
  0x1a   : > { %p6153_p11 = pneg %p6123_p9 }
  0x1d   : > { %s6136_s11 = scalar_lea.hbm %s6878_s2, %s4982_s8  ;;  %s5899_s12 = scalar_lea.hbm %s6878_s2, 128 }
  0x1e   : > { %s5894_s29 = scalar_lea.hbm %s6136_s11, 64  ;;  %p5900_p0 = scmp.lt.u32.totalorder %s6136_s11, %s6878_s2 }
  0x1f   : > { %p5895_p10 = scmp.ne.s32.totalorder %s6136_s11, %s5894_s29  ;;  %p5901_p1 = scmp.lt.u32.totalorder %s5899_s12, %s5894_s29 }
  0x20   : > { %p5903_p3 = scmp.lt.u32.totalorder %s5894_s29, %s6136_s11 }
  0x21   : > { %p5897_p12 = pnand %p6153_p11, %p5895_p10  ;;  %p5902_p2 = por %p5901_p1, %p5900_p0 }
  0x23   : > { %p5898_p13 = pneg %p5897_p12  ;;  %p5904_p4 = por %p5903_p3, %p5902_p2 }
  0x25   : > { %p5905_p5 = pnand %p5904_p4, %p5898_p13 }
  0x27   : > { %5908 = shalt.err (!%p5905_p5)
}
  0x28   : > { %s5909_s6 = scalar_lea.vmem %s6140_s13, 64  ;;  %s6040_s15 = smov [#allocation5]  }
  0x29   : > { %p5910_p6 = scmp.ne.s32.totalorder %s6140_s13, %s5909_s6  ;;  %s5914_s9 = sshll.u32 %s6040_s15, 4  ;;  %s5915_s9 = int_to_ptr.vmem [resolvable:$false] %s5914_s9 }
  0x2a   : > { %s5916_s10 = scalar_lea.vmem %s5915_s9, 128  ;;  %p5917_p12 = scmp.lt.s32.totalorder %s6140_s13, %s5915_s9 }
  0x2b   : > { %p5912_p8 = pnand %p5910_p6, %p6153_p11  ;;  %p5918_p7 = scmp.lt.s32.totalorder %s5916_s10, %s5909_s6 }
  0x2d   : > { %p5913_p10 = pneg %p5912_p8  ;;  %p5919_p0 = por %p5918_p7, %p5917_p12 }
  0x2f   : > { %p5920_p1 = pnand %p5919_p0, %p5913_p10 }
  0x31   : > { %5923 = shalt.err (!%p5920_p1)
}
  0x32   : > { %5054 = dma.hbm_to_vmem [thread:$0]  (!%p6123_p9), %s6136_s11, 64, %s6140_s13, %s6147_s24  }
  0x33   : > { %p4443_p13 = scmp.ge.s32.totalorder %s6038_s20, 1  ;;  %p266_p2 = scmp.lt.s32.totalorder %s6038_s20, 3 }
  0x34   : > { %s4981_s29 = sshll.u32 %s6034_s19, 8  ;;  %s6881_s1 = sld [smem:[#allocation11_spill]] }
  0x35   : > { %p6180_p3 = pnand %p4443_p13, %p266_p2  ;;  %s207_s15 = scalar_lea.sflag [#allocation4], %s6121_s27 }
  0x37   : > { %s6880_s12 = scalar_select %p6180_p3, 1, 0 }
  0x3a   : > { %s6187_s6 = scalar_lea.hbm %s6881_s1, %s4981_s29  ;;  %s5929_s10 = scalar_lea.hbm %s6881_s1, 131072 }
  0x3b   : > { %s5924_s9 = scalar_lea.hbm %s6187_s6, 65536  ;;  %p5930_p6 = scmp.lt.u32.totalorder %s6187_s6, %s6881_s1 }
  0x3c   : > { %p5925_p7 = scmp.ne.s32.totalorder %s6187_s6, %s5924_s9  ;;  %p5931_p8 = scmp.lt.u32.totalorder %s5929_s10, %s5924_s9 }
  0x3d   : > { %p5933_p12 = scmp.lt.u32.totalorder %s5924_s9, %s6187_s6 }
  0x3e   : > { %p5927_p4 = pnand %p5925_p7, %p6153_p11  ;;  %p5932_p10 = por %p5931_p8, %p5930_p6 }
  0x40   : > { %p5928_p5 = pneg %p5927_p4  ;;  %p5934_p0 = por %p5933_p12, %p5932_p10 }
  0x42   : > { %p5935_p1 = pnand %p5934_p0, %p5928_p5 }
  0x44   : > { %5938 = shalt.err (!%p5935_p1)
}
  0x45   : > { %s5939_s29 = scalar_lea.vmem %s6129_s5, 65536  ;;  %s6041_s14 = smov [#allocation3]  }
  0x46   : > { %p5940_p13 = scmp.ne.s32.totalorder %s6129_s5, %s5939_s29  ;;  %s5944_s8 = sshll.u32 %s6041_s14, 4  ;;  %s5945_s8 = int_to_ptr.vmem [resolvable:$false] %s5944_s8 }
  0x47   : > { %s5946_s21 = scalar_lea.vmem %s5945_s8, 131072  ;;  %p5947_p4 = scmp.lt.s32.totalorder %s6129_s5, %s5945_s8 }
  0x48   : > { %p5942_p2 = pnand %p5940_p13, %p6153_p11  ;;  %p5948_p3 = scmp.lt.s32.totalorder %s5946_s21, %s5939_s29 }
  0x4a   : > { %p5943_p7 = pneg %p5942_p2  ;;  %p5949_p6 = por %p5948_p3, %p5947_p4 }
  0x4c   : > { %p5950_p8 = pnand %p5949_p6, %p5943_p7 }
  0x4e   : > { %5953 = shalt.err (!%p5950_p8)
}
  0x4f   : > { %s6042_s7 = smov 512   ;;  %s6043_s9 = smov 256  }
  0x50   : > { %s6044_s11 = smov 16   ;;  %s6882_s13 = sshll.u32 %s6121_s27, 2 }
  0x51   : > { %5051 = dma.hbm_to_vmem [thread:$0]  (!%p6123_p9), %s6187_s6, 65536, %s6129_s5, %s207_s15, %s6042_s7, %s6043_s9, %s6044_s11  }
  0x52   : > { %s253_s10 = scalar_lea.vmem [#allocation7], %s6882_s13  ;;  %s5954_s14 = scalar_lea.hbm %s6145_s23, 64 }
  0x53   : > { %s261_s29 = sshll.u32 %s253_s10, 4  ;;  %p5955_p3 = scmp.ne.s32.totalorder %s6145_s23, %s5954_s14  ;;  %s262_s29 = int_to_ptr.vmem [resolvable:$true] %s261_s29 }
  0x54   : > { %s5959_s1 = scalar_lea.hbm %s6866_s3, 128  ;;  %p5960_p12 = scmp.lt.u32.totalorder %s6145_s23, %s6866_s3 }
  0x55   : > { %p5957_p5 = pnand %p5955_p3, %p6153_p11  ;;  %p5961_p0 = scmp.lt.u32.totalorder %s5959_s1, %s5954_s14 }
  0x56   : > { %p5963_p13 = scmp.lt.u32.totalorder %s5954_s14, %s6145_s23 }
  0x57   : > { %p5958_p10 = pneg %p5957_p5  ;;  %p5962_p1 = por %p5961_p0, %p5960_p12 }
  0x59   : > { %p5964_p2 = por %p5963_p13, %p5962_p1 }
  0x5b   : > { %p5965_p7 = pnand %p5964_p2, %p5958_p10 }
  0x5d   : > { %5968 = shalt.err (!%p5965_p7)
}
  0x5e   : > { %s5969_s27 = scalar_lea.vmem %s262_s29, 64  ;;  %s6045_s5 = smov [#allocation7]  }
  0x5f   : > { %p5970_p4 = scmp.ne.s32.totalorder %s262_s29, %s5969_s27  ;;  %s5974_s6 = sshll.u32 %s6045_s5, 4  ;;  %s5975_s6 = int_to_ptr.vmem [resolvable:$false] %s5974_s6 }
  0x60   : > { %s5976_s15 = scalar_lea.vmem %s5975_s6, 128  ;;  %p5977_p3 = scmp.lt.s32.totalorder %s262_s29, %s5975_s6 }
  0x61   : > { %p5972_p6 = pnand %p5970_p4, %p6153_p11  ;;  %p5978_p5 = scmp.lt.s32.totalorder %s5976_s15, %s5969_s27 }
  0x63   : > { %p5973_p8 = pneg %p5972_p6  ;;  %p5979_p9 = por %p5978_p5, %p5977_p3 }
  0x65   : > { %p5980_p0 = pnand %p5979_p9, %p5973_p8 }
  0x67   : > { %5983 = shalt.err (!%p5980_p0)
}
  0x68   : > { %p6883_p12 = scmp.ne.s32.totalorder %s6877_s28, 0  ;;  %p6884_p10 = scmp.ne.s32.totalorder %s6880_s12, 0 }
  0x69   : > { %s6236_s1 = sand.u32 (!%p6884_p10), 1, %s6022_s16   ;;  %p6885_p9 = scmp.ne.s32.totalorder (!%p6884_p10), %s6876_s25, 0 }
  0x6a   : > { %5057 = dma.hbm_to_vmem [thread:$0]  (!%p6883_p12), %s6145_s23, 64, %s262_s29, %s6147_s24  }
  0x6b   : > { %270 = sbr.rel (%p6884_p10) target bundleno = 855 (0x357), region = 36  ;;  %s4444_s2 = sshll.u32 (!%p6884_p10), %s6236_s1, 12 }
  0x6c   : > { %s273_s22 = scalar_lea.sflag (!%p6884_p10), [#allocation4], %s6236_s1  ;;  %s6240_s30 = scalar_lea.vmem (!%p6884_p10), [#allocation3], %s4444_s2 }
  0x72   : > { %6009 = dma.done.wait (%p6885_p9), %s273_s22, 65536  }
  0x73   : > { %6011 = vsyncadd (%p6885_p9), %s273_s22, 4294901760  ;;  %s6886_s28 = sadd.s32 4294967295, %s6038_s20   ;;  %s4445_s24 = sshll.u32 %s6236_s1, 2 }
  0x74   : > { %s281_s23 = sand.u32 1, %s6886_s28   ;;  %s6251_s7 = scalar_lea.vmem [#allocation5], %s4445_s24 }
  0x75   : > { %s282_s12 = scalar_lea.sflag [#allocation6], %s281_s23 }
  0x76   : > { %6013 = dma.done.wait (%p6885_p9), %s282_s12, 128  }
  0x77   : > { %6015 = vsyncadd (%p6885_p9), %s282_s12, 4294967168  ;;  %v5110_v0 = vld [vmem:[%s6240_s30 + $0x4] ss:$16 sps:$4 sm:$0xff]   ;;  %v5112_v1 = vld [vmem:[%s6240_s30 + $0xc] ss:$16 sps:$4 sm:$0xff]   ;;  %s4447_s23 = sshll.u32 %s6030_s18, 2 }
  0x78   : > { %3514 = vmatprep.subr.bf16.mxu0 %v5110_v0  ;;  %v5114_v2 = vld [vmem:[%s6240_s30] ss:$16 sps:$4 sm:$0xff]   ;;  %v5115_v3 = vld [vmem:[%s6240_s30 + $0x8] ss:$16 sps:$4 sm:$0xff]   ;;  %3842 = vmatprep.subr.bf16.mxu1 %v5112_v1  ;;  %v5116_v4 = vld [vmem:[%s6240_s30 + $0x24] ss:$16 sps:$4 sm:$0xff]  }
  0x79   : > { %3515 = vmatpush1.bf16.msra.mxu0 %v5114_v2  ;;  %3843 = vmatpush1.bf16.msra.mxu1 %v5115_v3  ;;  %v5118_v5 = vld [vmem:[%s6240_s30 + $0x2c] ss:$16 sps:$4 sm:$0xff]   ;;  %v5120_v6 = vld [vmem:[%s6240_s30 + $0x20] ss:$16 sps:$4 sm:$0xff]   ;;  %v5121_v7 = vld [vmem:[%s6240_s30 + $0x28] ss:$16 sps:$4 sm:$0xff]  }
  0x7a   : > { %3516 = vmatprep.subr.bf16.mxu0 %v5116_v4  ;;  %3844 = vmatprep.subr.bf16.mxu1 %v5118_v5  ;;  %v5122_v8 = vld [vmem:[%s6240_s30 + $0x44] ss:$16 sps:$4 sm:$0xff]   ;;  %v5124_v9 = vld [vmem:[%s6240_s30 + $0x4c] ss:$16 sps:$4 sm:$0xff]   ;;  %v5126_v10 = vld [vmem:[%s6240_s30 + $0x40] ss:$16 sps:$4 sm:$0xff]  }
  0x7b   : > { %v5127_v11 = vld [vmem:[%s6240_s30 + $0x48] ss:$16 sps:$4 sm:$0xff]   ;;  %v5128_v12 = vld [vmem:[%s6240_s30 + $0x64] ss:$16 sps:$4 sm:$0xff]   ;;  %v5130_v13 = vld [vmem:[%s6240_s30 + $0x6c] ss:$16 sps:$4 sm:$0xff]  }
  0x7c   : > { %v5132_v14 = vld [vmem:[%s6240_s30 + $0x60] ss:$16 sps:$4 sm:$0xff]   ;;  %v5133_v15 = vld [vmem:[%s6240_s30 + $0x68] ss:$16 sps:$4 sm:$0xff]   ;;  %v5134_v16 = vld [vmem:[%s6240_s30 + $0x84] ss:$16 sps:$4 sm:$0xff]  }
  0x7d   : > { %3517 = vmatpush1.bf16.msra.mxu0 %v5120_v6  ;;  %3845 = vmatpush1.bf16.msra.mxu1 %v5121_v7  ;;  %v5136_v17 = vld [vmem:[%s6240_s30 + $0x8c] ss:$16 sps:$4 sm:$0xff]   ;;  %v5138_v18 = vld [vmem:[%s6240_s30 + $0x80] ss:$16 sps:$4 sm:$0xff]   ;;  %v5139_v19 = vld [vmem:[%s6240_s30 + $0x88] ss:$16 sps:$4 sm:$0xff]  }
  0x7e   : > { %3518 = vmatprep.subr.bf16.mxu0 %v5122_v8  ;;  %3846 = vmatprep.subr.bf16.mxu1 %v5124_v9  ;;  %v5140_v20 = vld [vmem:[%s6240_s30 + $0xa4] ss:$16 sps:$4 sm:$0xff]   ;;  %v5142_v21 = vld [vmem:[%s6240_s30 + $0xac] ss:$16 sps:$4 sm:$0xff]   ;;  %v5144_v22 = vld [vmem:[%s6240_s30 + $0xa0] ss:$16 sps:$4 sm:$0xff]  }
  0x7f   : > { %v5145_v23 = vld [vmem:[%s6240_s30 + $0xa8] ss:$16 sps:$4 sm:$0xff]   ;;  %v5146_v24 = vld [vmem:[%s6240_s30 + $0xc4] ss:$16 sps:$4 sm:$0xff]   ;;  %v5148_v25 = vld [vmem:[%s6240_s30 + $0xcc] ss:$16 sps:$4 sm:$0xff]  }
  0x80   : > { %v5150_v26 = vld [vmem:[%s6240_s30 + $0xc0] ss:$16 sps:$4 sm:$0xff]   ;;  %v5151_v27 = vld [vmem:[%s6240_s30 + $0xc8] ss:$16 sps:$4 sm:$0xff]   ;;  %v5152_v28 = vld [vmem:[%s6240_s30 + $0xe4] ss:$16 sps:$4 sm:$0xff]  }
  0x81   : > { %3519 = vmatpush1.bf16.msra.mxu0 %v5126_v10  ;;  %3847 = vmatpush1.bf16.msra.mxu1 %v5127_v11  ;;  %v5154_v29 = vld [vmem:[%s6240_s30 + $0xec] ss:$16 sps:$4 sm:$0xff]   ;;  %v5156_v30 = vld [vmem:[%s6240_s30 + $0xe0] ss:$16 sps:$4 sm:$0xff]   ;;  %v5157_v31 = vld [vmem:[%s6240_s30 + $0xe8] ss:$16 sps:$4 sm:$0xff]  }
  0x82   : > { %3520 = vmatprep.subr.bf16.mxu0 %v5128_v12  ;;  %3848 = vmatprep.subr.bf16.mxu1 %v5130_v13  ;;  %v5158_v32 = vld [vmem:[%s6240_s30 + $0x104] ss:$16 sps:$4 sm:$0xff]   ;;  %v5160_v33 = vld [vmem:[%s6240_s30 + $0x10c] ss:$16 sps:$4 sm:$0xff]   ;;  %v5162_v34 = vld [vmem:[%s6240_s30 + $0x100] ss:$16 sps:$4 sm:$0xff]  }
  0x83   : > { %v5163_v35 = vld [vmem:[%s6240_s30 + $0x108] ss:$16 sps:$4 sm:$0xff]   ;;  %v5164_v36 = vld [vmem:[%s6240_s30 + $0x124] ss:$16 sps:$4 sm:$0xff]   ;;  %v5166_v37 = vld [vmem:[%s6240_s30 + $0x12c] ss:$16 sps:$4 sm:$0xff]  }
  0x84   : > { %v5168_v38 = vld [vmem:[%s6240_s30 + $0x120] ss:$16 sps:$4 sm:$0xff]   ;;  %v5169_v39 = vld [vmem:[%s6240_s30 + $0x128] ss:$16 sps:$4 sm:$0xff]   ;;  %v5170_v40 = vld [vmem:[%s6240_s30 + $0x144] ss:$16 sps:$4 sm:$0xff]  }
  0x85   : > { %3521 = vmatpush1.bf16.msra.mxu0 %v5132_v14  ;;  %3849 = vmatpush1.bf16.msra.mxu1 %v5133_v15  ;;  %v5172_v41 = vld [vmem:[%s6240_s30 + $0x14c] ss:$16 sps:$4 sm:$0xff]   ;;  %v5174_v42 = vld [vmem:[%s6240_s30 + $0x140] ss:$16 sps:$4 sm:$0xff]   ;;  %v5175_v43 = vld [vmem:[%s6240_s30 + $0x148] ss:$16 sps:$4 sm:$0xff]  }
  0x86   : > { %3522 = vmatprep.subr.bf16.mxu0 %v5134_v16  ;;  %3850 = vmatprep.subr.bf16.mxu1 %v5136_v17  ;;  %v5176_v44 = vld [vmem:[%s6240_s30 + $0x164] ss:$16 sps:$4 sm:$0xff]   ;;  %v5178_v45 = vld [vmem:[%s6240_s30 + $0x16c] ss:$16 sps:$4 sm:$0xff]   ;;  %v5180_v47 = vld [vmem:[%s6240_s30 + $0x160] ss:$16 sps:$4 sm:$0xff]  }
  0x87   : > { %v378_v46 = vld [vmem:[%s6863_s0] sm:$0xff]  ;;  %v5181_v49 = vld [vmem:[%s6240_s30 + $0x168] ss:$16 sps:$4 sm:$0xff]   ;;  %v5184_v51 = vld [vmem:[%s6240_s30 + $0x18c] ss:$16 sps:$4 sm:$0xff]   ;;  %p359_p11 = scmp.lt.s32.totalorder %s4447_s23, 7 }
  0x88   : > { %v4450_v48 = vcombine.high %v378_v46, %v378_v46  ;;  %v5182_v50 = vld [vmem:[%s6240_s30 + $0x184] ss:$16 sps:$4 sm:$0xff]   ;;  %v5186_v52 = vld [vmem:[%s6240_s30 + $0x180] ss:$16 sps:$4 sm:$0xff]   ;;  %v5187_v53 = vld [vmem:[%s6240_s30 + $0x188] ss:$16 sps:$4 sm:$0xff]   ;;  %v4449_v4 = vcombine.low %v378_v46, %v378_v46 }
  0x89   : > { %3523 = vmatpush1.bf16.msra.mxu0 %v5138_v18  ;;  %3851 = vmatpush1.bf16.msra.mxu1 %v5139_v19  ;;  %v5188_v54 = vld [vmem:[%s6240_s30 + $0x1a4] ss:$16 sps:$4 sm:$0xff]   ;;  %v5190_v55 = vld [vmem:[%s6240_s30 + $0x1ac] ss:$16 sps:$4 sm:$0xff]   ;;  %v5192_v56 = vld [vmem:[%s6240_s30 + $0x1a0] ss:$16 sps:$4 sm:$0xff]  }
  0x8a   : > { %3524 = vmatprep.subr.bf16.mxu0 %v5140_v20  ;;  %3852 = vmatprep.subr.bf16.mxu1 %v5142_v21  ;;  %v5193_v57 = vld [vmem:[%s6240_s30 + $0x1a8] ss:$16 sps:$4 sm:$0xff]   ;;  %v5194_v58 = vld [vmem:[%s6240_s30 + $0x1c4] ss:$16 sps:$4 sm:$0xff]   ;;  %v5196_v59 = vld [vmem:[%s6240_s30 + $0x1cc] ss:$16 sps:$4 sm:$0xff]  }
  0x8b   : > { %3546 = vmatprep.mubr.bf16.mxu0 %v4450_v48  ;;  %3874 = vmatprep.mubr.bf16.mxu1 %v4450_v48  ;;  %v5198_v60 = vld [vmem:[%s6240_s30 + $0x1c0] ss:$16 sps:$4 sm:$0xff]   ;;  %v5199_v61 = vld [vmem:[%s6240_s30 + $0x1c8] ss:$16 sps:$4 sm:$0xff]   ;;  %v5200_v62 = vld [vmem:[%s6240_s30 + $0x1e4] ss:$16 sps:$4 sm:$0xff]  }
  0x8c   : > { %v5202_v63 = vld [vmem:[%s6240_s30 + $0x1ec] ss:$16 sps:$4 sm:$0xff]   ;;  %v5204_v0 = vld [vmem:[%s6240_s30 + $0x1e0] ss:$16 sps:$4 sm:$0xff]   ;;  %v5205_v1 = vld [vmem:[%s6240_s30 + $0x1e8] ss:$16 sps:$4 sm:$0xff]  }
  0x8d   : > { %3525 = vmatpush1.bf16.msra.mxu0 %v5144_v22  ;;  %3853 = vmatpush1.bf16.msra.mxu1 %v5145_v23  ;;  %v5210_v2 = vld [vmem:[%s6240_s30 + $0x204] ss:$16 sps:$4 sm:$0xff]   ;;  %v5213_v3 = vld [vmem:[%s6240_s30 + $0x20c] ss:$16 sps:$4 sm:$0xff]   ;;  %v5208_v5 = vld [vmem:[%s6240_s30 + $0x200] ss:$16 sps:$4 sm:$0xff]  }
  0x8e   : > { %3526 = vmatprep.subr.bf16.mxu0 %v5146_v24  ;;  %3854 = vmatprep.subr.bf16.mxu1 %v5148_v25  ;;  %v5211_v6 = vld [vmem:[%s6240_s30 + $0x208] ss:$16 sps:$4 sm:$0xff]   ;;  %v5216_v7 = vld [vmem:[%s6240_s30 + $0x224] ss:$16 sps:$4 sm:$0xff]   ;;  %v5219_v8 = vld [vmem:[%s6240_s30 + $0x22c] ss:$16 sps:$4 sm:$0xff]  }
  0x8f   : > { %v5214_v9 = vld [vmem:[%s6240_s30 + $0x220] ss:$16 sps:$4 sm:$0xff]   ;;  %v5217_v10 = vld [vmem:[%s6240_s30 + $0x228] ss:$16 sps:$4 sm:$0xff]   ;;  %v5222_v11 = vld [vmem:[%s6240_s30 + $0x244] ss:$16 sps:$4 sm:$0xff]  }
  0x90   : > { %v5225_v12 = vld [vmem:[%s6240_s30 + $0x24c] ss:$16 sps:$4 sm:$0xff]   ;;  %v5220_v13 = vld [vmem:[%s6240_s30 + $0x240] ss:$16 sps:$4 sm:$0xff]   ;;  %v5223_v14 = vld [vmem:[%s6240_s30 + $0x248] ss:$16 sps:$4 sm:$0xff]  }
  0x91   : > { %3527 = vmatpush1.bf16.msra.mxu0 %v5150_v26  ;;  %3855 = vmatpush1.bf16.msra.mxu1 %v5151_v27  ;;  %v5228_v15 = vld [vmem:[%s6240_s30 + $0x264] ss:$16 sps:$4 sm:$0xff]   ;;  %v5231_v16 = vld [vmem:[%s6240_s30 + $0x26c] ss:$16 sps:$4 sm:$0xff]   ;;  %v5226_v17 = vld [vmem:[%s6240_s30 + $0x260] ss:$16 sps:$4 sm:$0xff]  }
  0x92   : > { %3528 = vmatprep.subr.bf16.mxu0 %v5152_v28  ;;  %3856 = vmatprep.subr.bf16.mxu1 %v5154_v29  ;;  %v5229_v18 = vld [vmem:[%s6240_s30 + $0x268] ss:$16 sps:$4 sm:$0xff]   ;;  %v5234_v19 = vld [vmem:[%s6240_s30 + $0x284] ss:$16 sps:$4 sm:$0xff]   ;;  %v5237_v20 = vld [vmem:[%s6240_s30 + $0x28c] ss:$16 sps:$4 sm:$0xff]  }
  0x93   : > { %v5232_v21 = vld [vmem:[%s6240_s30 + $0x280] ss:$16 sps:$4 sm:$0xff]   ;;  %v5235_v22 = vld [vmem:[%s6240_s30 + $0x288] ss:$16 sps:$4 sm:$0xff]   ;;  %v5240_v23 = vld [vmem:[%s6240_s30 + $0x2a4] ss:$16 sps:$4 sm:$0xff]  }
  0x94   : > { %v5243_v24 = vld [vmem:[%s6240_s30 + $0x2ac] ss:$16 sps:$4 sm:$0xff]   ;;  %v5238_v25 = vld [vmem:[%s6240_s30 + $0x2a0] ss:$16 sps:$4 sm:$0xff]   ;;  %v5241_v26 = vld [vmem:[%s6240_s30 + $0x2a8] ss:$16 sps:$4 sm:$0xff]  }
  0x95   : > { %3529 = vmatpush1.bf16.msra.mxu0 %v5156_v30  ;;  %3857 = vmatpush1.bf16.msra.mxu1 %v5157_v31  ;;  %v5246_v27 = vld [vmem:[%s6240_s30 + $0x2c4] ss:$16 sps:$4 sm:$0xff]   ;;  %v5249_v28 = vld [vmem:[%s6240_s30 + $0x2cc] ss:$16 sps:$4 sm:$0xff]   ;;  %v5244_v31 = vld [vmem:[%s6240_s30 + $0x2c0] ss:$16 sps:$4 sm:$0xff]  }
  0x96   : > { %3530 = vmatprep.subr.bf16.mxu0 %v5158_v32  ;;  %3858 = vmatprep.subr.bf16.mxu1 %v5160_v33  ;;  %v6353_v29 = vld [vmem:[%s6863_s0 + $0x8] sm:$0xff]  ;;  %v5252_v33 = vld [vmem:[%s6240_s30 + $0x2e4] ss:$16 sps:$4 sm:$0xff]   ;;  %s6896_s23 = smov (!%p359_p11, %s4447_s23), 7 }
  0x97   : > { %v4452_v30 = vcombine.high %v6353_v29, %v6353_v29  ;;  %v5247_v32 = vld [vmem:[%s6240_s30 + $0x2c8] ss:$16 sps:$4 sm:$0xff]   ;;  %v5273_v46 = vld [vmem:[%s6240_s30 + $0x34c] ss:$16 sps:$4 sm:$0xff]   ;;  %s4448_s18 = sshll.u32 %s6896_s23, 2 }
  0x98   : > { %v5271_v48 = vld [vmem:[%s6240_s30 + $0x348] ss:$16 sps:$4 sm:$0xff]   ;;  %s364_s12 = scalar_lea.vmem %s6867_s4, %s4448_s18 }
  0x99   : > { %3531 = vmatpush1.bf16.msra.mxu0 %v5162_v34  ;;  %3859 = vmatpush1.bf16.msra.mxu1 %v5163_v35  ;;  %v5255_v34 = vld [vmem:[%s6240_s30 + $0x2ec] ss:$16 sps:$4 sm:$0xff]   ;;  %v5250_v35 = vld [vmem:[%s6240_s30 + $0x2e0] ss:$16 sps:$4 sm:$0xff]  }
  0x9a   : > { %3532 = vmatprep.subr.bf16.mxu0 %v5164_v36  ;;  %3860 = vmatprep.subr.bf16.mxu1 %v5166_v37  ;;  %v5253_v36 = vld [vmem:[%s6240_s30 + $0x2e8] ss:$16 sps:$4 sm:$0xff]   ;;  %v5258_v37 = vld [vmem:[%s6240_s30 + $0x304] ss:$16 sps:$4 sm:$0xff]  }
  0x9d   : > { %3533 = vmatpush1.bf16.msra.mxu0 %v5168_v38  ;;  %3861 = vmatpush1.bf16.msra.mxu1 %v5169_v39  ;;  %v5261_v38 = vld [vmem:[%s6240_s30 + $0x30c] ss:$16 sps:$4 sm:$0xff]   ;;  %v5256_v39 = vld [vmem:[%s6240_s30 + $0x300] ss:$16 sps:$4 sm:$0xff]  }
  0x9e   : > { %3534 = vmatprep.subr.bf16.mxu0 %v5170_v40  ;;  %3862 = vmatprep.subr.bf16.mxu1 %v5172_v41  ;;  %v5259_v40 = vld [vmem:[%s6240_s30 + $0x308] ss:$16 sps:$4 sm:$0xff]   ;;  %v5264_v41 = vld [vmem:[%s6240_s30 + $0x324] ss:$16 sps:$4 sm:$0xff]  }
  0xa1   : > { %3535 = vmatpush1.bf16.msra.mxu0 %v5174_v42  ;;  %3863 = vmatpush1.bf16.msra.mxu1 %v5175_v43  ;;  %v5267_v42 = vld [vmem:[%s6240_s30 + $0x32c] ss:$16 sps:$4 sm:$0xff]   ;;  %v5262_v43 = vld [vmem:[%s6240_s30 + $0x320] ss:$16 sps:$4 sm:$0xff]  }
  0xa2   : > { %3536 = vmatprep.subr.bf16.mxu0 %v5176_v44  ;;  %3864 = vmatprep.subr.bf16.mxu1 %v5178_v45  ;;  %v5265_v44 = vld [vmem:[%s6240_s30 + $0x328] ss:$16 sps:$4 sm:$0xff]   ;;  %v5270_v45 = vld [vmem:[%s6240_s30 + $0x344] ss:$16 sps:$4 sm:$0xff]  }
  0xa5   : > { %3537 = vmatpush1.bf16.msra.mxu0 %v5180_v47  ;;  %3865 = vmatpush1.bf16.msra.mxu1 %v5181_v49  ;;  %v5268_v47 = vld [vmem:[%s6240_s30 + $0x340] ss:$16 sps:$4 sm:$0xff]   ;;  %v5276_v49 = vld [vmem:[%s6240_s30 + $0x364] ss:$16 sps:$4 sm:$0xff]  }
  0xa6   : > { %3538 = vmatprep.subr.bf16.mxu0 %v5182_v50  ;;  %3866 = vmatprep.subr.bf16.mxu1 %v5184_v51  ;;  %v5279_v50 = vld [vmem:[%s6240_s30 + $0x36c] ss:$16 sps:$4 sm:$0xff]   ;;  %v5274_v51 = vld [vmem:[%s6240_s30 + $0x360] ss:$16 sps:$4 sm:$0xff]  }
  0xa9   : > { %3539 = vmatpush1.bf16.msra.mxu0 %v5186_v52  ;;  %3867 = vmatpush1.bf16.msra.mxu1 %v5187_v53  ;;  %v5277_v52 = vld [vmem:[%s6240_s30 + $0x368] ss:$16 sps:$4 sm:$0xff]   ;;  %v5282_v53 = vld [vmem:[%s6240_s30 + $0x384] ss:$16 sps:$4 sm:$0xff]  }
  0xaa   : > { %3540 = vmatprep.subr.bf16.mxu0 %v5188_v54  ;;  %3868 = vmatprep.subr.bf16.mxu1 %v5190_v55  ;;  %v5285_v54 = vld [vmem:[%s6240_s30 + $0x38c] ss:$16 sps:$4 sm:$0xff]   ;;  %v5280_v55 = vld [vmem:[%s6240_s30 + $0x380] ss:$16 sps:$4 sm:$0xff]  }
  0xad   : > { %3541 = vmatpush1.bf16.msra.mxu0 %v5192_v56  ;;  %3869 = vmatpush1.bf16.msra.mxu1 %v5193_v57  ;;  %v5283_v56 = vld [vmem:[%s6240_s30 + $0x388] ss:$16 sps:$4 sm:$0xff]   ;;  %v5288_v57 = vld [vmem:[%s6240_s30 + $0x3a4] ss:$16 sps:$4 sm:$0xff]  }
  0xae   : > { %3542 = vmatprep.subr.bf16.mxu0 %v5194_v58  ;;  %3870 = vmatprep.subr.bf16.mxu1 %v5196_v59  ;;  %v5291_v58 = vld [vmem:[%s6240_s30 + $0x3ac] ss:$16 sps:$4 sm:$0xff]   ;;  %v5286_v59 = vld [vmem:[%s6240_s30 + $0x3a0] ss:$16 sps:$4 sm:$0xff]  }
  0xb1   : > { %3543 = vmatpush1.bf16.msra.mxu0 %v5198_v60  ;;  %3871 = vmatpush1.bf16.msra.mxu1 %v5199_v61  ;;  %v5289_v60 = vld [vmem:[%s6240_s30 + $0x3a8] ss:$16 sps:$4 sm:$0xff]   ;;  %v5294_v61 = vld [vmem:[%s6240_s30 + $0x3c4] ss:$16 sps:$4 sm:$0xff]  }
  0xb2   : > { %3544 = vmatprep.subr.bf16.mxu0 %v5200_v62  ;;  %3872 = vmatprep.subr.bf16.mxu1 %v5202_v63  ;;  %v5297_v62 = vld [vmem:[%s6240_s30 + $0x3cc] ss:$16 sps:$4 sm:$0xff]   ;;  %v5292_v63 = vld [vmem:[%s6240_s30 + $0x3c0] ss:$16 sps:$4 sm:$0xff]  }
  0xb5   : > { %3545 = vmatpush1.bf16.msra.mxu0 %v5204_v0  ;;  %3873 = vmatpush1.bf16.msra.mxu1 %v5205_v1  ;;  %v5295_v0 = vld [vmem:[%s6240_s30 + $0x3c8] ss:$16 sps:$4 sm:$0xff]   ;;  %v5300_v1 = vld [vmem:[%s6240_s30 + $0x3e4] ss:$16 sps:$4 sm:$0xff]  }
  0xb6   : > { %3555 = vmatprep.subr.bf16.mxu0 %v5210_v2  ;;  %3883 = vmatprep.subr.bf16.mxu1 %v5213_v3  ;;  %v5303_v2 = vld [vmem:[%s6240_s30 + $0x3ec] ss:$16 sps:$4 sm:$0xff]   ;;  %v5298_v3 = vld [vmem:[%s6240_s30 + $0x3e0] ss:$16 sps:$4 sm:$0xff]  }
  0xb8   : > { %3547 = vmatmul.mubr.bf16.vlgmr.msra.gmra.mrb[0].mxu0 %v4449_v4  ;;  %3875 = vmatmul.mubr.bf16.vlgmr.msra.gmra.mrb[0].mxu1 %v4449_v4  ;;  %v5301_v4 = vld [vmem:[%s6240_s30 + $0x3e8] ss:$16 sps:$4 sm:$0xff]  }
  0xb9   : > { %3556 = vmatpush1.bf16.msra.mxu0 %v5208_v5  ;;  %3884 = vmatpush1.bf16.msra.mxu1 %v5211_v6  ;;  %v5308_v5 = vld [vmem:[%s6240_s30 + $0x404] ss:$16 sps:$4 sm:$0xff]   ;;  %v5311_v6 = vld [vmem:[%s6240_s30 + $0x40c] ss:$16 sps:$4 sm:$0xff]  }
  0xba   : > { %3557 = vmatprep.subr.bf16.mxu0 %v5216_v7  ;;  %3885 = vmatprep.subr.bf16.mxu1 %v5219_v8  ;;  %v4451_v7 = vcombine.low %v6353_v29, %v6353_v29  ;;  %v5306_v8 = vld [vmem:[%s6240_s30 + $0x400] ss:$16 sps:$4 sm:$0xff]   ;;  %v5341_v29 = vld [vmem:[%s6240_s30 + $0x4ac] ss:$16 sps:$4 sm:$0xff]  }
  0xbb   : > { %3587 = vmatprep.mubr.bf16.mxu0 %v4452_v30  ;;  %3915 = vmatprep.mubr.bf16.mxu1 %v4452_v30  ;;  %v5336_v30 = vld [vmem:[%s6240_s30 + $0x4a0] ss:$16 sps:$4 sm:$0xff]  }
  0xbd   : > { %3558 = vmatpush1.bf16.msra.mxu0 %v5214_v9  ;;  %3886 = vmatpush1.bf16.msra.mxu1 %v5217_v10  ;;  %v5309_v9 = vld [vmem:[%s6240_s30 + $0x408] ss:$16 sps:$4 sm:$0xff]   ;;  %v5314_v10 = vld [vmem:[%s6240_s30 + $0x424] ss:$16 sps:$4 sm:$0xff]  }
  0xbe   : > { %3559 = vmatprep.subr.bf16.mxu0 %v5222_v11  ;;  %3887 = vmatprep.subr.bf16.mxu1 %v5225_v12  ;;  %v6405_v11 = vld [vmem:[%s6863_s0 + $0x10] sm:$0xff]  ;;  %v5317_v12 = vld [vmem:[%s6240_s30 + $0x42c] ss:$16 sps:$4 sm:$0xff]  }
  0xc1   : > { %3560 = vmatpush1.bf16.msra.mxu0 %v5220_v13  ;;  %3888 = vmatpush1.bf16.msra.mxu1 %v5223_v14  ;;  %v4454_v13 = vcombine.high %v6405_v11, %v6405_v11  ;;  %v5312_v14 = vld [vmem:[%s6240_s30 + $0x420] ss:$16 sps:$4 sm:$0xff]  }
  0xc2   : > { %3561 = vmatprep.subr.bf16.mxu0 %v5228_v15  ;;  %3889 = vmatprep.subr.bf16.mxu1 %v5231_v16  ;;  %v5315_v15 = vld [vmem:[%s6240_s30 + $0x428] ss:$16 sps:$4 sm:$0xff]   ;;  %v5320_v16 = vld [vmem:[%s6240_s30 + $0x444] ss:$16 sps:$4 sm:$0xff]  }
  0xc5   : > { %3562 = vmatpush1.bf16.msra.mxu0 %v5226_v17  ;;  %3890 = vmatpush1.bf16.msra.mxu1 %v5229_v18  ;;  %v5323_v17 = vld [vmem:[%s6240_s30 + $0x44c] ss:$16 sps:$4 sm:$0xff]   ;;  %v5318_v18 = vld [vmem:[%s6240_s30 + $0x440] ss:$16 sps:$4 sm:$0xff]  }
  0xc6   : > { %3563 = vmatprep.subr.bf16.mxu0 %v5234_v19  ;;  %3891 = vmatprep.subr.bf16.mxu1 %v5237_v20  ;;  %v5321_v19 = vld [vmem:[%s6240_s30 + $0x448] ss:$16 sps:$4 sm:$0xff]   ;;  %v5326_v20 = vld [vmem:[%s6240_s30 + $0x464] ss:$16 sps:$4 sm:$0xff]  }
  0xc9   : > { %3564 = vmatpush1.bf16.msra.mxu0 %v5232_v21  ;;  %3892 = vmatpush1.bf16.msra.mxu1 %v5235_v22  ;;  %v5329_v21 = vld [vmem:[%s6240_s30 + $0x46c] ss:$16 sps:$4 sm:$0xff]   ;;  %v5324_v22 = vld [vmem:[%s6240_s30 + $0x460] ss:$16 sps:$4 sm:$0xff]  }
  0xca   : > { %3565 = vmatprep.subr.bf16.mxu0 %v5240_v23  ;;  %3893 = vmatprep.subr.bf16.mxu1 %v5243_v24  ;;  %v5327_v23 = vld [vmem:[%s6240_s30 + $0x468] ss:$16 sps:$4 sm:$0xff]   ;;  %v5332_v24 = vld [vmem:[%s6240_s30 + $0x484] ss:$16 sps:$4 sm:$0xff]  }
  0xcd   : > { %3566 = vmatpush1.bf16.msra.mxu0 %v5238_v25  ;;  %3894 = vmatpush1.bf16.msra.mxu1 %v5241_v26  ;;  %v5335_v25 = vld [vmem:[%s6240_s30 + $0x48c] ss:$16 sps:$4 sm:$0xff]   ;;  %v5330_v26 = vld [vmem:[%s6240_s30 + $0x480] ss:$16 sps:$4 sm:$0xff]  }
  0xce   : > { %3567 = vmatprep.subr.bf16.mxu0 %v5246_v27  ;;  %3895 = vmatprep.subr.bf16.mxu1 %v5249_v28  ;;  %v5333_v27 = vld [vmem:[%s6240_s30 + $0x488] ss:$16 sps:$4 sm:$0xff]   ;;  %v5338_v28 = vld [vmem:[%s6240_s30 + $0x4a4] ss:$16 sps:$4 sm:$0xff]  }
  0xd1   : > { %3568 = vmatpush1.bf16.msra.mxu0 %v5244_v31  ;;  %3896 = vmatpush1.bf16.msra.mxu1 %v5247_v32  ;;  %v5339_v31 = vld [vmem:[%s6240_s30 + $0x4a8] ss:$16 sps:$4 sm:$0xff]   ;;  %v5344_v32 = vld [vmem:[%s6240_s30 + $0x4c4] ss:$16 sps:$4 sm:$0xff]  }
  0xd2   : > { %3569 = vmatprep.subr.bf16.mxu0 %v5252_v33  ;;  %3897 = vmatprep.subr.bf16.mxu1 %v5255_v34  ;;  %v5347_v33 = vld [vmem:[%s6240_s30 + $0x4cc] ss:$16 sps:$4 sm:$0xff]   ;;  %v5342_v34 = vld [vmem:[%s6240_s30 + $0x4c0] ss:$16 sps:$4 sm:$0xff]  }
  0xd5   : > { %3570 = vmatpush1.bf16.msra.mxu0 %v5250_v35  ;;  %3898 = vmatpush1.bf16.msra.mxu1 %v5253_v36  ;;  %v5345_v35 = vld [vmem:[%s6240_s30 + $0x4c8] ss:$16 sps:$4 sm:$0xff]   ;;  %v5350_v36 = vld [vmem:[%s6240_s30 + $0x4e4] ss:$16 sps:$4 sm:$0xff]  }
  0xd6   : > { %3571 = vmatprep.subr.bf16.mxu0 %v5258_v37  ;;  %3899 = vmatprep.subr.bf16.mxu1 %v5261_v38  ;;  %v5353_v37 = vld [vmem:[%s6240_s30 + $0x4ec] ss:$16 sps:$4 sm:$0xff]   ;;  %v5348_v38 = vld [vmem:[%s6240_s30 + $0x4e0] ss:$16 sps:$4 sm:$0xff]  }
  0xd9   : > { %3572 = vmatpush1.bf16.msra.mxu0 %v5256_v39  ;;  %3900 = vmatpush1.bf16.msra.mxu1 %v5259_v40  ;;  %v5351_v39 = vld [vmem:[%s6240_s30 + $0x4e8] ss:$16 sps:$4 sm:$0xff]   ;;  %v5356_v40 = vld [vmem:[%s6240_s30 + $0x504] ss:$16 sps:$4 sm:$0xff]  }
  0xda   : > { %3573 = vmatprep.subr.bf16.mxu0 %v5264_v41  ;;  %3901 = vmatprep.subr.bf16.mxu1 %v5267_v42  ;;  %v5359_v41 = vld [vmem:[%s6240_s30 + $0x50c] ss:$16 sps:$4 sm:$0xff]   ;;  %v5354_v42 = vld [vmem:[%s6240_s30 + $0x500] ss:$16 sps:$4 sm:$0xff]  }
  0xdd   : > { %3574 = vmatpush1.bf16.msra.mxu0 %v5262_v43  ;;  %3902 = vmatpush1.bf16.msra.mxu1 %v5265_v44  ;;  %v5357_v43 = vld [vmem:[%s6240_s30 + $0x508] ss:$16 sps:$4 sm:$0xff]   ;;  %v5362_v44 = vld [vmem:[%s6240_s30 + $0x524] ss:$16 sps:$4 sm:$0xff]  }
  0xde   : > { %3575 = vmatprep.subr.bf16.mxu0 %v5270_v45  ;;  %3903 = vmatprep.subr.bf16.mxu1 %v5273_v46  ;;  %v5365_v45 = vld [vmem:[%s6240_s30 + $0x52c] ss:$16 sps:$4 sm:$0xff]   ;;  %v5360_v46 = vld [vmem:[%s6240_s30 + $0x520] ss:$16 sps:$4 sm:$0xff]  }
  0xe1   : > { %3576 = vmatpush1.bf16.msra.mxu0 %v5268_v47  ;;  %3904 = vmatpush1.bf16.msra.mxu1 %v5271_v48  ;;  %v5363_v47 = vld [vmem:[%s6240_s30 + $0x528] ss:$16 sps:$4 sm:$0xff]   ;;  %v5368_v48 = vld [vmem:[%s6240_s30 + $0x544] ss:$16 sps:$4 sm:$0xff]  }
  0xe2   : > { %3577 = vmatprep.subr.bf16.mxu0 %v5276_v49  ;;  %3905 = vmatprep.subr.bf16.mxu1 %v5279_v50  ;;  %v5371_v49 = vld [vmem:[%s6240_s30 + $0x54c] ss:$16 sps:$4 sm:$0xff]   ;;  %v5366_v50 = vld [vmem:[%s6240_s30 + $0x540] ss:$16 sps:$4 sm:$0xff]  }
  0xe5   : > { %3578 = vmatpush1.bf16.msra.mxu0 %v5274_v51  ;;  %3906 = vmatpush1.bf16.msra.mxu1 %v5277_v52  ;;  %v5369_v51 = vld [vmem:[%s6240_s30 + $0x548] ss:$16 sps:$4 sm:$0xff]   ;;  %v5374_v52 = vld [vmem:[%s6240_s30 + $0x564] ss:$16 sps:$4 sm:$0xff]  }
  0xe6   : > { %3579 = vmatprep.subr.bf16.mxu0 %v5282_v53  ;;  %3907 = vmatprep.subr.bf16.mxu1 %v5285_v54  ;;  %v5377_v53 = vld [vmem:[%s6240_s30 + $0x56c] ss:$16 sps:$4 sm:$0xff]   ;;  %v5372_v54 = vld [vmem:[%s6240_s30 + $0x560] ss:$16 sps:$4 sm:$0xff]  }
  0xe9   : > { %3580 = vmatpush1.bf16.msra.mxu0 %v5280_v55  ;;  %3908 = vmatpush1.bf16.msra.mxu1 %v5283_v56  ;;  %v5375_v55 = vld [vmem:[%s6240_s30 + $0x568] ss:$16 sps:$4 sm:$0xff]   ;;  %v5380_v56 = vld [vmem:[%s6240_s30 + $0x584] ss:$16 sps:$4 sm:$0xff]  }
  0xea   : > { %3581 = vmatprep.subr.bf16.mxu0 %v5288_v57  ;;  %3909 = vmatprep.subr.bf16.mxu1 %v5291_v58  ;;  %v5383_v57 = vld [vmem:[%s6240_s30 + $0x58c] ss:$16 sps:$4 sm:$0xff]   ;;  %v5378_v58 = vld [vmem:[%s6240_s30 + $0x580] ss:$16 sps:$4 sm:$0xff]  }
  0xed   : > { %3582 = vmatpush1.bf16.msra.mxu0 %v5286_v59  ;;  %3910 = vmatpush1.bf16.msra.mxu1 %v5289_v60  ;;  %v5381_v59 = vld [vmem:[%s6240_s30 + $0x588] ss:$16 sps:$4 sm:$0xff]   ;;  %v5386_v60 = vld [vmem:[%s6240_s30 + $0x5a4] ss:$16 sps:$4 sm:$0xff]  }
  0xee   : > { %3583 = vmatprep.subr.bf16.mxu0 %v5294_v61  ;;  %3911 = vmatprep.subr.bf16.mxu1 %v5297_v62  ;;  %v5389_v61 = vld [vmem:[%s6240_s30 + $0x5ac] ss:$16 sps:$4 sm:$0xff]   ;;  %v5384_v62 = vld [vmem:[%s6240_s30 + $0x5a0] ss:$16 sps:$4 sm:$0xff]  }
  0xf1   : > { %3584 = vmatpush1.bf16.msra.mxu0 %v5292_v63  ;;  %3912 = vmatpush1.bf16.msra.mxu1 %v5295_v0  ;;  %v5387_v63 = vld [vmem:[%s6240_s30 + $0x5a8] ss:$16 sps:$4 sm:$0xff]   ;;  %v5392_v0 = vld [vmem:[%s6240_s30 + $0x5c4] ss:$16 sps:$4 sm:$0xff]  }
  0xf2   : > { %3585 = vmatprep.subr.bf16.mxu0 %v5300_v1  ;;  %3913 = vmatprep.subr.bf16.mxu1 %v5303_v2  ;;  %v5395_v1 = vld [vmem:[%s6240_s30 + $0x5cc] ss:$16 sps:$4 sm:$0xff]   ;;  %v5390_v2 = vld [vmem:[%s6240_s30 + $0x5c0] ss:$16 sps:$4 sm:$0xff]  }
  0xf5   : > { %3586 = vmatpush1.bf16.msra.mxu0 %v5298_v3  ;;  %3914 = vmatpush1.bf16.msra.mxu1 %v5301_v4  ;;  %v5393_v3 = vld [vmem:[%s6240_s30 + $0x5c8] ss:$16 sps:$4 sm:$0xff]   ;;  %v5398_v4 = vld [vmem:[%s6240_s30 + $0x5e4] ss:$16 sps:$4 sm:$0xff]  }
  0xf6   : > { %3596 = vmatprep.subr.bf16.mxu0 %v5308_v5  ;;  %3924 = vmatprep.subr.bf16.mxu1 %v5311_v6  ;;  %v5401_v5 = vld [vmem:[%s6240_s30 + $0x5ec] ss:$16 sps:$4 sm:$0xff]   ;;  %v5396_v6 = vld [vmem:[%s6240_s30 + $0x5e0] ss:$16 sps:$4 sm:$0xff]  }
  0xf8   : > { %3588 = vmatmul.mubr.bf16.vlgmr.msra.gmra.mrb[0].mxu0 %v4451_v7  ;;  %3916 = vmatmul.mubr.bf16.vlgmr.msra.gmra.mrb[0].mxu1 %v4451_v7  ;;  %v5399_v7 = vld [vmem:[%s6240_s30 + $0x5e8] ss:$16 sps:$4 sm:$0xff]  }
  0xf9   : > { %3597 = vmatpush1.bf16.msra.mxu0 %v5306_v8  ;;  %3925 = vmatpush1.bf16.msra.mxu1 %v5309_v9  ;;  %v5406_v8 = vld [vmem:[%s6240_s30 + $0x604] ss:$16 sps:$4 sm:$0xff]   ;;  %v5409_v9 = vld [vmem:[%s6240_s30 + $0x60c] ss:$16 sps:$4 sm:$0xff]  }
  0xfa   : > { %3598 = vmatprep.subr.bf16.mxu0 %v5314_v10  ;;  %3926 = vmatprep.subr.bf16.mxu1 %v5317_v12  ;;  %v5404_v10 = vld [vmem:[%s6240_s30 + $0x600] ss:$16 sps:$4 sm:$0xff]   ;;  %v4453_v12 = vcombine.low %v6405_v11, %v6405_v11 }
  0xfb   : > { %3628 = vmatprep.mubr.bf16.mxu0 %v4454_v13  ;;  %3956 = vmatprep.mubr.bf16.mxu1 %v4454_v13  ;;  %v5407_v13 = vld [vmem:[%s6240_s30 + $0x608] ss:$16 sps:$4 sm:$0xff]   ;;  %v5410_v11 = vld [vmem:[%s6240_s30 + $0x620] ss:$16 sps:$4 sm:$0xff]  }
  0xfd   : > { %3599 = vmatpush1.bf16.msra.mxu0 %v5312_v14  ;;  %3927 = vmatpush1.bf16.msra.mxu1 %v5315_v15  ;;  %v6477_v14 = vld [vmem:[%s6863_s0 + $0x18] sm:$0xff]  ;;  %v5412_v15 = vld [vmem:[%s6240_s30 + $0x624] ss:$16 sps:$4 sm:$0xff]  }
  0xfe   : > { %3600 = vmatprep.subr.bf16.mxu0 %v5320_v16  ;;  %3928 = vmatprep.subr.bf16.mxu1 %v5323_v17  ;;  %v5415_v16 = vld [vmem:[%s6240_s30 + $0x62c] ss:$16 sps:$4 sm:$0xff]   ;;  %v4456_v17 = vcombine.high %v6477_v14, %v6477_v14 }
 0x101   : > { %3601 = vmatpush1.bf16.msra.mxu0 %v5318_v18  ;;  %3929 = vmatpush1.bf16.msra.mxu1 %v5321_v19  ;;  %v5413_v18 = vld [vmem:[%s6240_s30 + $0x628] ss:$16 sps:$4 sm:$0xff]   ;;  %v5418_v19 = vld [vmem:[%s6240_s30 + $0x644] ss:$16 sps:$4 sm:$0xff]  }
 0x102   : > { %3602 = vmatprep.subr.bf16.mxu0 %v5326_v20  ;;  %3930 = vmatprep.subr.bf16.mxu1 %v5329_v21  ;;  %v5421_v20 = vld [vmem:[%s6240_s30 + $0x64c] ss:$16 sps:$4 sm:$0xff]   ;;  %v5416_v21 = vld [vmem:[%s6240_s30 + $0x640] ss:$16 sps:$4 sm:$0xff]  }
 0x105   : > { %3603 = vmatpush1.bf16.msra.mxu0 %v5324_v22  ;;  %3931 = vmatpush1.bf16.msra.mxu1 %v5327_v23  ;;  %v5419_v22 = vld [vmem:[%s6240_s30 + $0x648] ss:$16 sps:$4 sm:$0xff]   ;;  %v5424_v23 = vld [vmem:[%s6240_s30 + $0x664] ss:$16 sps:$4 sm:$0xff]  }
 0x106   : > { %3604 = vmatprep.subr.bf16.mxu0 %v5332_v24  ;;  %3932 = vmatprep.subr.bf16.mxu1 %v5335_v25  ;;  %v5427_v24 = vld [vmem:[%s6240_s30 + $0x66c] ss:$16 sps:$4 sm:$0xff]   ;;  %v5422_v25 = vld [vmem:[%s6240_s30 + $0x660] ss:$16 sps:$4 sm:$0xff]  }
 0x109   : > { %3605 = vmatpush1.bf16.msra.mxu0 %v5330_v26  ;;  %3933 = vmatpush1.bf16.msra.mxu1 %v5333_v27  ;;  %v5425_v26 = vld [vmem:[%s6240_s30 + $0x668] ss:$16 sps:$4 sm:$0xff]   ;;  %v5430_v27 = vld [vmem:[%s6240_s30 + $0x684] ss:$16 sps:$4 sm:$0xff]  }
 0x10a   : > { %3606 = vmatprep.subr.bf16.mxu0 %v5338_v28  ;;  %3934 = vmatprep.subr.bf16.mxu1 %v5341_v29  ;;  %v5433_v28 = vld [vmem:[%s6240_s30 + $0x68c] ss:$16 sps:$4 sm:$0xff]   ;;  %v5428_v29 = vld [vmem:[%s6240_s30 + $0x680] ss:$16 sps:$4 sm:$0xff]  }
 0x10d   : > { %3607 = vmatpush1.bf16.msra.mxu0 %v5336_v30  ;;  %3935 = vmatpush1.bf16.msra.mxu1 %v5339_v31  ;;  %v5431_v30 = vld [vmem:[%s6240_s30 + $0x688] ss:$16 sps:$4 sm:$0xff]   ;;  %v5436_v31 = vld [vmem:[%s6240_s30 + $0x6a4] ss:$16 sps:$4 sm:$0xff]  }
 0x10e   : > { %3608 = vmatprep.subr.bf16.mxu0 %v5344_v32  ;;  %3936 = vmatprep.subr.bf16.mxu1 %v5347_v33  ;;  %v5439_v32 = vld [vmem:[%s6240_s30 + $0x6ac] ss:$16 sps:$4 sm:$0xff]   ;;  %v5434_v33 = vld [vmem:[%s6240_s30 + $0x6a0] ss:$16 sps:$4 sm:$0xff]  }
 0x111   : > { %3609 = vmatpush1.bf16.msra.mxu0 %v5342_v34  ;;  %3937 = vmatpush1.bf16.msra.mxu1 %v5345_v35  ;;  %v5437_v34 = vld [vmem:[%s6240_s30 + $0x6a8] ss:$16 sps:$4 sm:$0xff]   ;;  %v5442_v35 = vld [vmem:[%s6240_s30 + $0x6c4] ss:$16 sps:$4 sm:$0xff]  }
 0x112   : > { %3610 = vmatprep.subr.bf16.mxu0 %v5350_v36  ;;  %3938 = vmatprep.subr.bf16.mxu1 %v5353_v37  ;;  %v5445_v36 = vld [vmem:[%s6240_s30 + $0x6cc] ss:$16 sps:$4 sm:$0xff]   ;;  %v5440_v37 = vld [vmem:[%s6240_s30 + $0x6c0] ss:$16 sps:$4 sm:$0xff]  }
 0x115   : > { %3611 = vmatpush1.bf16.msra.mxu0 %v5348_v38  ;;  %3939 = vmatpush1.bf16.msra.mxu1 %v5351_v39  ;;  %v5443_v38 = vld [vmem:[%s6240_s30 + $0x6c8] ss:$16 sps:$4 sm:$0xff]   ;;  %v5448_v39 = vld [vmem:[%s6240_s30 + $0x6e4] ss:$16 sps:$4 sm:$0xff]  }
 0x116   : > { %3612 = vmatprep.subr.bf16.mxu0 %v5356_v40  ;;  %3940 = vmatprep.subr.bf16.mxu1 %v5359_v41  ;;  %v5451_v40 = vld [vmem:[%s6240_s30 + $0x6ec] ss:$16 sps:$4 sm:$0xff]   ;;  %v5446_v41 = vld [vmem:[%s6240_s30 + $0x6e0] ss:$16 sps:$4 sm:$0xff]  }
 0x119   : > { %3613 = vmatpush1.bf16.msra.mxu0 %v5354_v42  ;;  %3941 = vmatpush1.bf16.msra.mxu1 %v5357_v43  ;;  %v5449_v42 = vld [vmem:[%s6240_s30 + $0x6e8] ss:$16 sps:$4 sm:$0xff]   ;;  %v5454_v43 = vld [vmem:[%s6240_s30 + $0x704] ss:$16 sps:$4 sm:$0xff]  }
 0x11a   : > { %3614 = vmatprep.subr.bf16.mxu0 %v5362_v44  ;;  %3942 = vmatprep.subr.bf16.mxu1 %v5365_v45  ;;  %v5457_v44 = vld [vmem:[%s6240_s30 + $0x70c] ss:$16 sps:$4 sm:$0xff]   ;;  %v5452_v45 = vld [vmem:[%s6240_s30 + $0x700] ss:$16 sps:$4 sm:$0xff]  }
 0x11d   : > { %3615 = vmatpush1.bf16.msra.mxu0 %v5360_v46  ;;  %3943 = vmatpush1.bf16.msra.mxu1 %v5363_v47  ;;  %v5455_v46 = vld [vmem:[%s6240_s30 + $0x708] ss:$16 sps:$4 sm:$0xff]   ;;  %v5460_v47 = vld [vmem:[%s6240_s30 + $0x724] ss:$16 sps:$4 sm:$0xff]  }
 0x11e   : > { %3616 = vmatprep.subr.bf16.mxu0 %v5368_v48  ;;  %3944 = vmatprep.subr.bf16.mxu1 %v5371_v49  ;;  %v5463_v48 = vld [vmem:[%s6240_s30 + $0x72c] ss:$16 sps:$4 sm:$0xff]   ;;  %v5458_v49 = vld [vmem:[%s6240_s30 + $0x720] ss:$16 sps:$4 sm:$0xff]  }
 0x121   : > { %3617 = vmatpush1.bf16.msra.mxu0 %v5366_v50  ;;  %3945 = vmatpush1.bf16.msra.mxu1 %v5369_v51  ;;  %v5461_v50 = vld [vmem:[%s6240_s30 + $0x728] ss:$16 sps:$4 sm:$0xff]   ;;  %v5466_v51 = vld [vmem:[%s6240_s30 + $0x744] ss:$16 sps:$4 sm:$0xff]  }
 0x122   : > { %3618 = vmatprep.subr.bf16.mxu0 %v5374_v52  ;;  %3946 = vmatprep.subr.bf16.mxu1 %v5377_v53  ;;  %v5469_v52 = vld [vmem:[%s6240_s30 + $0x74c] ss:$16 sps:$4 sm:$0xff]   ;;  %v5464_v53 = vld [vmem:[%s6240_s30 + $0x740] ss:$16 sps:$4 sm:$0xff]  }
 0x125   : > { %3619 = vmatpush1.bf16.msra.mxu0 %v5372_v54  ;;  %3947 = vmatpush1.bf16.msra.mxu1 %v5375_v55  ;;  %v5467_v54 = vld [vmem:[%s6240_s30 + $0x748] ss:$16 sps:$4 sm:$0xff]   ;;  %v5472_v55 = vld [vmem:[%s6240_s30 + $0x764] ss:$16 sps:$4 sm:$0xff]  }
 0x126   : > { %3620 = vmatprep.subr.bf16.mxu0 %v5380_v56  ;;  %3948 = vmatprep.subr.bf16.mxu1 %v5383_v57  ;;  %v5475_v56 = vld [vmem:[%s6240_s30 + $0x76c] ss:$16 sps:$4 sm:$0xff]   ;;  %v5470_v57 = vld [vmem:[%s6240_s30 + $0x760] ss:$16 sps:$4 sm:$0xff]  }
 0x129   : > { %3621 = vmatpush1.bf16.msra.mxu0 %v5378_v58  ;;  %3949 = vmatpush1.bf16.msra.mxu1 %v5381_v59  ;;  %v5473_v58 = vld [vmem:[%s6240_s30 + $0x768] ss:$16 sps:$4 sm:$0xff]   ;;  %v5478_v59 = vld [vmem:[%s6240_s30 + $0x784] ss:$16 sps:$4 sm:$0xff]  }
 0x12a   : > { %3622 = vmatprep.subr.bf16.mxu0 %v5386_v60  ;;  %3950 = vmatprep.subr.bf16.mxu1 %v5389_v61  ;;  %v5481_v60 = vld [vmem:[%s6240_s30 + $0x78c] ss:$16 sps:$4 sm:$0xff]   ;;  %v5476_v61 = vld [vmem:[%s6240_s30 + $0x780] ss:$16 sps:$4 sm:$0xff]  }
 0x12d   : > { %3623 = vmatpush1.bf16.msra.mxu0 %v5384_v62  ;;  %3951 = vmatpush1.bf16.msra.mxu1 %v5387_v63  ;;  %v5479_v62 = vld [vmem:[%s6240_s30 + $0x788] ss:$16 sps:$4 sm:$0xff]   ;;  %v5484_v63 = vld [vmem:[%s6240_s30 + $0x7a4] ss:$16 sps:$4 sm:$0xff]  }
 0x12e   : > { %3624 = vmatprep.subr.bf16.mxu0 %v5392_v0  ;;  %3952 = vmatprep.subr.bf16.mxu1 %v5395_v1  ;;  %v5487_v0 = vld [vmem:[%s6240_s30 + $0x7ac] ss:$16 sps:$4 sm:$0xff]   ;;  %v5482_v1 = vld [vmem:[%s6240_s30 + $0x7a0] ss:$16 sps:$4 sm:$0xff]  }
 0x131   : > { %3625 = vmatpush1.bf16.msra.mxu0 %v5390_v2  ;;  %3953 = vmatpush1.bf16.msra.mxu1 %v5393_v3  ;;  %v5485_v2 = vld [vmem:[%s6240_s30 + $0x7a8] ss:$16 sps:$4 sm:$0xff]   ;;  %v5490_v3 = vld [vmem:[%s6240_s30 + $0x7c4] ss:$16 sps:$4 sm:$0xff]  }
 0x132   : > { %3626 = vmatprep.subr.bf16.mxu0 %v5398_v4  ;;  %3954 = vmatprep.subr.bf16.mxu1 %v5401_v5  ;;  %v5493_v4 = vld [vmem:[%s6240_s30 + $0x7cc] ss:$16 sps:$4 sm:$0xff]   ;;  %v5488_v5 = vld [vmem:[%s6240_s30 + $0x7c0] ss:$16 sps:$4 sm:$0xff]  }
 0x135   : > { %3627 = vmatpush1.bf16.msra.mxu0 %v5396_v6  ;;  %3955 = vmatpush1.bf16.msra.mxu1 %v5399_v7  ;;  %v5491_v6 = vld [vmem:[%s6240_s30 + $0x7c8] ss:$16 sps:$4 sm:$0xff]   ;;  %v5496_v7 = vld [vmem:[%s6240_s30 + $0x7e4] ss:$16 sps:$4 sm:$0xff]  }
 0x136   : > { %3637 = vmatprep.subr.bf16.mxu0 %v5406_v8  ;;  %3965 = vmatprep.subr.bf16.mxu1 %v5409_v9  ;;  %v5499_v8 = vld [vmem:[%s6240_s30 + $0x7ec] ss:$16 sps:$4 sm:$0xff]   ;;  %v5494_v9 = vld [vmem:[%s6240_s30 + $0x7e0] ss:$16 sps:$4 sm:$0xff]  }
 0x138   : > { %3629 = vmatmul.mubr.bf16.vlgmr.msra.gmra.mrb[0].mxu0 %v4453_v12  ;;  %3957 = vmatmul.mubr.bf16.vlgmr.msra.gmra.mrb[0].mxu1 %v4453_v12  ;;  %v5504_v12 = vld [vmem:[%s6240_s30 + $0x804] ss:$16 sps:$4 sm:$0xff]  }
 0x139   : > { %3638 = vmatpush1.bf16.msra.mxu0 %v5404_v10  ;;  %3966 = vmatpush1.bf16.msra.mxu1 %v5407_v13  ;;  %v5497_v10 = vld [vmem:[%s6240_s30 + $0x7e8] ss:$16 sps:$4 sm:$0xff]   ;;  %v5507_v13 = vld [vmem:[%s6240_s30 + $0x80c] ss:$16 sps:$4 sm:$0xff]  }
 0x13a   : > { %3639 = vmatprep.subr.bf16.mxu0 %v5412_v15  ;;  %3967 = vmatprep.subr.bf16.mxu1 %v5415_v16  ;;  %v5502_v15 = vld [vmem:[%s6240_s30 + $0x800] ss:$16 sps:$4 sm:$0xff]   ;;  %v4455_v16 = vcombine.low %v6477_v14, %v6477_v14 }
 0x13b   : > { %3669 = vmatprep.mubr.bf16.mxu0 %v4456_v17  ;;  %3997 = vmatprep.mubr.bf16.mxu1 %v4456_v17  ;;  %v6549_v17 = vld [vmem:[%s6863_s0 + $0x20] sm:$0xff] }
 0x13c   : > { %v5508_v14 = vld [vmem:[%s6240_s30 + $0x820] ss:$16 sps:$4 sm:$0xff]  }
 0x13d   : > { %3640 = vmatpush1.bf16.msra.mxu0 %v5410_v11  ;;  %3968 = vmatpush1.bf16.msra.mxu1 %v5413_v18  ;;  %v5505_v11 = vld [vmem:[%s6240_s30 + $0x808] ss:$16 sps:$4 sm:$0xff]   ;;  %v5510_v18 = vld [vmem:[%s6240_s30 + $0x824] ss:$16 sps:$4 sm:$0xff]  }
 0x13e   : > { %3641 = vmatprep.subr.bf16.mxu0 %v5418_v19  ;;  %3969 = vmatprep.subr.bf16.mxu1 %v5421_v20  ;;  %v5513_v19 = vld [vmem:[%s6240_s30 + $0x82c] ss:$16 sps:$4 sm:$0xff]   ;;  %v4458_v20 = vcombine.high %v6549_v17, %v6549_v17 }
 0x141   : > { %3642 = vmatpush1.bf16.msra.mxu0 %v5416_v21  ;;  %3970 = vmatpush1.bf16.msra.mxu1 %v5419_v22  ;;  %v5511_v21 = vld [vmem:[%s6240_s30 + $0x828] ss:$16 sps:$4 sm:$0xff]   ;;  %v5516_v22 = vld [vmem:[%s6240_s30 + $0x844] ss:$16 sps:$4 sm:$0xff]  }
 0x142   : > { %3643 = vmatprep.subr.bf16.mxu0 %v5424_v23  ;;  %3971 = vmatprep.subr.bf16.mxu1 %v5427_v24  ;;  %v5519_v23 = vld [vmem:[%s6240_s30 + $0x84c] ss:$16 sps:$4 sm:$0xff]   ;;  %v5514_v24 = vld [vmem:[%s6240_s30 + $0x840] ss:$16 sps:$4 sm:$0xff]  }
 0x145   : > { %3644 = vmatpush1.bf16.msra.mxu0 %v5422_v25  ;;  %3972 = vmatpush1.bf16.msra.mxu1 %v5425_v26  ;;  %v5517_v25 = vld [vmem:[%s6240_s30 + $0x848] ss:$16 sps:$4 sm:$0xff]   ;;  %v5522_v26 = vld [vmem:[%s6240_s30 + $0x864] ss:$16 sps:$4 sm:$0xff]  }
 0x146   : > { %3645 = vmatprep.subr.bf16.mxu0 %v5430_v27  ;;  %3973 = vmatprep.subr.bf16.mxu1 %v5433_v28  ;;  %v5525_v27 = vld [vmem:[%s6240_s30 + $0x86c] ss:$16 sps:$4 sm:$0xff]   ;;  %v5520_v28 = vld [vmem:[%s6240_s30 + $0x860] ss:$16 sps:$4 sm:$0xff]  }
 0x149   : > { %3646 = vmatpush1.bf16.msra.mxu0 %v5428_v29  ;;  %3974 = vmatpush1.bf16.msra.mxu1 %v5431_v30  ;;  %v5523_v29 = vld [vmem:[%s6240_s30 + $0x868] ss:$16 sps:$4 sm:$0xff]   ;;  %v5528_v30 = vld [vmem:[%s6240_s30 + $0x884] ss:$16 sps:$4 sm:$0xff]  }
 0x14a   : > { %3647 = vmatprep.subr.bf16.mxu0 %v5436_v31  ;;  %3975 = vmatprep.subr.bf16.mxu1 %v5439_v32  ;;  %v5531_v31 = vld [vmem:[%s6240_s30 + $0x88c] ss:$16 sps:$4 sm:$0xff]   ;;  %v5526_v32 = vld [vmem:[%s6240_s30 + $0x880] ss:$16 sps:$4 sm:$0xff]  }
 0x14d   : > { %3648 = vmatpush1.bf16.msra.mxu0 %v5434_v33  ;;  %3976 = vmatpush1.bf16.msra.mxu1 %v5437_v34  ;;  %v5529_v33 = vld [vmem:[%s6240_s30 + $0x888] ss:$16 sps:$4 sm:$0xff]   ;;  %v5534_v34 = vld [vmem:[%s6240_s30 + $0x8a4] ss:$16 sps:$4 sm:$0xff]  }
 0x14e   : > { %3649 = vmatprep.subr.bf16.mxu0 %v5442_v35  ;;  %3977 = vmatprep.subr.bf16.mxu1 %v5445_v36  ;;  %v5537_v35 = vld [vmem:[%s6240_s30 + $0x8ac] ss:$16 sps:$4 sm:$0xff]   ;;  %v5532_v36 = vld [vmem:[%s6240_s30 + $0x8a0] ss:$16 sps:$4 sm:$0xff]  }
 0x151   : > { %3650 = vmatpush1.bf16.msra.mxu0 %v5440_v37  ;;  %3978 = vmatpush1.bf16.msra.mxu1 %v5443_v38  ;;  %v5535_v37 = vld [vmem:[%s6240_s30 + $0x8a8] ss:$16 sps:$4 sm:$0xff]   ;;  %v5540_v38 = vld [vmem:[%s6240_s30 + $0x8c4] ss:$16 sps:$4 sm:$0xff]  }
 0x152   : > { %3651 = vmatprep.subr.bf16.mxu0 %v5448_v39  ;;  %3979 = vmatprep.subr.bf16.mxu1 %v5451_v40  ;;  %v5543_v39 = vld [vmem:[%s6240_s30 + $0x8cc] ss:$16 sps:$4 sm:$0xff]   ;;  %v5538_v40 = vld [vmem:[%s6240_s30 + $0x8c0] ss:$16 sps:$4 sm:$0xff]  }
 0x155   : > { %3652 = vmatpush1.bf16.msra.mxu0 %v5446_v41  ;;  %3980 = vmatpush1.bf16.msra.mxu1 %v5449_v42  ;;  %v5541_v41 = vld [vmem:[%s6240_s30 + $0x8c8] ss:$16 sps:$4 sm:$0xff]   ;;  %v5546_v42 = vld [vmem:[%s6240_s30 + $0x8e4] ss:$16 sps:$4 sm:$0xff]  }
 0x156   : > { %3653 = vmatprep.subr.bf16.mxu0 %v5454_v43  ;;  %3981 = vmatprep.subr.bf16.mxu1 %v5457_v44  ;;  %v5549_v43 = vld [vmem:[%s6240_s30 + $0x8ec] ss:$16 sps:$4 sm:$0xff]   ;;  %v5544_v44 = vld [vmem:[%s6240_s30 + $0x8e0] ss:$16 sps:$4 sm:$0xff]  }
 0x159   : > { %3654 = vmatpush1.bf16.msra.mxu0 %v5452_v45  ;;  %3982 = vmatpush1.bf16.msra.mxu1 %v5455_v46  ;;  %v5547_v45 = vld [vmem:[%s6240_s30 + $0x8e8] ss:$16 sps:$4 sm:$0xff]   ;;  %v5552_v46 = vld [vmem:[%s6240_s30 + $0x904] ss:$16 sps:$4 sm:$0xff]  }
 0x15a   : > { %3655 = vmatprep.subr.bf16.mxu0 %v5460_v47  ;;  %3983 = vmatprep.subr.bf16.mxu1 %v5463_v48  ;;  %v5555_v47 = vld [vmem:[%s6240_s30 + $0x90c] ss:$16 sps:$4 sm:$0xff]   ;;  %v5550_v48 = vld [vmem:[%s6240_s30 + $0x900] ss:$16 sps:$4 sm:$0xff]  }
 0x15d   : > { %3656 = vmatpush1.bf16.msra.mxu0 %v5458_v49  ;;  %3984 = vmatpush1.bf16.msra.mxu1 %v5461_v50  ;;  %v5553_v49 = vld [vmem:[%s6240_s30 + $0x908] ss:$16 sps:$4 sm:$0xff]   ;;  %v5558_v50 = vld [vmem:[%s6240_s30 + $0x924] ss:$16 sps:$4 sm:$0xff]  }
 0x15e   : > { %3657 = vmatprep.subr.bf16.mxu0 %v5466_v51  ;;  %3985 = vmatprep.subr.bf16.mxu1 %v5469_v52  ;;  %v5561_v51 = vld [vmem:[%s6240_s30 + $0x92c] ss:$16 sps:$4 sm:$0xff]   ;;  %v5556_v52 = vld [vmem:[%s6240_s30 + $0x920] ss:$16 sps:$4 sm:$0xff]  }
 0x161   : > { %3658 = vmatpush1.bf16.msra.mxu0 %v5464_v53  ;;  %3986 = vmatpush1.bf16.msra.mxu1 %v5467_v54  ;;  %v5559_v53 = vld [vmem:[%s6240_s30 + $0x928] ss:$16 sps:$4 sm:$0xff]   ;;  %v5564_v54 = vld [vmem:[%s6240_s30 + $0x944] ss:$16 sps:$4 sm:$0xff]  }
 0x162   : > { %3659 = vmatprep.subr.bf16.mxu0 %v5472_v55  ;;  %3987 = vmatprep.subr.bf16.mxu1 %v5475_v56  ;;  %v5567_v55 = vld [vmem:[%s6240_s30 + $0x94c] ss:$16 sps:$4 sm:$0xff]   ;;  %v5562_v56 = vld [vmem:[%s6240_s30 + $0x940] ss:$16 sps:$4 sm:$0xff]  }
 0x165   : > { %3660 = vmatpush1.bf16.msra.mxu0 %v5470_v57  ;;  %3988 = vmatpush1.bf16.msra.mxu1 %v5473_v58  ;;  %v5565_v57 = vld [vmem:[%s6240_s30 + $0x948] ss:$16 sps:$4 sm:$0xff]   ;;  %v5570_v58 = vld [vmem:[%s6240_s30 + $0x964] ss:$16 sps:$4 sm:$0xff]  }
 0x166   : > { %3661 = vmatprep.subr.bf16.mxu0 %v5478_v59  ;;  %3989 = vmatprep.subr.bf16.mxu1 %v5481_v60  ;;  %v5573_v59 = vld [vmem:[%s6240_s30 + $0x96c] ss:$16 sps:$4 sm:$0xff]   ;;  %v5568_v60 = vld [vmem:[%s6240_s30 + $0x960] ss:$16 sps:$4 sm:$0xff]  }
 0x169   : > { %3662 = vmatpush1.bf16.msra.mxu0 %v5476_v61  ;;  %3990 = vmatpush1.bf16.msra.mxu1 %v5479_v62  ;;  %v5571_v61 = vld [vmem:[%s6240_s30 + $0x968] ss:$16 sps:$4 sm:$0xff]   ;;  %v5576_v62 = vld [vmem:[%s6240_s30 + $0x984] ss:$16 sps:$4 sm:$0xff]  }
 0x16a   : > { %3663 = vmatprep.subr.bf16.mxu0 %v5484_v63  ;;  %3991 = vmatprep.subr.bf16.mxu1 %v5487_v0  ;;  %v5579_v63 = vld [vmem:[%s6240_s30 + $0x98c] ss:$16 sps:$4 sm:$0xff]   ;;  %v5574_v0 = vld [vmem:[%s6240_s30 + $0x980] ss:$16 sps:$4 sm:$0xff]  }
 0x16d   : > { %3664 = vmatpush1.bf16.msra.mxu0 %v5482_v1  ;;  %3992 = vmatpush1.bf16.msra.mxu1 %v5485_v2  ;;  %v5577_v1 = vld [vmem:[%s6240_s30 + $0x988] ss:$16 sps:$4 sm:$0xff]   ;;  %v5582_v2 = vld [vmem:[%s6240_s30 + $0x9a4] ss:$16 sps:$4 sm:$0xff]  }
 0x16e   : > { %3665 = vmatprep.subr.bf16.mxu0 %v5490_v3  ;;  %3993 = vmatprep.subr.bf16.mxu1 %v5493_v4  ;;  %v5585_v3 = vld [vmem:[%s6240_s30 + $0x9ac] ss:$16 sps:$4 sm:$0xff]   ;;  %v5580_v4 = vld [vmem:[%s6240_s30 + $0x9a0] ss:$16 sps:$4 sm:$0xff]  }
 0x171   : > { %3666 = vmatpush1.bf16.msra.mxu0 %v5488_v5  ;;  %3994 = vmatpush1.bf16.msra.mxu1 %v5491_v6  ;;  %v5583_v5 = vld [vmem:[%s6240_s30 + $0x9a8] ss:$16 sps:$4 sm:$0xff]   ;;  %v5588_v6 = vld [vmem:[%s6240_s30 + $0x9c4] ss:$16 sps:$4 sm:$0xff]  }
 0x172   : > { %3667 = vmatprep.subr.bf16.mxu0 %v5496_v7  ;;  %3995 = vmatprep.subr.bf16.mxu1 %v5499_v8  ;;  %v5591_v7 = vld [vmem:[%s6240_s30 + $0x9cc] ss:$16 sps:$4 sm:$0xff]   ;;  %v5586_v8 = vld [vmem:[%s6240_s30 + $0x9c0] ss:$16 sps:$4 sm:$0xff]  }
 0x175   : > { %3668 = vmatpush1.bf16.msra.mxu0 %v5494_v9  ;;  %3996 = vmatpush1.bf16.msra.mxu1 %v5497_v10  ;;  %v5589_v9 = vld [vmem:[%s6240_s30 + $0x9c8] ss:$16 sps:$4 sm:$0xff]   ;;  %v5594_v10 = vld [vmem:[%s6240_s30 + $0x9e4] ss:$16 sps:$4 sm:$0xff]  }
 0x176   : > { %3678 = vmatprep.subr.bf16.mxu0 %v5504_v12  ;;  %4006 = vmatprep.subr.bf16.mxu1 %v5507_v13  ;;  %v5597_v12 = vld [vmem:[%s6240_s30 + $0x9ec] ss:$16 sps:$4 sm:$0xff]   ;;  %v5592_v13 = vld [vmem:[%s6240_s30 + $0x9e0] ss:$16 sps:$4 sm:$0xff]  }
 0x178   : > { %3670 = vmatmul.mubr.bf16.vlgmr.msra.gmra.mrb[0].mxu0 %v4455_v16  ;;  %3998 = vmatmul.mubr.bf16.vlgmr.msra.gmra.mrb[0].mxu1 %v4455_v16  ;;  %v5602_v16 = vld [vmem:[%s6240_s30 + $0xa04] ss:$16 sps:$4 sm:$0xff]  }
 0x179   : > { %3679 = vmatpush1.bf16.msra.mxu0 %v5502_v15  ;;  %4007 = vmatpush1.bf16.msra.mxu1 %v5505_v11  ;;  %v5595_v15 = vld [vmem:[%s6240_s30 + $0x9e8] ss:$16 sps:$4 sm:$0xff]   ;;  %v5605_v11 = vld [vmem:[%s6240_s30 + $0xa0c] ss:$16 sps:$4 sm:$0xff]  }
 0x17a   : > { %3680 = vmatprep.subr.bf16.mxu0 %v5510_v18  ;;  %4008 = vmatprep.subr.bf16.mxu1 %v5513_v19  ;;  %v6619_v18 = vld [vmem:[%s6863_s0 + $0x28] sm:$0xff]  ;;  %v4457_v19 = vcombine.low %v6549_v17, %v6549_v17  ;;  %v5606_v17 = vld [vmem:[%s6240_s30 + $0xa20] ss:$16 sps:$4 sm:$0xff]  }
 0x17b   : > { %3710 = vmatprep.mubr.bf16.mxu0 %v4458_v20  ;;  %4038 = vmatprep.mubr.bf16.mxu1 %v4458_v20  ;;  %v5600_v20 = vld [vmem:[%s6240_s30 + $0xa00] ss:$16 sps:$4 sm:$0xff]  }
 0x17d   : > { %3681 = vmatpush1.bf16.msra.mxu0 %v5508_v14  ;;  %4009 = vmatpush1.bf16.msra.mxu1 %v5511_v21  ;;  %v5603_v14 = vld [vmem:[%s6240_s30 + $0xa08] ss:$16 sps:$4 sm:$0xff]   ;;  %v5608_v21 = vld [vmem:[%s6240_s30 + $0xa24] ss:$16 sps:$4 sm:$0xff]  }
 0x17e   : > { %3682 = vmatprep.subr.bf16.mxu0 %v5516_v22  ;;  %4010 = vmatprep.subr.bf16.mxu1 %v5519_v23  ;;  %v5611_v22 = vld [vmem:[%s6240_s30 + $0xa2c] ss:$16 sps:$4 sm:$0xff]   ;;  %v4460_v23 = vcombine.high %v6619_v18, %v6619_v18 }
 0x181   : > { %3683 = vmatpush1.bf16.msra.mxu0 %v5514_v24  ;;  %4011 = vmatpush1.bf16.msra.mxu1 %v5517_v25  ;;  %v5609_v24 = vld [vmem:[%s6240_s30 + $0xa28] ss:$16 sps:$4 sm:$0xff]   ;;  %v5614_v25 = vld [vmem:[%s6240_s30 + $0xa44] ss:$16 sps:$4 sm:$0xff]  }
 0x182   : > { %3684 = vmatprep.subr.bf16.mxu0 %v5522_v26  ;;  %4012 = vmatprep.subr.bf16.mxu1 %v5525_v27  ;;  %v5617_v26 = vld [vmem:[%s6240_s30 + $0xa4c] ss:$16 sps:$4 sm:$0xff]   ;;  %v5612_v27 = vld [vmem:[%s6240_s30 + $0xa40] ss:$16 sps:$4 sm:$0xff]  }
 0x185   : > { %3685 = vmatpush1.bf16.msra.mxu0 %v5520_v28  ;;  %4013 = vmatpush1.bf16.msra.mxu1 %v5523_v29  ;;  %v5615_v28 = vld [vmem:[%s6240_s30 + $0xa48] ss:$16 sps:$4 sm:$0xff]   ;;  %v5620_v29 = vld [vmem:[%s6240_s30 + $0xa64] ss:$16 sps:$4 sm:$0xff]  }
 0x186   : > { %3686 = vmatprep.subr.bf16.mxu0 %v5528_v30  ;;  %4014 = vmatprep.subr.bf16.mxu1 %v5531_v31  ;;  %v5623_v30 = vld [vmem:[%s6240_s30 + $0xa6c] ss:$16 sps:$4 sm:$0xff]   ;;  %v5618_v31 = vld [vmem:[%s6240_s30 + $0xa60] ss:$16 sps:$4 sm:$0xff]  }
 0x189   : > { %3687 = vmatpush1.bf16.msra.mxu0 %v5526_v32  ;;  %4015 = vmatpush1.bf16.msra.mxu1 %v5529_v33  ;;  %v5621_v32 = vld [vmem:[%s6240_s30 + $0xa68] ss:$16 sps:$4 sm:$0xff]   ;;  %v5626_v33 = vld [vmem:[%s6240_s30 + $0xa84] ss:$16 sps:$4 sm:$0xff]  }
 0x18a   : > { %3688 = vmatprep.subr.bf16.mxu0 %v5534_v34  ;;  %4016 = vmatprep.subr.bf16.mxu1 %v5537_v35  ;;  %v5629_v34 = vld [vmem:[%s6240_s30 + $0xa8c] ss:$16 sps:$4 sm:$0xff]   ;;  %v5624_v35 = vld [vmem:[%s6240_s30 + $0xa80] ss:$16 sps:$4 sm:$0xff]  }
 0x18d   : > { %3689 = vmatpush1.bf16.msra.mxu0 %v5532_v36  ;;  %4017 = vmatpush1.bf16.msra.mxu1 %v5535_v37  ;;  %v5627_v36 = vld [vmem:[%s6240_s30 + $0xa88] ss:$16 sps:$4 sm:$0xff]   ;;  %v5632_v37 = vld [vmem:[%s6240_s30 + $0xaa4] ss:$16 sps:$4 sm:$0xff]  }
 0x18e   : > { %3690 = vmatprep.subr.bf16.mxu0 %v5540_v38  ;;  %4018 = vmatprep.subr.bf16.mxu1 %v5543_v39  ;;  %v5635_v38 = vld [vmem:[%s6240_s30 + $0xaac] ss:$16 sps:$4 sm:$0xff]   ;;  %v5630_v39 = vld [vmem:[%s6240_s30 + $0xaa0] ss:$16 sps:$4 sm:$0xff]  }
 0x191   : > { %3691 = vmatpush1.bf16.msra.mxu0 %v5538_v40  ;;  %4019 = vmatpush1.bf16.msra.mxu1 %v5541_v41  ;;  %v5633_v40 = vld [vmem:[%s6240_s30 + $0xaa8] ss:$16 sps:$4 sm:$0xff]   ;;  %v5638_v41 = vld [vmem:[%s6240_s30 + $0xac4] ss:$16 sps:$4 sm:$0xff]  }
 0x192   : > { %3692 = vmatprep.subr.bf16.mxu0 %v5546_v42  ;;  %4020 = vmatprep.subr.bf16.mxu1 %v5549_v43  ;;  %v5641_v42 = vld [vmem:[%s6240_s30 + $0xacc] ss:$16 sps:$4 sm:$0xff]   ;;  %v5636_v43 = vld [vmem:[%s6240_s30 + $0xac0] ss:$16 sps:$4 sm:$0xff]  }
 0x195   : > { %3693 = vmatpush1.bf16.msra.mxu0 %v5544_v44  ;;  %4021 = vmatpush1.bf16.msra.mxu1 %v5547_v45  ;;  %v5639_v44 = vld [vmem:[%s6240_s30 + $0xac8] ss:$16 sps:$4 sm:$0xff]   ;;  %v5644_v45 = vld [vmem:[%s6240_s30 + $0xae4] ss:$16 sps:$4 sm:$0xff]  }
 0x196   : > { %3694 = vmatprep.subr.bf16.mxu0 %v5552_v46  ;;  %4022 = vmatprep.subr.bf16.mxu1 %v5555_v47  ;;  %v5647_v46 = vld [vmem:[%s6240_s30 + $0xaec] ss:$16 sps:$4 sm:$0xff]   ;;  %v5642_v47 = vld [vmem:[%s6240_s30 + $0xae0] ss:$16 sps:$4 sm:$0xff]  }
 0x199   : > { %3695 = vmatpush1.bf16.msra.mxu0 %v5550_v48  ;;  %4023 = vmatpush1.bf16.msra.mxu1 %v5553_v49  ;;  %v5645_v48 = vld [vmem:[%s6240_s30 + $0xae8] ss:$16 sps:$4 sm:$0xff]   ;;  %v5650_v49 = vld [vmem:[%s6240_s30 + $0xb04] ss:$16 sps:$4 sm:$0xff]  }
 0x19a   : > { %3696 = vmatprep.subr.bf16.mxu0 %v5558_v50  ;;  %4024 = vmatprep.subr.bf16.mxu1 %v5561_v51  ;;  %v5653_v50 = vld [vmem:[%s6240_s30 + $0xb0c] ss:$16 sps:$4 sm:$0xff]   ;;  %v5648_v51 = vld [vmem:[%s6240_s30 + $0xb00] ss:$16 sps:$4 sm:$0xff]  }
 0x19d   : > { %3697 = vmatpush1.bf16.msra.mxu0 %v5556_v52  ;;  %4025 = vmatpush1.bf16.msra.mxu1 %v5559_v53  ;;  %v5651_v52 = vld [vmem:[%s6240_s30 + $0xb08] ss:$16 sps:$4 sm:$0xff]   ;;  %v5656_v53 = vld [vmem:[%s6240_s30 + $0xb24] ss:$16 sps:$4 sm:$0xff]  }
 0x19e   : > { %3698 = vmatprep.subr.bf16.mxu0 %v5564_v54  ;;  %4026 = vmatprep.subr.bf16.mxu1 %v5567_v55  ;;  %v5659_v54 = vld [vmem:[%s6240_s30 + $0xb2c] ss:$16 sps:$4 sm:$0xff]   ;;  %v5654_v55 = vld [vmem:[%s6240_s30 + $0xb20] ss:$16 sps:$4 sm:$0xff]  }
 0x1a1   : > { %3699 = vmatpush1.bf16.msra.mxu0 %v5562_v56  ;;  %4027 = vmatpush1.bf16.msra.mxu1 %v5565_v57  ;;  %v5657_v56 = vld [vmem:[%s6240_s30 + $0xb28] ss:$16 sps:$4 sm:$0xff]   ;;  %v5662_v57 = vld [vmem:[%s6240_s30 + $0xb44] ss:$16 sps:$4 sm:$0xff]  }
 0x1a2   : > { %3700 = vmatprep.subr.bf16.mxu0 %v5570_v58  ;;  %4028 = vmatprep.subr.bf16.mxu1 %v5573_v59  ;;  %v5665_v58 = vld [vmem:[%s6240_s30 + $0xb4c] ss:$16 sps:$4 sm:$0xff]   ;;  %v5660_v59 = vld [vmem:[%s6240_s30 + $0xb40] ss:$16 sps:$4 sm:$0xff]  }
 0x1a5   : > { %3701 = vmatpush1.bf16.msra.mxu0 %v5568_v60  ;;  %4029 = vmatpush1.bf16.msra.mxu1 %v5571_v61  ;;  %v5663_v60 = vld [vmem:[%s6240_s30 + $0xb48] ss:$16 sps:$4 sm:$0xff]   ;;  %v5668_v61 = vld [vmem:[%s6240_s30 + $0xb64] ss:$16 sps:$4 sm:$0xff]  }
 0x1a6   : > { %3702 = vmatprep.subr.bf16.mxu0 %v5576_v62  ;;  %4030 = vmatprep.subr.bf16.mxu1 %v5579_v63  ;;  %v5671_v62 = vld [vmem:[%s6240_s30 + $0xb6c] ss:$16 sps:$4 sm:$0xff]   ;;  %v5666_v63 = vld [vmem:[%s6240_s30 + $0xb60] ss:$16 sps:$4 sm:$0xff]  }
 0x1a9   : > { %3703 = vmatpush1.bf16.msra.mxu0 %v5574_v0  ;;  %4031 = vmatpush1.bf16.msra.mxu1 %v5577_v1  ;;  %v5669_v0 = vld [vmem:[%s6240_s30 + $0xb68] ss:$16 sps:$4 sm:$0xff]   ;;  %v5674_v1 = vld [vmem:[%s6240_s30 + $0xb84] ss:$16 sps:$4 sm:$0xff]  }
 0x1aa   : > { %3704 = vmatprep.subr.bf16.mxu0 %v5582_v2  ;;  %4032 = vmatprep.subr.bf16.mxu1 %v5585_v3  ;;  %v5677_v2 = vld [vmem:[%s6240_s30 + $0xb8c] ss:$16 sps:$4 sm:$0xff]   ;;  %v5672_v3 = vld [vmem:[%s6240_s30 + $0xb80] ss:$16 sps:$4 sm:$0xff]  }
 0x1ad   : > { %3705 = vmatpush1.bf16.msra.mxu0 %v5580_v4  ;;  %4033 = vmatpush1.bf16.msra.mxu1 %v5583_v5  ;;  %v5675_v4 = vld [vmem:[%s6240_s30 + $0xb88] ss:$16 sps:$4 sm:$0xff]   ;;  %v5680_v5 = vld [vmem:[%s6240_s30 + $0xba4] ss:$16 sps:$4 sm:$0xff]  }
 0x1ae   : > { %3706 = vmatprep.subr.bf16.mxu0 %v5588_v6  ;;  %4034 = vmatprep.subr.bf16.mxu1 %v5591_v7  ;;  %v5683_v6 = vld [vmem:[%s6240_s30 + $0xbac] ss:$16 sps:$4 sm:$0xff]   ;;  %v5678_v7 = vld [vmem:[%s6240_s30 + $0xba0] ss:$16 sps:$4 sm:$0xff]  }
 0x1b1   : > { %3707 = vmatpush1.bf16.msra.mxu0 %v5586_v8  ;;  %4035 = vmatpush1.bf16.msra.mxu1 %v5589_v9  ;;  %v5681_v8 = vld [vmem:[%s6240_s30 + $0xba8] ss:$16 sps:$4 sm:$0xff]   ;;  %v5686_v9 = vld [vmem:[%s6240_s30 + $0xbc4] ss:$16 sps:$4 sm:$0xff]  }
 0x1b2   : > { %3708 = vmatprep.subr.bf16.mxu0 %v5594_v10  ;;  %4036 = vmatprep.subr.bf16.mxu1 %v5597_v12  ;;  %v5689_v10 = vld [vmem:[%s6240_s30 + $0xbcc] ss:$16 sps:$4 sm:$0xff]   ;;  %v5684_v12 = vld [vmem:[%s6240_s30 + $0xbc0] ss:$16 sps:$4 sm:$0xff]  }
 0x1b5   : > { %3709 = vmatpush1.bf16.msra.mxu0 %v5592_v13  ;;  %4037 = vmatpush1.bf16.msra.mxu1 %v5595_v15  ;;  %v5687_v13 = vld [vmem:[%s6240_s30 + $0xbc8] ss:$16 sps:$4 sm:$0xff]   ;;  %v5692_v15 = vld [vmem:[%s6240_s30 + $0xbe4] ss:$16 sps:$4 sm:$0xff]  }
 0x1b6   : > { %3719 = vmatprep.subr.bf16.mxu0 %v5602_v16  ;;  %4047 = vmatprep.subr.bf16.mxu1 %v5605_v11  ;;  %v5695_v16 = vld [vmem:[%s6240_s30 + $0xbec] ss:$16 sps:$4 sm:$0xff]   ;;  %v5690_v11 = vld [vmem:[%s6240_s30 + $0xbe0] ss:$16 sps:$4 sm:$0xff]  }
 0x1b8   : > { %3711 = vmatmul.mubr.bf16.vlgmr.msra.gmra.mrb[0].mxu0 %v4457_v19  ;;  %4039 = vmatmul.mubr.bf16.vlgmr.msra.gmra.mrb[0].mxu1 %v4457_v19  ;;  %v5693_v19 = vld [vmem:[%s6240_s30 + $0xbe8] ss:$16 sps:$4 sm:$0xff]  }
 0x1b9   : > { %3720 = vmatpush1.bf16.msra.mxu0 %v5600_v20  ;;  %4048 = vmatpush1.bf16.msra.mxu1 %v5603_v14  ;;  %v5700_v20 = vld [vmem:[%s6240_s30 + $0xc04] ss:$16 sps:$4 sm:$0xff]   ;;  %v5703_v14 = vld [vmem:[%s6240_s30 + $0xc0c] ss:$16 sps:$4 sm:$0xff]  }
 0x1ba   : > { %3721 = vmatprep.subr.bf16.mxu0 %v5608_v21  ;;  %4049 = vmatprep.subr.bf16.mxu1 %v5611_v22  ;;  %v4459_v21 = vcombine.low %v6619_v18, %v6619_v18  ;;  %v6694_v22 = vld [vmem:[%s6863_s0 + $0x30] sm:$0xff] }
 0x1bb   : > { %3751 = vmatprep.mubr.bf16.mxu0 %v4460_v23  ;;  %4079 = vmatprep.mubr.bf16.mxu1 %v4460_v23  ;;  %v5698_v23 = vld [vmem:[%s6240_s30 + $0xc00] ss:$16 sps:$4 sm:$0xff]   ;;  %v4462_v18 = vcombine.high %v6694_v22, %v6694_v22 }
 0x1bd   : > { %3722 = vmatpush1.bf16.msra.mxu0 %v5606_v17  ;;  %4050 = vmatpush1.bf16.msra.mxu1 %v5609_v24  ;;  %v5701_v17 = vld [vmem:[%s6240_s30 + $0xc08] ss:$16 sps:$4 sm:$0xff]   ;;  %v5706_v24 = vld [vmem:[%s6240_s30 + $0xc24] ss:$16 sps:$4 sm:$0xff]  }
 0x1be   : > { %3723 = vmatprep.subr.bf16.mxu0 %v5614_v25  ;;  %4051 = vmatprep.subr.bf16.mxu1 %v5617_v26  ;;  %v5709_v25 = vld [vmem:[%s6240_s30 + $0xc2c] ss:$16 sps:$4 sm:$0xff]   ;;  %v5704_v26 = vld [vmem:[%s6240_s30 + $0xc20] ss:$16 sps:$4 sm:$0xff]  }
 0x1c1   : > { %3724 = vmatpush1.bf16.msra.mxu0 %v5612_v27  ;;  %4052 = vmatpush1.bf16.msra.mxu1 %v5615_v28  ;;  %v5707_v27 = vld [vmem:[%s6240_s30 + $0xc28] ss:$16 sps:$4 sm:$0xff]   ;;  %v5712_v28 = vld [vmem:[%s6240_s30 + $0xc44] ss:$16 sps:$4 sm:$0xff]  }
 0x1c2   : > { %3725 = vmatprep.subr.bf16.mxu0 %v5620_v29  ;;  %4053 = vmatprep.subr.bf16.mxu1 %v5623_v30  ;;  %v5715_v29 = vld [vmem:[%s6240_s30 + $0xc4c] ss:$16 sps:$4 sm:$0xff]   ;;  %v5710_v30 = vld [vmem:[%s6240_s30 + $0xc40] ss:$16 sps:$4 sm:$0xff]  }
 0x1c5   : > { %3726 = vmatpush1.bf16.msra.mxu0 %v5618_v31  ;;  %4054 = vmatpush1.bf16.msra.mxu1 %v5621_v32  ;;  %v5713_v31 = vld [vmem:[%s6240_s30 + $0xc48] ss:$16 sps:$4 sm:$0xff]   ;;  %v5718_v32 = vld [vmem:[%s6240_s30 + $0xc64] ss:$16 sps:$4 sm:$0xff]  }
 0x1c6   : > { %3727 = vmatprep.subr.bf16.mxu0 %v5626_v33  ;;  %4055 = vmatprep.subr.bf16.mxu1 %v5629_v34  ;;  %v5721_v33 = vld [vmem:[%s6240_s30 + $0xc6c] ss:$16 sps:$4 sm:$0xff]   ;;  %v5716_v34 = vld [vmem:[%s6240_s30 + $0xc60] ss:$16 sps:$4 sm:$0xff]  }
 0x1c9   : > { %3728 = vmatpush1.bf16.msra.mxu0 %v5624_v35  ;;  %4056 = vmatpush1.bf16.msra.mxu1 %v5627_v36  ;;  %v5719_v35 = vld [vmem:[%s6240_s30 + $0xc68] ss:$16 sps:$4 sm:$0xff]   ;;  %v5724_v36 = vld [vmem:[%s6240_s30 + $0xc84] ss:$16 sps:$4 sm:$0xff]  }
 0x1ca   : > { %3729 = vmatprep.subr.bf16.mxu0 %v5632_v37  ;;  %4057 = vmatprep.subr.bf16.mxu1 %v5635_v38  ;;  %v5727_v37 = vld [vmem:[%s6240_s30 + $0xc8c] ss:$16 sps:$4 sm:$0xff]   ;;  %v5722_v38 = vld [vmem:[%s6240_s30 + $0xc80] ss:$16 sps:$4 sm:$0xff]  }
 0x1cd   : > { %3730 = vmatpush1.bf16.msra.mxu0 %v5630_v39  ;;  %4058 = vmatpush1.bf16.msra.mxu1 %v5633_v40  ;;  %v5725_v39 = vld [vmem:[%s6240_s30 + $0xc88] ss:$16 sps:$4 sm:$0xff]   ;;  %v5730_v40 = vld [vmem:[%s6240_s30 + $0xca4] ss:$16 sps:$4 sm:$0xff]  }
 0x1ce   : > { %3731 = vmatprep.subr.bf16.mxu0 %v5638_v41  ;;  %4059 = vmatprep.subr.bf16.mxu1 %v5641_v42  ;;  %v5733_v41 = vld [vmem:[%s6240_s30 + $0xcac] ss:$16 sps:$4 sm:$0xff]   ;;  %v5728_v42 = vld [vmem:[%s6240_s30 + $0xca0] ss:$16 sps:$4 sm:$0xff]  }
 0x1d1   : > { %3732 = vmatpush1.bf16.msra.mxu0 %v5636_v43  ;;  %4060 = vmatpush1.bf16.msra.mxu1 %v5639_v44  ;;  %v5731_v43 = vld [vmem:[%s6240_s30 + $0xca8] ss:$16 sps:$4 sm:$0xff]   ;;  %v5736_v44 = vld [vmem:[%s6240_s30 + $0xcc4] ss:$16 sps:$4 sm:$0xff]  }
 0x1d2   : > { %3733 = vmatprep.subr.bf16.mxu0 %v5644_v45  ;;  %4061 = vmatprep.subr.bf16.mxu1 %v5647_v46  ;;  %v5739_v45 = vld [vmem:[%s6240_s30 + $0xccc] ss:$16 sps:$4 sm:$0xff]   ;;  %v5734_v46 = vld [vmem:[%s6240_s30 + $0xcc0] ss:$16 sps:$4 sm:$0xff]  }
 0x1d5   : > { %3734 = vmatpush1.bf16.msra.mxu0 %v5642_v47  ;;  %4062 = vmatpush1.bf16.msra.mxu1 %v5645_v48  ;;  %v5737_v47 = vld [vmem:[%s6240_s30 + $0xcc8] ss:$16 sps:$4 sm:$0xff]   ;;  %v5742_v48 = vld [vmem:[%s6240_s30 + $0xce4] ss:$16 sps:$4 sm:$0xff]  }
 0x1d6   : > { %3735 = vmatprep.subr.bf16.mxu0 %v5650_v49  ;;  %4063 = vmatprep.subr.bf16.mxu1 %v5653_v50  ;;  %v5745_v49 = vld [vmem:[%s6240_s30 + $0xcec] ss:$16 sps:$4 sm:$0xff]   ;;  %v5740_v50 = vld [vmem:[%s6240_s30 + $0xce0] ss:$16 sps:$4 sm:$0xff]  }
 0x1d9   : > { %3736 = vmatpush1.bf16.msra.mxu0 %v5648_v51  ;;  %4064 = vmatpush1.bf16.msra.mxu1 %v5651_v52  ;;  %v5743_v51 = vld [vmem:[%s6240_s30 + $0xce8] ss:$16 sps:$4 sm:$0xff]   ;;  %v5748_v52 = vld [vmem:[%s6240_s30 + $0xd04] ss:$16 sps:$4 sm:$0xff]  }
 0x1da   : > { %3737 = vmatprep.subr.bf16.mxu0 %v5656_v53  ;;  %4065 = vmatprep.subr.bf16.mxu1 %v5659_v54  ;;  %v5751_v53 = vld [vmem:[%s6240_s30 + $0xd0c] ss:$16 sps:$4 sm:$0xff]   ;;  %v5746_v54 = vld [vmem:[%s6240_s30 + $0xd00] ss:$16 sps:$4 sm:$0xff]  }
 0x1dd   : > { %3738 = vmatpush1.bf16.msra.mxu0 %v5654_v55  ;;  %4066 = vmatpush1.bf16.msra.mxu1 %v5657_v56  ;;  %v5749_v55 = vld [vmem:[%s6240_s30 + $0xd08] ss:$16 sps:$4 sm:$0xff]   ;;  %v5754_v56 = vld [vmem:[%s6240_s30 + $0xd24] ss:$16 sps:$4 sm:$0xff]  }
 0x1de   : > { %3739 = vmatprep.subr.bf16.mxu0 %v5662_v57  ;;  %4067 = vmatprep.subr.bf16.mxu1 %v5665_v58  ;;  %v5757_v57 = vld [vmem:[%s6240_s30 + $0xd2c] ss:$16 sps:$4 sm:$0xff]   ;;  %v5752_v58 = vld [vmem:[%s6240_s30 + $0xd20] ss:$16 sps:$4 sm:$0xff]  }
 0x1e1   : > { %3740 = vmatpush1.bf16.msra.mxu0 %v5660_v59  ;;  %4068 = vmatpush1.bf16.msra.mxu1 %v5663_v60  ;;  %v5755_v59 = vld [vmem:[%s6240_s30 + $0xd28] ss:$16 sps:$4 sm:$0xff]   ;;  %v5760_v60 = vld [vmem:[%s6240_s30 + $0xd44] ss:$16 sps:$4 sm:$0xff]  }
 0x1e2   : > { %3741 = vmatprep.subr.bf16.mxu0 %v5668_v61  ;;  %4069 = vmatprep.subr.bf16.mxu1 %v5671_v62  ;;  %v5763_v61 = vld [vmem:[%s6240_s30 + $0xd4c] ss:$16 sps:$4 sm:$0xff]   ;;  %v5758_v62 = vld [vmem:[%s6240_s30 + $0xd40] ss:$16 sps:$4 sm:$0xff]  }
 0x1e5   : > { %3742 = vmatpush1.bf16.msra.mxu0 %v5666_v63  ;;  %4070 = vmatpush1.bf16.msra.mxu1 %v5669_v0  ;;  %v5761_v63 = vld [vmem:[%s6240_s30 + $0xd48] ss:$16 sps:$4 sm:$0xff]   ;;  %v5766_v0 = vld [vmem:[%s6240_s30 + $0xd64] ss:$16 sps:$4 sm:$0xff]  }
 0x1e6   : > { %3743 = vmatprep.subr.bf16.mxu0 %v5674_v1  ;;  %4071 = vmatprep.subr.bf16.mxu1 %v5677_v2  ;;  %v5769_v1 = vld [vmem:[%s6240_s30 + $0xd6c] ss:$16 sps:$4 sm:$0xff]   ;;  %v5764_v2 = vld [vmem:[%s6240_s30 + $0xd60] ss:$16 sps:$4 sm:$0xff]  }
 0x1e9   : > { %3744 = vmatpush1.bf16.msra.mxu0 %v5672_v3  ;;  %4072 = vmatpush1.bf16.msra.mxu1 %v5675_v4  ;;  %v5767_v3 = vld [vmem:[%s6240_s30 + $0xd68] ss:$16 sps:$4 sm:$0xff]   ;;  %v5772_v4 = vld [vmem:[%s6240_s30 + $0xd84] ss:$16 sps:$4 sm:$0xff]  }
 0x1ea   : > { %3745 = vmatprep.subr.bf16.mxu0 %v5680_v5  ;;  %4073 = vmatprep.subr.bf16.mxu1 %v5683_v6  ;;  %v5775_v5 = vld [vmem:[%s6240_s30 + $0xd8c] ss:$16 sps:$4 sm:$0xff]   ;;  %v5770_v6 = vld [vmem:[%s6240_s30 + $0xd80] ss:$16 sps:$4 sm:$0xff]  }
 0x1ed   : > { %3746 = vmatpush1.bf16.msra.mxu0 %v5678_v7  ;;  %4074 = vmatpush1.bf16.msra.mxu1 %v5681_v8  ;;  %v5773_v7 = vld [vmem:[%s6240_s30 + $0xd88] ss:$16 sps:$4 sm:$0xff]   ;;  %v5778_v8 = vld [vmem:[%s6240_s30 + $0xda4] ss:$16 sps:$4 sm:$0xff]  }
 0x1ee   : > { %3747 = vmatprep.subr.bf16.mxu0 %v5686_v9  ;;  %4075 = vmatprep.subr.bf16.mxu1 %v5689_v10  ;;  %v5781_v9 = vld [vmem:[%s6240_s30 + $0xdac] ss:$16 sps:$4 sm:$0xff]   ;;  %v5776_v10 = vld [vmem:[%s6240_s30 + $0xda0] ss:$16 sps:$4 sm:$0xff]  }
 0x1f1   : > { %3748 = vmatpush1.bf16.msra.mxu0 %v5684_v12  ;;  %4076 = vmatpush1.bf16.msra.mxu1 %v5687_v13  ;;  %v5779_v12 = vld [vmem:[%s6240_s30 + $0xda8] ss:$16 sps:$4 sm:$0xff]   ;;  %v5784_v13 = vld [vmem:[%s6240_s30 + $0xdc4] ss:$16 sps:$4 sm:$0xff]  }
 0x1f2   : > { %3749 = vmatprep.subr.bf16.mxu0 %v5692_v15  ;;  %4077 = vmatprep.subr.bf16.mxu1 %v5695_v16  ;;  %v5787_v15 = vld [vmem:[%s6240_s30 + $0xdcc] ss:$16 sps:$4 sm:$0xff]   ;;  %v5782_v16 = vld [vmem:[%s6240_s30 + $0xdc0] ss:$16 sps:$4 sm:$0xff]  }
 0x1f5   : > { %3750 = vmatpush1.bf16.msra.mxu0 %v5690_v11  ;;  %4078 = vmatpush1.bf16.msra.mxu1 %v5693_v19  ;;  %v5785_v11 = vld [vmem:[%s6240_s30 + $0xdc8] ss:$16 sps:$4 sm:$0xff]   ;;  %v5790_v19 = vld [vmem:[%s6240_s30 + $0xde4] ss:$16 sps:$4 sm:$0xff]  }
 0x1f6   : > { %3760 = vmatprep.subr.bf16.mxu0 %v5700_v20  ;;  %4088 = vmatprep.subr.bf16.mxu1 %v5703_v14  ;;  %v5793_v20 = vld [vmem:[%s6240_s30 + $0xdec] ss:$16 sps:$4 sm:$0xff]   ;;  %v5788_v14 = vld [vmem:[%s6240_s30 + $0xde0] ss:$16 sps:$4 sm:$0xff]  }
 0x1f8   : > { %3752 = vmatmul.mubr.bf16.vlgmr.msra.gmra.mrb[0].mxu0 %v4459_v21  ;;  %4080 = vmatmul.mubr.bf16.vlgmr.msra.gmra.mrb[0].mxu1 %v4459_v21  ;;  %v5791_v21 = vld [vmem:[%s6240_s30 + $0xde8] ss:$16 sps:$4 sm:$0xff]  }
 0x1f9   : > { %3761 = vmatpush1.bf16.msra.mxu0 %v5698_v23  ;;  %4089 = vmatpush1.bf16.msra.mxu1 %v5701_v17  ;;  %v5798_v23 = vld [vmem:[%s6240_s30 + $0xe04] ss:$16 sps:$4 sm:$0xff]   ;;  %v5801_v17 = vld [vmem:[%s6240_s30 + $0xe0c] ss:$16 sps:$4 sm:$0xff]  }
 0x1fa   : > { %3762 = vmatprep.subr.bf16.mxu0 %v5706_v24  ;;  %4090 = vmatprep.subr.bf16.mxu1 %v5709_v25  ;;  %v4461_v24 = vcombine.low %v6694_v22, %v6694_v22  ;;  %v6767_v25 = vld [vmem:[%s6863_s0 + $0x38] sm:$0xff] }
 0x1fb   : > { %3792 = vmatprep.mubr.bf16.mxu0 %v4462_v18  ;;  %4120 = vmatprep.mubr.bf16.mxu1 %v4462_v18  ;;  %v5796_v18 = vld [vmem:[%s6240_s30 + $0xe00] ss:$16 sps:$4 sm:$0xff]   ;;  %v4464_v22 = vcombine.high %v6767_v25, %v6767_v25 }
 0x1fd   : > { %3763 = vmatpush1.bf16.msra.mxu0 %v5704_v26  ;;  %4091 = vmatpush1.bf16.msra.mxu1 %v5707_v27  ;;  %v5799_v26 = vld [vmem:[%s6240_s30 + $0xe08] ss:$16 sps:$4 sm:$0xff]   ;;  %v5804_v27 = vld [vmem:[%s6240_s30 + $0xe24] ss:$16 sps:$4 sm:$0xff]  }
 0x1fe   : > { %3764 = vmatprep.subr.bf16.mxu0 %v5712_v28  ;;  %4092 = vmatprep.subr.bf16.mxu1 %v5715_v29  ;;  %v5807_v28 = vld [vmem:[%s6240_s30 + $0xe2c] ss:$16 sps:$4 sm:$0xff]   ;;  %v5802_v29 = vld [vmem:[%s6240_s30 + $0xe20] ss:$16 sps:$4 sm:$0xff]  }
 0x201   : > { %3765 = vmatpush1.bf16.msra.mxu0 %v5710_v30  ;;  %4093 = vmatpush1.bf16.msra.mxu1 %v5713_v31  ;;  %v5805_v30 = vld [vmem:[%s6240_s30 + $0xe28] ss:$16 sps:$4 sm:$0xff]   ;;  %v5810_v31 = vld [vmem:[%s6240_s30 + $0xe44] ss:$16 sps:$4 sm:$0xff]  }
 0x202   : > { %3766 = vmatprep.subr.bf16.mxu0 %v5718_v32  ;;  %4094 = vmatprep.subr.bf16.mxu1 %v5721_v33  ;;  %v5813_v32 = vld [vmem:[%s6240_s30 + $0xe4c] ss:$16 sps:$4 sm:$0xff]   ;;  %v5808_v33 = vld [vmem:[%s6240_s30 + $0xe40] ss:$16 sps:$4 sm:$0xff]  }
 0x205   : > { %3767 = vmatpush1.bf16.msra.mxu0 %v5716_v34  ;;  %4095 = vmatpush1.bf16.msra.mxu1 %v5719_v35  ;;  %v5811_v34 = vld [vmem:[%s6240_s30 + $0xe48] ss:$16 sps:$4 sm:$0xff]   ;;  %v5816_v35 = vld [vmem:[%s6240_s30 + $0xe64] ss:$16 sps:$4 sm:$0xff]  }
 0x206   : > { %3768 = vmatprep.subr.bf16.mxu0 %v5724_v36  ;;  %4096 = vmatprep.subr.bf16.mxu1 %v5727_v37  ;;  %v5819_v36 = vld [vmem:[%s6240_s30 + $0xe6c] ss:$16 sps:$4 sm:$0xff]   ;;  %v5814_v37 = vld [vmem:[%s6240_s30 + $0xe60] ss:$16 sps:$4 sm:$0xff]  }
 0x209   : > { %3769 = vmatpush1.bf16.msra.mxu0 %v5722_v38  ;;  %4097 = vmatpush1.bf16.msra.mxu1 %v5725_v39  ;;  %v5817_v38 = vld [vmem:[%s6240_s30 + $0xe68] ss:$16 sps:$4 sm:$0xff]   ;;  %v5822_v39 = vld [vmem:[%s6240_s30 + $0xe84] ss:$16 sps:$4 sm:$0xff]  }
 0x20a   : > { %3770 = vmatprep.subr.bf16.mxu0 %v5730_v40  ;;  %4098 = vmatprep.subr.bf16.mxu1 %v5733_v41  ;;  %v5825_v40 = vld [vmem:[%s6240_s30 + $0xe8c] ss:$16 sps:$4 sm:$0xff]   ;;  %v5820_v41 = vld [vmem:[%s6240_s30 + $0xe80] ss:$16 sps:$4 sm:$0xff]  }
 0x20d   : > { %3771 = vmatpush1.bf16.msra.mxu0 %v5728_v42  ;;  %4099 = vmatpush1.bf16.msra.mxu1 %v5731_v43  ;;  %v5823_v42 = vld [vmem:[%s6240_s30 + $0xe88] ss:$16 sps:$4 sm:$0xff]   ;;  %v5828_v43 = vld [vmem:[%s6240_s30 + $0xea4] ss:$16 sps:$4 sm:$0xff]  }
 0x20e   : > { %3772 = vmatprep.subr.bf16.mxu0 %v5736_v44  ;;  %4100 = vmatprep.subr.bf16.mxu1 %v5739_v45  ;;  %v5831_v44 = vld [vmem:[%s6240_s30 + $0xeac] ss:$16 sps:$4 sm:$0xff]   ;;  %v5826_v45 = vld [vmem:[%s6240_s30 + $0xea0] ss:$16 sps:$4 sm:$0xff]  }
 0x211   : > { %3773 = vmatpush1.bf16.msra.mxu0 %v5734_v46  ;;  %4101 = vmatpush1.bf16.msra.mxu1 %v5737_v47  ;;  %v5829_v46 = vld [vmem:[%s6240_s30 + $0xea8] ss:$16 sps:$4 sm:$0xff]   ;;  %v5834_v47 = vld [vmem:[%s6240_s30 + $0xec4] ss:$16 sps:$4 sm:$0xff]  }
 0x212   : > { %3774 = vmatprep.subr.bf16.mxu0 %v5742_v48  ;;  %4102 = vmatprep.subr.bf16.mxu1 %v5745_v49  ;;  %v5837_v48 = vld [vmem:[%s6240_s30 + $0xecc] ss:$16 sps:$4 sm:$0xff]   ;;  %v5832_v49 = vld [vmem:[%s6240_s30 + $0xec0] ss:$16 sps:$4 sm:$0xff]  }
 0x215   : > { %3775 = vmatpush1.bf16.msra.mxu0 %v5740_v50  ;;  %4103 = vmatpush1.bf16.msra.mxu1 %v5743_v51  ;;  %v5835_v50 = vld [vmem:[%s6240_s30 + $0xec8] ss:$16 sps:$4 sm:$0xff]   ;;  %v5840_v51 = vld [vmem:[%s6240_s30 + $0xee4] ss:$16 sps:$4 sm:$0xff]  }
 0x216   : > { %3776 = vmatprep.subr.bf16.mxu0 %v5748_v52  ;;  %4104 = vmatprep.subr.bf16.mxu1 %v5751_v53  ;;  %v5843_v52 = vld [vmem:[%s6240_s30 + $0xeec] ss:$16 sps:$4 sm:$0xff]   ;;  %v5838_v53 = vld [vmem:[%s6240_s30 + $0xee0] ss:$16 sps:$4 sm:$0xff]  }
 0x219   : > { %3777 = vmatpush1.bf16.msra.mxu0 %v5746_v54  ;;  %4105 = vmatpush1.bf16.msra.mxu1 %v5749_v55  ;;  %v5841_v54 = vld [vmem:[%s6240_s30 + $0xee8] ss:$16 sps:$4 sm:$0xff]   ;;  %v5846_v55 = vld [vmem:[%s6240_s30 + $0xf04] ss:$16 sps:$4 sm:$0xff]  }
 0x21a   : > { %3778 = vmatprep.subr.bf16.mxu0 %v5754_v56  ;;  %4106 = vmatprep.subr.bf16.mxu1 %v5757_v57  ;;  %v5849_v56 = vld [vmem:[%s6240_s30 + $0xf0c] ss:$16 sps:$4 sm:$0xff]   ;;  %v5844_v57 = vld [vmem:[%s6240_s30 + $0xf00] ss:$16 sps:$4 sm:$0xff]  }
 0x21d   : > { %3779 = vmatpush1.bf16.msra.mxu0 %v5752_v58  ;;  %4107 = vmatpush1.bf16.msra.mxu1 %v5755_v59  ;;  %v5847_v58 = vld [vmem:[%s6240_s30 + $0xf08] ss:$16 sps:$4 sm:$0xff]   ;;  %v5852_v59 = vld [vmem:[%s6240_s30 + $0xf24] ss:$16 sps:$4 sm:$0xff]  }
 0x21e   : > { %3780 = vmatprep.subr.bf16.mxu0 %v5760_v60  ;;  %4108 = vmatprep.subr.bf16.mxu1 %v5763_v61  ;;  %v5855_v60 = vld [vmem:[%s6240_s30 + $0xf2c] ss:$16 sps:$4 sm:$0xff]   ;;  %v5850_v61 = vld [vmem:[%s6240_s30 + $0xf20] ss:$16 sps:$4 sm:$0xff]  }
 0x221   : > { %3781 = vmatpush1.bf16.msra.mxu0 %v5758_v62  ;;  %4109 = vmatpush1.bf16.msra.mxu1 %v5761_v63  ;;  %v5853_v62 = vld [vmem:[%s6240_s30 + $0xf28] ss:$16 sps:$4 sm:$0xff]   ;;  %v5858_v63 = vld [vmem:[%s6240_s30 + $0xf44] ss:$16 sps:$4 sm:$0xff]  }
 0x222   : > { %3782 = vmatprep.subr.bf16.mxu0 %v5766_v0  ;;  %4110 = vmatprep.subr.bf16.mxu1 %v5769_v1  ;;  %v5861_v0 = vld [vmem:[%s6240_s30 + $0xf4c] ss:$16 sps:$4 sm:$0xff]   ;;  %v5856_v1 = vld [vmem:[%s6240_s30 + $0xf40] ss:$16 sps:$4 sm:$0xff]  }
 0x225   : > { %3783 = vmatpush1.bf16.msra.mxu0 %v5764_v2  ;;  %4111 = vmatpush1.bf16.msra.mxu1 %v5767_v3  ;;  %v5859_v2 = vld [vmem:[%s6240_s30 + $0xf48] ss:$16 sps:$4 sm:$0xff]   ;;  %v5864_v3 = vld [vmem:[%s6240_s30 + $0xf64] ss:$16 sps:$4 sm:$0xff]  }
 0x226   : > { %3784 = vmatprep.subr.bf16.mxu0 %v5772_v4  ;;  %4112 = vmatprep.subr.bf16.mxu1 %v5775_v5  ;;  %v5867_v4 = vld [vmem:[%s6240_s30 + $0xf6c] ss:$16 sps:$4 sm:$0xff]   ;;  %v5862_v5 = vld [vmem:[%s6240_s30 + $0xf60] ss:$16 sps:$4 sm:$0xff]  }
 0x229   : > { %3785 = vmatpush1.bf16.msra.mxu0 %v5770_v6  ;;  %4113 = vmatpush1.bf16.msra.mxu1 %v5773_v7  ;;  %v5865_v6 = vld [vmem:[%s6240_s30 + $0xf68] ss:$16 sps:$4 sm:$0xff]   ;;  %v5870_v7 = vld [vmem:[%s6240_s30 + $0xf84] ss:$16 sps:$4 sm:$0xff]  }
 0x22a   : > { %3786 = vmatprep.subr.bf16.mxu0 %v5778_v8  ;;  %4114 = vmatprep.subr.bf16.mxu1 %v5781_v9  ;;  %v5873_v8 = vld [vmem:[%s6240_s30 + $0xf8c] ss:$16 sps:$4 sm:$0xff]   ;;  %v5868_v9 = vld [vmem:[%s6240_s30 + $0xf80] ss:$16 sps:$4 sm:$0xff]  }
 0x22d   : > { %3787 = vmatpush1.bf16.msra.mxu0 %v5776_v10  ;;  %4115 = vmatpush1.bf16.msra.mxu1 %v5779_v12  ;;  %v5871_v10 = vld [vmem:[%s6240_s30 + $0xf88] ss:$16 sps:$4 sm:$0xff]   ;;  %v5876_v12 = vld [vmem:[%s6240_s30 + $0xfa4] ss:$16 sps:$4 sm:$0xff]  }
 0x22e   : > { %3788 = vmatprep.subr.bf16.mxu0 %v5784_v13  ;;  %4116 = vmatprep.subr.bf16.mxu1 %v5787_v15  ;;  %v5879_v13 = vld [vmem:[%s6240_s30 + $0xfac] ss:$16 sps:$4 sm:$0xff]   ;;  %v5874_v15 = vld [vmem:[%s6240_s30 + $0xfa0] ss:$16 sps:$4 sm:$0xff]  }
 0x231   : > { %3789 = vmatpush1.bf16.msra.mxu0 %v5782_v16  ;;  %4117 = vmatpush1.bf16.msra.mxu1 %v5785_v11  ;;  %v5877_v16 = vld [vmem:[%s6240_s30 + $0xfa8] ss:$16 sps:$4 sm:$0xff]   ;;  %v5882_v11 = vld [vmem:[%s6240_s30 + $0xfc4] ss:$16 sps:$4 sm:$0xff]  }
 0x232   : > { %3790 = vmatprep.subr.bf16.mxu0 %v5790_v19  ;;  %4118 = vmatprep.subr.bf16.mxu1 %v5793_v20  ;;  %v5885_v19 = vld [vmem:[%s6240_s30 + $0xfcc] ss:$16 sps:$4 sm:$0xff]   ;;  %v5880_v20 = vld [vmem:[%s6240_s30 + $0xfc0] ss:$16 sps:$4 sm:$0xff]  }
 0x235   : > { %3791 = vmatpush1.bf16.msra.mxu0 %v5788_v14  ;;  %4119 = vmatpush1.bf16.msra.mxu1 %v5791_v21  ;;  %v5883_v14 = vld [vmem:[%s6240_s30 + $0xfc8] ss:$16 sps:$4 sm:$0xff]   ;;  %v5888_v21 = vld [vmem:[%s6240_s30 + $0xfe4] ss:$16 sps:$4 sm:$0xff]  }
 0x236   : > { %3801 = vmatprep.subr.bf16.mxu0 %v5798_v23  ;;  %4129 = vmatprep.subr.bf16.mxu1 %v5801_v17  ;;  %v5891_v23 = vld [vmem:[%s6240_s30 + $0xfec] ss:$16 sps:$4 sm:$0xff]   ;;  %v5886_v17 = vld [vmem:[%s6240_s30 + $0xfe0] ss:$16 sps:$4 sm:$0xff]  }
 0x238   : > { %3793 = vmatmul.mubr.bf16.vlgmr.msra.gmra.mrb[0].mxu0 %v4461_v24  ;;  %4121 = vmatmul.mubr.bf16.vlgmr.msra.gmra.mrb[0].mxu1 %v4461_v24  ;;  %v5889_v24 = vld [vmem:[%s6240_s30 + $0xfe8] ss:$16 sps:$4 sm:$0xff]   ;;  %s294_s30 = scalar_lea.vmem [#allocation7], %s4445_s24 }
 0x239   : > { %3802 = vmatpush1.bf16.msra.mxu0 %v5796_v18  ;;  %4130 = vmatpush1.bf16.msra.mxu1 %v5799_v26  ;;  %v4463_v18 = vcombine.low %v6767_v25, %v6767_v25  ;;  %v4187_v26 = vlaneseq }
 0x23a   : > { %3803 = vmatprep.subr.bf16.mxu0 %v5804_v27  ;;  %4131 = vmatprep.subr.bf16.mxu1 %v5807_v28 }
 0x23b   : > { %3833 = vmatprep.mubr.bf16.mxu0 %v4464_v22  ;;  %4161 = vmatprep.mubr.bf16.mxu1 %v4464_v22  ;;  %v4188_v27 = vshrl.u32 %v4187_v26, 7 }
 0x23d   : > { %3804 = vmatpush1.bf16.msra.mxu0 %v5802_v29  ;;  %4132 = vmatpush1.bf16.msra.mxu1 %v5805_v30  ;;  %v4189_v28 = vsub.s32 0, %v4188_v27  ;;  %v4197_v22 = vsub.s32 2, %v4188_v27  ;;  %v4185_v29 = vld [vmem:[%s6251_s7] sm:$0xf]  ;;  %v4193_v30 = vsub.s32 1, %v4188_v27 }
 0x23e   : > { %3805 = vmatprep.subr.bf16.mxu0 %v5810_v31  ;;  %4133 = vmatprep.subr.bf16.mxu1 %v5813_v32  ;;  %v4201_v31 = vsub.s32 3, %v4188_v27  ;;  %v4211_v32 = vld [vmem:[%s294_s30] sm:$0xf] }
 0x240   : > { %v4202_v25 = vrot.slane %v4185_v29, %v4201_v31 }
 0x241   : > { %3806 = vmatpush1.bf16.msra.mxu0 %v5808_v33  ;;  %4134 = vmatpush1.bf16.msra.mxu1 %v5811_v34  ;;  %v4190_v33 = vrot.slane %v4185_v29, %v4189_v28  ;;  %v4198_v34 = vrot.slane %v4185_v29, %v4197_v22 }
 0x242   : > { %3807 = vmatprep.subr.bf16.mxu0 %v5816_v35  ;;  %4135 = vmatprep.subr.bf16.mxu1 %v5819_v36  ;;  %v4194_v35 = vrot.slane %v4185_v29, %v4193_v30  ;;  %v4216_v36 = vrot.slane %v4211_v32, %v4189_v28 }
 0x245   : > { %3808 = vmatpush1.bf16.msra.mxu0 %v5814_v37  ;;  %4136 = vmatpush1.bf16.msra.mxu1 %v5817_v38  ;;  %v4224_v37 = vrot.slane %v4211_v32, %v4197_v22 }
 0x246   : > { %3809 = vmatprep.subr.bf16.mxu0 %v5822_v39  ;;  %4137 = vmatprep.subr.bf16.mxu1 %v5825_v40  ;;  %v4220_v40 = vrot.slane %v4211_v32, %v4193_v30 }
 0x249   : > { %3810 = vmatpush1.bf16.msra.mxu0 %v5820_v41  ;;  %4138 = vmatpush1.bf16.msra.mxu1 %v5823_v42  ;;  %v4228_v41 = vrot.slane %v4211_v32, %v4201_v31 }
 0x24a   : > { %3811 = vmatprep.subr.bf16.mxu0 %v5828_v43  ;;  %4139 = vmatprep.subr.bf16.mxu1 %v5831_v44 }
 0x24d   : > { %3812 = vmatpush1.bf16.msra.mxu0 %v5826_v45  ;;  %4140 = vmatpush1.bf16.msra.mxu1 %v5829_v46 }
 0x24e   : > { %3813 = vmatprep.subr.bf16.mxu0 %v5834_v47  ;;  %4141 = vmatprep.subr.bf16.mxu1 %v5837_v48 }
 0x251   : > { %3814 = vmatpush1.bf16.msra.mxu0 %v5832_v49  ;;  %4142 = vmatpush1.bf16.msra.mxu1 %v5835_v50 }
 0x252   : > { %3815 = vmatprep.subr.bf16.mxu0 %v5840_v51  ;;  %4143 = vmatprep.subr.bf16.mxu1 %v5843_v52 }
 0x255   : > { %3816 = vmatpush1.bf16.msra.mxu0 %v5838_v53  ;;  %4144 = vmatpush1.bf16.msra.mxu1 %v5841_v54 }
 0x256   : > { %3817 = vmatprep.subr.bf16.mxu0 %v5846_v55  ;;  %4145 = vmatprep.subr.bf16.mxu1 %v5849_v56 }
 0x259   : > { %3818 = vmatpush1.bf16.msra.mxu0 %v5844_v57  ;;  %4146 = vmatpush1.bf16.msra.mxu1 %v5847_v58 }
 0x25a   : > { %3819 = vmatprep.subr.bf16.mxu0 %v5852_v59  ;;  %4147 = vmatprep.subr.bf16.mxu1 %v5855_v60 }
 0x25d   : > { %3820 = vmatpush1.bf16.msra.mxu0 %v5850_v61  ;;  %4148 = vmatpush1.bf16.msra.mxu1 %v5853_v62 }
 0x25e   : > { %3821 = vmatprep.subr.bf16.mxu0 %v5858_v63  ;;  %4149 = vmatprep.subr.bf16.mxu1 %v5861_v0 }
 0x261   : > { %3822 = vmatpush1.bf16.msra.mxu0 %v5856_v1  ;;  %4150 = vmatpush1.bf16.msra.mxu1 %v5859_v2 }
 0x262   : > { %3823 = vmatprep.subr.bf16.mxu0 %v5864_v3  ;;  %4151 = vmatprep.subr.bf16.mxu1 %v5867_v4 }
 0x265   : > { %3824 = vmatpush1.bf16.msra.mxu0 %v5862_v5  ;;  %4152 = vmatpush1.bf16.msra.mxu1 %v5865_v6 }
 0x266   : > { %3825 = vmatprep.subr.bf16.mxu0 %v5870_v7  ;;  %4153 = vmatprep.subr.bf16.mxu1 %v5873_v8 }
 0x269   : > { %3826 = vmatpush1.bf16.msra.mxu0 %v5868_v9  ;;  %4154 = vmatpush1.bf16.msra.mxu1 %v5871_v10 }
 0x26a   : > { %3827 = vmatprep.subr.bf16.mxu0 %v5876_v12  ;;  %4155 = vmatprep.subr.bf16.mxu1 %v5879_v13 }
 0x26d   : > { %3828 = vmatpush1.bf16.msra.mxu0 %v5874_v15  ;;  %4156 = vmatpush1.bf16.msra.mxu1 %v5877_v16 }
 0x26e   : > { %3829 = vmatprep.subr.bf16.mxu0 %v5882_v11  ;;  %4157 = vmatprep.subr.bf16.mxu1 %v5885_v19 }
 0x271   : > { %3830 = vmatpush1.bf16.msra.mxu0 %v5880_v20  ;;  %4158 = vmatpush1.bf16.msra.mxu1 %v5883_v14 }
 0x272   : > { %3831 = vmatprep.subr.bf16.mxu0 %v5888_v21  ;;  %4159 = vmatprep.subr.bf16.mxu1 %v5891_v23 }
 0x275   : > { %3832 = vmatpush1.bf16.msra.mxu0 %v5886_v17  ;;  %4160 = vmatpush1.bf16.msra.mxu1 %v5889_v24 }
 0x278   : > { %3834 = vmatmul.mubr.bf16.vlgmr.msra.gmra.mrb[0].mxu0 %v4463_v18  ;;  %4162 = vmatmul.mubr.bf16.vlgmr.msra.gmra.mrb[0].mxu1 %v4463_v18 }
 0x34b   : > { %v3835_v38 = vpop.f32.mrb[0].mxu0  ;;  %v4163_v39 = vpop.f32.mrb[0].mxu1 }
 0x34c   : > { %v4207_v42 = vmul.f32 %v4190_v33, %v3835_v38  ;;  %v4209_v43 = vmul.f32 %v4198_v34, %v4163_v39  ;;  %v3837_v44 = vpop.f32.mrb[1].mxu0  ;;  %v4165_v45 = vpop.f32.mrb[1].mxu1 }
 0x34d   : > { %v4208_v46 = vmul.f32 %v4194_v35, %v3837_v44  ;;  %v4210_v47 = vmul.f32 %v4202_v25, %v4165_v45  ;;  %v3839_v48 = vpop.f32.mrb[2].mxu0  ;;  %v4167_v49 = vpop.f32.mrb[2].mxu1 }
 0x34e   : > { %v4233_v50 = vadd.f32 %v4216_v36, %v4207_v42  ;;  %v4235_v51 = vadd.f32 %v4224_v37, %v4209_v43  ;;  %v3840_v52 = vpop.f32.mrb[3].mxu0  ;;  %v4168_v53 = vpop.f32.mrb[3].mxu1 }
 0x34f   : > { %v4234_v54 = vadd.f32 %v4220_v40, %v4208_v46  ;;  %v4236_v55 = vadd.f32 %v4228_v41, %v4210_v47 }
 0x350   : > { %vm4237_vm0 = vcmp.ge.f32.partialorder %v4233_v50, 0.0  ;;  %v4241_v56 = vmul.f32 0.2, %v4233_v50  ;;  %vm4239_vm1 = vcmp.ge.f32.partialorder %v4235_v51, 0.0  ;;  %v4243_v57 = vmul.f32 0.2, %v4235_v51 }
 0x351   : > { %vm4238_vm2 = vcmp.ge.f32.partialorder %v4234_v54, 0.0  ;;  %v4242_v58 = vmul.f32 0.2, %v4234_v54  ;;  %vm4240_vm3 = vcmp.ge.f32.partialorder %v4236_v55, 0.0  ;;  %v4244_v59 = vmul.f32 0.2, %v4236_v55 }
 0x352   : > { %v4245_v60 = vsel %vm4237_vm0, %v4233_v50, %v4241_v56  ;;  %v4247_v61 = vsel %vm4239_vm1, %v4235_v51, %v4243_v57 }
 0x353   : > { %v4246_v62 = vsel %vm4238_vm2, %v4234_v54, %v4242_v58  ;;  %v4248_v63 = vsel %vm4240_vm3, %v4236_v55, %v4244_v59 }
 0x354   : > { %v4984_v0 = vpack.c.bf16 %v4246_v62, %v4245_v60  ;;  %v4985_v1 = vpack.c.bf16 %v4248_v63, %v4247_v61 }
 0x356   : > { %4265 = vst [vmem:[%s364_s12] sm:$0xff] %v4984_v0  ;;  %4266 = vst [vmem:[%s364_s12 + $0x8] sm:$0xff] %v4985_v1 }
 0x357 PF: > { %s20_s20 = sadd.s32 1, %s6038_s20   ;;  %s6887_s7 = sld [smem:[#allocation10_spill]] }
 0x358   : > { %p17_p1 = scmp.ge.s32.totalorder %s20_s20, 4   ;;  %s6888_s15 = smov %s6022_s16 }
 0x359   : > { %s6889_s16 = smov %s6026_s17  ;;  %s6890_s17 = smov %s6118_s26 }
 0x35a   : > { %s6891_s18 = smov %s6034_s19  ;;  %19 = sbr.rel (!%p17_p1) target bundleno = 9 (0x9), region = 111 }
 0x35d   : > { %s6892_s19 = smov %s6887_s7 }
 0x361   :  { %4297 = vsyncpa [#allocation4], 1 }
 0x362   :  { %4299 = vsyncpa [#allocation4 + $0x1], 1 }
 0x363   :  { %4300 = vsyncpa [#allocation6], 1 }
 0x364   :  { %4302 = vsyncpa [#allocation6 + $0x1], 1 }

</bundles_post_ra>
